<compile_context>
chip_gen: v7x
topology: tpu7x:2x2x1
jax: 0.10.0
libtpu: 0.0.40
codegen_flags: <defaults>
</compile_context>

<pallas_src>
from functools import partial

import jax
import jax.numpy as jnp
from jax import lax
from jax.experimental import pallas as pl
from jax.experimental.pallas import tpu as pltpu

EPS = 1e-5          # nn.InstanceNorm2d default (affine=False, biased variance)
NEG_SLOPE = 0.2     # LeakyReLU(0.2)


# ---------------------------------------------------------------------------
# Fused kernel factory
# ---------------------------------------------------------------------------
def _make_kernel(H, W, need_identity, compute_dtype):
    Wp = W + 2                     # padded row width
    N = H * Wp                     # extended output rows (W valid + 2 wrap cols/row)
    offs = tuple(dy * Wp + dx for dy in range(3) for dx in range(3))
    ctr = Wp + 1                   # flat offset of the centre tap / h1 interior
    inv_cnt = 1.0 / float(H * W)

    def leaky_relu(y):
        return jnp.where(y >= 0, y, NEG_SLOPE * y)

    def masked_instance_norm(y, mask):
        # One-pass biased stats over the H*W valid rows only.
        s1 = jnp.sum(y * mask, axis=0, keepdims=True)
        s2 = jnp.sum(y * y * mask, axis=0, keepdims=True)
        mean = s1 * inv_cnt
        var = jnp.maximum(s2 * inv_cnt - mean * mean, 0.0)
        return (y - mean) * lax.rsqrt(var + EPS)

    def patches_from(read):
        # (N, 9*C): the 9 conv taps folded into the contraction dimension.
        return jnp.concatenate([read(o) for o in offs], axis=-1).astype(compute_dtype)

    def kernel(mask_ref, x_ref, w1_ref, w2_ref, *rest):
        if need_identity:
            wr_ref, o_ref, h1_scr = rest
        else:
            o_ref, h1_scr = rest
        mask = mask_ref[...]                                    # (N, 1) f32

        # ---- stage 1: conv3x3 -> IN -> LeakyReLU -------------------------
        p1 = patches_from(lambda o: x_ref[0, o:o + N, :])       # (N, 9*Cin)
        y1 = jnp.dot(p1, w1_ref[...], preferred_element_type=jnp.float32)
        y1 = leaky_relu(masked_instance_norm(y1, mask)) * mask  # zero wrap rows

        # ---- residual branch ---------------------------------------------
        if need_identity:
            xc = x_ref[0, ctr:ctr + N, :].astype(compute_dtype)
            res = jnp.dot(xc, wr_ref[...], preferred_element_type=jnp.float32)
            res = masked_instance_norm(res, mask)
        else:
            res = x_ref[0, ctr:ctr + N, :].astype(jnp.float32)  # identity (Cin==Cout)

        # ---- stage 2: conv3x3 -> IN -> +res -> LeakyReLU -------------------
        # Stash h1 into a zero-bordered VMEM scratch; its 9 taps are the same
        # static row-windows again.  h1 never touches HBM.
        h1_scr[...] = jnp.zeros_like(h1_scr)
        h1_scr[ctr:ctr + N, :] = y1.astype(h1_scr.dtype)
        p2 = patches_from(lambda o: h1_scr[o:o + N, :])         # (N, 9*Cout)
        y2 = jnp.dot(p2, w2_ref[...], preferred_element_type=jnp.float32)
        y2 = masked_instance_norm(y2, mask)

        o_ref[0] = leaky_relu(y2 + res).astype(o_ref.dtype)

    return kernel


def _vmem_limit_bytes(Npad, N, Cin, Cout, itemsize):
    io = 2 * 4 * (Npad * Cin + N * Cout)                      # double-buffered in/out blocks
    wts = 2 * itemsize * ((9 * Cin + Cin) * Cout + 9 * Cout * Cout) + 4 * N
    scratch = itemsize * Npad * Cout
    live = 4 * N * (9 * Cin + 9 * Cout + 8 * Cout)            # patch matrices + temporaries
    return int(min(2 * (io + wts + scratch + live) + (8 << 20), 96 << 20))


# ---------------------------------------------------------------------------
# Wrapper
# ---------------------------------------------------------------------------
@partial(jax.jit, static_argnames=("need_identity", "compute_dtype"))
def res_conv_block_v2(x_nchw, params, need_identity, compute_dtype=jnp.float32):
    """Forward pass of ResConvBlock_v2. Input/output: NCHW float32."""
    B, Cin, H, W = x_nchw.shape
    Cout = params["w1"].shape[0]
    Wp = W + 2
    N = H * Wp                       # extended output rows
    Npad = (H + 3) * Wp              # padded rows: 1 top, 2 bottom (covers all 9 windows)

    # NCHW -> NHWC, zero-pad spatially, flatten spatial (all cheap XLA glue).
    x = jnp.transpose(x_nchw, (0, 2, 3, 1)).astype(jnp.float32)
    x = jnp.pad(x, ((0, 0), (1, 2), (1, 1), (0, 0)))
    xf = x.reshape(B, Npad, Cin)

    # PyTorch conv weights (Cout, Cin, kh, kw) -> (9*Cin, Cout), tap-major to
    # match the in-kernel lane concatenation order (dy, dx, cin).
    w1 = jnp.transpose(params["w1"], (2, 3, 1, 0)).reshape(9 * Cin, Cout).astype(compute_dtype)
    w2 = jnp.transpose(params["w2"], (2, 3, 1, 0)).reshape(9 * Cout, Cout).astype(compute_dtype)
    # NOTE: conv biases are intentionally NOT passed — InstanceNorm cancels them.

    # Valid-row mask for the flattened (row-extended) layout: row e is valid
    # iff (e mod (W+2)) < W.  Precomputed here to keep the kernel simple.
    mask = (jnp.arange(N, dtype=jnp.int32) % Wp < W).astype(jnp.float32).reshape(N, 1)

    in_specs = [
        pl.BlockSpec((N, 1), lambda b: (0, 0)),               # valid-row mask
        pl.BlockSpec((1, Npad, Cin), lambda b: (b, 0, 0)),    # padded-flat input
        pl.BlockSpec((9 * Cin, Cout), lambda b: (0, 0)),      # w1
        pl.BlockSpec((9 * Cout, Cout), lambda b: (0, 0)),     # w2
    ]
    args = [mask, xf, w1, w2]
    if need_identity:
        wr = params["wr"].reshape(Cout, Cin).T.astype(compute_dtype)   # (Cin, Cout)
        in_specs.append(pl.BlockSpec((Cin, Cout), lambda b: (0, 0)))
        args.append(wr)

    kernel = _make_kernel(H, W, need_identity, compute_dtype)
    itemsize = jnp.dtype(compute_dtype).itemsize

    out_ext = pl.pallas_call(
        kernel,
        out_shape=jax.ShapeDtypeStruct((B, N, Cout), jnp.float32),
        grid=(B,),
        in_specs=in_specs,
        out_specs=pl.BlockSpec((1, N, Cout), lambda b: (b, 0, 0)),
        scratch_shapes=[pltpu.VMEM((Npad, Cout), compute_dtype)],   # zero-bordered h1
        compiler_params=pltpu.CompilerParams(
            dimension_semantics=("parallel",),
            vmem_limit_bytes=_vmem_limit_bytes(Npad, N, Cin, Cout, itemsize),
        ),
    )(*args)

    # Drop the 2 wrap columns per row and return NCHW.
    out = out_ext.reshape(B, H, Wp, Cout)[:, :, :W, :]
    return jnp.transpose(out, (0, 3, 1, 2))


# ---------------------------------------------------------------------------
# Pure-JAX reference (keeps the biases — verifies the IN bias cancellation)
# ---------------------------------------------------------------------------
def reference(x, params, need_identity):
    def conv(x, w, b, pad):
        y = lax.conv_general_dilated(x, w, (1, 1), [(pad, pad), (pad, pad)],
                                     dimension_numbers=("NCHW", "OIHW", "NCHW"))
        return y + b[None, :, None, None]

    def inorm(y):
        m = jnp.mean(y, axis=(2, 3), keepdims=True)
        v = jnp.mean((y - m) ** 2, axis=(2, 3), keepdims=True)
        return (y - m) / jnp.sqrt(v + EPS)

    def lrelu(y):
        return jnp.where(y >= 0, y, NEG_SLOPE * y)

    h = lrelu(inorm(conv(x, params["w1"], params["b1"], 1)))
    h = inorm(conv(h, params["w2"], params["b2"], 1))
    r = x
    if need_identity:
        r = inorm(conv(x, params["wr"], params["br"], 0))
    return lrelu(h + r)


def init_params(key, cin, cout):
    ks = jax.random.split(key, 6)
    return {
        "w1": 0.1 * jax.random.normal(ks[0], (cout, cin, 3, 3), jnp.float32),
        "b1": 0.1 * jax.random.normal(ks[1], (cout,), jnp.float32),
        "w2": 0.1 * jax.random.normal(ks[2], (cout, cout, 3, 3), jnp.float32),
        "b2": 0.1 * jax.random.normal(ks[3], (cout,), jnp.float32),
        "wr": 0.1 * jax.random.normal(ks[4], (cout, cin, 1, 1), jnp.float32),
        "br": 0.1 * jax.random.normal(ks[5], (cout,), jnp.float32),
    }


if __name__ == "__main__":
    B, Cin, Cout, H, W = 2, 4, 8, 16, 16
    key = jax.random.PRNGKey(0)
    kx, kp, kx2, kp2 = jax.random.split(key, 4)

    # Path 1: need_identity=True (Cin != Cout, 1x1-conv residual)
    x = jax.random.normal(kx, (B, Cin, H, W), jnp.float32)
    params = init_params(kp, Cin, Cout)
    out = jax.block_until_ready(res_conv_block_v2(x, params, need_identity=True))
    ref = reference(x, params, need_identity=True)
    assert out.shape == (B, Cout, H, W)
    assert jnp.allclose(out, ref, atol=1e-3, rtol=1e-3), "need_identity=True mismatch"

    # Path 2: need_identity=False (identity residual, Cin == Cout)
    x2 = jax.random.normal(kx2, (B, Cout, H, W), jnp.float32)
    params2 = init_params(kp2, Cout, Cout)
    out2 = jax.block_until_ready(res_conv_block_v2(x2, params2, need_identity=False))
    ref2 = reference(x2, params2, need_identity=False)
    assert jnp.allclose(out2, ref2, atol=1e-3, rtol=1e-3), "need_identity=False mismatch"

    print("KERNEL_OK")
</pallas_src>

<mosaic_0001>
module attributes {stable_mosaic.version = 11 : i64} {
  func.func @kernel(%arg0: i32, %arg1: memref<288x1xf32, #tpu.memory_space<vmem>>, %arg2: memref<1x342x4xf32, #tpu.memory_space<vmem>>, %arg3: memref<36x8xf32, #tpu.memory_space<vmem>>, %arg4: memref<72x8xf32, #tpu.memory_space<vmem>>, %arg5: memref<4x8xf32, #tpu.memory_space<vmem>>, %arg6: memref<1x288x8xf32, #tpu.memory_space<vmem>>, %arg7: memref<342x8xf32, #tpu.memory_space<vmem>>) attributes {dimension_semantics = [#tpu.dimension_semantics<parallel>], iteration_bounds = array<i64: 2>, scalar_prefetch = 0 : i64, scratch_operands = 1 : i64, tpu.core_type = #tpu.core_type<tc>, window_params = [{pipeline_mode = #tpu.pipeline_mode<synchronous>, transform_indices = @transform_0, window_bounds = array<i64: 288, 1>}, {transform_indices = @transform_1, window_bounds = array<i64: 1, 342, 4>}, {pipeline_mode = #tpu.pipeline_mode<synchronous>, transform_indices = @transform_2, window_bounds = array<i64: 36, 8>}, {pipeline_mode = #tpu.pipeline_mode<synchronous>, transform_indices = @transform_3, window_bounds = array<i64: 72, 8>}, {pipeline_mode = #tpu.pipeline_mode<synchronous>, transform_indices = @transform_4, window_bounds = array<i64: 4, 8>}, {transform_indices = @transform_5, window_bounds = array<i64: 1, 288, 8>}]} {
    %c0 = arith.constant 0 : index
    %c0_0 = arith.constant 0 : index
    %0 = vector.load %arg1[%c0, %c0_0] : memref<288x1xf32, #tpu.memory_space<vmem>>, vector<288x1xf32>
    %c0_1 = arith.constant 0 : index
    %c0_2 = arith.constant 0 : index
    %c0_3 = arith.constant 0 : index
    %1 = vector.load %arg2[%c0_1, %c0_2, %c0_3] : memref<1x342x4xf32, #tpu.memory_space<vmem>>, vector<1x288x4xf32>
    %2 = vector.shape_cast %1 : vector<1x288x4xf32> to vector<288x4xf32>
    %c0_4 = arith.constant 0 : index
    %c1 = arith.constant 1 : index
    %c0_5 = arith.constant 0 : index
    %3 = vector.load %arg2[%c0_4, %c1, %c0_5] : memref<1x342x4xf32, #tpu.memory_space<vmem>>, vector<1x288x4xf32>
    %4 = vector.shape_cast %3 : vector<1x288x4xf32> to vector<288x4xf32>
    %c0_6 = arith.constant 0 : index
    %c2 = arith.constant 2 : index
    %c0_7 = arith.constant 0 : index
    %5 = vector.load %arg2[%c0_6, %c2, %c0_7] : memref<1x342x4xf32, #tpu.memory_space<vmem>>, vector<1x288x4xf32>
    %6 = vector.shape_cast %5 : vector<1x288x4xf32> to vector<288x4xf32>
    %c0_8 = arith.constant 0 : index
    %c18 = arith.constant 18 : index
    %c0_9 = arith.constant 0 : index
    %7 = vector.load %arg2[%c0_8, %c18, %c0_9] : memref<1x342x4xf32, #tpu.memory_space<vmem>>, vector<1x288x4xf32>
    %8 = vector.shape_cast %7 : vector<1x288x4xf32> to vector<288x4xf32>
    %c0_10 = arith.constant 0 : index
    %c19 = arith.constant 19 : index
    %c0_11 = arith.constant 0 : index
    %9 = vector.load %arg2[%c0_10, %c19, %c0_11] : memref<1x342x4xf32, #tpu.memory_space<vmem>>, vector<1x288x4xf32>
    %10 = vector.shape_cast %9 : vector<1x288x4xf32> to vector<288x4xf32>
    %c0_12 = arith.constant 0 : index
    %c20 = arith.constant 20 : index
    %c0_13 = arith.constant 0 : index
    %11 = vector.load %arg2[%c0_12, %c20, %c0_13] : memref<1x342x4xf32, #tpu.memory_space<vmem>>, vector<1x288x4xf32>
    %12 = vector.shape_cast %11 : vector<1x288x4xf32> to vector<288x4xf32>
    %c0_14 = arith.constant 0 : index
    %c36 = arith.constant 36 : index
    %c0_15 = arith.constant 0 : index
    %13 = vector.load %arg2[%c0_14, %c36, %c0_15] : memref<1x342x4xf32, #tpu.memory_space<vmem>>, vector<1x288x4xf32>
    %14 = vector.shape_cast %13 : vector<1x288x4xf32> to vector<288x4xf32>
    %c0_16 = arith.constant 0 : index
    %c37 = arith.constant 37 : index
    %c0_17 = arith.constant 0 : index
    %15 = vector.load %arg2[%c0_16, %c37, %c0_17] : memref<1x342x4xf32, #tpu.memory_space<vmem>>, vector<1x288x4xf32>
    %16 = vector.shape_cast %15 : vector<1x288x4xf32> to vector<288x4xf32>
    %c0_18 = arith.constant 0 : index
    %c38 = arith.constant 38 : index
    %c0_19 = arith.constant 0 : index
    %17 = vector.load %arg2[%c0_18, %c38, %c0_19] : memref<1x342x4xf32, #tpu.memory_space<vmem>>, vector<1x288x4xf32>
    %18 = vector.shape_cast %17 : vector<1x288x4xf32> to vector<288x4xf32>
    %19 = tpu.concatenate %2, %4, %6, %8, %10, %12, %14, %16, %18 in 1 : vector<288x4xf32>, vector<288x4xf32>, vector<288x4xf32>, vector<288x4xf32>, vector<288x4xf32>, vector<288x4xf32>, vector<288x4xf32>, vector<288x4xf32>, vector<288x4xf32> -> vector<288x36xf32>
    %c0_20 = arith.constant 0 : index
    %c0_21 = arith.constant 0 : index
    %20 = vector.load %arg3[%c0_20, %c0_21] : memref<36x8xf32, #tpu.memory_space<vmem>>, vector<36x8xf32>
    %cst = arith.constant dense<0.000000e+00> : vector<288x8xf32>
    %21 = tpu.matmul %19, %20, %cst {dimension_numbers = #tpu.dot_dimension_numbers<[1], [0], [0], [1], [0, 0, 1, 1], [], []>} : vector<288x36xf32>, vector<36x8xf32>, vector<288x8xf32> -> vector<288x8xf32>
    %22 = vector.broadcast %0 : vector<288x1xf32> to vector<288x8xf32>
    %23 = arith.mulf %21, %22 : vector<288x8xf32>
    %cst_22 = arith.constant dense<0.000000e+00> : vector<8xf32>
    %24 = vector.multi_reduction <add>, %23, %cst_22 [0] : vector<288x8xf32> to vector<8xf32>
    %25 = vector.shape_cast %24 : vector<8xf32> to vector<1x8xf32>
    %26 = arith.mulf %21, %21 : vector<288x8xf32>
    %27 = vector.broadcast %0 : vector<288x1xf32> to vector<288x8xf32>
    %28 = arith.mulf %26, %27 : vector<288x8xf32>
    %cst_23 = arith.constant dense<0.000000e+00> : vector<8xf32>
    %29 = vector.multi_reduction <add>, %28, %cst_23 [0] : vector<288x8xf32> to vector<8xf32>
    %30 = vector.shape_cast %29 : vector<8xf32> to vector<1x8xf32>
    %cst_24 = arith.constant 3.906250e-03 : f32
    %31 = vector.broadcast %cst_24 : f32 to vector<1x8xf32>
    %32 = arith.mulf %25, %31 : vector<1x8xf32>
    %cst_25 = arith.constant 3.906250e-03 : f32
    %33 = vector.broadcast %cst_25 : f32 to vector<1x8xf32>
    %34 = arith.mulf %30, %33 : vector<1x8xf32>
    %35 = arith.mulf %32, %32 : vector<1x8xf32>
    %36 = arith.subf %34, %35 : vector<1x8xf32>
    %cst_26 = arith.constant 0.000000e+00 : f32
    %37 = vector.broadcast %cst_26 : f32 to vector<1x8xf32>
    %38 = arith.maximumf %36, %37 : vector<1x8xf32>
    %39 = vector.broadcast %32 : vector<1x8xf32> to vector<288x8xf32>
    %40 = arith.subf %21, %39 : vector<288x8xf32>
    %cst_27 = arith.constant 9.99999974E-6 : f32
    %41 = vector.broadcast %cst_27 : f32 to vector<1x8xf32>
    %42 = arith.addf %38, %41 : vector<1x8xf32>
    %43 = math.rsqrt %42 : vector<1x8xf32>
    %44 = vector.broadcast %43 : vector<1x8xf32> to vector<288x8xf32>
    %45 = arith.mulf %40, %44 : vector<288x8xf32>
    %cst_28 = arith.constant 0.000000e+00 : f32
    %46 = vector.broadcast %cst_28 : f32 to vector<288x8xf32>
    %47 = arith.cmpf oge, %45, %46 : vector<288x8xf32>
    %cst_29 = arith.constant 2.000000e-01 : f32
    %48 = vector.broadcast %cst_29 : f32 to vector<288x8xf32>
    %49 = arith.mulf %48, %45 : vector<288x8xf32>
    %50 = arith.select %47, %45, %49 : vector<288x8xi1>, vector<288x8xf32>
    %51 = vector.broadcast %0 : vector<288x1xf32> to vector<288x8xf32>
    %52 = arith.mulf %50, %51 : vector<288x8xf32>
    %c0_30 = arith.constant 0 : index
    %c19_31 = arith.constant 19 : index
    %c0_32 = arith.constant 0 : index
    %53 = vector.load %arg2[%c0_30, %c19_31, %c0_32] : memref<1x342x4xf32, #tpu.memory_space<vmem>>, vector<1x288x4xf32>
    %54 = vector.shape_cast %53 : vector<1x288x4xf32> to vector<288x4xf32>
    %c0_33 = arith.constant 0 : index
    %c0_34 = arith.constant 0 : index
    %55 = vector.load %arg5[%c0_33, %c0_34] : memref<4x8xf32, #tpu.memory_space<vmem>>, vector<4x8xf32>
    %cst_35 = arith.constant dense<0.000000e+00> : vector<288x8xf32>
    %56 = tpu.matmul %54, %55, %cst_35 {dimension_numbers = #tpu.dot_dimension_numbers<[1], [0], [0], [1], [0, 0, 1, 1], [], []>} : vector<288x4xf32>, vector<4x8xf32>, vector<288x8xf32> -> vector<288x8xf32>
    %57 = vector.broadcast %0 : vector<288x1xf32> to vector<288x8xf32>
    %58 = arith.mulf %56, %57 : vector<288x8xf32>
    %cst_36 = arith.constant dense<0.000000e+00> : vector<8xf32>
    %59 = vector.multi_reduction <add>, %58, %cst_36 [0] : vector<288x8xf32> to vector<8xf32>
    %60 = vector.shape_cast %59 : vector<8xf32> to vector<1x8xf32>
    %61 = arith.mulf %56, %56 : vector<288x8xf32>
    %62 = vector.broadcast %0 : vector<288x1xf32> to vector<288x8xf32>
    %63 = arith.mulf %61, %62 : vector<288x8xf32>
    %cst_37 = arith.constant dense<0.000000e+00> : vector<8xf32>
    %64 = vector.multi_reduction <add>, %63, %cst_37 [0] : vector<288x8xf32> to vector<8xf32>
    %65 = vector.shape_cast %64 : vector<8xf32> to vector<1x8xf32>
    %cst_38 = arith.constant 3.906250e-03 : f32
    %66 = vector.broadcast %cst_38 : f32 to vector<1x8xf32>
    %67 = arith.mulf %60, %66 : vector<1x8xf32>
    %cst_39 = arith.constant 3.906250e-03 : f32
    %68 = vector.broadcast %cst_39 : f32 to vector<1x8xf32>
    %69 = arith.mulf %65, %68 : vector<1x8xf32>
    %70 = arith.mulf %67, %67 : vector<1x8xf32>
    %71 = arith.subf %69, %70 : vector<1x8xf32>
    %cst_40 = arith.constant 0.000000e+00 : f32
    %72 = vector.broadcast %cst_40 : f32 to vector<1x8xf32>
    %73 = arith.maximumf %71, %72 : vector<1x8xf32>
    %74 = vector.broadcast %67 : vector<1x8xf32> to vector<288x8xf32>
    %75 = arith.subf %56, %74 : vector<288x8xf32>
    %cst_41 = arith.constant 9.99999974E-6 : f32
    %76 = vector.broadcast %cst_41 : f32 to vector<1x8xf32>
    %77 = arith.addf %73, %76 : vector<1x8xf32>
    %78 = math.rsqrt %77 : vector<1x8xf32>
    %79 = vector.broadcast %78 : vector<1x8xf32> to vector<288x8xf32>
    %80 = arith.mulf %75, %79 : vector<288x8xf32>
    %cst_42 = arith.constant 0.000000e+00 : f32
    %81 = vector.broadcast %cst_42 : f32 to vector<342x8xf32>
    %c0_43 = arith.constant 0 : index
    %c0_44 = arith.constant 0 : index
    %82 = vector.load %arg7[%c0_43, %c0_44] : memref<342x8xf32, #tpu.memory_space<vmem>>, vector<342x8xf32>
    tpu.vector_store %arg7[%c0_43, %c0_44], %81 {strides = array<i32>} : memref<342x8xf32, #tpu.memory_space<vmem>>, vector<342x8xf32>,
    %c19_45 = arith.constant 19 : index
    %c0_46 = arith.constant 0 : index
    %83 = vector.load %arg7[%c19_45, %c0_46] : memref<342x8xf32, #tpu.memory_space<vmem>>, vector<288x8xf32>
    tpu.vector_store %arg7[%c19_45, %c0_46], %52 {strides = array<i32>} : memref<342x8xf32, #tpu.memory_space<vmem>>, vector<288x8xf32>,
    %c0_47 = arith.constant 0 : index
    %c0_48 = arith.constant 0 : index
    %84 = vector.load %arg7[%c0_47, %c0_48] : memref<342x8xf32, #tpu.memory_space<vmem>>, vector<288x8xf32>
    %c1_49 = arith.constant 1 : index
    %c0_50 = arith.constant 0 : index
    %85 = vector.load %arg7[%c1_49, %c0_50] : memref<342x8xf32, #tpu.memory_space<vmem>>, vector<288x8xf32>
    %c2_51 = arith.constant 2 : index
    %c0_52 = arith.constant 0 : index
    %86 = vector.load %arg7[%c2_51, %c0_52] : memref<342x8xf32, #tpu.memory_space<vmem>>, vector<288x8xf32>
    %c18_53 = arith.constant 18 : index
    %c0_54 = arith.constant 0 : index
    %87 = vector.load %arg7[%c18_53, %c0_54] : memref<342x8xf32, #tpu.memory_space<vmem>>, vector<288x8xf32>
    %c19_55 = arith.constant 19 : index
    %c0_56 = arith.constant 0 : index
    %88 = vector.load %arg7[%c19_55, %c0_56] : memref<342x8xf32, #tpu.memory_space<vmem>>, vector<288x8xf32>
    %c20_57 = arith.constant 20 : index
    %c0_58 = arith.constant 0 : index
    %89 = vector.load %arg7[%c20_57, %c0_58] : memref<342x8xf32, #tpu.memory_space<vmem>>, vector<288x8xf32>
    %c36_59 = arith.constant 36 : index
    %c0_60 = arith.constant 0 : index
    %90 = vector.load %arg7[%c36_59, %c0_60] : memref<342x8xf32, #tpu.memory_space<vmem>>, vector<288x8xf32>
    %c37_61 = arith.constant 37 : index
    %c0_62 = arith.constant 0 : index
    %91 = vector.load %arg7[%c37_61, %c0_62] : memref<342x8xf32, #tpu.memory_space<vmem>>, vector<288x8xf32>
    %c38_63 = arith.constant 38 : index
    %c0_64 = arith.constant 0 : index
    %92 = vector.load %arg7[%c38_63, %c0_64] : memref<342x8xf32, #tpu.memory_space<vmem>>, vector<288x8xf32>
    %93 = tpu.concatenate %84, %85, %86, %87, %88, %89, %90, %91, %92 in 1 : vector<288x8xf32>, vector<288x8xf32>, vector<288x8xf32>, vector<288x8xf32>, vector<288x8xf32>, vector<288x8xf32>, vector<288x8xf32>, vector<288x8xf32>, vector<288x8xf32> -> vector<288x72xf32>
    %c0_65 = arith.constant 0 : index
    %c0_66 = arith.constant 0 : index
    %94 = vector.load %arg4[%c0_65, %c0_66] : memref<72x8xf32, #tpu.memory_space<vmem>>, vector<72x8xf32>
    %cst_67 = arith.constant dense<0.000000e+00> : vector<288x8xf32>
    %95 = tpu.matmul %93, %94, %cst_67 {dimension_numbers = #tpu.dot_dimension_numbers<[1], [0], [0], [1], [0, 0, 1, 1], [], []>} : vector<288x72xf32>, vector<72x8xf32>, vector<288x8xf32> -> vector<288x8xf32>
    %96 = vector.broadcast %0 : vector<288x1xf32> to vector<288x8xf32>
    %97 = arith.mulf %95, %96 : vector<288x8xf32>
    %cst_68 = arith.constant dense<0.000000e+00> : vector<8xf32>
    %98 = vector.multi_reduction <add>, %97, %cst_68 [0] : vector<288x8xf32> to vector<8xf32>
    %99 = vector.shape_cast %98 : vector<8xf32> to vector<1x8xf32>
    %100 = arith.mulf %95, %95 : vector<288x8xf32>
    %101 = vector.broadcast %0 : vector<288x1xf32> to vector<288x8xf32>
    %102 = arith.mulf %100, %101 : vector<288x8xf32>
    %cst_69 = arith.constant dense<0.000000e+00> : vector<8xf32>
    %103 = vector.multi_reduction <add>, %102, %cst_69 [0] : vector<288x8xf32> to vector<8xf32>
    %104 = vector.shape_cast %103 : vector<8xf32> to vector<1x8xf32>
    %cst_70 = arith.constant 3.906250e-03 : f32
    %105 = vector.broadcast %cst_70 : f32 to vector<1x8xf32>
    %106 = arith.mulf %99, %105 : vector<1x8xf32>
    %cst_71 = arith.constant 3.906250e-03 : f32
    %107 = vector.broadcast %cst_71 : f32 to vector<1x8xf32>
    %108 = arith.mulf %104, %107 : vector<1x8xf32>
    %109 = arith.mulf %106, %106 : vector<1x8xf32>
    %110 = arith.subf %108, %109 : vector<1x8xf32>
    %cst_72 = arith.constant 0.000000e+00 : f32
    %111 = vector.broadcast %cst_72 : f32 to vector<1x8xf32>
    %112 = arith.maximumf %110, %111 : vector<1x8xf32>
    %113 = vector.broadcast %106 : vector<1x8xf32> to vector<288x8xf32>
    %114 = arith.subf %95, %113 : vector<288x8xf32>
    %cst_73 = arith.constant 9.99999974E-6 : f32
    %115 = vector.broadcast %cst_73 : f32 to vector<1x8xf32>
    %116 = arith.addf %112, %115 : vector<1x8xf32>
    %117 = math.rsqrt %116 : vector<1x8xf32>
    %118 = vector.broadcast %117 : vector<1x8xf32> to vector<288x8xf32>
    %119 = arith.mulf %114, %118 : vector<288x8xf32>
    %120 = arith.addf %119, %80 : vector<288x8xf32>
    %cst_74 = arith.constant 0.000000e+00 : f32
    %121 = vector.broadcast %cst_74 : f32 to vector<288x8xf32>
    %122 = arith.cmpf oge, %120, %121 : vector<288x8xf32>
    %cst_75 = arith.constant 2.000000e-01 : f32
    %123 = vector.broadcast %cst_75 : f32 to vector<288x8xf32>
    %124 = arith.mulf %123, %120 : vector<288x8xf32>
    %125 = arith.select %122, %120, %124 : vector<288x8xi1>, vector<288x8xf32>
    %c0_76 = arith.constant 0 : index
    %c0_77 = arith.constant 0 : index
    %c0_78 = arith.constant 0 : index
    %126 = vector.load %arg6[%c0_76, %c0_77, %c0_78] : memref<1x288x8xf32, #tpu.memory_space<vmem>>, vector<1x288x8xf32>
    %127 = vector.shape_cast %126 : vector<1x288x8xf32> to vector<288x8xf32>
    %128 = vector.shape_cast %125 : vector<288x8xf32> to vector<1x288x8xf32>
    tpu.vector_store %arg6[%c0_76, %c0_77, %c0_78], %128 {strides = array<i32>} : memref<1x288x8xf32, #tpu.memory_space<vmem>>, vector<1x288x8xf32>,
    return
  }
  func.func @transform_0(%arg0: i32) -> (i32, i32) {
    %c0_i32 = arith.constant 0 : i32
    %c0_i32_0 = arith.constant 0 : i32
    %c0_i32_1 = arith.constant 0 : i32
    return %c0_i32, %c0_i32_0 : i32, i32
  }
  func.func @transform_1(%arg0: i32) -> (i32, i32, i32) {
    %c0_i32 = arith.constant 0 : i32
    %c0_i32_0 = arith.constant 0 : i32
    %c0_i32_1 = arith.constant 0 : i32
    return %arg0, %c0_i32, %c0_i32_0 : i32, i32, i32
  }
  func.func @transform_2(%arg0: i32) -> (i32, i32) {
    %c0_i32 = arith.constant 0 : i32
    %c0_i32_0 = arith.constant 0 : i32
    %c0_i32_1 = arith.constant 0 : i32
    return %c0_i32, %c0_i32_0 : i32, i32
  }
  func.func @transform_3(%arg0: i32) -> (i32, i32) {
    %c0_i32 = arith.constant 0 : i32
    %c0_i32_0 = arith.constant 0 : i32
    %c0_i32_1 = arith.constant 0 : i32
    return %c0_i32, %c0_i32_0 : i32, i32
  }
  func.func @transform_4(%arg0: i32) -> (i32, i32) {
    %c0_i32 = arith.constant 0 : i32
    %c0_i32_0 = arith.constant 0 : i32
    %c0_i32_1 = arith.constant 0 : i32
    return %c0_i32, %c0_i32_0 : i32, i32
  }
  func.func @transform_5(%arg0: i32) -> (i32, i32, i32) {
    %c0_i32 = arith.constant 0 : i32
    %c0_i32_0 = arith.constant 0 : i32
    %c0_i32_1 = arith.constant 0 : i32
    return %arg0, %c0_i32, %c0_i32_0 : i32, i32, i32
  }
}

</mosaic_0001>

<bundles_post_ra>
// kernel: res_conv_block_v2.1
= control target key start
LH: loop header
LB: loop body
LE: loop exit
PB: predicated region body
PF: predicated region fallthrough
CT: control target
= control target key end

     0   :  { %s6809_s18 = smov 0   ;;  %s12315_s0 = inlined_call_operand.vmem [shape: f32[288,1], index: 0, kind: input, shape index: {}]   ;;  %s12316_s1 = inlined_call_operand.vmem [shape: f32[2,342,4], index: 1, kind: input, shape index: {}]   ;;  %s12317_s2 = inlined_call_operand.vmem [shape: f32[36,8], index: 2, kind: input, shape index: {}]   ;;  %s12318_s3 = inlined_call_operand.vmem [shape: f32[72,8], index: 3, kind: input, shape index: {}]   ;;  %s12319_s4 = inlined_call_operand.vmem [shape: f32[4,8], index: 4, kind: input, shape index: {}]   ;;  %s12320_s5 = inlined_call_operand.vmem [shape: f32[2,288,8], index: 5, kind: output, shape index: {}]  }
   0x1 LB: > { %s6238_s19 = sadd.s32 4294967295, %s6763_s18   ;;  %p6242_p0 = scmp.ge.s32.totalorder %s6763_s18, 1  ;;  %s6763_s18 = sphi %s6809_s18, %s15_s18  }
   0x2   : > { %p187_p1 = scmp.lt.s32.totalorder %s6763_s18, 3 }
   0x4   : > { %p188_p2 = pnand %p6242_p0, %p187_p1 }
   0x6   : > { %191 = sbr.rel (%p188_p2) target bundleno = 2057 (0x809), region = 40 }
   0xd   : > { %p215_p3 = scmp.lt.s32.totalorder %s6238_s19, 1  ;;  %s6765_s24 = smov 4   ;;  %vm1601_vm0 = vcmask 31744   ;;  %vm2011_vm1 = vcmask 1043456   ;;  %vm12430_vm2 = vcmask 64512   ;;  %vm1675_vm3 = vcmask 97280  }
   0xe   : > { %s6766_s25 = smov 8   ;;  %s6767_s26 = smov 12   ;;  %vm12429_vm4 = vcmask 130048   ;;  %vm1749_vm5 = vcmask 162816   ;;  %vm12428_vm6 = vcmask 195584   ;;  %vm1823_vm7 = vcmask 228352  }
   0xf   : > { %s13661_s19 = smov (!%p215_p3, %s6238_s19), 1  ;;  %s6768_s27 = smov 16   ;;  %vm12427_vm8 = vcmask 261120   ;;  %vm1902_vm9 = vcmask 293888  }
  0x10   : > { %s6698_s20 = smul.u32 344, %s13661_s19  ;;  %s6769_s28 = smov 20  }
  0x11   : > { %s6770_s29 = smov 24   ;;  %s6771_s30 = smov 28  }
  0x12   : > { %s6823_s23 = scalar_lea.vmem %s12316_s1, %s6698_s20  ;;  %s6772_s20 = smov 32  }
  0x13   : > { %v299_v0 = vld [vmem:[%s6823_s23 + $0x11] sm:$0xff]  ;;  %v297_v1 = vld [vmem:[%s6823_s23 + $0x1] sm:$0xff]  ;;  %v300_v2 = vld [vmem:[%s6823_s23 + $0x19] sm:$0xff]  ;;  %s6775_s9 = smov 40   ;;  %s6776_s14 = smov 48  }
  0x14   : > { %557 = vrot.lane.b32.xlu1 %v299_v0, %s6765_s24  ;;  %553 = vrot.lane.b32.xlu0 %v297_v1, %s6765_s24  ;;  %v298_v3 = vld [vmem:[%s6823_s23 + $0x9] sm:$0xff]  ;;  %v301_v5 = vld [vmem:[%s6823_s23 + $0x21] sm:$0xff]  ;;  %s6777_s17 = smov 56  }
  0x15   : > { %v302_v4 = vld [vmem:[%s6823_s23 + $0x29] sm:$0xff]  ;;  %v304_v6 = vld [vmem:[%s6823_s23 + $0x39] sm:$0xff]  ;;  %v303_v7 = vld [vmem:[%s6823_s23 + $0x31] sm:$0xff] }
  0x16   : > { %v306_v8 = vld [vmem:[%s6823_s23 + $0x49] sm:$0xff]  ;;  %v305_v9 = vld [vmem:[%s6823_s23 + $0x41] sm:$0xff]  ;;  %v308_v10 = vld [vmem:[%s6823_s23 + $0x59] sm:$0xff] }
  0x17   : > { %v307_v11 = vld [vmem:[%s6823_s23 + $0x51] sm:$0xff]  ;;  %v310_v12 = vld [vmem:[%s6823_s23 + $0x69] sm:$0xff]  ;;  %v309_v13 = vld [vmem:[%s6823_s23 + $0x61] sm:$0xff] }
  0x18   : > { %559 = vrot.lane.b32.xlu1 %v300_v2, %s6765_s24  ;;  %555 = vrot.lane.b32.xlu0 %v298_v3, %s6765_s24  ;;  %v312_v14 = vld [vmem:[%s6823_s23 + $0x79] sm:$0xff]  ;;  %v311_v15 = vld [vmem:[%s6823_s23 + $0x71] sm:$0xff] }
  0x19   : > { %v314_v16 = vld [vmem:[%s6823_s23 + $0x89] sm:$0xff]  ;;  %v313_v17 = vld [vmem:[%s6823_s23 + $0x81] sm:$0xff]  ;;  %v316_v18 = vld [vmem:[%s6823_s23 + $0x99] sm:$0xff] }
  0x1a   : > { %v315_v19 = vld [vmem:[%s6823_s23 + $0x91] sm:$0xff]  ;;  %v318_v20 = vld [vmem:[%s6823_s23 + $0xa9] sm:$0xff]  ;;  %v317_v21 = vld [vmem:[%s6823_s23 + $0xa1] sm:$0xff] }
  0x1b   : > { %v320_v22 = vld [vmem:[%s6823_s23 + $0xb9] sm:$0xff]  ;;  %v319_v23 = vld [vmem:[%s6823_s23 + $0xb1] sm:$0xff]  ;;  %v322_v24 = vld [vmem:[%s6823_s23 + $0xc9] sm:$0xff] }
  0x1c   : > { %563 = vrot.lane.b32.xlu1 %v302_v4, %s6765_s24  ;;  %561 = vrot.lane.b32.xlu0 %v301_v5, %s6765_s24  ;;  %v321_v25 = vld [vmem:[%s6823_s23 + $0xc1] sm:$0xff]  ;;  %v324_v26 = vld [vmem:[%s6823_s23 + $0xd9] sm:$0xff] }
  0x1d   : > { %v323_v27 = vld [vmem:[%s6823_s23 + $0xd1] sm:$0xff]  ;;  %v326_v28 = vld [vmem:[%s6823_s23 + $0xe9] sm:$0xff]  ;;  %v325_v29 = vld [vmem:[%s6823_s23 + $0xe1] sm:$0xff] }
  0x1e   : > { %v328_v30 = vld [vmem:[%s6823_s23 + $0xf9] sm:$0xff]  ;;  %v327_v31 = vld [vmem:[%s6823_s23 + $0xf1] sm:$0xff]  ;;  %v330_v32 = vld [vmem:[%s6823_s23 + $0x109] sm:$0xff] }
  0x1f   : > { %v329_v33 = vld [vmem:[%s6823_s23 + $0x101] sm:$0xff]  ;;  %v332_v34 = vld [vmem:[%s6823_s23 + $0x119] sm:$0xff]  ;;  %v331_v35 = vld [vmem:[%s6823_s23 + $0x111] sm:$0xff] }
  0x20   : > { %567 = vrot.lane.b32.xlu1 %v304_v6, %s6765_s24  ;;  %565 = vrot.lane.b32.xlu0 %v303_v7, %s6765_s24  ;;  %v334_v36 = vld [vmem:[%s6823_s23 + $0xa] sm:$0xff]  ;;  %v333_v37 = vld [vmem:[%s6823_s23 + $0x2] sm:$0xff] }
  0x21   : > { %v6902_v38 = vld [vmem:[%s6823_s23 + $0x1a] sm:$0xff]  ;;  %v6905_v39 = vld [vmem:[%s6823_s23 + $0x12] sm:$0xff]  ;;  %v6912_v40 = vld [vmem:[%s6823_s23 + $0x2a] sm:$0xff] }
  0x22   : > { %v6915_v41 = vld [vmem:[%s6823_s23 + $0x22] sm:$0xff]  ;;  %v6922_v42 = vld [vmem:[%s6823_s23 + $0x3a] sm:$0xff]  ;;  %v6925_v43 = vld [vmem:[%s6823_s23 + $0x32] sm:$0xff] }
  0x23   : > { %v6932_v44 = vld [vmem:[%s6823_s23 + $0x4a] sm:$0xff]  ;;  %v6935_v45 = vld [vmem:[%s6823_s23 + $0x42] sm:$0xff]  ;;  %v6942_v46 = vld [vmem:[%s6823_s23 + $0x5a] sm:$0xff] }
  0x24   : > { %571 = vrot.lane.b32.xlu1 %v306_v8, %s6765_s24  ;;  %569 = vrot.lane.b32.xlu0 %v305_v9, %s6765_s24  ;;  %v6945_v47 = vld [vmem:[%s6823_s23 + $0x52] sm:$0xff]  ;;  %v6952_v48 = vld [vmem:[%s6823_s23 + $0x6a] sm:$0xff] }
  0x25   : > { %v6955_v49 = vld [vmem:[%s6823_s23 + $0x62] sm:$0xff]  ;;  %v6962_v50 = vld [vmem:[%s6823_s23 + $0x7a] sm:$0xff]  ;;  %v6965_v51 = vld [vmem:[%s6823_s23 + $0x72] sm:$0xff] }
  0x26   : > { %v6972_v52 = vld [vmem:[%s6823_s23 + $0x8a] sm:$0xff]  ;;  %v6975_v53 = vld [vmem:[%s6823_s23 + $0x82] sm:$0xff]  ;;  %v6982_v54 = vld [vmem:[%s6823_s23 + $0x9a] sm:$0xff] }
  0x27   : > { %v6985_v55 = vld [vmem:[%s6823_s23 + $0x92] sm:$0xff]  ;;  %v6992_v56 = vld [vmem:[%s6823_s23 + $0xaa] sm:$0xff]  ;;  %v6995_v57 = vld [vmem:[%s6823_s23 + $0xa2] sm:$0xff] }
  0x28   : > { %575 = vrot.lane.b32.xlu1 %v308_v10, %s6765_s24  ;;  %573 = vrot.lane.b32.xlu0 %v307_v11, %s6765_s24  ;;  %v7002_v58 = vld [vmem:[%s6823_s23 + $0xba] sm:$0xff]  ;;  %v7005_v59 = vld [vmem:[%s6823_s23 + $0xb2] sm:$0xff] }
  0x29   : > { %v7016_v62 = vld [vmem:[%s6823_s23 + $0xca] sm:$0xff]  ;;  %v7019_v63 = vld [vmem:[%s6823_s23 + $0xc2] sm:$0xff]  ;;  %v7030_v2 = vld [vmem:[%s6823_s23 + $0x93] sm:$0xff] }
  0x2a   : > { %v7033_v3 = vld [vmem:[%s6823_s23 + $0xda] sm:$0xff]  ;;  %v7036_v4 = vld [vmem:[%s6823_s23 + $0xd2] sm:$0xff]  ;;  %6570 = vmatprep.mubr.msk.f32.mxu1 %vm1601_vm0, %v7030_v2  ;;  %v7049_v7 = vld [vmem:[%s6823_s23 + $0xea] sm:$0xff] }
  0x2b   : > { %v7052_v8 = vld [vmem:[%s6823_s23 + $0xe2] sm:$0xff]  ;;  %v7063_v11 = vld [vmem:[%s6823_s23 + $0xfa] sm:$0xff] }
  0x2c   : > { %579 = vrot.lane.b32.xlu1 %v310_v12, %s6765_s24  ;;  %577 = vrot.lane.b32.xlu0 %v309_v13, %s6765_s24  ;;  %v7066_v12 = vld [vmem:[%s6823_s23 + $0xf2] sm:$0xff] }
  0x30   : > { %583 = vrot.lane.b32.xlu1 %v312_v14, %s6765_s24  ;;  %581 = vrot.lane.b32.xlu0 %v311_v15, %s6765_s24  ;;  %v7077_v15 = vld [vmem:[%s6823_s23 + $0x10a] sm:$0xff] }
  0x34   : > { %587 = vrot.lane.b32.xlu1 %v314_v16, %s6765_s24  ;;  %585 = vrot.lane.b32.xlu0 %v313_v17, %s6765_s24  ;;  %v7080_v16 = vld [vmem:[%s6823_s23 + $0x102] sm:$0xff] }
  0x38   : > { %591 = vrot.lane.b32.xlu1 %v316_v18, %s6765_s24  ;;  %589 = vrot.lane.b32.xlu0 %v315_v19, %s6765_s24  ;;  %v7091_v19 = vld [vmem:[%s6823_s23 + $0x11a] sm:$0xff] }
  0x3c   : > { %595 = vrot.lane.b32.xlu1 %v318_v20, %s6765_s24  ;;  %593 = vrot.lane.b32.xlu0 %v317_v21, %s6765_s24  ;;  %v7094_v20 = vld [vmem:[%s6823_s23 + $0x112] sm:$0xff] }
  0x40   : > { %599 = vrot.lane.b32.xlu1 %v320_v22, %s6765_s24  ;;  %597 = vrot.lane.b32.xlu0 %v319_v23, %s6765_s24 }
  0x44   : > { %603 = vrot.lane.b32.xlu1 %v322_v24, %s6765_s24  ;;  %601 = vrot.lane.b32.xlu0 %v321_v25, %s6765_s24 }
  0x48   : > { %607 = vrot.lane.b32.xlu1 %v324_v26, %s6765_s24  ;;  %605 = vrot.lane.b32.xlu0 %v323_v27, %s6765_s24 }
  0x4c   : > { %611 = vrot.lane.b32.xlu1 %v326_v28, %s6765_s24  ;;  %609 = vrot.lane.b32.xlu0 %v325_v29, %s6765_s24 }
  0x50   : > { %615 = vrot.lane.b32.xlu1 %v328_v30, %s6765_s24  ;;  %613 = vrot.lane.b32.xlu0 %v327_v31, %s6765_s24 }
  0x54   : > { %619 = vrot.lane.b32.xlu1 %v330_v32, %s6765_s24  ;;  %617 = vrot.lane.b32.xlu0 %v329_v33, %s6765_s24 }
  0x58   : > { %623 = vrot.lane.b32.xlu1 %v332_v34, %s6765_s24  ;;  %621 = vrot.lane.b32.xlu0 %v331_v35, %s6765_s24 }
  0x5c   : > { %699 = vrot.lane.b32.xlu1 %v334_v36, %s6766_s25  ;;  %697 = vrot.lane.b32.xlu0 %v333_v37, %s6766_s25 }
  0x60   : > { %703 = vrot.lane.b32.xlu1 %v6902_v38, %s6766_s25  ;;  %701 = vrot.lane.b32.xlu0 %v6905_v39, %s6766_s25 }
  0x64   : > { %707 = vrot.lane.b32.xlu1 %v6912_v40, %s6766_s25  ;;  %705 = vrot.lane.b32.xlu0 %v6915_v41, %s6766_s25 }
  0x68   : > { %711 = vrot.lane.b32.xlu1 %v6922_v42, %s6766_s25  ;;  %709 = vrot.lane.b32.xlu0 %v6925_v43, %s6766_s25 }
  0x6c   : > { %715 = vrot.lane.b32.xlu1 %v6932_v44, %s6766_s25  ;;  %713 = vrot.lane.b32.xlu0 %v6935_v45, %s6766_s25 }
  0x70   : > { %719 = vrot.lane.b32.xlu1 %v6942_v46, %s6766_s25  ;;  %717 = vrot.lane.b32.xlu0 %v6945_v47, %s6766_s25 }
  0x74   : > { %723 = vrot.lane.b32.xlu1 %v6952_v48, %s6766_s25  ;;  %721 = vrot.lane.b32.xlu0 %v6955_v49, %s6766_s25 }
  0x78   : > { %727 = vrot.lane.b32.xlu1 %v6962_v50, %s6766_s25  ;;  %725 = vrot.lane.b32.xlu0 %v6965_v51, %s6766_s25 }
  0x7c   : > { %731 = vrot.lane.b32.xlu1 %v6972_v52, %s6766_s25  ;;  %729 = vrot.lane.b32.xlu0 %v6975_v53, %s6766_s25 }
  0x80   : > { %735 = vrot.lane.b32.xlu1 %v6982_v54, %s6766_s25  ;;  %733 = vrot.lane.b32.xlu0 %v6985_v55, %s6766_s25 }
  0x84   : > { %739 = vrot.lane.b32.xlu1 %v6992_v56, %s6766_s25  ;;  %737 = vrot.lane.b32.xlu0 %v6995_v57, %s6766_s25 }
  0x86   : > { %v7007_v60 = vpop.permute.xlu1 %557  ;;  %v7009_v61 = vpop.permute.xlu0 %553 }
  0x88   : > { %743 = vrot.lane.b32.xlu1 %v7002_v58, %s6766_s25  ;;  %741 = vrot.lane.b32.xlu0 %v7005_v59, %s6766_s25 }
  0x8a   : > { %v7021_v0 = vpop.permute.xlu1 %559  ;;  %v7023_v1 = vpop.permute.xlu0 %555 }
  0x8c   : > { %747 = vrot.lane.b32.xlu1 %v7016_v62, %s6766_s25  ;;  %745 = vrot.lane.b32.xlu0 %v7019_v63, %s6766_s25 }
  0x8e   : > { %v7040_v5 = vpop.permute.xlu1 %563  ;;  %v7042_v6 = vpop.permute.xlu0 %561 }
  0x90   : > { %751 = vrot.lane.b32.xlu1 %v7033_v3, %s6766_s25  ;;  %749 = vrot.lane.b32.xlu0 %v7036_v4, %s6766_s25 }
  0x92   : > { %v7054_v9 = vpop.permute.xlu1 %567  ;;  %v7056_v10 = vpop.permute.xlu0 %565 }
  0x93   : > { %12465 = vst [vmem:[#allocation3_spill] sm:$0xff] %v7056_v10 }
  0x94   : > { %755 = vrot.lane.b32.xlu1 %v7049_v7, %s6766_s25  ;;  %753 = vrot.lane.b32.xlu0 %v7052_v8, %s6766_s25 }
  0x96   : > { %v7068_v13 = vpop.permute.xlu1 %571  ;;  %v7070_v14 = vpop.permute.xlu0 %569 }
  0x97   : > { %12466 = vst [vmem:[#allocation4_spill] sm:$0xff] %v7068_v13  ;;  %12467 = vst [vmem:[#allocation5_spill] sm:$0xff] %v7070_v14 }
  0x98   : > { %759 = vrot.lane.b32.xlu1 %v7063_v11, %s6766_s25  ;;  %757 = vrot.lane.b32.xlu0 %v7066_v12, %s6766_s25 }
  0x9a   : > { %v7082_v17 = vpop.permute.xlu1 %575  ;;  %v7084_v18 = vpop.permute.xlu0 %573 }
  0x9b   : > { %12468 = vst [vmem:[#allocation6_spill] sm:$0xff] %v7082_v17  ;;  %12469 = vst [vmem:[#allocation7_spill] sm:$0xff] %v7084_v18 }
  0x9c   : > { %763 = vrot.lane.b32.xlu1 %v7077_v15, %s6766_s25  ;;  %761 = vrot.lane.b32.xlu0 %v7080_v16, %s6766_s25 }
  0x9e   : > { %v7096_v21 = vpop.permute.xlu1 %579  ;;  %v7098_v22 = vpop.permute.xlu0 %577 }
  0x9f   : > { %12470 = vst [vmem:[#allocation8_spill] sm:$0xff] %v7096_v21  ;;  %12471 = vst [vmem:[#allocation9_spill] sm:$0xff] %v7098_v22 }
  0xa0   : > { %767 = vrot.lane.b32.xlu1 %v7091_v19, %s6766_s25  ;;  %765 = vrot.lane.b32.xlu0 %v7094_v20, %s6766_s25 }
  0xa2   : > { %v7104_v23 = vpop.permute.xlu1 %583  ;;  %v7106_v24 = vpop.permute.xlu0 %581 }
  0xa3   : > { %12472 = vst [vmem:[#allocation10_spill] sm:$0xff] %v7104_v23  ;;  %12473 = vst [vmem:[#allocation11_spill] sm:$0xff] %v7106_v24 }
  0xa4   : > { %809 = vrot.lane.b32.xlu1 %v6902_v38, %s6767_s26  ;;  %807 = vrot.lane.b32.xlu0 %v6905_v39, %s6767_s26 }
  0xa6   : > { %v7112_v25 = vpop.permute.xlu1 %587  ;;  %v7114_v26 = vpop.permute.xlu0 %585 }
  0xa7   : > { %12474 = vst [vmem:[#allocation12_spill] sm:$0xff] %v7112_v25  ;;  %12475 = vst [vmem:[#allocation13_spill] sm:$0xff] %v7114_v26 }
  0xa8   : > { %813 = vrot.lane.b32.xlu1 %v6912_v40, %s6767_s26  ;;  %811 = vrot.lane.b32.xlu0 %v6915_v41, %s6767_s26 }
  0xaa   : > { %v7120_v27 = vpop.permute.xlu1 %591  ;;  %v7122_v28 = vpop.permute.xlu0 %589 }
  0xab   : > { %12476 = vst [vmem:[#allocation14_spill] sm:$0xff] %v7120_v27  ;;  %12477 = vst [vmem:[#allocation15_spill] sm:$0xff] %v7122_v28  ;;  %v7425_v28 = vld [vmem:[%s6823_s23 + $0x113] sm:$0xff] }
  0xac   : > { %817 = vrot.lane.b32.xlu1 %v6922_v42, %s6767_s26  ;;  %815 = vrot.lane.b32.xlu0 %v6925_v43, %s6767_s26 }
  0xae   : > { %v7128_v29 = vpop.permute.xlu1 %595  ;;  %v7130_v30 = vpop.permute.xlu0 %593 }
  0xaf   : > { %12478 = vst [vmem:[#allocation16_spill] sm:$0xff] %v7128_v29  ;;  %12479 = vst [vmem:[#allocation17_spill] sm:$0xff] %v7130_v30  ;;  %v7411_v30 = vld [vmem:[%s6823_s23 + $0x103] sm:$0xff] }
  0xb0   : > { %821 = vrot.lane.b32.xlu1 %v6932_v44, %s6767_s26  ;;  %819 = vrot.lane.b32.xlu0 %v6935_v45, %s6767_s26 }
  0xb2   : > { %v7136_v31 = vpop.permute.xlu1 %599  ;;  %v7138_v32 = vpop.permute.xlu0 %597 }
  0xb3   : > { %12480 = vst [vmem:[#allocation18_spill] sm:$0xff] %v7136_v31  ;;  %12481 = vst [vmem:[#allocation19_spill] sm:$0xff] %v7138_v32  ;;  %v7397_v32 = vld [vmem:[%s6823_s23 + $0xf3] sm:$0xff] }
  0xb4   : > { %825 = vrot.lane.b32.xlu1 %v6942_v46, %s6767_s26  ;;  %823 = vrot.lane.b32.xlu0 %v6945_v47, %s6767_s26 }
  0xb6   : > { %v7144_v33 = vpop.permute.xlu1 %603  ;;  %v7146_v34 = vpop.permute.xlu0 %601 }
  0xb7   : > { %12482 = vst [vmem:[#allocation20_spill] sm:$0xff] %v7144_v33  ;;  %12483 = vst [vmem:[#allocation21_spill] sm:$0xff] %v7146_v34  ;;  %v7383_v34 = vld [vmem:[%s6823_s23 + $0xe3] sm:$0xff] }
  0xb8   : > { %829 = vrot.lane.b32.xlu1 %v6952_v48, %s6767_s26  ;;  %827 = vrot.lane.b32.xlu0 %v6955_v49, %s6767_s26 }
  0xba   : > { %v7152_v35 = vpop.permute.xlu1 %607  ;;  %v7154_v36 = vpop.permute.xlu0 %605 }
  0xbb   : > { %12484 = vst [vmem:[#allocation22_spill] sm:$0xff] %v7152_v35  ;;  %12485 = vst [vmem:[#allocation23_spill] sm:$0xff] %v7154_v36 }
  0xbc   : > { %833 = vrot.lane.b32.xlu1 %v6962_v50, %s6767_s26  ;;  %831 = vrot.lane.b32.xlu0 %v6965_v51, %s6767_s26 }
  0xbe   : > { %v7160_v37 = vpop.permute.xlu1 %611  ;;  %v7162_v38 = vpop.permute.xlu0 %609 }
  0xbf   : > { %12486 = vst [vmem:[#allocation24_spill] sm:$0xff] %v7160_v37  ;;  %12487 = vst [vmem:[#allocation25_spill] sm:$0xff] %v7162_v38  ;;  %v385_v38 = vld [vmem:[%s6823_s23 + $0x83] sm:$0xff] }
  0xc0   : > { %837 = vrot.lane.b32.xlu1 %v6972_v52, %s6767_s26  ;;  %835 = vrot.lane.b32.xlu0 %v6975_v53, %s6767_s26 }
  0xc2   : > { %v7168_v39 = vpop.permute.xlu1 %615  ;;  %v7170_v40 = vpop.permute.xlu0 %613 }
  0xc3   : > { %12488 = vst [vmem:[#allocation26_spill] sm:$0xff] %v7168_v39  ;;  %12489 = vst [vmem:[#allocation27_spill] sm:$0xff] %v7170_v40  ;;  %v383_v40 = vld [vmem:[%s6823_s23 + $0x73] sm:$0xff] }
  0xc4   : > { %841 = vrot.lane.b32.xlu1 %v6982_v54, %s6767_s26  ;;  %839 = vrot.lane.b32.xlu0 %v6985_v55, %s6767_s26 }
  0xc6   : > { %v7176_v41 = vpop.permute.xlu1 %619  ;;  %v7178_v42 = vpop.permute.xlu0 %617 }
  0xc7   : > { %12490 = vst [vmem:[#allocation28_spill] sm:$0xff] %v7176_v41  ;;  %12491 = vst [vmem:[#allocation29_spill] sm:$0xff] %v7178_v42  ;;  %v381_v42 = vld [vmem:[%s6823_s23 + $0x63] sm:$0xff] }
  0xc8   : > { %845 = vrot.lane.b32.xlu1 %v6992_v56, %s6767_s26  ;;  %843 = vrot.lane.b32.xlu0 %v6995_v57, %s6767_s26  ;;  %v370_v57 = vld [vmem:[%s6823_s23 + $0x12a] sm:$0xff] }
  0xca   : > { %v7184_v43 = vpop.permute.xlu1 %623  ;;  %v7186_v44 = vpop.permute.xlu0 %621 }
  0xcb   : > { %12492 = vst [vmem:[#allocation30_spill] sm:$0xff] %v7184_v43  ;;  %12493 = vst [vmem:[#allocation31_spill] sm:$0xff] %v7186_v44  ;;  %v379_v44 = vld [vmem:[%s6823_s23 + $0x53] sm:$0xff] }
  0xcc   : > { %849 = vrot.lane.b32.xlu1 %v7002_v58, %s6767_s26  ;;  %847 = vrot.lane.b32.xlu0 %v7005_v59, %s6767_s26  ;;  %v369_v58 = vld [vmem:[%s6823_s23 + $0x122] sm:$0xff] }
  0xce   : > { %v7192_v45 = vpop.permute.xlu1 %699  ;;  %v7194_v46 = vpop.permute.xlu0 %697 }
  0xcf   : > { %12494 = vst [vmem:[#allocation32_spill] sm:$0xff] %v7192_v45  ;;  %12495 = vst [vmem:[#allocation33_spill] sm:$0xff] %v7194_v46 }
  0xd0   : > { %853 = vrot.lane.b32.xlu1 %v7016_v62, %s6767_s26  ;;  %851 = vrot.lane.b32.xlu0 %v7019_v63, %s6767_s26  ;;  %v372_v63 = vld [vmem:[%s6823_s23 + $0x1b] sm:$0xff] }
  0xd2   : > { %v7200_v47 = vpop.permute.xlu1 %703  ;;  %v7202_v48 = vpop.permute.xlu0 %701 }
  0xd3   : > { %12496 = vst [vmem:[#allocation34_spill] sm:$0xff] %v7200_v47  ;;  %12497 = vst [vmem:[#allocation35_spill] sm:$0xff] %v7202_v48 }
  0xd4   : > { %857 = vrot.lane.b32.xlu1 %v7033_v3, %s6767_s26  ;;  %855 = vrot.lane.b32.xlu0 %v7036_v4, %s6767_s26  ;;  %v371_v3 = vld [vmem:[%s6823_s23 + $0x13] sm:$0xff] }
  0xd6   : > { %v7208_v49 = vpop.permute.xlu1 %707  ;;  %v7210_v50 = vpop.permute.xlu0 %705 }
  0xd7   : > { %12498 = vst [vmem:[#allocation36_spill] sm:$0xff] %v7208_v49  ;;  %12499 = vst [vmem:[#allocation37_spill] sm:$0xff] %v7210_v50 }
  0xd8   : > { %861 = vrot.lane.b32.xlu1 %v7049_v7, %s6767_s26  ;;  %859 = vrot.lane.b32.xlu0 %v7052_v8, %s6767_s26  ;;  %v374_v8 = vld [vmem:[%s6823_s23 + $0x2b] sm:$0xff] }
  0xda   : > { %v7216_v51 = vpop.permute.xlu1 %711  ;;  %v7218_v52 = vpop.permute.xlu0 %709 }
  0xdb   : > { %12500 = vst [vmem:[#allocation38_spill] sm:$0xff] %v7216_v51  ;;  %12501 = vst [vmem:[#allocation39_spill] sm:$0xff] %v7218_v52 }
  0xdc   : > { %865 = vrot.lane.b32.xlu1 %v7063_v11, %s6767_s26  ;;  %863 = vrot.lane.b32.xlu0 %v7066_v12, %s6767_s26  ;;  %v373_v11 = vld [vmem:[%s6823_s23 + $0x23] sm:$0xff] }
  0xde   : > { %v7224_v53 = vpop.permute.xlu1 %715  ;;  %v7226_v54 = vpop.permute.xlu0 %713 }
  0xdf   : > { %12502 = vst [vmem:[#allocation40_spill] sm:$0xff] %v7224_v53  ;;  %12503 = vst [vmem:[#allocation41_spill] sm:$0xff] %v7226_v54 }
  0xe0   : > { %869 = vrot.lane.b32.xlu1 %v7077_v15, %s6767_s26  ;;  %867 = vrot.lane.b32.xlu0 %v7080_v16, %s6767_s26  ;;  %v376_v16 = vld [vmem:[%s6823_s23 + $0x3b] sm:$0xff] }
  0xe2   : > { %v7232_v55 = vpop.permute.xlu1 %719  ;;  %v7234_v56 = vpop.permute.xlu0 %717 }
  0xe3   : > { %12504 = vst [vmem:[#allocation42_spill] sm:$0xff] %v7232_v55  ;;  %12505 = vst [vmem:[#allocation43_spill] sm:$0xff] %v7234_v56 }
  0xe4   : > { %873 = vrot.lane.b32.xlu1 %v7091_v19, %s6767_s26  ;;  %871 = vrot.lane.b32.xlu0 %v7094_v20, %s6767_s26  ;;  %v375_v19 = vld [vmem:[%s6823_s23 + $0x33] sm:$0xff] }
  0xe6   : > { %v7242_v59 = vpop.permute.xlu1 %723  ;;  %v7244_v62 = vpop.permute.xlu0 %721 }
  0xe7   : > { %12506 = vst [vmem:[#allocation44_spill] sm:$0xff] %v7242_v59  ;;  %12507 = vst [vmem:[#allocation45_spill] sm:$0xff] %v7244_v62  ;;  %v408_v59 = vld [vmem:[%s6823_s23 + $0x1c] sm:$0xff] }
  0xe8   : > { %877 = vrot.lane.b32.xlu1 %v370_v57, %s6767_s26  ;;  %875 = vrot.lane.b32.xlu0 %v369_v58, %s6767_s26  ;;  %v378_v58 = vld [vmem:[%s6823_s23 + $0x4b] sm:$0xff] }
  0xea   : > { %v7250_v4 = vpop.permute.xlu1 %727  ;;  %v7252_v7 = vpop.permute.xlu0 %725 }
  0xeb   : > { %12508 = vst [vmem:[#allocation46_spill] sm:$0xff] %v7250_v4  ;;  %12509 = vst [vmem:[#allocation47_spill] sm:$0xff] %v7252_v7  ;;  %v7439_v7 = vld [vmem:[%s6823_s23 + $0x123] sm:$0xff] }
  0xec   : > { %953 = vrot.lane.b32.xlu1 %v372_v63, %s6768_s27  ;;  %951 = vrot.lane.b32.xlu0 %v371_v3, %s6768_s27  ;;  %v377_v63 = vld [vmem:[%s6823_s23 + $0x43] sm:$0xff] }
  0xee   : > { %v7258_v12 = vpop.permute.xlu1 %731  ;;  %v7260_v15 = vpop.permute.xlu0 %729 }
  0xef   : > { %12510 = vst [vmem:[#allocation48_spill] sm:$0xff] %v7258_v12  ;;  %12511 = vst [vmem:[#allocation49_spill] sm:$0xff] %v7260_v15  ;;  %v7436_v12 = vld [vmem:[%s6823_s23 + $0x12b] sm:$0xff] }
  0xf0   : > { %957 = vrot.lane.b32.xlu1 %v374_v8, %s6768_s27  ;;  %955 = vrot.lane.b32.xlu0 %v373_v11, %s6768_s27  ;;  %v380_v11 = vld [vmem:[%s6823_s23 + $0x5b] sm:$0xff] }
  0xf2   : > { %v7266_v20 = vpop.permute.xlu1 %735  ;;  %v7268_v57 = vpop.permute.xlu0 %733 }
  0xf3   : > { %12512 = vst [vmem:[#allocation50_spill] sm:$0xff] %v7266_v20  ;;  %12513 = vst [vmem:[#allocation51_spill] sm:$0xff] %v7268_v57  ;;  %v7422_v20 = vld [vmem:[%s6823_s23 + $0x11b] sm:$0xff] }
  0xf4   : > { %961 = vrot.lane.b32.xlu1 %v376_v16, %s6768_s27  ;;  %959 = vrot.lane.b32.xlu0 %v375_v19, %s6768_s27  ;;  %v382_v19 = vld [vmem:[%s6823_s23 + $0x6b] sm:$0xff] }
  0xf6   : > { %v7274_v3 = vpop.permute.xlu1 %739  ;;  %v7276_v8 = vpop.permute.xlu0 %737 }
  0xf7   : > { %12514 = vst [vmem:[#allocation52_spill] sm:$0xff] %v7274_v3  ;;  %12515 = vst [vmem:[#allocation53_spill] sm:$0xff] %v7276_v8  ;;  %v7408_v3 = vld [vmem:[%s6823_s23 + $0x10b] sm:$0xff] }
  0xf8   : > { %965 = vrot.lane.b32.xlu1 %v378_v58, %s6768_s27  ;;  %963 = vrot.lane.b32.xlu0 %v377_v63, %s6768_s27  ;;  %v384_v63 = vld [vmem:[%s6823_s23 + $0x7b] sm:$0xff] }
  0xfa   : > { %v7282_v43 = vpop.permute.xlu1 %743  ;;  %v7284_v16 = vpop.permute.xlu0 %741 }
  0xfb   : > { %12516 = vst [vmem:[#allocation54_spill] sm:$0xff] %v7282_v43  ;;  %12517 = vst [vmem:[#allocation55_spill] sm:$0xff] %v7284_v16  ;;  %v7394_v43 = vld [vmem:[%s6823_s23 + $0xfb] sm:$0xff] }
  0xfc   : > { %969 = vrot.lane.b32.xlu1 %v380_v11, %s6768_s27  ;;  %967 = vrot.lane.b32.xlu0 %v379_v44, %s6768_s27  ;;  %v386_v44 = vld [vmem:[%s6823_s23 + $0x8b] sm:$0xff] }
  0xfe   : > { %v7290_v41 = vpop.permute.xlu1 %747  ;;  %v7292_v58 = vpop.permute.xlu0 %745 }
  0xff   : > { %12518 = vst [vmem:[#allocation56_spill] sm:$0xff] %v7290_v41  ;;  %12519 = vst [vmem:[#allocation57_spill] sm:$0xff] %v7292_v58  ;;  %v7380_v41 = vld [vmem:[%s6823_s23 + $0xeb] sm:$0xff] }
 0x100   : > { %973 = vrot.lane.b32.xlu1 %v382_v19, %s6768_s27  ;;  %971 = vrot.lane.b32.xlu0 %v381_v42, %s6768_s27  ;;  %v7313_v42 = vld [vmem:[%s6823_s23 + $0x9b] sm:$0xff] }
 0x102   : > { %v7298_v39 = vpop.permute.xlu1 %751  ;;  %v7300_v11 = vpop.permute.xlu0 %749 }
 0x103   : > { %12520 = vst [vmem:[#allocation58_spill] sm:$0xff] %v7298_v39  ;;  %12521 = vst [vmem:[#allocation59_spill] sm:$0xff] %v7300_v11 }
 0x104   : > { %977 = vrot.lane.b32.xlu1 %v384_v63, %s6768_s27  ;;  %975 = vrot.lane.b32.xlu0 %v383_v40, %s6768_s27  ;;  %v7324_v40 = vld [vmem:[%s6823_s23 + $0xab] sm:$0xff] }
 0x106   : > { %v7306_v37 = vpop.permute.xlu1 %755  ;;  %v7308_v19 = vpop.permute.xlu0 %753 }
 0x107   : > { %12522 = vst [vmem:[#allocation60_spill] sm:$0xff] %v7306_v37  ;;  %12523 = vst [vmem:[#allocation61_spill] sm:$0xff] %v7308_v19  ;;  %v7327_v19 = vld [vmem:[%s6823_s23 + $0xa3] sm:$0xff] }
 0x108   : > { %981 = vrot.lane.b32.xlu1 %v386_v44, %s6768_s27  ;;  %979 = vrot.lane.b32.xlu0 %v385_v38, %s6768_s27 }
 0x10a   : > { %v7315_v39 = vpop.permute.xlu1 %759  ;;  %v7317_v63 = vpop.permute.xlu0 %757 }
 0x10b   : > { %12524 = vst [vmem:[#allocation62_spill] sm:$0xff] %v7315_v39  ;;  %12525 = vst [vmem:[#allocation63_spill] sm:$0xff] %v7317_v63  ;;  %v7338_v63 = vld [vmem:[%s6823_s23 + $0xbb] sm:$0xff]  ;;  %v7341_v39 = vld [vmem:[%s6823_s23 + $0xb3] sm:$0xff] }
 0x10c   : > { %985 = vrot.lane.b32.xlu1 %v7313_v42, %s6768_s27  ;;  %983 = vrot.lane.b32.xlu0 %v7030_v2, %s6768_s27 }
 0x10e   : > { %v7329_v44 = vpop.permute.xlu1 %763  ;;  %v7331_v38 = vpop.permute.xlu0 %761 }
 0x10f   : > { %12526 = vst [vmem:[#allocation64_spill] sm:$0xff] %v7329_v44  ;;  %12527 = vst [vmem:[#allocation65_spill] sm:$0xff] %v7331_v38  ;;  %v7352_v38 = vld [vmem:[%s6823_s23 + $0xcb] sm:$0xff]  ;;  %v7355_v44 = vld [vmem:[%s6823_s23 + $0xc3] sm:$0xff] }
 0x110   : > { %989 = vrot.lane.b32.xlu1 %v7324_v40, %s6768_s27  ;;  %987 = vrot.lane.b32.xlu0 %v7327_v19, %s6768_s27 }
 0x112   : > { %v7343_v2 = vpop.permute.xlu1 %767  ;;  %v7345_v37 = vpop.permute.xlu0 %765 }
 0x113   : > { %12528 = vst [vmem:[#allocation66_spill] sm:$0xff] %v7343_v2  ;;  %12529 = vst [vmem:[#allocation67_spill] sm:$0xff] %v7345_v37  ;;  %v7366_v37 = vld [vmem:[%s6823_s23 + $0xdb] sm:$0xff]  ;;  %v7369_v2 = vld [vmem:[%s6823_s23 + $0xd3] sm:$0xff] }
 0x114   : > { %993 = vrot.lane.b32.xlu1 %v7338_v63, %s6768_s27  ;;  %991 = vrot.lane.b32.xlu0 %v7341_v39, %s6768_s27 }
 0x116   : > { %v7357_v11 = vpop.permute.xlu1 %809  ;;  %v7359_v36 = vpop.permute.xlu0 %807 }
 0x117   : > { %12530 = vst [vmem:[#allocation68_spill] sm:$0xff] %v7357_v11  ;;  %12531 = vst [vmem:[#allocation69_spill] sm:$0xff] %v7359_v36 }
 0x118   : > { %997 = vrot.lane.b32.xlu1 %v7352_v38, %s6768_s27  ;;  %995 = vrot.lane.b32.xlu0 %v7355_v44, %s6768_s27 }
 0x11a   : > { %v7371_v35 = vpop.permute.xlu1 %813  ;;  %v7373_v58 = vpop.permute.xlu0 %811 }
 0x11b   : > { %12532 = vst [vmem:[#allocation70_spill] sm:$0xff] %v7371_v35  ;;  %12533 = vst [vmem:[#allocation71_spill] sm:$0xff] %v7373_v58 }
 0x11c   : > { %1001 = vrot.lane.b32.xlu1 %v7366_v37, %s6768_s27  ;;  %999 = vrot.lane.b32.xlu0 %v7369_v2, %s6768_s27 }
 0x11e   : > { %v7385_v33 = vpop.permute.xlu1 %817  ;;  %v7387_v16 = vpop.permute.xlu0 %815 }
 0x11f   : > { %12534 = vst [vmem:[#allocation72_spill] sm:$0xff] %v7385_v33  ;;  %12535 = vst [vmem:[#allocation73_spill] sm:$0xff] %v7387_v16 }
 0x120   : > { %1005 = vrot.lane.b32.xlu1 %v7380_v41, %s6768_s27  ;;  %1003 = vrot.lane.b32.xlu0 %v7383_v34, %s6768_s27 }
 0x122   : > { %v7399_v31 = vpop.permute.xlu1 %821  ;;  %v7401_v8 = vpop.permute.xlu0 %819 }
 0x123   : > { %12536 = vst [vmem:[#allocation74_spill] sm:$0xff] %v7399_v31  ;;  %12537 = vst [vmem:[#allocation75_spill] sm:$0xff] %v7401_v8 }
 0x124   : > { %1009 = vrot.lane.b32.xlu1 %v7394_v43, %s6768_s27  ;;  %1007 = vrot.lane.b32.xlu0 %v7397_v32, %s6768_s27 }
 0x126   : > { %v7413_v29 = vpop.permute.xlu1 %825  ;;  %v7415_v57 = vpop.permute.xlu0 %823 }
 0x127   : > { %12538 = vst [vmem:[#allocation76_spill] sm:$0xff] %v7413_v29  ;;  %12539 = vst [vmem:[#allocation77_spill] sm:$0xff] %v7415_v57 }
 0x128   : > { %1013 = vrot.lane.b32.xlu1 %v7408_v3, %s6768_s27  ;;  %1011 = vrot.lane.b32.xlu0 %v7411_v30, %s6768_s27 }
 0x12a   : > { %v7427_v27 = vpop.permute.xlu1 %829  ;;  %v7429_v15 = vpop.permute.xlu0 %827 }
 0x12b   : > { %12540 = vst [vmem:[#allocation78_spill] sm:$0xff] %v7427_v27  ;;  %12541 = vst [vmem:[#allocation79_spill] sm:$0xff] %v7429_v15  ;;  %v407_v15 = vld [vmem:[%s6823_s23 + $0x14] sm:$0xff] }
 0x12c   : > { %1017 = vrot.lane.b32.xlu1 %v7422_v20, %s6768_s27  ;;  %1015 = vrot.lane.b32.xlu0 %v7425_v28, %s6768_s27 }
 0x12e   : > { %v7441_v4 = vpop.permute.xlu1 %833  ;;  %v7443_v62 = vpop.permute.xlu0 %831 }
 0x12f   : > { %12542 = vst [vmem:[#allocation80_spill] sm:$0xff] %v7441_v4  ;;  %12543 = vst [vmem:[#allocation81_spill] sm:$0xff] %v7443_v62  ;;  %v7458_v62 = vld [vmem:[%s6823_s23 + $0x2c] sm:$0xff]  ;;  %v7461_v4 = vld [vmem:[%s6823_s23 + $0x24] sm:$0xff] }
 0x130   : > { %1021 = vrot.lane.b32.xlu1 %v7436_v12, %s6768_s27  ;;  %1019 = vrot.lane.b32.xlu0 %v7439_v7, %s6768_s27 }
 0x132   : > { %v7451_v27 = vpop.permute.xlu1 %837  ;;  %v7453_v56 = vpop.permute.xlu0 %835 }
 0x133   : > { %12544 = vst [vmem:[#allocation82_spill] sm:$0xff] %v7451_v27  ;;  %12545 = vst [vmem:[#allocation83_spill] sm:$0xff] %v7453_v56  ;;  %v7472_v56 = vld [vmem:[%s6823_s23 + $0x3c] sm:$0xff] }
 0x134   : > { %1097 = vrot.lane.b32.xlu1 %v408_v59, %s6769_s28  ;;  %1095 = vrot.lane.b32.xlu0 %v407_v15, %s6769_s28  ;;  %v7475_v59 = vld [vmem:[%s6823_s23 + $0x34] sm:$0xff] }
 0x136   : > { %v7463_v55 = vpop.permute.xlu1 %841  ;;  %v7465_v57 = vpop.permute.xlu0 %839 }
 0x137   : > { %12546 = vst [vmem:[#allocation84_spill] sm:$0xff] %v7463_v55  ;;  %12547 = vst [vmem:[#allocation85_spill] sm:$0xff] %v7465_v57  ;;  %v7486_v57 = vld [vmem:[%s6823_s23 + $0x4c] sm:$0xff]  ;;  %v7489_v55 = vld [vmem:[%s6823_s23 + $0x44] sm:$0xff] }
 0x138   : > { %1101 = vrot.lane.b32.xlu1 %v7458_v62, %s6769_s28  ;;  %1099 = vrot.lane.b32.xlu0 %v7461_v4, %s6769_s28 }
 0x13a   : > { %v7477_v15 = vpop.permute.xlu1 %845  ;;  %v7479_v27 = vpop.permute.xlu0 %843 }
 0x13b   : > { %12548 = vst [vmem:[#allocation86_spill] sm:$0xff] %v7477_v15  ;;  %12549 = vst [vmem:[#allocation87_spill] sm:$0xff] %v7479_v27  ;;  %v7500_v27 = vld [vmem:[%s6823_s23 + $0x5c] sm:$0xff]  ;;  %v7503_v15 = vld [vmem:[%s6823_s23 + $0x54] sm:$0xff] }
 0x13c   : > { %1105 = vrot.lane.b32.xlu1 %v7472_v56, %s6769_s28  ;;  %1103 = vrot.lane.b32.xlu0 %v7475_v59, %s6769_s28 }
 0x13e   : > { %v7491_v29 = vpop.permute.xlu1 %849  ;;  %v7493_v54 = vpop.permute.xlu0 %847 }
 0x13f   : > { %12550 = vst [vmem:[#allocation88_spill] sm:$0xff] %v7491_v29  ;;  %12551 = vst [vmem:[#allocation89_spill] sm:$0xff] %v7493_v54  ;;  %v7514_v54 = vld [vmem:[%s6823_s23 + $0x6c] sm:$0xff]  ;;  %v7517_v29 = vld [vmem:[%s6823_s23 + $0x64] sm:$0xff] }
 0x140   : > { %1109 = vrot.lane.b32.xlu1 %v7486_v57, %s6769_s28  ;;  %1107 = vrot.lane.b32.xlu0 %v7489_v55, %s6769_s28 }
 0x142   : > { %v7505_v53 = vpop.permute.xlu1 %853  ;;  %v7507_v8 = vpop.permute.xlu0 %851 }
 0x143   : > { %12552 = vst [vmem:[#allocation90_spill] sm:$0xff] %v7505_v53  ;;  %12553 = vst [vmem:[#allocation91_spill] sm:$0xff] %v7507_v8  ;;  %v7528_v8 = vld [vmem:[%s6823_s23 + $0x7c] sm:$0xff]  ;;  %v7531_v53 = vld [vmem:[%s6823_s23 + $0x74] sm:$0xff] }
 0x144   : > { %1113 = vrot.lane.b32.xlu1 %v7500_v27, %s6769_s28  ;;  %1111 = vrot.lane.b32.xlu0 %v7503_v15, %s6769_s28 }
 0x146   : > { %v7519_v31 = vpop.permute.xlu1 %857  ;;  %v7521_v52 = vpop.permute.xlu0 %855 }
 0x147   : > { %12554 = vst [vmem:[#allocation92_spill] sm:$0xff] %v7519_v31  ;;  %12555 = vst [vmem:[#allocation93_spill] sm:$0xff] %v7521_v52  ;;  %v7542_v52 = vld [vmem:[%s6823_s23 + $0x8c] sm:$0xff]  ;;  %v7545_v31 = vld [vmem:[%s6823_s23 + $0x84] sm:$0xff] }
 0x148   : > { %1117 = vrot.lane.b32.xlu1 %v7514_v54, %s6769_s28  ;;  %1115 = vrot.lane.b32.xlu0 %v7517_v29, %s6769_s28 }
 0x14a   : > { %v7533_v51 = vpop.permute.xlu1 %861  ;;  %v7535_v16 = vpop.permute.xlu0 %859 }
 0x14b   : > { %12556 = vst [vmem:[#allocation94_spill] sm:$0xff] %v7533_v51  ;;  %12557 = vst [vmem:[#allocation95_spill] sm:$0xff] %v7535_v16  ;;  %v7556_v16 = vld [vmem:[%s6823_s23 + $0x9c] sm:$0xff]  ;;  %v7559_v51 = vld [vmem:[%s6823_s23 + $0x94] sm:$0xff] }
 0x14c   : > { %1121 = vrot.lane.b32.xlu1 %v7528_v8, %s6769_s28  ;;  %1119 = vrot.lane.b32.xlu0 %v7531_v53, %s6769_s28 }
 0x14e   : > { %v7547_v33 = vpop.permute.xlu1 %865  ;;  %v7549_v50 = vpop.permute.xlu0 %863 }
 0x14f   : > { %12558 = vst [vmem:[#allocation96_spill] sm:$0xff] %v7547_v33  ;;  %12559 = vst [vmem:[#allocation97_spill] sm:$0xff] %v7549_v50  ;;  %v7570_v50 = vld [vmem:[%s6823_s23 + $0xac] sm:$0xff]  ;;  %v7573_v33 = vld [vmem:[%s6823_s23 + $0xa4] sm:$0xff] }
 0x150   : > { %1125 = vrot.lane.b32.xlu1 %v7542_v52, %s6769_s28  ;;  %1123 = vrot.lane.b32.xlu0 %v7545_v31, %s6769_s28 }
 0x152   : > { %v7561_v49 = vpop.permute.xlu1 %869  ;;  %v7563_v58 = vpop.permute.xlu0 %867 }
 0x153   : > { %12560 = vst [vmem:[#allocation98_spill] sm:$0xff] %v7561_v49  ;;  %12561 = vst [vmem:[#allocation99_spill] sm:$0xff] %v7563_v58  ;;  %v7584_v58 = vld [vmem:[%s6823_s23 + $0xbc] sm:$0xff]  ;;  %v7587_v49 = vld [vmem:[%s6823_s23 + $0xb4] sm:$0xff] }
 0x154   : > { %1129 = vrot.lane.b32.xlu1 %v7556_v16, %s6769_s28  ;;  %1127 = vrot.lane.b32.xlu0 %v7559_v51, %s6769_s28 }
 0x156   : > { %v7575_v35 = vpop.permute.xlu1 %873  ;;  %v7577_v48 = vpop.permute.xlu0 %871 }
 0x157   : > { %12562 = vst [vmem:[#allocation100_spill] sm:$0xff] %v7575_v35  ;;  %12563 = vst [vmem:[#allocation101_spill] sm:$0xff] %v7577_v48  ;;  %v7598_v48 = vld [vmem:[%s6823_s23 + $0xcc] sm:$0xff]  ;;  %v7601_v35 = vld [vmem:[%s6823_s23 + $0xc4] sm:$0xff] }
 0x158   : > { %1133 = vrot.lane.b32.xlu1 %v7570_v50, %s6769_s28  ;;  %1131 = vrot.lane.b32.xlu0 %v7573_v33, %s6769_s28 }
 0x15a   : > { %v7589_v47 = vpop.permute.xlu1 %877  ;;  %v7591_v26 = vpop.permute.xlu0 %875 }
 0x15b   : > { %12564 = vst [vmem:[#allocation102_spill] sm:$0xff] %v7589_v47  ;;  %12565 = vst [vmem:[#allocation103_spill] sm:$0xff] %v7591_v26  ;;  %v7612_v26 = vld [vmem:[%s6823_s23 + $0xdc] sm:$0xff]  ;;  %v7615_v47 = vld [vmem:[%s6823_s23 + $0xd4] sm:$0xff] }
 0x15c   : > { %1137 = vrot.lane.b32.xlu1 %v7584_v58, %s6769_s28  ;;  %1135 = vrot.lane.b32.xlu0 %v7587_v49, %s6769_s28 }
 0x15e   : > { %v7603_v36 = vpop.permute.xlu1 %953  ;;  %v7605_v11 = vpop.permute.xlu0 %951 }
 0x15f   : > { %12566 = vst [vmem:[#allocation104_spill] sm:$0xff] %v7603_v36  ;;  %12567 = vst [vmem:[#allocation105_spill] sm:$0xff] %v7605_v11  ;;  %v7626_v11 = vld [vmem:[%s6823_s23 + $0xec] sm:$0xff]  ;;  %v7629_v36 = vld [vmem:[%s6823_s23 + $0xe4] sm:$0xff] }
 0x160   : > { %1141 = vrot.lane.b32.xlu1 %v7598_v48, %s6769_s28  ;;  %1139 = vrot.lane.b32.xlu0 %v7601_v35, %s6769_s28 }
 0x162   : > { %v7617_v25 = vpop.permute.xlu1 %957  ;;  %v7619_v46 = vpop.permute.xlu0 %955 }
 0x163   : > { %12568 = vst [vmem:[#allocation106_spill] sm:$0xff] %v7617_v25  ;;  %12569 = vst [vmem:[#allocation107_spill] sm:$0xff] %v7619_v46  ;;  %v7640_v46 = vld [vmem:[%s6823_s23 + $0xfc] sm:$0xff]  ;;  %v7643_v25 = vld [vmem:[%s6823_s23 + $0xf4] sm:$0xff] }
 0x164   : > { %1145 = vrot.lane.b32.xlu1 %v7612_v26, %s6769_s28  ;;  %1143 = vrot.lane.b32.xlu0 %v7615_v47, %s6769_s28 }
 0x166   : > { %v7631_v45 = vpop.permute.xlu1 %961  ;;  %v7633_v24 = vpop.permute.xlu0 %959 }
 0x167   : > { %12570 = vst [vmem:[#allocation108_spill] sm:$0xff] %v7631_v45  ;;  %12571 = vst [vmem:[#allocation109_spill] sm:$0xff] %v7633_v24  ;;  %v7654_v24 = vld [vmem:[%s6823_s23 + $0x10c] sm:$0xff]  ;;  %v7657_v45 = vld [vmem:[%s6823_s23 + $0x104] sm:$0xff] }
 0x168   : > { %1149 = vrot.lane.b32.xlu1 %v7626_v11, %s6769_s28  ;;  %1147 = vrot.lane.b32.xlu0 %v7629_v36, %s6769_s28 }
 0x16a   : > { %v7645_v23 = vpop.permute.xlu1 %965  ;;  %v7647_v22 = vpop.permute.xlu0 %963 }
 0x16b   : > { %12572 = vst [vmem:[#allocation110_spill] sm:$0xff] %v7645_v23  ;;  %12573 = vst [vmem:[#allocation111_spill] sm:$0xff] %v7647_v22  ;;  %v7668_v22 = vld [vmem:[%s6823_s23 + $0x11c] sm:$0xff]  ;;  %v7671_v23 = vld [vmem:[%s6823_s23 + $0x114] sm:$0xff] }
 0x16c   : > { %1153 = vrot.lane.b32.xlu1 %v7640_v46, %s6769_s28  ;;  %1151 = vrot.lane.b32.xlu0 %v7643_v25, %s6769_s28 }
 0x16e   : > { %v7659_v21 = vpop.permute.xlu1 %969  ;;  %v7661_v18 = vpop.permute.xlu0 %967 }
 0x16f   : > { %12574 = vst [vmem:[#allocation112_spill] sm:$0xff] %v7659_v21  ;;  %12575 = vst [vmem:[#allocation113_spill] sm:$0xff] %v7661_v18  ;;  %v7682_v18 = vld [vmem:[%s6823_s23 + $0x12c] sm:$0xff]  ;;  %v7685_v21 = vld [vmem:[%s6823_s23 + $0x124] sm:$0xff] }
 0x170   : > { %1157 = vrot.lane.b32.xlu1 %v7654_v24, %s6769_s28  ;;  %1155 = vrot.lane.b32.xlu0 %v7657_v45, %s6769_s28 }
 0x172   : > { %v7673_v17 = vpop.permute.xlu1 %973  ;;  %v7675_v14 = vpop.permute.xlu0 %971 }
 0x173   : > { %12576 = vst [vmem:[#allocation114_spill] sm:$0xff] %v7673_v17  ;;  %12577 = vst [vmem:[#allocation115_spill] sm:$0xff] %v7675_v14 }
 0x174   : > { %1161 = vrot.lane.b32.xlu1 %v7668_v22, %s6769_s28  ;;  %1159 = vrot.lane.b32.xlu0 %v7671_v23, %s6769_s28 }
 0x176   : > { %v7687_v13 = vpop.permute.xlu1 %977  ;;  %v7689_v10 = vpop.permute.xlu0 %975 }
 0x177   : > { %12578 = vst [vmem:[#allocation116_spill] sm:$0xff] %v7687_v13  ;;  %12579 = vst [vmem:[#allocation117_spill] sm:$0xff] %v7689_v10 }
 0x178   : > { %1165 = vrot.lane.b32.xlu1 %v7682_v18, %s6769_s28  ;;  %1163 = vrot.lane.b32.xlu0 %v7685_v21, %s6769_s28 }
 0x17a   : > { %v7695_v14 = vpop.permute.xlu1 %981  ;;  %v7697_v17 = vpop.permute.xlu0 %979 }
 0x17b   : > { %12580 = vst [vmem:[#allocation118_spill] sm:$0xff] %v7695_v14  ;;  %12581 = vst [vmem:[#allocation119_spill] sm:$0xff] %v7697_v17 }
 0x17c   : > { %1207 = vrot.lane.b32.xlu1 %v7458_v62, %s6770_s29  ;;  %1205 = vrot.lane.b32.xlu0 %v7461_v4, %s6770_s29 }
 0x17e   : > { %v7703_v13 = vpop.permute.xlu1 %985  ;;  %v7705_v10 = vpop.permute.xlu0 %983 }
 0x17f   : > { %12582 = vst [vmem:[#allocation120_spill] sm:$0xff] %v7703_v13  ;;  %12583 = vst [vmem:[#allocation121_spill] sm:$0xff] %v7705_v10  ;;  %v229_v10 = vld [vmem:[%s12315_s0 + $0x20] sm:$0xff] }
 0x180   : > { %1211 = vrot.lane.b32.xlu1 %v7472_v56, %s6770_s29  ;;  %1209 = vrot.lane.b32.xlu0 %v7475_v59, %s6770_s29 }
 0x182   : > { %v7711_v14 = vpop.permute.xlu1 %989  ;;  %v7713_v17 = vpop.permute.xlu0 %987 }
 0x183   : > { %12584 = vst [vmem:[#allocation122_spill] sm:$0xff] %v7711_v14  ;;  %12585 = vst [vmem:[#allocation123_spill] sm:$0xff] %v7713_v17 }
 0x184   : > { %1215 = vrot.lane.b32.xlu1 %v7486_v57, %s6770_s29  ;;  %1213 = vrot.lane.b32.xlu0 %v7489_v55, %s6770_s29 }
 0x186   : > { %v7719_v62 = vpop.permute.xlu1 %993  ;;  %v7721_v4 = vpop.permute.xlu0 %991 }
 0x187   : > { %12586 = vst [vmem:[#allocation124_spill] sm:$0xff] %v7719_v62  ;;  %12587 = vst [vmem:[#allocation125_spill] sm:$0xff] %v7721_v4  ;;  %v509_v62 = vld [vmem:[%s6823_s23 + $0x106] sm:$0xff] }
 0x188   : > { %1219 = vrot.lane.b32.xlu1 %v7500_v27, %s6770_s29  ;;  %1217 = vrot.lane.b32.xlu0 %v7503_v15, %s6770_s29 }
 0x18a   : > { %v7727_v56 = vpop.permute.xlu1 %997  ;;  %v7729_v59 = vpop.permute.xlu0 %995 }
 0x18b   : > { %12588 = vst [vmem:[#allocation126_spill] sm:$0xff] %v7727_v56  ;;  %12589 = vst [vmem:[#allocation127_spill] sm:$0xff] %v7729_v59  ;;  %v489_v56 = vld [vmem:[%s6823_s23 + $0x66] sm:$0xff] }
 0x18c   : > { %1223 = vrot.lane.b32.xlu1 %v7514_v54, %s6770_s29  ;;  %1221 = vrot.lane.b32.xlu0 %v7517_v29, %s6770_s29 }
 0x18e   : > { %v7735_v55 = vpop.permute.xlu1 %1001  ;;  %v7737_v57 = vpop.permute.xlu0 %999 }
 0x18f   : > { %12590 = vst [vmem:[#allocation128_spill] sm:$0xff] %v7735_v55  ;;  %12591 = vst [vmem:[#allocation129_spill] sm:$0xff] %v7737_v57 }
 0x190   : > { %1227 = vrot.lane.b32.xlu1 %v7528_v8, %s6770_s29  ;;  %1225 = vrot.lane.b32.xlu0 %v7531_v53, %s6770_s29 }
 0x192   : > { %v7743_v27 = vpop.permute.xlu1 %1005  ;;  %v7745_v15 = vpop.permute.xlu0 %1003 }
 0x193   : > { %12592 = vst [vmem:[#allocation130_spill] sm:$0xff] %v7743_v27  ;;  %12593 = vst [vmem:[#allocation131_spill] sm:$0xff] %v7745_v15 }
 0x194   : > { %1231 = vrot.lane.b32.xlu1 %v7542_v52, %s6770_s29  ;;  %1229 = vrot.lane.b32.xlu0 %v7545_v31, %s6770_s29 }
 0x196   : > { %v7751_v29 = vpop.permute.xlu1 %1009  ;;  %v7753_v54 = vpop.permute.xlu0 %1007 }
 0x197   : > { %12594 = vst [vmem:[#allocation132_spill] sm:$0xff] %v7751_v29  ;;  %12595 = vst [vmem:[#allocation133_spill] sm:$0xff] %v7753_v54  ;;  %v451_v29 = vld [vmem:[%s6823_s23 + $0x55] sm:$0xff] }
 0x198   : > { %1235 = vrot.lane.b32.xlu1 %v7556_v16, %s6770_s29  ;;  %1233 = vrot.lane.b32.xlu0 %v7559_v51, %s6770_s29 }
 0x19a   : > { %v7759_v53 = vpop.permute.xlu1 %1013  ;;  %v7761_v8 = vpop.permute.xlu0 %1011 }
 0x19b   : > { %12596 = vst [vmem:[#allocation134_spill] sm:$0xff] %v7759_v53  ;;  %12597 = vst [vmem:[#allocation135_spill] sm:$0xff] %v7761_v8  ;;  %v449_v53 = vld [vmem:[%s6823_s23 + $0x45] sm:$0xff] }
 0x19c   : > { %1239 = vrot.lane.b32.xlu1 %v7570_v50, %s6770_s29  ;;  %1237 = vrot.lane.b32.xlu0 %v7573_v33, %s6770_s29 }
 0x19e   : > { %v7767_v31 = vpop.permute.xlu1 %1017  ;;  %v7769_v52 = vpop.permute.xlu0 %1015 }
 0x19f   : > { %12598 = vst [vmem:[#allocation136_spill] sm:$0xff] %v7767_v31  ;;  %12599 = vst [vmem:[#allocation137_spill] sm:$0xff] %v7769_v52  ;;  %v447_v31 = vld [vmem:[%s6823_s23 + $0x35] sm:$0xff] }
 0x1a0   : > { %1243 = vrot.lane.b32.xlu1 %v7584_v58, %s6770_s29  ;;  %1241 = vrot.lane.b32.xlu0 %v7587_v49, %s6770_s29 }
 0x1a2   : > { %v7775_v51 = vpop.permute.xlu1 %1021  ;;  %v7777_v16 = vpop.permute.xlu0 %1019 }
 0x1a3   : > { %12600 = vst [vmem:[#allocation138_spill] sm:$0xff] %v7775_v51  ;;  %12601 = vst [vmem:[#allocation139_spill] sm:$0xff] %v7777_v16  ;;  %v445_v51 = vld [vmem:[%s6823_s23 + $0x25] sm:$0xff] }
 0x1a4   : > { %1247 = vrot.lane.b32.xlu1 %v7598_v48, %s6770_s29  ;;  %1245 = vrot.lane.b32.xlu0 %v7601_v35, %s6770_s29 }
 0x1a6   : > { %v7783_v33 = vpop.permute.xlu1 %1097  ;;  %v7785_v50 = vpop.permute.xlu0 %1095 }
 0x1a8   : > { %1251 = vrot.lane.b32.xlu1 %v7612_v26, %s6770_s29  ;;  %1249 = vrot.lane.b32.xlu0 %v7615_v47, %s6770_s29 }
 0x1aa   : > { %v7791_v49 = vpop.permute.xlu1 %1101  ;;  %v7793_v58 = vpop.permute.xlu0 %1099 }
 0x1ac   : > { %1255 = vrot.lane.b32.xlu1 %v7626_v11, %s6770_s29  ;;  %1253 = vrot.lane.b32.xlu0 %v7629_v36, %s6770_s29 }
 0x1ae   : > { %v7799_v35 = vpop.permute.xlu1 %1105  ;;  %v7801_v48 = vpop.permute.xlu0 %1103 }
 0x1b0   : > { %1259 = vrot.lane.b32.xlu1 %v7640_v46, %s6770_s29  ;;  %1257 = vrot.lane.b32.xlu0 %v7643_v25, %s6770_s29 }
 0x1b2   : > { %v7807_v26 = vpop.permute.xlu1 %1109  ;;  %v7809_v47 = vpop.permute.xlu0 %1107 }
 0x1b4   : > { %1263 = vrot.lane.b32.xlu1 %v7654_v24, %s6770_s29  ;;  %1261 = vrot.lane.b32.xlu0 %v7657_v45, %s6770_s29  ;;  %v444_v24 = vld [vmem:[%s6823_s23 + $0x13c] sm:$0xff]  ;;  %v443_v45 = vld [vmem:[%s6823_s23 + $0x134] sm:$0xff] }
 0x1b6   : > { %v7815_v36 = vpop.permute.xlu1 %1113  ;;  %v7817_v11 = vpop.permute.xlu0 %1111 }
 0x1b8   : > { %1267 = vrot.lane.b32.xlu1 %v7668_v22, %s6770_s29  ;;  %1265 = vrot.lane.b32.xlu0 %v7671_v23, %s6770_s29  ;;  %v446_v23 = vld [vmem:[%s6823_s23 + $0x2d] sm:$0xff] }
 0x1ba   : > { %v7823_v25 = vpop.permute.xlu1 %1117  ;;  %v7825_v46 = vpop.permute.xlu0 %1115 }
 0x1bc   : > { %1271 = vrot.lane.b32.xlu1 %v7682_v18, %s6770_s29  ;;  %1269 = vrot.lane.b32.xlu0 %v7685_v21, %s6770_s29  ;;  %v448_v21 = vld [vmem:[%s6823_s23 + $0x3d] sm:$0xff] }
 0x1be   : > { %v7833_v16 = vpop.permute.xlu1 %1121  ;;  %v7835_v22 = vpop.permute.xlu0 %1119 }
 0x1bf   : > { %12602 = vst [vmem:[#allocation140_spill] sm:$0xff] %v7833_v16  ;;  %12603 = vst [vmem:[#allocation141_spill] sm:$0xff] %v7835_v22  ;;  %v273_v22 = vld [vmem:[%s6823_s23 + $0x60] sm:$0xff] }
 0x1c0   : > { %1275 = vrot.lane.b32.xlu1 %v444_v24, %s6770_s29  ;;  %1273 = vrot.lane.b32.xlu0 %v443_v45, %s6770_s29  ;;  %v450_v45 = vld [vmem:[%s6823_s23 + $0x4d] sm:$0xff] }
 0x1c2   : > { %v7841_v52 = vpop.permute.xlu1 %1125  ;;  %v7843_v18 = vpop.permute.xlu0 %1123 }
 0x1c3   : > { %12604 = vst [vmem:[#allocation142_spill] sm:$0xff] %v7841_v52  ;;  %12605 = vst [vmem:[#allocation143_spill] sm:$0xff] %v7843_v18 }
 0x1c4   : > { %1351 = vrot.lane.b32.xlu1 %v446_v23, %s6771_s30  ;;  %1349 = vrot.lane.b32.xlu0 %v445_v51, %s6771_s30  ;;  %v452_v51 = vld [vmem:[%s6823_s23 + $0x5d] sm:$0xff] }
 0x1c6   : > { %v7849_v8 = vpop.permute.xlu1 %1129  ;;  %v7851_v24 = vpop.permute.xlu0 %1127 }
 0x1c7   : > { %12606 = vst [vmem:[#allocation144_spill] sm:$0xff] %v7849_v8  ;;  %12607 = vst [vmem:[#allocation145_spill] sm:$0xff] %v7851_v24 }
 0x1c8   : > { %1355 = vrot.lane.b32.xlu1 %v448_v21, %s6771_s30  ;;  %1353 = vrot.lane.b32.xlu0 %v447_v31, %s6771_s30  ;;  %v454_v31 = vld [vmem:[%s6823_s23 + $0x6d] sm:$0xff]  ;;  %v453_v21 = vld [vmem:[%s6823_s23 + $0x65] sm:$0xff] }
 0x1ca   : > { %v7857_v54 = vpop.permute.xlu1 %1133  ;;  %v7859_v23 = vpop.permute.xlu0 %1131 }
 0x1cb   : > { %12608 = vst [vmem:[#allocation146_spill] sm:$0xff] %v7857_v54  ;;  %12609 = vst [vmem:[#allocation147_spill] sm:$0xff] %v7859_v23 }
 0x1cc   : > { %1359 = vrot.lane.b32.xlu1 %v450_v45, %s6771_s30  ;;  %1357 = vrot.lane.b32.xlu0 %v449_v53, %s6771_s30  ;;  %v456_v53 = vld [vmem:[%s6823_s23 + $0x7d] sm:$0xff]  ;;  %v455_v45 = vld [vmem:[%s6823_s23 + $0x75] sm:$0xff] }
 0x1ce   : > { %v7865_v15 = vpop.permute.xlu1 %1137  ;;  %v7867_v27 = vpop.permute.xlu0 %1135 }
 0x1cf   : > { %12610 = vst [vmem:[#allocation148_spill] sm:$0xff] %v7865_v15  ;;  %12611 = vst [vmem:[#allocation149_spill] sm:$0xff] %v7867_v27  ;;  %v507_v15 = vld [vmem:[%s6823_s23 + $0xf6] sm:$0xff] }
 0x1d0   : > { %1363 = vrot.lane.b32.xlu1 %v452_v51, %s6771_s30  ;;  %1361 = vrot.lane.b32.xlu0 %v451_v29, %s6771_s30  ;;  %v7888_v29 = vld [vmem:[%s12319_s4] sm:$0xf] }
 0x1d1   : > { %6696 = vmatprep.subr.msk.mxu1 %vm2011_vm1, %v7888_v29 }
 0x1d2   : > { %v7873_v57 = vpop.permute.xlu1 %1141  ;;  %v7875_v55 = vpop.permute.xlu0 %1139  ;;  %6697 = vmatpush3.msk.msra.mxu1 %vm2011_vm1, %v7888_v29 }
 0x1d3   : > { %12612 = vst [vmem:[#allocation150_spill] sm:$0xff] %v7873_v57  ;;  %12613 = vst [vmem:[#allocation151_spill] sm:$0xff] %v7875_v55  ;;  %6571 = vmatmul.mubr.msk.f32.vlgmr.msra.gmra.mrb[0].mxu1 %vm1601_vm0, %v7313_v42  ;;  %v462_v42 = vld [vmem:[%s6823_s23 + $0xad] sm:$0xff]  ;;  %v487_v55 = vld [vmem:[%s6823_s23 + $0x56] sm:$0xff] }
 0x1d4   : > { %1367 = vrot.lane.b32.xlu1 %v454_v31, %s6771_s30  ;;  %1365 = vrot.lane.b32.xlu0 %v453_v21, %s6771_s30  ;;  %v458_v31 = vld [vmem:[%s6823_s23 + $0x8d] sm:$0xff]  ;;  %v457_v21 = vld [vmem:[%s6823_s23 + $0x85] sm:$0xff] }
 0x1d5   : > { %6573 = vmatprep.mubr.msk.f32.mxu1 %vm1601_vm0, %v7327_v19 }
 0x1d6   : > { %v7881_v59 = vpop.permute.xlu1 %1145  ;;  %v7883_v51 = vpop.permute.xlu0 %1143 }
 0x1d7   : > { %12614 = vst [vmem:[#allocation152_spill] sm:$0xff] %v7881_v59  ;;  %12615 = vst [vmem:[#allocation153_spill] sm:$0xff] %v7883_v51  ;;  %6574 = vmatmul.mubr.msk.f32.gmra.mrb[2].mxu1 %vm1601_vm0, %v7324_v40  ;;  %v464_v40 = vld [vmem:[%s6823_s23 + $0xbd] sm:$0xff] }
 0x1d8   : > { %1371 = vrot.lane.b32.xlu1 %v456_v53, %s6771_s30  ;;  %1369 = vrot.lane.b32.xlu0 %v455_v45, %s6771_s30  ;;  %v460_v53 = vld [vmem:[%s6823_s23 + $0x9d] sm:$0xff]  ;;  %v459_v45 = vld [vmem:[%s6823_s23 + $0x95] sm:$0xff] }
 0x1d9   : > { %6576 = vmatprep.mubr.msk.f32.mxu1 %vm1601_vm0, %v7341_v39 }
 0x1da   : > { %v7896_v59 = vpop.permute.xlu1 %1149  ;;  %v7898_v51 = vpop.permute.xlu0 %1147 }
 0x1db   : > { %12616 = vst [vmem:[#allocation154_spill] sm:$0xff] %v7896_v59  ;;  %12617 = vst [vmem:[#allocation155_spill] sm:$0xff] %v7898_v51  ;;  %6577 = vmatmul.mubr.msk.f32.gmra.mrb[4].mxu1 %vm1601_vm0, %v7338_v63  ;;  %v466_v63 = vld [vmem:[%s6823_s23 + $0xcd] sm:$0xff] }
 0x1dc   : > { %1375 = vrot.lane.b32.xlu1 %v458_v31, %s6771_s30  ;;  %1373 = vrot.lane.b32.xlu0 %v457_v21, %s6771_s30  ;;  %v461_v31 = vld [vmem:[%s6823_s23 + $0xa5] sm:$0xff] }
 0x1dd   : > { %6579 = vmatprep.mubr.msk.f32.mxu1 %vm1601_vm0, %v7355_v44 }
 0x1de   : > { %v7910_v59 = vpop.permute.xlu1 %1153  ;;  %v7912_v51 = vpop.permute.xlu0 %1151 }
 0x1df   : > { %12618 = vst [vmem:[#allocation156_spill] sm:$0xff] %v7910_v59  ;;  %12619 = vst [vmem:[#allocation157_spill] sm:$0xff] %v7912_v51  ;;  %6580 = vmatmul.mubr.msk.f32.gmra.mrb[6].mxu1 %vm1601_vm0, %v7352_v38  ;;  %v468_v38 = vld [vmem:[%s6823_s23 + $0xdd] sm:$0xff]  ;;  %v485_v51 = vld [vmem:[%s6823_s23 + $0x46] sm:$0xff]  ;;  %v6773_v59 = vmov 0  }
 0x1e0   : > { %1379 = vrot.lane.b32.xlu1 %v460_v53, %s6771_s30  ;;  %1377 = vrot.lane.b32.xlu0 %v459_v45, %s6771_s30  ;;  %v463_v53 = vld [vmem:[%s6823_s23 + $0xb5] sm:$0xff] }
 0x1e1   : > { %6582 = vmatprep.mubr.msk.f32.mxu1 %vm1601_vm0, %v7369_v2  ;;  %6723 = vset.pattern.permute.xlu1 %v6773_v59 }
 0x1e2   : > { %v7922_v21 = vpop.permute.xlu1 %1157  ;;  %v7924_v19 = vpop.permute.xlu0 %1155  ;;  %6722 = vset.pattern.permute.xlu0 %v6773_v59  ;;  %v490_v59 = vld [vmem:[%s6823_s23 + $0x6e] sm:$0xff] }
 0x1e3   : > { %12620 = vst [vmem:[#allocation158_spill] sm:$0xff] %v7922_v21  ;;  %12621 = vst [vmem:[#allocation159_spill] sm:$0xff] %v7924_v19  ;;  %6583 = vmatmul.mubr.msk.f32.gmra.mrb[8].mxu1 %vm1601_vm0, %v7366_v37  ;;  %v470_v37 = vld [vmem:[%s6823_s23 + $0xed] sm:$0xff]  ;;  %v483_v19 = vld [vmem:[%s6823_s23 + $0x36] sm:$0xff] }
 0x1e4   : > { %1383 = vrot.lane.b32.xlu1 %v462_v42, %s6771_s30  ;;  %1381 = vrot.lane.b32.xlu0 %v461_v31, %s6771_s30  ;;  %v465_v42 = vld [vmem:[%s6823_s23 + $0xc5] sm:$0xff] }
 0x1e5   : > { %6585 = vmatprep.mubr.msk.f32.mxu1 %vm1601_vm0, %v7383_v34 }
 0x1e6   : > { %v7934_v45 = vpop.permute.xlu1 %1161  ;;  %v7936_v39 = vpop.permute.xlu0 %1159 }
 0x1e7   : > { %12622 = vst [vmem:[#allocation160_spill] sm:$0xff] %v7934_v45  ;;  %12623 = vst [vmem:[#allocation161_spill] sm:$0xff] %v7936_v39  ;;  %6586 = vmatmul.mubr.msk.f32.gmra.mrb[10].mxu1 %vm1601_vm0, %v7380_v41  ;;  %v1897_v41 = vld [vmem:[%s12317_s2] sm:$0xff] }
 0x1e8   : > { %1387 = vrot.lane.b32.xlu1 %v464_v40, %s6771_s30  ;;  %1385 = vrot.lane.b32.xlu0 %v463_v53, %s6771_s30  ;;  %v467_v40 = vld [vmem:[%s6823_s23 + $0xd5] sm:$0xff]  ;;  %v481_v39 = vld [vmem:[%s6823_s23 + $0x26] sm:$0xff] }
 0x1e9   : > { %6588 = vmatprep.mubr.msk.f32.mxu1 %vm1601_vm0, %v7397_v32  ;;  %v1898_v32 = vld [vmem:[%s12317_s2 + $0x8] sm:$0xff] }
 0x1ea   : > { %v7946_v31 = vpop.permute.xlu1 %1165  ;;  %v7948_v44 = vpop.permute.xlu0 %1163 }
 0x1eb   : > { %12624 = vst [vmem:[#allocation162_spill] sm:$0xff] %v7946_v31  ;;  %12625 = vst [vmem:[#allocation163_spill] sm:$0xff] %v7948_v44  ;;  %6589 = vmatmul.mubr.msk.f32.gmra.mrb[12].mxu1 %vm1601_vm0, %v7394_v43  ;;  %v6672_v43 = vpack.c.bf16 %v1898_v32, %v1897_v41  ;;  %v474_v41 = vld [vmem:[%s6823_s23 + $0x10d] sm:$0xff]  ;;  %v473_v32 = vld [vmem:[%s6823_s23 + $0x105] sm:$0xff] }
 0x1ec   : > { %1391 = vrot.lane.b32.xlu1 %v466_v63, %s6771_s30  ;;  %1389 = vrot.lane.b32.xlu0 %v465_v42, %s6771_s30  ;;  %v469_v63 = vld [vmem:[%s6823_s23 + $0xe5] sm:$0xff] }
 0x1ed   : > { %6591 = vmatprep.mubr.msk.f32.mxu1 %vm1601_vm0, %v7411_v30  ;;  %6673 = vmatprep.subr.bf16.mxu0 %v6672_v43  ;;  %v1900_v30 = vld [vmem:[%s12317_s2 + $0x18] sm:$0xff] }
 0x1ee   : > { %v7958_v53 = vpop.permute.xlu1 %1207  ;;  %v7960_v2 = vpop.permute.xlu0 %1205  ;;  %6675 = vmatpush3.bf16.msra.mxu0 %v6672_v43  ;;  %v475_v43 = vld [vmem:[%s6823_s23 + $0x115] sm:$0xff] }
 0x1ef   : > { %6592 = vmatmul.mubr.msk.f32.gmra.mrb[14].mxu1 %vm1601_vm0, %v7408_v3 }
 0x1f0   : > { %1395 = vrot.lane.b32.xlu1 %v468_v38, %s6771_s30  ;;  %1393 = vrot.lane.b32.xlu0 %v467_v40, %s6771_s30  ;;  %v472_v38 = vld [vmem:[%s6823_s23 + $0xfd] sm:$0xff]  ;;  %v471_v40 = vld [vmem:[%s6823_s23 + $0xf5] sm:$0xff] }
 0x1f1   : > { %6594 = vmatprep.mubr.msk.f32.mxu1 %vm1601_vm0, %v7425_v28 }
 0x1f2   : > { %v7970_v42 = vpop.permute.xlu1 %1211  ;;  %v7972_v34 = vpop.permute.xlu0 %1209 }
 0x1f3   : > { %6595 = vmatmul.mubr.msk.f32.gmra.mrb[16].mxu1 %vm1601_vm0, %v7422_v20  ;;  %v1901_v20 = vld [vmem:[%s12317_s2 + $0x20] sm:$0xf] }
 0x1f4   : > { %1399 = vrot.lane.b32.xlu1 %v470_v37, %s6771_s30  ;;  %1397 = vrot.lane.b32.xlu0 %v469_v63, %s6771_s30  ;;  %v1899_v63 = vld [vmem:[%s12317_s2 + $0x10] sm:$0xff] }
 0x1f5   : > { %v6676_v3 = vpack.c.bf16 %v1900_v30, %v1899_v63  ;;  %6597 = vmatprep.mubr.msk.f32.mxu1 %vm1601_vm0, %v7439_v7  ;;  %v478_v7 = vld [vmem:[%s6823_s23 + $0x12d] sm:$0xff]  ;;  %v477_v30 = vld [vmem:[%s6823_s23 + $0x125] sm:$0xff] }
 0x1f6   : > { %v7988_v44 = vpop.permute.xlu1 %1215  ;;  %v7990_v37 = vpop.permute.xlu0 %1213 }
 0x1f7   : > { %6677 = vmatprep.subr.bf16.mxu0 %v6676_v3  ;;  %6598 = vmatmul.mubr.msk.f32.gmra.mrb[18].mxu1 %vm1601_vm0, %v7436_v12  ;;  %v480_v12 = vld [vmem:[%s6823_s23 + $0x13d] sm:$0xff] }
 0x1f8   : > { %1403 = vrot.lane.b32.xlu1 %v472_v38, %s6771_s30  ;;  %1401 = vrot.lane.b32.xlu0 %v471_v40, %s6771_s30  ;;  %v476_v40 = vld [vmem:[%s6823_s23 + $0x11d] sm:$0xff] }
 0x1f9   : > { %6679 = vmatpush3.bf16.msra.mxu0 %v6676_v3  ;;  %v479_v3 = vld [vmem:[%s6823_s23 + $0x135] sm:$0xff] }
 0x1fa   : > { %v8006_v31 = vpop.permute.xlu1 %1219  ;;  %v8008_v38 = vpop.permute.xlu0 %1217  ;;  %6488 = vmatprep.subr.msk.mxu0 %vm2011_vm1, %v1901_v20 }
 0x1fc   : > { %1407 = vrot.lane.b32.xlu1 %v474_v41, %s6771_s30  ;;  %1405 = vrot.lane.b32.xlu0 %v473_v32, %s6771_s30 }
 0x1fd   : > { %6489 = vmatpush3.msk.msra.mxu0 %vm2011_vm1, %v1901_v20  ;;  %v482_v20 = vld [vmem:[%s6823_s23 + $0x2e] sm:$0xff] }
 0x1fe   : > { %v8018_v28 = vpop.permute.xlu1 %1223  ;;  %v8020_v63 = vpop.permute.xlu0 %1221  ;;  %6544 = vmatprep.subr.msk.mxu0 %vm2011_vm1, %v7888_v29 }
 0x200   : > { %1411 = vrot.lane.b32.xlu1 %v476_v40, %s6771_s30  ;;  %1409 = vrot.lane.b32.xlu0 %v475_v43, %s6771_s30 }
 0x202   : > { %v8033_v41 = vpop.permute.xlu1 %1227  ;;  %v8035_v32 = vpop.permute.xlu0 %1225 }
 0x203   : > { %12626 = vst [vmem:[#allocation164_spill] sm:$0xff] %v8035_v32  ;;  %v12681_v32 = vld [vmem:[#allocation9_spill] sm:$0xff] }
 0x204   : > { %1415 = vrot.lane.b32.xlu1 %v478_v7, %s6771_s30  ;;  %1413 = vrot.lane.b32.xlu0 %v477_v30, %s6771_s30  ;;  %v484_v30 = vld [vmem:[%s6823_s23 + $0x3e] sm:$0xff] }
 0x206   : > { %v8043_v40 = vpop.permute.xlu1 %1231  ;;  %v8045_v43 = vpop.permute.xlu0 %1229 }
 0x207   : > { %12627 = vst [vmem:[#allocation165_spill] sm:$0xff] %v8043_v40  ;;  %12628 = vst [vmem:[#allocation166_spill] sm:$0xff] %v8045_v43  ;;  %v271_v43 = vld [vmem:[%s6823_s23 + $0x50] sm:$0xff]  ;;  %v274_v40 = vld [vmem:[%s6823_s23 + $0x68] sm:$0xff] }
 0x208   : > { %1419 = vrot.lane.b32.xlu1 %v480_v12, %s6771_s30  ;;  %1417 = vrot.lane.b32.xlu0 %v479_v3, %s6771_s30  ;;  %v486_v3 = vld [vmem:[%s6823_s23 + $0x4e] sm:$0xff] }
 0x20a   : > { %v8051_v45 = vpop.permute.xlu1 %1235  ;;  %v8053_v7 = vpop.permute.xlu0 %1233 }
 0x20b   : > { %12629 = vst [vmem:[#allocation167_spill] sm:$0xff] %v8051_v45  ;;  %12630 = vst [vmem:[#allocation168_spill] sm:$0xff] %v8053_v7  ;;  %v268_v7 = vld [vmem:[%s6823_s23 + $0x38] sm:$0xff]  ;;  %v267_v45 = vld [vmem:[%s6823_s23 + $0x30] sm:$0xff] }
 0x20c   : > { %1495 = vrot.lane.b32.xlu1 %v482_v20, %s6772_s20  ;;  %1493 = vrot.lane.b32.xlu0 %v481_v39, %s6772_s20 }
 0x20e   : > { %v8059_v21 = vpop.permute.xlu1 %1239  ;;  %v8061_v12 = vpop.permute.xlu0 %1237 }
 0x20f   : > { %12631 = vst [vmem:[#allocation169_spill] sm:$0xff] %v8059_v21  ;;  %12632 = vst [vmem:[#allocation170_spill] sm:$0xff] %v8061_v12 }
 0x210   : > { %1499 = vrot.lane.b32.xlu1 %v484_v30, %s6772_s20  ;;  %1497 = vrot.lane.b32.xlu0 %v483_v19, %s6772_s20  ;;  %v488_v30 = vld [vmem:[%s6823_s23 + $0x5e] sm:$0xff] }
 0x212   : > { %v8067_v39 = vpop.permute.xlu1 %1243  ;;  %v8069_v20 = vpop.permute.xlu0 %1241 }
 0x213   : > { %12633 = vst [vmem:[#allocation171_spill] sm:$0xff] %v8067_v39  ;;  %12634 = vst [vmem:[#allocation172_spill] sm:$0xff] %v8069_v20  ;;  %v511_v39 = vld [vmem:[%s6823_s23 + $0x116] sm:$0xff] }
 0x214   : > { %1503 = vrot.lane.b32.xlu1 %v486_v3, %s6772_s20  ;;  %1501 = vrot.lane.b32.xlu0 %v485_v51, %s6772_s20  ;;  %v492_v51 = vld [vmem:[%s6823_s23 + $0x7e] sm:$0xff] }
 0x216   : > { %v8075_v19 = vpop.permute.xlu1 %1247  ;;  %v8077_v57 = vpop.permute.xlu0 %1245 }
 0x217   : > { %12635 = vst [vmem:[#allocation173_spill] sm:$0xff] %v8075_v19  ;;  %12636 = vst [vmem:[#allocation174_spill] sm:$0xff] %v8077_v57  ;;  %v491_v19 = vld [vmem:[%s6823_s23 + $0x76] sm:$0xff] }
 0x218   : > { %1507 = vrot.lane.b32.xlu1 %v488_v30, %s6772_s20  ;;  %1505 = vrot.lane.b32.xlu0 %v487_v55, %s6772_s20  ;;  %v494_v55 = vld [vmem:[%s6823_s23 + $0x8e] sm:$0xff] }
 0x21a   : > { %v8083_v27 = vpop.permute.xlu1 %1251  ;;  %v8085_v3 = vpop.permute.xlu0 %1249 }
 0x21b   : > { %12637 = vst [vmem:[#allocation175_spill] sm:$0xff] %v8083_v27  ;;  %12638 = vst [vmem:[#allocation176_spill] sm:$0xff] %v8085_v3  ;;  %v493_v27 = vld [vmem:[%s6823_s23 + $0x86] sm:$0xff] }
 0x21c   : > { %1511 = vrot.lane.b32.xlu1 %v490_v59, %s6772_s20  ;;  %1509 = vrot.lane.b32.xlu0 %v489_v56, %s6772_s20  ;;  %v496_v56 = vld [vmem:[%s6823_s23 + $0x9e] sm:$0xff] }
 0x21e   : > { %v8091_v57 = vpop.permute.xlu1 %1255  ;;  %v8093_v30 = vpop.permute.xlu0 %1253 }
 0x21f   : > { %12639 = vst [vmem:[#allocation177_spill] sm:$0xff] %v8091_v57  ;;  %12640 = vst [vmem:[#allocation178_spill] sm:$0xff] %v8093_v30  ;;  %v495_v57 = vld [vmem:[%s6823_s23 + $0x96] sm:$0xff] }
 0x220   : > { %1515 = vrot.lane.b32.xlu1 %v492_v51, %s6772_s20  ;;  %1513 = vrot.lane.b32.xlu0 %v491_v19, %s6772_s20  ;;  %v498_v19 = vld [vmem:[%s6823_s23 + $0xae] sm:$0xff] }
 0x222   : > { %v8099_v3 = vpop.permute.xlu1 %1259  ;;  %v8101_v59 = vpop.permute.xlu0 %1257 }
 0x223   : > { %12641 = vst [vmem:[#allocation179_spill] sm:$0xff] %v8099_v3  ;;  %12642 = vst [vmem:[#allocation180_spill] sm:$0xff] %v8101_v59  ;;  %v497_v3 = vld [vmem:[%s6823_s23 + $0xa6] sm:$0xff] }
 0x224   : > { %1519 = vrot.lane.b32.xlu1 %v494_v55, %s6772_s20  ;;  %1517 = vrot.lane.b32.xlu0 %v493_v27, %s6772_s20  ;;  %v500_v27 = vld [vmem:[%s6823_s23 + $0xbe] sm:$0xff] }
 0x226   : > { %v8107_v30 = vpop.permute.xlu1 %1263  ;;  %v8109_v51 = vpop.permute.xlu0 %1261 }
 0x227   : > { %12643 = vst [vmem:[#allocation181_spill] sm:$0xff] %v8107_v30  ;;  %12644 = vst [vmem:[#allocation182_spill] sm:$0xff] %v8109_v51  ;;  %v499_v30 = vld [vmem:[%s6823_s23 + $0xb6] sm:$0xff] }
 0x228   : > { %1523 = vrot.lane.b32.xlu1 %v496_v56, %s6772_s20  ;;  %1521 = vrot.lane.b32.xlu0 %v495_v57, %s6772_s20  ;;  %v502_v57 = vld [vmem:[%s6823_s23 + $0xce] sm:$0xff] }
 0x22a   : > { %v8115_v59 = vpop.permute.xlu1 %1267  ;;  %v8117_v55 = vpop.permute.xlu0 %1265 }
 0x22b   : > { %12645 = vst [vmem:[#allocation183_spill] sm:$0xff] %v8115_v59  ;;  %12646 = vst [vmem:[#allocation184_spill] sm:$0xff] %v8117_v55  ;;  %v501_v59 = vld [vmem:[%s6823_s23 + $0xc6] sm:$0xff] }
 0x22c   : > { %1527 = vrot.lane.b32.xlu1 %v498_v19, %s6772_s20  ;;  %1525 = vrot.lane.b32.xlu0 %v497_v3, %s6772_s20  ;;  %v504_v3 = vld [vmem:[%s6823_s23 + $0xde] sm:$0xff] }
 0x22e   : > { %v8123_v51 = vpop.permute.xlu1 %1271  ;;  %v8125_v56 = vpop.permute.xlu0 %1269 }
 0x22f   : > { %12647 = vst [vmem:[#allocation185_spill] sm:$0xff] %v8123_v51  ;;  %12648 = vst [vmem:[#allocation186_spill] sm:$0xff] %v8125_v56  ;;  %v503_v51 = vld [vmem:[%s6823_s23 + $0xd6] sm:$0xff] }
 0x230   : > { %1531 = vrot.lane.b32.xlu1 %v500_v27, %s6772_s20  ;;  %1529 = vrot.lane.b32.xlu0 %v499_v30, %s6772_s20  ;;  %v506_v30 = vld [vmem:[%s6823_s23 + $0xee] sm:$0xff] }
 0x232   : > { %v8131_v55 = vpop.permute.xlu1 %1275  ;;  %v8133_v19 = vpop.permute.xlu0 %1273 }
 0x233   : > { %12649 = vst [vmem:[#allocation187_spill] sm:$0xff] %v8131_v55  ;;  %12650 = vst [vmem:[#allocation188_spill] sm:$0xff] %v8133_v19  ;;  %v505_v55 = vld [vmem:[%s6823_s23 + $0xe6] sm:$0xff] }
 0x234   : > { %1535 = vrot.lane.b32.xlu1 %v502_v57, %s6772_s20  ;;  %1533 = vrot.lane.b32.xlu0 %v501_v59, %s6772_s20  ;;  %v508_v59 = vld [vmem:[%s6823_s23 + $0xfe] sm:$0xff] }
 0x236   : > { %v8139_v56 = vpop.permute.xlu1 %1351  ;;  %v8141_v27 = vpop.permute.xlu0 %1349 }
 0x238   : > { %1539 = vrot.lane.b32.xlu1 %v504_v3, %s6772_s20  ;;  %1537 = vrot.lane.b32.xlu0 %v503_v51, %s6772_s20  ;;  %v510_v51 = vld [vmem:[%s6823_s23 + $0x10e] sm:$0xff] }
 0x23a   : > { %v8147_v19 = vpop.permute.xlu1 %1355  ;;  %v8149_v57 = vpop.permute.xlu0 %1353 }
 0x23c   : > { %1543 = vrot.lane.b32.xlu1 %v506_v30, %s6772_s20  ;;  %1541 = vrot.lane.b32.xlu0 %v505_v55, %s6772_s20  ;;  %v512_v55 = vld [vmem:[%s6823_s23 + $0x11e] sm:$0xff] }
 0x23e   : > { %v8155_v4 = vpop.permute.xlu1 %1359  ;;  %v8157_v3 = vpop.permute.xlu0 %1357 }
 0x240   : > { %1547 = vrot.lane.b32.xlu1 %v508_v59, %s6772_s20  ;;  %1545 = vrot.lane.b32.xlu0 %v507_v15, %s6772_s20  ;;  %v514_v15 = vld [vmem:[%s6823_s23 + $0x12e] sm:$0xff]  ;;  %v513_v59 = vld [vmem:[%s6823_s23 + $0x126] sm:$0xff] }
 0x242   : > { %v8163_v20 = vpop.permute.xlu1 %1363  ;;  %v8165_v30 = vpop.permute.xlu0 %1361 }
 0x244   : > { %1551 = vrot.lane.b32.xlu1 %v510_v51, %s6772_s20  ;;  %1549 = vrot.lane.b32.xlu0 %v509_v62, %s6772_s20  ;;  %v516_v62 = vld [vmem:[%s6823_s23 + $0x13e] sm:$0xff]  ;;  %v515_v51 = vld [vmem:[%s6823_s23 + $0x136] sm:$0xff] }
 0x246   : > { %v8171_v23 = vpop.permute.xlu1 %1367  ;;  %v8173_v54 = vpop.permute.xlu0 %1365 }
 0x248   : > { %1555 = vrot.lane.b32.xlu1 %v512_v55, %s6772_s20  ;;  %1553 = vrot.lane.b32.xlu0 %v511_v39, %s6772_s20  ;;  %v226_v39 = vld [vmem:[%s12315_s0 + $0x8] sm:$0xff]  ;;  %v225_v55 = vld [vmem:[%s12315_s0] sm:$0xff] }
 0x24a   : > { %v8179_v17 = vpop.permute.xlu1 %1371  ;;  %v8181_v14 = vpop.permute.xlu0 %1369 }
 0x24b   : > { %12651 = vst [vmem:[#allocation189_spill] sm:$0xff] %v8179_v17  ;;  %12652 = vst [vmem:[#allocation190_spill] sm:$0xff] %v8181_v14  ;;  %v243_v14 = vld [vmem:[%s12315_s0 + $0x90] sm:$0xff]  ;;  %v278_v17 = vld [vmem:[%s6823_s23 + $0x88] sm:$0xff] }
 0x24c   : > { %1559 = vrot.lane.b32.xlu1 %v514_v15, %s6772_s20  ;;  %1557 = vrot.lane.b32.xlu0 %v513_v59, %s6772_s20 }
 0x24e   : > { %v8187_v12 = vpop.permute.xlu1 %1375  ;;  %v8189_v21 = vpop.permute.xlu0 %1373 }
 0x24f   : > { %12653 = vst [vmem:[#allocation191_spill] sm:$0xff] %v8187_v12  ;;  %12654 = vst [vmem:[#allocation192_spill] sm:$0xff] %v8189_v21  ;;  %v269_v21 = vld [vmem:[%s6823_s23 + $0x40] sm:$0xff] }
 0x250   : > { %1563 = vrot.lane.b32.xlu1 %v516_v62, %s6772_s20  ;;  %1561 = vrot.lane.b32.xlu0 %v515_v51, %s6772_s20  ;;  %v227_v62 = vld [vmem:[%s12315_s0 + $0x10] sm:$0xff]  ;;  %v228_v51 = vld [vmem:[%s12315_s0 + $0x18] sm:$0xff] }
 0x252   : > { %v8199_v15 = vpop.permute.xlu1 %1379  ;;  %v8201_v59 = vpop.permute.xlu0 %1377 }
 0x253   : > { %12655 = vst [vmem:[#allocation193_spill] sm:$0xff] %v8199_v15  ;;  %12656 = vst [vmem:[#allocation194_spill] sm:$0xff] %v8201_v59  ;;  %v266_v59 = vld [vmem:[%s6823_s23 + $0x28] sm:$0xff]  ;;  %v241_v15 = vld [vmem:[%s12315_s0 + $0x80] sm:$0xff] }
 0x254   : > { %2267 = vperm.xlu1 %6723, %v226_v39   ;;  %2262 = vperm.xlu0 %6722, %v225_v55   ;;  %v230_v39 = vld [vmem:[%s12315_s0 + $0x28] sm:$0xff] }
 0x256   : > { %v8209_v24 = vpop.permute.xlu1 %1383  ;;  %v8211_v8 = vpop.permute.xlu0 %1381 }
 0x257   : > { %12657 = vst [vmem:[#allocation195_spill] sm:$0xff] %v8209_v24  ;;  %12658 = vst [vmem:[#allocation196_spill] sm:$0xff] %v8211_v8  ;;  %v231_v8 = vld [vmem:[%s12315_s0 + $0x30] sm:$0xff] }
 0x258   : > { %2272 = vperm.xlu1 %6723, %v227_v62   ;;  %2277 = vperm.xlu0 %6722, %v228_v51   ;;  %v232_v62 = vld [vmem:[%s12315_s0 + $0x38] sm:$0xff] }
 0x25a   : > { %v8219_v55 = vpop.permute.xlu1 %1387  ;;  %v8221_v13 = vpop.permute.xlu0 %1385 }
 0x25b   : > { %12659 = vst [vmem:[#allocation197_spill] sm:$0xff] %v8219_v55  ;;  %12660 = vst [vmem:[#allocation198_spill] sm:$0xff] %v8221_v13  ;;  %v233_v13 = vld [vmem:[%s12315_s0 + $0x40] sm:$0xff] }
 0x25c   : > { %2282 = vperm.xlu1 %6723, %v229_v10   ;;  %2287 = vperm.xlu0 %6722, %v230_v39   ;;  %v234_v10 = vld [vmem:[%s12315_s0 + $0x48] sm:$0xff] }
 0x25e   : > { %v8229_v51 = vpop.permute.xlu1 %1391  ;;  %v8231_v24 = vpop.permute.xlu0 %1389 }
 0x25f   : > { %12661 = vst [vmem:[#allocation199_spill] sm:$0xff] %v8229_v51  ;;  %12662 = vst [vmem:[#allocation200_spill] sm:$0xff] %v8231_v24  ;;  %v235_v24 = vld [vmem:[%s12315_s0 + $0x50] sm:$0xff] }
 0x260   : > { %2292 = vperm.xlu1 %6723, %v231_v8   ;;  %2297 = vperm.xlu0 %6722, %v232_v62   ;;  %v236_v8 = vld [vmem:[%s12315_s0 + $0x58] sm:$0xff] }
 0x262   : > { %v8239_v39 = vpop.permute.xlu1 %1395  ;;  %v8241_v55 = vpop.permute.xlu0 %1393 }
 0x263   : > { %12663 = vst [vmem:[#allocation201_spill] sm:$0xff] %v8239_v39  ;;  %12664 = vst [vmem:[#allocation202_spill] sm:$0xff] %v8241_v55 }
 0x264   : > { %2302 = vperm.xlu1 %6723, %v233_v13   ;;  %2307 = vperm.xlu0 %6722, %v234_v10   ;;  %v237_v13 = vld [vmem:[%s12315_s0 + $0x60] sm:$0xff]  ;;  %v238_v10 = vld [vmem:[%s12315_s0 + $0x68] sm:$0xff] }
 0x266   : > { %v8249_v62 = vpop.permute.xlu1 %1399  ;;  %v8251_v51 = vpop.permute.xlu0 %1397 }
 0x267   : > { %12665 = vst [vmem:[#allocation203_spill] sm:$0xff] %v8249_v62  ;;  %12666 = vst [vmem:[#allocation204_spill] sm:$0xff] %v8251_v51 }
 0x268   : > { %2312 = vperm.xlu1 %6723, %v235_v24   ;;  %2317 = vperm.xlu0 %6722, %v236_v8   ;;  %v239_v24 = vld [vmem:[%s12315_s0 + $0x70] sm:$0xff]  ;;  %v240_v8 = vld [vmem:[%s12315_s0 + $0x78] sm:$0xff] }
 0x26a   : > { %v8259_v55 = vpop.permute.xlu1 %1403  ;;  %v8261_v39 = vpop.permute.xlu0 %1401 }
 0x26b   : > { %12667 = vst [vmem:[#allocation205_spill] sm:$0xff] %v8259_v55  ;;  %12668 = vst [vmem:[#allocation206_spill] sm:$0xff] %v8261_v39  ;;  %v263_v39 = vld [vmem:[%s6823_s23 + $0x10] sm:$0xff]  ;;  %v264_v55 = vld [vmem:[%s6823_s23 + $0x18] sm:$0xff] }
 0x26c   : > { %2322 = vperm.xlu1 %6723, %v237_v13   ;;  %2327 = vperm.xlu0 %6722, %v238_v10   ;;  %v261_v13 = vld [vmem:[%s6823_s23] sm:$0xff]  ;;  %v262_v10 = vld [vmem:[%s6823_s23 + $0x8] sm:$0xff]  ;;  %v1604_v12 = vsel %vm1601_vm0, %v263_v39, %v7007_v60  ;;  %v1607_v60 = vsel %vm1601_vm0, %v266_v59, %v7040_v5  ;;  %v276_v39 = vld [vmem:[%s6823_s23 + $0x78] sm:$0xff] }
 0x26d   : > { %v1602_v16 = vsel %vm1601_vm0, %v261_v13, %v7009_v61  ;;  %v275_v59 = vld [vmem:[%s6823_s23 + $0x70] sm:$0xff]  ;;  %v12676_v13 = vld [vmem:[#allocation4_spill] sm:$0xff] }
 0x26e   : > { %v8269_v51 = vpop.permute.xlu1 %1407  ;;  %v8271_v62 = vpop.permute.xlu0 %1405 }
 0x26f   : > { %12669 = vst [vmem:[#allocation207_spill] sm:$0xff] %v8269_v51  ;;  %12670 = vst [vmem:[#allocation208_spill] sm:$0xff] %v8271_v62  ;;  %v242_v62 = vld [vmem:[%s12315_s0 + $0x88] sm:$0xff]  ;;  %v265_v51 = vld [vmem:[%s6823_s23 + $0x20] sm:$0xff] }
 0x270   : > { %2332 = vperm.xlu1 %6723, %v239_v24   ;;  %2337 = vperm.xlu0 %6722, %v240_v8   ;;  %v270_v24 = vld [vmem:[%s6823_s23 + $0x48] sm:$0xff]  ;;  %v272_v8 = vld [vmem:[%s6823_s23 + $0x58] sm:$0xff]  ;;  %v8316_v61 = vsel %vm1601_vm0, %v265_v51, %v7042_v6 }
 0x271   : > { %v12677_v6 = vld [vmem:[#allocation5_spill] sm:$0xff] }
 0x272   : > { %v8287_v18 = vpop.permute.xlu1 %1411  ;;  %v8289_v52 = vpop.permute.xlu0 %1409  ;;  %v8337_v51 = vsel %vm1601_vm0, %v269_v21, %v12677_v6  ;;  %v277_v6 = vld [vmem:[%s6823_s23 + $0x80] sm:$0xff] }
 0x273   : > { %12671 = vst [vmem:[#allocation209_spill] sm:$0xff] %v8287_v18  ;;  %12672 = vst [vmem:[#allocation210_spill] sm:$0xff] %v8289_v52  ;;  %v1605_v18 = vsel %vm1601_vm0, %v264_v55, %v7021_v0  ;;  %v1603_v52 = vsel %vm1601_vm0, %v262_v10, %v7023_v1  ;;  %v8320_v0 = vsel %vm1601_vm0, %v268_v7, %v7054_v9  ;;  %v12673_v1 = vld [vmem:[#allocation3_spill] sm:$0xff]  ;;  %v12678_v9 = vld [vmem:[#allocation6_spill] sm:$0xff] }
 0x274   : > { %2342 = vperm.xlu1 %6723, %v241_v15   ;;  %2347 = vperm.xlu0 %6722, %v242_v62   ;;  %v244_v15 = vld [vmem:[%s12315_s0 + $0x98] sm:$0xff]  ;;  %v8324_v5 = vsel %vm1601_vm0, %v267_v45, %v12673_v1  ;;  %v8333_v10 = vsel %vm1601_vm0, %v270_v24, %v12676_v13  ;;  %v8341_v7 = vsel %vm1601_vm0, %v272_v8, %v12678_v9  ;;  %v12682_v13 = vld [vmem:[#allocation10_spill] sm:$0xff]  ;;  %v12686_v9 = vld [vmem:[#allocation32_spill] sm:$0xff] }
 0x275   : > { %v12679_v45 = vld [vmem:[#allocation7_spill] sm:$0xff]  ;;  %v8354_v24 = vsel %vm1601_vm0, %v273_v22, %v12681_v32  ;;  %v8358_v21 = vsel %vm1601_vm0, %v276_v39, %v12682_v13  ;;  %v245_v22 = vld [vmem:[%s12315_s0 + $0xa0] sm:$0xff] }
 0x276   : > { %v8327_v55 = vpop.permute.xlu1 %1415  ;;  %v8329_v62 = vpop.permute.xlu0 %1413  ;;  %v8345_v1 = vsel %vm1601_vm0, %v271_v43, %v12679_v45  ;;  %12683 = vst [vmem:[#allocation4_spill] sm:$0xff] %v8358_v21  ;;  %v12684_v8 = vld [vmem:[#allocation11_spill] sm:$0xff]  ;;  %v12688_v32 = vld [vmem:[#allocation12_spill] sm:$0xff] }
 0x277   : > { %12674 = vst [vmem:[#allocation3_spill] sm:$0xff] %v8327_v55  ;;  %12675 = vst [vmem:[#allocation211_spill] sm:$0xff] %v8329_v62  ;;  %v12680_v55 = vld [vmem:[#allocation8_spill] sm:$0xff]  ;;  %v8363_v43 = vsel %vm1601_vm0, %v275_v59, %v12684_v8  ;;  %v8377_v39 = vsel %vm1601_vm0, %v278_v17, %v12688_v32  ;;  %v12693_v17 = vld [vmem:[#allocation105_spill] sm:$0xff] }
 0x278   : > { %v8350_v62 = vsel %vm1601_vm0, %v274_v40, %v12680_v55  ;;  %2352 = vperm.xlu1 %6723, %v243_v14   ;;  %2357 = vperm.xlu0 %6722, %v244_v15   ;;  %12685 = vst [vmem:[#allocation5_spill] sm:$0xff] %v8363_v43  ;;  %v1640_v40 = vsel %vm12430_vm2, %v1603_v52, %v12686_v9  ;;  %v12687_v55 = vld [vmem:[#allocation33_spill] sm:$0xff]  ;;  %v12689_v15 = vld [vmem:[#allocation68_spill] sm:$0xff] }
 0x279   : > { %v1639_v45 = vsel %vm12430_vm2, %v1602_v16, %v12687_v55  ;;  %v246_v14 = vld [vmem:[%s12315_s0 + $0xa8] sm:$0xff]  ;;  %v1677_v59 = vsel %vm1675_vm3, %v1640_v40, %v12689_v15  ;;  %v12692_v43 = vld [vmem:[#allocation104_spill] sm:$0xff]  ;;  %v12694_v40 = vld [vmem:[#allocation34_spill] sm:$0xff] }
 0x27a   : > { %v12690_v52 = vld [vmem:[#allocation69_spill] sm:$0xff]  ;;  %v8383_v16 = vpop.permute.xlu1 %1419  ;;  %v8385_v8 = vpop.permute.xlu0 %1417  ;;  %v1714_v21 = vsel %vm12429_vm4, %v1677_v59, %v12692_v43  ;;  %v1642_v15 = vsel %vm12430_vm2, %v1605_v18, %v12694_v40  ;;  %v12696_v18 = vld [vmem:[#allocation70_spill] sm:$0xff]  ;;  %v12699_v40 = vld [vmem:[#allocation107_spill] sm:$0xff] }
 0x27b   : > { %v1676_v13 = vsel %vm1675_vm3, %v1639_v45, %v12690_v52  ;;  %v12691_v9 = vld [vmem:[#allocation13_spill] sm:$0xff]  ;;  %v1751_v45 = vsel %vm1749_vm5, %v1714_v21, %v7783_v33  ;;  %v247_v33 = vld [vmem:[%s12315_s0 + $0xb0] sm:$0xff]  ;;  %v12697_v21 = vld [vmem:[#allocation71_spill] sm:$0xff] }
 0x27c   : > { %v8389_v55 = vsel %vm1601_vm0, %v277_v6, %v12691_v9  ;;  %v1713_v32 = vsel %vm12429_vm4, %v1676_v13, %v12693_v17  ;;  %2362 = vperm.xlu1 %6723, %v245_v22   ;;  %2367 = vperm.xlu0 %6722, %v246_v14   ;;  %v12695_v6 = vld [vmem:[#allocation35_spill] sm:$0xff]  ;;  %v1788_v43 = vsel %vm12428_vm6, %v1751_v45, %v7958_v53  ;;  %v12698_v17 = vld [vmem:[#allocation106_spill] sm:$0xff] }
 0x27d   : > { %v1750_v52 = vsel %vm1749_vm5, %v1713_v32, %v7785_v50  ;;  %v1641_v9 = vsel %vm12430_vm2, %v1604_v12, %v12695_v6  ;;  %v1679_v50 = vsel %vm1675_vm3, %v1642_v15, %v12696_v18  ;;  %v1825_v12 = vsel %vm1823_vm7, %v1788_v43, %v8139_v56  ;;  %v12700_v56 = vld [vmem:[#allocation36_spill] sm:$0xff]  ;;  %v12701_v43 = vld [vmem:[#allocation37_spill] sm:$0xff] }
 0x27e   : > { %v1787_v59 = vsel %vm12428_vm6, %v1750_v52, %v7960_v2  ;;  %v1678_v22 = vsel %vm1675_vm3, %v1641_v9, %v12697_v21  ;;  %v1496_v14 = vpop.permute.xlu1 %1495  ;;  %v1494_v13 = vpop.permute.xlu0 %1493  ;;  %v248_v2 = vld [vmem:[%s12315_s0 + $0xb8] sm:$0xff]  ;;  %v1716_v32 = vsel %vm12429_vm4, %v1679_v50, %v12698_v17  ;;  %v1644_v6 = vsel %vm12430_vm2, %v1607_v60, %v12700_v56 }
 0x27f   : > { %v1824_v53 = vsel %vm1823_vm7, %v1787_v59, %v8141_v27  ;;  %v1715_v15 = vsel %vm12429_vm4, %v1678_v22, %v12699_v40  ;;  %v1862_v45 = vsel %vm12427_vm8, %v1825_v12, %v1496_v14  ;;  %v1753_v27 = vsel %vm1749_vm5, %v1716_v32, %v7791_v49  ;;  %v249_v49 = vld [vmem:[%s12315_s0 + $0xc0] sm:$0xff]  ;;  %v250_v12 = vld [vmem:[%s12315_s0 + $0xc8] sm:$0xff] }
 0x280   : > { %v1861_v52 = vsel %vm12427_vm8, %v1824_v53, %v1494_v13  ;;  %v1752_v9 = vsel %vm1749_vm5, %v1715_v15, %v7793_v58  ;;  %2372 = vperm.xlu1 %6723, %v247_v33   ;;  %v1643_v59 = vsel %vm12430_vm2, %v8316_v61, %v12701_v43  ;;  %v1790_v18 = vsel %vm12428_vm6, %v1753_v27, %v7970_v42  ;;  %v12702_v58 = vld [vmem:[#allocation72_spill] sm:$0xff]  ;;  %v12703_v33 = vld [vmem:[#allocation73_spill] sm:$0xff]  ;;  %v12707_v15 = vld [vmem:[#allocation39_spill] sm:$0xff] }
 0x281   : > { %6490 = vmatprep.mubr.msk.f32.mxu0 %vm1902_vm9, %v1861_v52  ;;  %v1789_v50 = vsel %vm12428_vm6, %v1752_v9, %v7972_v34  ;;  %2377 = vperm.xlu0 %6722, %v248_v2   ;;  %v1681_v60 = vsel %vm1675_vm3, %v1644_v6, %v12702_v58  ;;  %v1680_v21 = vsel %vm1675_vm3, %v1643_v59, %v12703_v33  ;;  %v12704_v53 = vld [vmem:[#allocation108_spill] sm:$0xff]  ;;  %v12705_v13 = vld [vmem:[#allocation109_spill] sm:$0xff]  ;;  %v12709_v6 = vld [vmem:[#allocation75_spill] sm:$0xff] }
 0x282   : > { %6491 = vmatmul.mubr.msk.f32.vlgmr.msra.gmra.mrb[0].mxu0 %vm1902_vm9, %v1862_v45  ;;  %v1827_v61 = vsel %vm1823_vm7, %v1790_v18, %v8147_v19  ;;  %v1826_v42 = vsel %vm1823_vm7, %v1789_v50, %v8149_v57  ;;  %v1500_v34 = vpop.permute.xlu1 %1499  ;;  %v1498_v22 = vpop.permute.xlu0 %1497  ;;  %v1718_v14 = vsel %vm12429_vm4, %v1681_v60, %v12704_v53  ;;  %v1717_v2 = vsel %vm12429_vm4, %v1680_v21, %v12705_v13  ;;  %v12706_v57 = vld [vmem:[#allocation38_spill] sm:$0xff]  ;;  %v252_v43 = vld [vmem:[%s12315_s0 + $0xd8] sm:$0xff]  ;;  %v254_v13 = vld [vmem:[%s12315_s0 + $0xe8] sm:$0xff] }
 0x283   : > { %6545 = vmatpush3.msk.msra.mxu0 %vm2011_vm1, %v7888_v29  ;;  %v1864_v19 = vsel %vm12427_vm8, %v1827_v61, %v1500_v34  ;;  %v1863_v17 = vsel %vm12427_vm8, %v1826_v42, %v1498_v22  ;;  %v1646_v32 = vsel %vm12430_vm2, %v8320_v0, %v12706_v57  ;;  %v1755_v40 = vsel %vm1749_vm5, %v1718_v14, %v7799_v35  ;;  %v251_v35 = vld [vmem:[%s12315_s0 + $0xd0] sm:$0xff]  ;;  %v12711_v50 = vld [vmem:[#allocation111_spill] sm:$0xff]  ;;  %v12713_v61 = vld [vmem:[#allocation41_spill] sm:$0xff] }
 0x284   : > { %v1754_v29 = vsel %vm1749_vm5, %v1717_v2, %v7801_v48  ;;  %6493 = vmatprep.mubr.msk.f32.mxu0 %vm1902_vm9, %v1863_v17  ;;  %2382 = vperm.xlu1 %6723, %v249_v49   ;;  %v1645_v45 = vsel %vm12430_vm2, %v8324_v5, %v12707_v15  ;;  %v1792_v52 = vsel %vm12428_vm6, %v1755_v40, %v7988_v44  ;;  %v12708_v48 = vld [vmem:[#allocation74_spill] sm:$0xff]  ;;  %v12716_v2 = vld [vmem:[#allocation112_spill] sm:$0xff]  ;;  %v12717_v17 = vld [vmem:[#allocation113_spill] sm:$0xff] }
 0x285   : > { %v1791_v56 = vsel %vm12428_vm6, %v1754_v29, %v7990_v37  ;;  %2387 = vperm.xlu0 %6722, %v250_v12   ;;  %v1683_v0 = vsel %vm1675_vm3, %v1646_v32, %v12708_v48  ;;  %v1682_v27 = vsel %vm1675_vm3, %v1645_v45, %v12709_v6  ;;  %v1829_v5 = vsel %vm1823_vm7, %v1792_v52, %v8155_v4  ;;  %v12710_v59 = vld [vmem:[#allocation110_spill] sm:$0xff]  ;;  %v12712_v4 = vld [vmem:[#allocation40_spill] sm:$0xff]  ;;  %v12715_v12 = vld [vmem:[#allocation77_spill] sm:$0xff] }
 0x286   : > { %6494 = vmatmul.mubr.msk.f32.gmra.mrb[2].mxu0 %vm1902_vm9, %v1864_v19  ;;  %v1828_v44 = vsel %vm1823_vm7, %v1791_v56, %v8157_v3  ;;  %v1504_v37 = vpop.permute.xlu1 %1503  ;;  %v1502_v9 = vpop.permute.xlu0 %1501  ;;  %v1720_v18 = vsel %vm12429_vm4, %v1683_v0, %v12710_v59  ;;  %v1719_v49 = vsel %vm12429_vm4, %v1682_v27, %v12711_v50  ;;  %v1648_v3 = vsel %vm12430_vm2, %v8333_v10, %v12712_v4  ;;  %v12719_v45 = vld [vmem:[#allocation43_spill] sm:$0xff]  ;;  %v12726_v4 = vld [vmem:[#allocation164_spill] sm:$0xff] }
 0x287   : > { %v1866_v58 = vsel %vm12427_vm8, %v1829_v5, %v1504_v37  ;;  %v1865_v60 = vsel %vm12427_vm8, %v1828_v44, %v1502_v9  ;;  %v1757_v33 = vsel %vm1749_vm5, %v1720_v18, %v7807_v26  ;;  %v1756_v21 = vsel %vm1749_vm5, %v1719_v49, %v7809_v47  ;;  %v253_v26 = vld [vmem:[%s12315_s0 + $0xe0] sm:$0xff]  ;;  %v12721_v48 = vld [vmem:[#allocation79_spill] sm:$0xff]  ;;  %v12722_v5 = vld [vmem:[#allocation114_spill] sm:$0xff] }
 0x288   : > { %6496 = vmatprep.mubr.msk.f32.mxu0 %vm1902_vm9, %v1865_v60  ;;  %2392 = vperm.xlu1 %6723, %v251_v35   ;;  %v1647_v42 = vsel %vm12430_vm2, %v8337_v51, %v12713_v61  ;;  %v1794_v34 = vsel %vm12428_vm6, %v1757_v33, %v8006_v31  ;;  %v1793_v22 = vsel %vm12428_vm6, %v1756_v21, %v8008_v38  ;;  %v12714_v47 = vld [vmem:[#allocation76_spill] sm:$0xff]  ;;  %v256_v27 = vld [vmem:[%s12315_s0 + $0xf8] sm:$0xff]  ;;  %v12725_v49 = vld [vmem:[#allocation45_spill] sm:$0xff] }
 0x289   : > { %2397 = vperm.xlu0 %6722, %v252_v43   ;;  %v1685_v10 = vsel %vm1675_vm3, %v1648_v3, %v12714_v47  ;;  %v1684_v53 = vsel %vm1675_vm3, %v1647_v42, %v12715_v12  ;;  %v1831_v51 = vsel %vm1823_vm7, %v1794_v34, %v8163_v20  ;;  %v1830_v31 = vsel %vm1823_vm7, %v1793_v22, %v8165_v30  ;;  %v12718_v20 = vld [vmem:[#allocation42_spill] sm:$0xff]  ;;  %v12723_v37 = vld [vmem:[#allocation115_spill] sm:$0xff]  ;;  %v12728_v33 = vld [vmem:[#allocation81_spill] sm:$0xff] }
 0x28a   : > { %6497 = vmatmul.mubr.msk.f32.gmra.mrb[4].mxu0 %vm1902_vm9, %v1866_v58  ;;  %v1508_v38 = vpop.permute.xlu1 %1507  ;;  %v1506_v14 = vpop.permute.xlu0 %1505  ;;  %v1722_v19 = vsel %vm12429_vm4, %v1685_v10, %v12716_v2  ;;  %v1721_v57 = vsel %vm12429_vm4, %v1684_v53, %v12717_v17  ;;  %v1650_v30 = vsel %vm12430_vm2, %v8341_v7, %v12718_v20  ;;  %v1649_v52 = vsel %vm12430_vm2, %v8345_v1, %v12719_v45  ;;  %v12731_v47 = vld [vmem:[#allocation116_spill] sm:$0xff]  ;;  %v12732_v12 = vld [vmem:[#allocation117_spill] sm:$0xff] }
 0x28b   : > { %v1868_v32 = vsel %vm12427_vm8, %v1831_v51, %v1508_v38  ;;  %v1867_v40 = vsel %vm12427_vm8, %v1830_v31, %v1506_v14  ;;  %v1759_v29 = vsel %vm1749_vm5, %v1722_v19, %v7815_v36  ;;  %v1758_v15 = vsel %vm1749_vm5, %v1721_v57, %v7817_v11  ;;  %v255_v36 = vld [vmem:[%s12315_s0 + $0xf0] sm:$0xff]  ;;  %v12734_v14 = vld [vmem:[#allocation4_spill] sm:$0xff]  ;;  %v12736_v17 = vld [vmem:[#allocation141_spill] sm:$0xff] }
 0x28c   : > { %6499 = vmatprep.mubr.msk.f32.mxu0 %vm1902_vm9, %v1867_v40  ;;  %2402 = vperm.xlu1 %6723, %v253_v26   ;;  %v1796_v56 = vsel %vm12428_vm6, %v1759_v29, %v8018_v28  ;;  %v1795_v35 = vsel %vm12428_vm6, %v1758_v15, %v8020_v63  ;;  %v12720_v11 = vld [vmem:[#allocation78_spill] sm:$0xff]  ;;  %v1686_v0 = vsel %vm1675_vm3, %v1649_v52, %v12721_v48  ;;  %v258_v26 = vld [vmem:[%s12315_s0 + $0x108] sm:$0xff]  ;;  %v12735_v2 = vld [vmem:[#allocation140_spill] sm:$0xff] }
 0x28d   : > { %2407 = vperm.xlu0 %6722, %v254_v13   ;;  %v1687_v7 = vsel %vm1675_vm3, %v1650_v30, %v12720_v11  ;;  %v1833_v1 = vsel %vm1823_vm7, %v1796_v56, %v8171_v23  ;;  %v1832_v28 = vsel %vm1823_vm7, %v1795_v35, %v8173_v54  ;;  %v1723_v9 = vsel %vm12429_vm4, %v1686_v0, %v12723_v37  ;;  %v12724_v23 = vld [vmem:[#allocation44_spill] sm:$0xff]  ;;  %v12733_v38 = vld [vmem:[#allocation46_spill] sm:$0xff]  ;;  %v12738_v40 = vld [vmem:[#allocation5_spill] sm:$0xff] }
 0x28e   : > { %6500 = vmatmul.mubr.msk.f32.gmra.mrb[6].mxu0 %vm1902_vm9, %v1868_v32  ;;  %v1512_v63 = vpop.permute.xlu1 %1511  ;;  %v1510_v6 = vpop.permute.xlu0 %1509  ;;  %v1724_v44 = vsel %vm12429_vm4, %v1687_v7, %v12722_v5  ;;  %v1652_v54 = vsel %vm12430_vm2, %v8350_v62, %v12724_v23  ;;  %v1760_v50 = vsel %vm1749_vm5, %v1723_v9, %v7825_v46  ;;  %v1651_v58 = vsel %vm12430_vm2, %v8354_v24, %v12725_v49  ;;  %v12727_v46 = vld [vmem:[#allocation80_spill] sm:$0xff]  ;;  %v12729_v24 = vld [vmem:[#allocation189_spill] sm:$0xff]  ;;  %v12737_v32 = vld [vmem:[#allocation47_spill] sm:$0xff] }
 0x28f   : > { %v1870_v43 = vsel %vm12427_vm8, %v1833_v1, %v1512_v63  ;;  %v1869_v59 = vsel %vm12427_vm8, %v1832_v28, %v1510_v6  ;;  %v1761_v18 = vsel %vm1749_vm5, %v1724_v44, %v7823_v25  ;;  %v1797_v3 = vsel %vm12428_vm6, %v1760_v50, %v12726_v4  ;;  %v257_v25 = vld [vmem:[%s12315_s0 + $0x100] sm:$0xff]  ;;  %v12739_v30 = vld [vmem:[#allocation165_spill] sm:$0xff]  ;;  %v12740_v15 = vld [vmem:[#allocation166_spill] sm:$0xff] }
 0x290   : > { %6502 = vmatprep.mubr.msk.f32.mxu0 %vm1902_vm9, %v1869_v59  ;;  %2412 = vperm.xlu1 %6723, %v255_v36   ;;  %v1798_v60 = vsel %vm12428_vm6, %v1761_v18, %v8033_v41  ;;  %v1689_v62 = vsel %vm1675_vm3, %v1652_v54, %v12727_v46  ;;  %v1688_v21 = vsel %vm1675_vm3, %v1651_v58, %v12728_v33  ;;  %v12730_v41 = vld [vmem:[#allocation190_spill] sm:$0xff]  ;;  %v12742_v36 = vld [vmem:[#allocation83_spill] sm:$0xff]  ;;  %v12744_v0 = vld [vmem:[#allocation192_spill] sm:$0xff] }
 0x291   : > { %2417 = vperm.xlu0 %6722, %v256_v27   ;;  %v1835_v61 = vsel %vm1823_vm7, %v1798_v60, %v12729_v24  ;;  %v1834_v42 = vsel %vm1823_vm7, %v1797_v3, %v12730_v41  ;;  %v1726_v10 = vsel %vm12429_vm4, %v1689_v62, %v12731_v47  ;;  %v1725_v53 = vsel %vm12429_vm4, %v1688_v21, %v12732_v12  ;;  %v259_v52 = vld [vmem:[%s12315_s0 + $0x110] sm:$0xff]  ;;  %v12743_v7 = vld [vmem:[#allocation191_spill] sm:$0xff]  ;;  %v12747_v59 = vld [vmem:[#allocation48_spill] sm:$0xff] }
 0x292   : > { %6503 = vmatmul.mubr.msk.f32.gmra.mrb[8].mxu0 %vm1902_vm9, %v1870_v43  ;;  %v1516_v34 = vpop.permute.xlu1 %1515  ;;  %v1514_v22 = vpop.permute.xlu0 %1513  ;;  %v1654_v13 = vsel %vm12430_vm2, %v12734_v14, %v12733_v38  ;;  %v1763_v19 = vsel %vm1749_vm5, %v1726_v10, %v12735_v2  ;;  %v1762_v57 = vsel %vm1749_vm5, %v1725_v53, %v12736_v17  ;;  %v1653_v20 = vsel %vm12430_vm2, %v12738_v40, %v12737_v32  ;;  %v12741_v56 = vld [vmem:[#allocation82_spill] sm:$0xff]  ;;  %v260_v6 = vld [vmem:[%s12315_s0 + $0x118] sm:$0xff]  ;;  %v12750_v4 = vld [vmem:[#allocation49_spill] sm:$0xff] }
 0x293   : > { %v1872_v51 = vsel %vm12427_vm8, %v1835_v61, %v1516_v34  ;;  %v1871_v31 = vsel %vm12427_vm8, %v1834_v42, %v1514_v22  ;;  %v1800_v29 = vsel %vm12428_vm6, %v1763_v19, %v12739_v30  ;;  %v1799_v45 = vsel %vm12428_vm6, %v1762_v57, %v12740_v15  ;;  %v12745_v27 = vld [vmem:[#allocation118_spill] sm:$0xff]  ;;  %v12746_v44 = vld [vmem:[#allocation119_spill] sm:$0xff]  ;;  %v12752_v62 = vld [vmem:[#allocation168_spill] sm:$0xff] }
 0x294   : > { %6505 = vmatprep.mubr.msk.f32.mxu0 %vm1902_vm9, %v1871_v31  ;;  %2422 = vperm.xlu1 %6723, %v257_v25   ;;  %v1691_v35 = vsel %vm1675_vm3, %v1654_v13, %v12741_v56  ;;  %v1690_v11 = vsel %vm1675_vm3, %v1653_v20, %v12742_v36  ;;  %v1837_v48 = vsel %vm1823_vm7, %v1800_v29, %v12743_v7  ;;  %v12748_v54 = vld [vmem:[#allocation142_spill] sm:$0xff]  ;;  %v12749_v50 = vld [vmem:[#allocation143_spill] sm:$0xff]  ;;  %v12753_v33 = vld [vmem:[#allocation84_spill] sm:$0xff] }
 0x295   : > { %2427 = vperm.xlu0 %6722, %v258_v26   ;;  %v1836_v1 = vsel %vm1823_vm7, %v1799_v45, %v12744_v0  ;;  %v1728_v5 = vsel %vm12429_vm4, %v1691_v35, %v12745_v27  ;;  %v1727_v37 = vsel %vm12429_vm4, %v1690_v11, %v12746_v44  ;;  %v1656_v23 = vsel %vm12430_vm2, %v8377_v39, %v12747_v59  ;;  %v280_v58 = vld [vmem:[%s6823_s23 + $0x98] sm:$0xff]  ;;  %v279_v60 = vld [vmem:[%s6823_s23 + $0x90] sm:$0xff]  ;;  %v12754_v24 = vld [vmem:[#allocation85_spill] sm:$0xff] }
 0x296   : > { %6506 = vmatmul.mubr.msk.f32.gmra.mrb[10].mxu0 %vm1902_vm9, %v1872_v51  ;;  %v1520_v28 = vpop.permute.xlu1 %1519  ;;  %v1518_v63 = vpop.permute.xlu0 %1517  ;;  %v1765_v18 = vsel %vm1749_vm5, %v1728_v5, %v12748_v54  ;;  %v1764_v49 = vsel %vm1749_vm5, %v1727_v37, %v12749_v50  ;;  %v1655_v3 = vsel %vm12430_vm2, %v8389_v55, %v12750_v4  ;;  %v12751_v25 = vld [vmem:[#allocation167_spill] sm:$0xff]  ;;  %v1693_v21 = vsel %vm1675_vm3, %v1656_v23, %v12753_v33  ;;  %v12755_v41 = vld [vmem:[#allocation193_spill] sm:$0xff]  ;;  %v12756_v42 = vld [vmem:[#allocation194_spill] sm:$0xff] }
 0x297   : > { %v1874_v9 = vsel %vm12427_vm8, %v1837_v48, %v1520_v28  ;;  %v1873_v43 = vsel %vm12427_vm8, %v1836_v1, %v1518_v63  ;;  %v1802_v46 = vsel %vm12428_vm6, %v1765_v18, %v12751_v25  ;;  %v1801_v39 = vsel %vm12428_vm6, %v1764_v49, %v12752_v62  ;;  %v12757_v47 = vld [vmem:[#allocation120_spill] sm:$0xff]  ;;  %v12758_v12 = vld [vmem:[#allocation121_spill] sm:$0xff]  ;;  %v12759_v38 = vld [vmem:[#allocation14_spill] sm:$0xff] }
 0x298   : > { %6508 = vmatprep.mubr.msk.f32.mxu0 %vm1902_vm9, %v1873_v43  ;;  %2432 = vperm.xlu1 %6723, %v259_v52   ;;  %v1692_v61 = vsel %vm1675_vm3, %v1655_v3, %v12754_v24  ;;  %v1839_v55 = vsel %vm1823_vm7, %v1802_v46, %v12755_v41  ;;  %v1838_v34 = vsel %vm1823_vm7, %v1801_v39, %v12756_v42  ;;  %v12760_v13 = vld [vmem:[#allocation15_spill] sm:$0xff]  ;;  %v12761_v19 = vld [vmem:[#allocation144_spill] sm:$0xff]  ;;  %v12762_v57 = vld [vmem:[#allocation145_spill] sm:$0xff] }
 0x299   : > { %2437 = vperm.xlu0 %6722, %v260_v6   ;;  %v1730_v10 = vsel %vm12429_vm4, %v1693_v21, %v12757_v47  ;;  %v1729_v53 = vsel %vm12429_vm4, %v1692_v61, %v12758_v12  ;;  %v1621_v14 = vsel %vm1601_vm0, %v280_v58, %v12759_v38  ;;  %v1620_v2 = vsel %vm1601_vm0, %v279_v60, %v12760_v13  ;;  %v282_v40 = vld [vmem:[%s6823_s23 + $0xa8] sm:$0xff]  ;;  %v281_v20 = vld [vmem:[%s6823_s23 + $0xa0] sm:$0xff]  ;;  %v12763_v30 = vld [vmem:[#allocation50_spill] sm:$0xff] }
 0x29a   : > { %6509 = vmatmul.mubr.msk.f32.gmra.mrb[12].mxu0 %vm1902_vm9, %v1874_v9  ;;  %v1524_v22 = vpop.permute.xlu1 %1523  ;;  %v1522_v26 = vpop.permute.xlu0 %1521  ;;  %v1767_v17 = vsel %vm1749_vm5, %v1730_v10, %v12761_v19  ;;  %v1766_v32 = vsel %vm1749_vm5, %v1729_v53, %v12762_v57  ;;  %v1658_v29 = vsel %vm12430_vm2, %v1621_v14, %v12763_v30  ;;  %v12764_v15 = vld [vmem:[#allocation51_spill] sm:$0xff]  ;;  %v12765_v52 = vld [vmem:[#allocation169_spill] sm:$0xff]  ;;  %v12766_v35 = vld [vmem:[#allocation170_spill] sm:$0xff] }
 0x29b   : > { %v1876_v51 = vsel %vm12427_vm8, %v1839_v55, %v1524_v22  ;;  %v1875_v31 = vsel %vm12427_vm8, %v1838_v34, %v1522_v26  ;;  %v1657_v45 = vsel %vm12430_vm2, %v1620_v2, %v12764_v15  ;;  %v1804_v56 = vsel %vm12428_vm6, %v1767_v17, %v12765_v52  ;;  %v12767_v11 = vld [vmem:[#allocation86_spill] sm:$0xff]  ;;  %v12768_v48 = vld [vmem:[#allocation87_spill] sm:$0xff]  ;;  %v12770_v63 = vld [vmem:[#allocation196_spill] sm:$0xff] }
 0x29c   : > { %6511 = vmatprep.mubr.msk.f32.mxu0 %vm1902_vm9, %v1875_v31  ;;  %v1803_v36 = vsel %vm12428_vm6, %v1766_v32, %v12766_v35  ;;  %v1695_v7 = vsel %vm1675_vm3, %v1658_v29, %v12767_v11  ;;  %v1694_v0 = vsel %vm1675_vm3, %v1657_v45, %v12768_v48  ;;  %v12769_v1 = vld [vmem:[#allocation195_spill] sm:$0xff]  ;;  %v12771_v44 = vld [vmem:[#allocation122_spill] sm:$0xff]  ;;  %v12773_v54 = vld [vmem:[#allocation16_spill] sm:$0xff] }
 0x29d   : > { %v1841_v28 = vsel %vm1823_vm7, %v1804_v56, %v12769_v1  ;;  %v1840_v6 = vsel %vm1823_vm7, %v1803_v36, %v12770_v63  ;;  %v1732_v37 = vsel %vm12429_vm4, %v1695_v7, %v12771_v44  ;;  %v12772_v9 = vld [vmem:[#allocation123_spill] sm:$0xff]  ;;  %v1623_v18 = vsel %vm1601_vm0, %v282_v40, %v12773_v54  ;;  %v12774_v50 = vld [vmem:[#allocation17_spill] sm:$0xff]  ;;  %v12775_v58 = vld [vmem:[#allocation146_spill] sm:$0xff] }
 0x29e   : > { %6512 = vmatmul.mubr.msk.f32.gmra.mrb[14].mxu0 %vm1902_vm9, %v1876_v51  ;;  %v1528_v27 = vpop.permute.xlu1 %1527  ;;  %v1526_v5 = vpop.permute.xlu0 %1525  ;;  %v1731_v43 = vsel %vm12429_vm4, %v1694_v0, %v12772_v9  ;;  %v1622_v49 = vsel %vm1601_vm0, %v281_v20, %v12774_v50  ;;  %v1769_v60 = vsel %vm1749_vm5, %v1732_v37, %v12775_v58  ;;  %v12776_v4 = vld [vmem:[#allocation147_spill] sm:$0xff]  ;;  %v283_v46 = vld [vmem:[%s6823_s23 + $0xb0] sm:$0xff]  ;;  %v12777_v62 = vld [vmem:[#allocation52_spill] sm:$0xff] }
 0x29f   : > { %v1878_v59 = vsel %vm12427_vm8, %v1841_v28, %v1528_v27  ;;  %v1877_v23 = vsel %vm12427_vm8, %v1840_v6, %v1526_v5  ;;  %v1768_v3 = vsel %vm1749_vm5, %v1731_v43, %v12776_v4  ;;  %v284_v25 = vld [vmem:[%s6823_s23 + $0xb8] sm:$0xff]  ;;  %v1660_v39 = vsel %vm12430_vm2, %v1623_v18, %v12777_v62  ;;  %v12778_v33 = vld [vmem:[#allocation53_spill] sm:$0xff]  ;;  %v12780_v41 = vld [vmem:[#allocation172_spill] sm:$0xff] }
 0x2a0   : > { %6514 = vmatprep.mubr.msk.f32.mxu0 %vm1902_vm9, %v1877_v23  ;;  %v1659_v21 = vsel %vm12430_vm2, %v1622_v49, %v12778_v33  ;;  %v12779_v24 = vld [vmem:[#allocation171_spill] sm:$0xff]  ;;  %v1805_v55 = vsel %vm12428_vm6, %v1768_v3, %v12780_v41  ;;  %v12781_v42 = vld [vmem:[#allocation88_spill] sm:$0xff]  ;;  %v12782_v22 = vld [vmem:[#allocation89_spill] sm:$0xff] }
 0x2a1   : > { %v1806_v61 = vsel %vm12428_vm6, %v1769_v60, %v12779_v24  ;;  %v1697_v34 = vsel %vm1675_vm3, %v1660_v39, %v12781_v42  ;;  %v1696_v26 = vsel %vm1675_vm3, %v1659_v21, %v12782_v22  ;;  %v12783_v47 = vld [vmem:[#allocation197_spill] sm:$0xff]  ;;  %v12784_v12 = vld [vmem:[#allocation198_spill] sm:$0xff]  ;;  %v12785_v38 = vld [vmem:[#allocation124_spill] sm:$0xff] }
 0x2a2   : > { %6515 = vmatmul.mubr.msk.f32.gmra.mrb[16].mxu0 %vm1902_vm9, %v1878_v59  ;;  %v1843_v10 = vsel %vm1823_vm7, %v1806_v61, %v12783_v47  ;;  %v1842_v53 = vsel %vm1823_vm7, %v1805_v55, %v12784_v12  ;;  %v1532_v51 = vpop.permute.xlu1 %1531  ;;  %v1530_v31 = vpop.permute.xlu0 %1529  ;;  %v1734_v14 = vsel %vm12429_vm4, %v1697_v34, %v12785_v38  ;;  %v12786_v13 = vld [vmem:[#allocation125_spill] sm:$0xff]  ;;  %v12787_v57 = vld [vmem:[#allocation18_spill] sm:$0xff]  ;;  %v12788_v40 = vld [vmem:[#allocation19_spill] sm:$0xff] }
 0x2a3   : > { %v1733_v2 = vsel %vm12429_vm4, %v1696_v26, %v12786_v13  ;;  %v1880_v19 = vsel %vm12427_vm8, %v1843_v10, %v1532_v51  ;;  %v1879_v17 = vsel %vm12427_vm8, %v1842_v53, %v1530_v31  ;;  %v1625_v32 = vsel %vm1601_vm0, %v284_v25, %v12787_v57  ;;  %v12789_v30 = vld [vmem:[#allocation148_spill] sm:$0xff]  ;;  %v12790_v15 = vld [vmem:[#allocation149_spill] sm:$0xff]  ;;  %v12791_v35 = vld [vmem:[#allocation54_spill] sm:$0xff] }
 0x2a4   : > { %v1624_v20 = vsel %vm1601_vm0, %v283_v46, %v12788_v40  ;;  %v1771_v29 = vsel %vm1749_vm5, %v1734_v14, %v12789_v30  ;;  %v1770_v45 = vsel %vm1749_vm5, %v1733_v2, %v12790_v15  ;;  %6517 = vmatprep.mubr.msk.f32.mxu0 %vm1902_vm9, %v1879_v17  ;;  %v286_v52 = vld [vmem:[%s6823_s23 + $0xc8] sm:$0xff]  ;;  %v285_v56 = vld [vmem:[%s6823_s23 + $0xc0] sm:$0xff]  ;;  %v1662_v36 = vsel %vm12430_vm2, %v1625_v32, %v12791_v35  ;;  %v12792_v11 = vld [vmem:[#allocation55_spill] sm:$0xff] }
 0x2a5   : > { %v1661_v7 = vsel %vm12430_vm2, %v1624_v20, %v12792_v11  ;;  %v12793_v48 = vld [vmem:[#allocation173_spill] sm:$0xff]  ;;  %v12794_v1 = vld [vmem:[#allocation174_spill] sm:$0xff]  ;;  %v12796_v27 = vld [vmem:[#allocation91_spill] sm:$0xff] }
 0x2a6   : > { %v1808_v0 = vsel %vm12428_vm6, %v1771_v29, %v12793_v48  ;;  %v1807_v28 = vsel %vm12428_vm6, %v1770_v45, %v12794_v1  ;;  %6518 = vmatmul.mubr.msk.f32.gmra.mrb[18].mxu0 %vm1902_vm9, %v1880_v19  ;;  %v12795_v63 = vld [vmem:[#allocation90_spill] sm:$0xff]  ;;  %v1698_v5 = vsel %vm1675_vm3, %v1661_v7, %v12796_v27  ;;  %v12797_v44 = vld [vmem:[#allocation199_spill] sm:$0xff]  ;;  %v12798_v9 = vld [vmem:[#allocation200_spill] sm:$0xff]  ;;  %v1536_v59 = vpop.permute.xlu1 %1535  ;;  %v1534_v23 = vpop.permute.xlu0 %1533 }
 0x2a7   : > { %v1699_v6 = vsel %vm1675_vm3, %v1662_v36, %v12795_v63  ;;  %v1845_v37 = vsel %vm1823_vm7, %v1808_v0, %v12797_v44  ;;  %v1844_v43 = vsel %vm1823_vm7, %v1807_v28, %v12798_v9  ;;  %v12799_v54 = vld [vmem:[#allocation126_spill] sm:$0xff]  ;;  %v12800_v50 = vld [vmem:[#allocation127_spill] sm:$0xff]  ;;  %v12801_v4 = vld [vmem:[#allocation20_spill] sm:$0xff] }
 0x2a8   : > { %v1736_v18 = vsel %vm12429_vm4, %v1699_v6, %v12799_v54  ;;  %v1735_v49 = vsel %vm12429_vm4, %v1698_v5, %v12800_v50  ;;  %v1882_v58 = vsel %vm12427_vm8, %v1845_v37, %v1536_v59  ;;  %v1881_v60 = vsel %vm12427_vm8, %v1844_v43, %v1534_v23  ;;  %v12802_v25 = vld [vmem:[#allocation21_spill] sm:$0xff]  ;;  %v12803_v62 = vld [vmem:[#allocation150_spill] sm:$0xff]  ;;  %v12804_v33 = vld [vmem:[#allocation151_spill] sm:$0xff] }
 0x2a9   : > { %v1627_v3 = vsel %vm1601_vm0, %v286_v52, %v12801_v4  ;;  %v1626_v46 = vsel %vm1601_vm0, %v285_v56, %v12802_v25  ;;  %v1773_v39 = vsel %vm1749_vm5, %v1736_v18, %v12803_v62  ;;  %v1772_v21 = vsel %vm1749_vm5, %v1735_v49, %v12804_v33  ;;  %6520 = vmatprep.mubr.msk.f32.mxu0 %vm1902_vm9, %v1881_v60  ;;  %v288_v24 = vld [vmem:[%s6823_s23 + $0xd8] sm:$0xff]  ;;  %v287_v61 = vld [vmem:[%s6823_s23 + $0xd0] sm:$0xff]  ;;  %v12805_v41 = vld [vmem:[#allocation56_spill] sm:$0xff]  ;;  %v8846_v33 = vpop.f32.mrb[0].mxu1 }
 0x2aa   : > { %v1664_v55 = vsel %vm12430_vm2, %v1627_v3, %v12805_v41  ;;  %v12806_v42 = vld [vmem:[#allocation57_spill] sm:$0xff]  ;;  %v12807_v22 = vld [vmem:[#allocation175_spill] sm:$0xff]  ;;  %v12808_v47 = vld [vmem:[#allocation176_spill] sm:$0xff]  ;;  %6521 = vmatmul.mubr.msk.f32.gmra.mrb[20].mxu0 %vm1902_vm9, %v1882_v58  ;;  %v1540_v19 = vpop.permute.xlu1 %1539  ;;  %v1538_v17 = vpop.permute.xlu0 %1537  ;;  %12829 = vst [vmem:[#allocation6_spill] sm:$0xff] %v8846_v33 }
 0x2ab   : > { %v1663_v34 = vsel %vm12430_vm2, %v1626_v46, %v12806_v42  ;;  %v1810_v26 = vsel %vm12428_vm6, %v1773_v39, %v12807_v22  ;;  %v1809_v10 = vsel %vm12428_vm6, %v1772_v21, %v12808_v47  ;;  %v12809_v12 = vld [vmem:[#allocation92_spill] sm:$0xff]  ;;  %v12810_v51 = vld [vmem:[#allocation93_spill] sm:$0xff]  ;;  %v12812_v13 = vld [vmem:[#allocation202_spill] sm:$0xff] }
 0x2ac   : > { %v1701_v53 = vsel %vm1675_vm3, %v1664_v55, %v12809_v12  ;;  %v1700_v31 = vsel %vm1675_vm3, %v1663_v34, %v12810_v51  ;;  %v12811_v38 = vld [vmem:[#allocation201_spill] sm:$0xff]  ;;  %v1846_v2 = vsel %vm1823_vm7, %v1809_v10, %v12812_v13  ;;  %v12813_v57 = vld [vmem:[#allocation128_spill] sm:$0xff]  ;;  %v12815_v15 = vld [vmem:[#allocation22_spill] sm:$0xff] }
 0x2ad   : > { %v1847_v14 = vsel %vm1823_vm7, %v1810_v26, %v12811_v38  ;;  %v1738_v32 = vsel %vm12429_vm4, %v1701_v53, %v12813_v57  ;;  %v12814_v40 = vld [vmem:[#allocation129_spill] sm:$0xff]  ;;  %v1883_v29 = vsel %vm12427_vm8, %v1846_v2, %v1538_v17  ;;  %v1629_v45 = vsel %vm1601_vm0, %v288_v24, %v12815_v15  ;;  %v12816_v52 = vld [vmem:[#allocation23_spill] sm:$0xff]  ;;  %v12817_v35 = vld [vmem:[#allocation152_spill] sm:$0xff]  ;;  %v8857_v26 = vpop.f32.mrb[1].mxu1 }
 0x2ae   : > { %v1737_v20 = vsel %vm12429_vm4, %v1700_v31, %v12814_v40  ;;  %v1884_v30 = vsel %vm12427_vm8, %v1847_v14, %v1540_v19  ;;  %v1628_v56 = vsel %vm1601_vm0, %v287_v61, %v12816_v52  ;;  %v1775_v36 = vsel %vm1749_vm5, %v1738_v32, %v12817_v35  ;;  %v12818_v11 = vld [vmem:[#allocation153_spill] sm:$0xff]  ;;  %6523 = vmatprep.mubr.msk.f32.mxu0 %vm1902_vm9, %v1883_v29  ;;  %v289_v0 = vld [vmem:[%s6823_s23 + $0xe0] sm:$0xff]  ;;  %v12819_v1 = vld [vmem:[#allocation58_spill] sm:$0xff]  ;;  %v1544_v58 = vpop.permute.xlu1 %1543  ;;  %v1542_v60 = vpop.permute.xlu0 %1541 }
 0x2af   : > { %v1774_v7 = vsel %vm1749_vm5, %v1737_v20, %v12818_v11  ;;  %v290_v48 = vld [vmem:[%s6823_s23 + $0xe8] sm:$0xff]  ;;  %v1666_v28 = vsel %vm12430_vm2, %v1629_v45, %v12819_v1  ;;  %v12820_v63 = vld [vmem:[#allocation59_spill] sm:$0xff]  ;;  %v12822_v44 = vld [vmem:[#allocation178_spill] sm:$0xff]  ;;  %6524 = vmatmul.mubr.msk.f32.gmra.mrb[22].mxu0 %vm1902_vm9, %v1884_v30  ;;  %12834 = vst [vmem:[#allocation7_spill] sm:$0xff] %v8857_v26 }
 0x2b0   : > { %v1665_v6 = vsel %vm12430_vm2, %v1628_v56, %v12820_v63  ;;  %v12821_v27 = vld [vmem:[#allocation177_spill] sm:$0xff]  ;;  %v1811_v37 = vsel %vm12428_vm6, %v1774_v7, %v12822_v44  ;;  %v12823_v9 = vld [vmem:[#allocation94_spill] sm:$0xff]  ;;  %v12824_v59 = vld [vmem:[#allocation95_spill] sm:$0xff] }
 0x2b1   : > { %v1812_v5 = vsel %vm12428_vm6, %v1775_v36, %v12821_v27  ;;  %v1703_v43 = vsel %vm1675_vm3, %v1666_v28, %v12823_v9  ;;  %v1702_v23 = vsel %vm1675_vm3, %v1665_v6, %v12824_v59  ;;  %v12825_v54 = vld [vmem:[#allocation203_spill] sm:$0xff]  ;;  %v12826_v50 = vld [vmem:[#allocation204_spill] sm:$0xff]  ;;  %v12827_v4 = vld [vmem:[#allocation130_spill] sm:$0xff] }
 0x2b2   : > { %v1849_v18 = vsel %vm1823_vm7, %v1812_v5, %v12825_v54  ;;  %v1848_v49 = vsel %vm1823_vm7, %v1811_v37, %v12826_v50  ;;  %v1740_v3 = vsel %vm12429_vm4, %v1703_v43, %v12827_v4  ;;  %v12828_v25 = vld [vmem:[#allocation131_spill] sm:$0xff]  ;;  %v12830_v21 = vld [vmem:[#allocation24_spill] sm:$0xff]  ;;  %v12831_v61 = vld [vmem:[#allocation25_spill] sm:$0xff]  ;;  %v1548_v15 = vpop.permute.xlu1 %1547  ;;  %v1546_v45 = vpop.permute.xlu0 %1545 }
 0x2b3   : > { %v1739_v46 = vsel %vm12429_vm4, %v1702_v23, %v12828_v25  ;;  %v1886_v62 = vsel %vm12427_vm8, %v1849_v18, %v1544_v58  ;;  %v1885_v39 = vsel %vm12427_vm8, %v1848_v49, %v1542_v60  ;;  %v1631_v24 = vsel %vm1601_vm0, %v290_v48, %v12830_v21  ;;  %v12832_v55 = vld [vmem:[#allocation154_spill] sm:$0xff]  ;;  %v12833_v34 = vld [vmem:[#allocation155_spill] sm:$0xff]  ;;  %v12835_v12 = vld [vmem:[#allocation60_spill] sm:$0xff]  ;;  %v8884_v48 = vpop.f32.mrb[2].mxu1 }
 0x2b4   : > { %v1630_v41 = vsel %vm1601_vm0, %v289_v0, %v12831_v61  ;;  %v1777_v42 = vsel %vm1749_vm5, %v1740_v3, %v12832_v55  ;;  %v1776_v22 = vsel %vm1749_vm5, %v1739_v46, %v12833_v34  ;;  %6526 = vmatprep.mubr.msk.f32.mxu0 %vm1902_vm9, %v1885_v39  ;;  %v292_v47 = vld [vmem:[%s6823_s23 + $0xf8] sm:$0xff]  ;;  %v291_v10 = vld [vmem:[%s6823_s23 + $0xf0] sm:$0xff]  ;;  %v1668_v53 = vsel %vm12430_vm2, %v1631_v24, %v12835_v12  ;;  %v12836_v51 = vld [vmem:[#allocation61_spill] sm:$0xff]  ;;  %v8895_v37 = vpop.f32.mrb[3].mxu1 }
 0x2b5   : > { %v1667_v31 = vsel %vm12430_vm2, %v1630_v41, %v12836_v51  ;;  %v12837_v38 = vld [vmem:[#allocation179_spill] sm:$0xff]  ;;  %v12838_v13 = vld [vmem:[#allocation180_spill] sm:$0xff]  ;;  %6527 = vmatmul.mubr.msk.f32.gmra.mrb[24].mxu0 %vm1902_vm9, %v1886_v62  ;;  %v12840_v57 = vld [vmem:[#allocation97_spill] sm:$0xff]  ;;  %12845 = vst [vmem:[#allocation8_spill] sm:$0xff] %v8884_v48  ;;  %v8922_v12 = vpop.f32.mrb[4].mxu1 }
 0x2b6   : > { %v1814_v14 = vsel %vm12428_vm6, %v1777_v42, %v12837_v38  ;;  %v1813_v2 = vsel %vm12428_vm6, %v1776_v22, %v12838_v13  ;;  %v12839_v19 = vld [vmem:[#allocation96_spill] sm:$0xff]  ;;  %v1704_v32 = vsel %vm1675_vm3, %v1667_v31, %v12840_v57  ;;  %v12841_v40 = vld [vmem:[#allocation205_spill] sm:$0xff]  ;;  %v12842_v30 = vld [vmem:[#allocation206_spill] sm:$0xff]  ;;  %12850 = vst [vmem:[#allocation9_spill] sm:$0xff] %v8895_v37  ;;  %v1552_v61 = vpop.permute.xlu1 %1551  ;;  %v1550_v41 = vpop.permute.xlu0 %1549 }
 0x2b7   : > { %v1705_v17 = vsel %vm1675_vm3, %v1668_v53, %v12839_v19  ;;  %v1851_v20 = vsel %vm1823_vm7, %v1814_v14, %v12841_v40  ;;  %v1850_v29 = vsel %vm1823_vm7, %v1813_v2, %v12842_v30  ;;  %v12843_v52 = vld [vmem:[#allocation132_spill] sm:$0xff]  ;;  %v12844_v35 = vld [vmem:[#allocation133_spill] sm:$0xff]  ;;  %v12846_v0 = vld [vmem:[#allocation26_spill] sm:$0xff]  ;;  %12861 = vst [vmem:[#allocation10_spill] sm:$0xff] %v8922_v12 }
 0x2b8   : > { %v1742_v56 = vsel %vm12429_vm4, %v1705_v17, %v12843_v52  ;;  %v1741_v36 = vsel %vm12429_vm4, %v1704_v32, %v12844_v35  ;;  %v1888_v11 = vsel %vm12427_vm8, %v1851_v20, %v1548_v15  ;;  %v1887_v7 = vsel %vm12427_vm8, %v1850_v29, %v1546_v45  ;;  %v12847_v28 = vld [vmem:[#allocation27_spill] sm:$0xff]  ;;  %v12848_v6 = vld [vmem:[#allocation156_spill] sm:$0xff]  ;;  %v12849_v5 = vld [vmem:[#allocation157_spill] sm:$0xff]  ;;  %v8933_v17 = vpop.f32.mrb[5].mxu1 }
 0x2b9   : > { %v1633_v1 = vsel %vm1601_vm0, %v292_v47, %v12846_v0  ;;  %v1632_v63 = vsel %vm1601_vm0, %v291_v10, %v12847_v28  ;;  %v1779_v27 = vsel %vm1749_vm5, %v1742_v56, %v12848_v6  ;;  %v1778_v44 = vsel %vm1749_vm5, %v1741_v36, %v12849_v5  ;;  %6529 = vmatprep.mubr.msk.f32.mxu0 %vm1902_vm9, %v1887_v7  ;;  %v294_v9 = vld [vmem:[%s6823_s23 + $0x108] sm:$0xff]  ;;  %v293_v43 = vld [vmem:[%s6823_s23 + $0x100] sm:$0xff]  ;;  %v12851_v59 = vld [vmem:[#allocation62_spill] sm:$0xff] }
 0x2ba   : > { %v1670_v23 = vsel %vm12430_vm2, %v1633_v1, %v12851_v59  ;;  %v12852_v54 = vld [vmem:[#allocation63_spill] sm:$0xff]  ;;  %v12853_v50 = vld [vmem:[#allocation181_spill] sm:$0xff]  ;;  %v12854_v58 = vld [vmem:[#allocation182_spill] sm:$0xff]  ;;  %6530 = vmatmul.mubr.msk.f32.gmra.mrb[26].mxu0 %vm1902_vm9, %v1888_v11  ;;  %12866 = vst [vmem:[#allocation11_spill] sm:$0xff] %v8933_v17  ;;  %v1556_v6 = vpop.permute.xlu1 %1555 }
 0x2bb   : > { %v1669_v18 = vsel %vm12430_vm2, %v1632_v63, %v12852_v54  ;;  %v1816_v49 = vsel %vm12428_vm6, %v1779_v27, %v12853_v50  ;;  %v1815_v60 = vsel %vm12428_vm6, %v1778_v44, %v12854_v58  ;;  %v12855_v4 = vld [vmem:[#allocation98_spill] sm:$0xff]  ;;  %v12856_v25 = vld [vmem:[#allocation99_spill] sm:$0xff]  ;;  %v12858_v21 = vld [vmem:[#allocation208_spill] sm:$0xff]  ;;  %v1554_v27 = vpop.permute.xlu0 %1553  ;;  %v8960_v54 = vpop.f32.mrb[6].mxu1 }
 0x2bc   : > { %v1707_v3 = vsel %vm1675_vm3, %v1670_v23, %v12855_v4  ;;  %v1706_v46 = vsel %vm1675_vm3, %v1669_v18, %v12856_v25  ;;  %v12857_v62 = vld [vmem:[#allocation207_spill] sm:$0xff]  ;;  %v1852_v24 = vsel %vm1823_vm7, %v1815_v60, %v12858_v21  ;;  %v12859_v55 = vld [vmem:[#allocation134_spill] sm:$0xff]  ;;  %v12862_v53 = vld [vmem:[#allocation28_spill] sm:$0xff]  ;;  %12877 = vst [vmem:[#allocation32_spill] sm:$0xff] %v8960_v54 }
 0x2bd   : > { %v1853_v39 = vsel %vm1823_vm7, %v1816_v49, %v12857_v62  ;;  %v1744_v42 = vsel %vm12429_vm4, %v1707_v3, %v12859_v55  ;;  %v12860_v34 = vld [vmem:[#allocation135_spill] sm:$0xff]  ;;  %v1889_v10 = vsel %vm12427_vm8, %v1852_v24, %v1550_v41  ;;  %v1635_v51 = vsel %vm1601_vm0, %v294_v9, %v12862_v53  ;;  %v12863_v31 = vld [vmem:[#allocation29_spill] sm:$0xff]  ;;  %v12864_v14 = vld [vmem:[#allocation158_spill] sm:$0xff] }
 0x2be   : > { %v1743_v22 = vsel %vm12429_vm4, %v1706_v46, %v12860_v34  ;;  %v1890_v47 = vsel %vm12427_vm8, %v1853_v39, %v1552_v61  ;;  %v1634_v38 = vsel %vm1601_vm0, %v293_v43, %v12863_v31  ;;  %v1781_v13 = vsel %vm1749_vm5, %v1744_v42, %v12864_v14  ;;  %v12865_v2 = vld [vmem:[#allocation159_spill] sm:$0xff]  ;;  %6532 = vmatprep.mubr.msk.f32.mxu0 %vm1902_vm9, %v1889_v10  ;;  %v295_v32 = vld [vmem:[%s6823_s23 + $0x110] sm:$0xff]  ;;  %v12867_v40 = vld [vmem:[#allocation64_spill] sm:$0xff]  ;;  %v8971_v46 = vpop.f32.mrb[7].mxu1  ;;  %v1560_v14 = vpop.permute.xlu1 %1559 }
 0x2bf   : > { %v1780_v19 = vsel %vm1749_vm5, %v1743_v22, %v12865_v2  ;;  %v296_v57 = vld [vmem:[%s6823_s23 + $0x118] sm:$0xff]  ;;  %v1672_v20 = vsel %vm12430_vm2, %v1635_v51, %v12867_v40  ;;  %v12868_v30 = vld [vmem:[#allocation65_spill] sm:$0xff]  ;;  %v12870_v52 = vld [vmem:[#allocation184_spill] sm:$0xff]  ;;  %6533 = vmatmul.mubr.msk.f32.gmra.mrb[28].mxu0 %vm1902_vm9, %v1890_v47  ;;  %12882 = vst [vmem:[#allocation33_spill] sm:$0xff] %v8971_v46 }
 0x2c0   : > { %v1671_v29 = vsel %vm12430_vm2, %v1634_v38, %v12868_v30  ;;  %v12869_v15 = vld [vmem:[#allocation183_spill] sm:$0xff]  ;;  %v1817_v56 = vsel %vm12428_vm6, %v1780_v19, %v12870_v52  ;;  %v12871_v35 = vld [vmem:[#allocation100_spill] sm:$0xff]  ;;  %v12872_v11 = vld [vmem:[#allocation101_spill] sm:$0xff]  ;;  %v8996_v30 = vpop.f32.mrb[8].mxu1 }
 0x2c1   : > { %v1818_v45 = vsel %vm12428_vm6, %v1781_v13, %v12869_v15  ;;  %v1709_v36 = vsel %vm1675_vm3, %v1672_v20, %v12871_v35  ;;  %v1708_v7 = vsel %vm1675_vm3, %v1671_v29, %v12872_v11  ;;  %v12873_v0 = vld [vmem:[#allocation209_spill] sm:$0xff]  ;;  %v12874_v28 = vld [vmem:[#allocation210_spill] sm:$0xff]  ;;  %v12875_v5 = vld [vmem:[#allocation136_spill] sm:$0xff]  ;;  %v1558_v13 = vpop.permute.xlu0 %1557  ;;  %12893 = vst [vmem:[#allocation12_spill] sm:$0xff] %v8996_v30 }
 0x2c2   : > { %v1855_v1 = vsel %vm1823_vm7, %v1818_v45, %v12873_v0  ;;  %v1854_v63 = vsel %vm1823_vm7, %v1817_v56, %v12874_v28  ;;  %v1746_v44 = vsel %vm12429_vm4, %v1709_v36, %v12875_v5  ;;  %v12876_v9 = vld [vmem:[#allocation137_spill] sm:$0xff]  ;;  %v12878_v18 = vld [vmem:[#allocation30_spill] sm:$0xff]  ;;  %v12879_v49 = vld [vmem:[#allocation31_spill] sm:$0xff]  ;;  %v9003_v56 = vpop.f32.mrb[9].mxu1  ;;  %v1564_v28 = vpop.permute.xlu1 %1563 }
 0x2c3   : > { %v1745_v43 = vsel %vm12429_vm4, %v1708_v7, %v12876_v9  ;;  %v1892_v59 = vsel %vm12427_vm8, %v1855_v1, %v1556_v6  ;;  %v1891_v23 = vsel %vm12427_vm8, %v1854_v63, %v1554_v27  ;;  %v1637_v50 = vsel %vm1601_vm0, %v296_v57, %v12878_v18  ;;  %v12880_v60 = vld [vmem:[#allocation160_spill] sm:$0xff]  ;;  %v12881_v3 = vld [vmem:[#allocation161_spill] sm:$0xff]  ;;  %v12883_v62 = vld [vmem:[#allocation66_spill] sm:$0xff]  ;;  %12896 = vst [vmem:[#allocation68_spill] sm:$0xff] %v9003_v56  ;;  %v9016_v5 = vpop.f32.mrb[10].mxu1 }
 0x2c4   : > { %v1636_v58 = vsel %vm1601_vm0, %v295_v32, %v12879_v49  ;;  %v1783_v4 = vsel %vm1749_vm5, %v1746_v44, %v12880_v60  ;;  %v1782_v25 = vsel %vm1749_vm5, %v1745_v43, %v12881_v3  ;;  %6535 = vmatprep.mubr.msk.f32.mxu0 %vm1902_vm9, %v1891_v23  ;;  %v1674_v39 = vsel %vm12430_vm2, %v1637_v50, %v12883_v62  ;;  %v12884_v21 = vld [vmem:[#allocation67_spill] sm:$0xff]  ;;  %v12885_v61 = vld [vmem:[#allocation185_spill] sm:$0xff]  ;;  %v12886_v55 = vld [vmem:[#allocation186_spill] sm:$0xff]  ;;  %v9019_v44 = vpop.f32.mrb[11].mxu1 }
 0x2c5   : > { %v1673_v24 = vsel %vm12430_vm2, %v1636_v58, %v12884_v21  ;;  %v1820_v41 = vsel %vm12428_vm6, %v1783_v4, %v12885_v61  ;;  %v1819_v42 = vsel %vm12428_vm6, %v1782_v25, %v12886_v55  ;;  %6536 = vmatmul.mubr.msk.f32.gmra.mrb[30].mxu0 %vm1902_vm9, %v1892_v59  ;;  %v12887_v34 = vld [vmem:[#allocation102_spill] sm:$0xff]  ;;  %v12888_v47 = vld [vmem:[#allocation103_spill] sm:$0xff]  ;;  %v12898_v11 = vld [vmem:[#allocation188_spill] sm:$0xff]  ;;  %v1562_v63 = vpop.permute.xlu0 %1561  ;;  %12899 = vst [vmem:[#allocation69_spill] sm:$0xff] %v9016_v5 }
 0x2c6   : > { %v1711_v22 = vsel %vm1675_vm3, %v1674_v39, %v12887_v34  ;;  %v1710_v10 = vsel %vm1675_vm3, %v1673_v24, %v12888_v47  ;;  %v12889_v53 = vld [vmem:[#allocation3_spill] sm:$0xff]  ;;  %v12891_v2 = vld [vmem:[#allocation138_spill] sm:$0xff]  ;;  %12900 = vst [vmem:[#allocation13_spill] sm:$0xff] %v9019_v44  ;;  %v6732_v59 = vld [vmem:[%s6823_s23 + $0x23] sm:$0xff] }
 0x2c7   : > { %v1857_v51 = vsel %vm1823_vm7, %v1820_v41, %v12889_v53  ;;  %v12890_v31 = vld [vmem:[#allocation211_spill] sm:$0xff]  ;;  %v1748_v19 = vsel %vm12429_vm4, %v1711_v22, %v12891_v2  ;;  %v12894_v29 = vld [vmem:[#allocation162_spill] sm:$0xff]  ;;  %v6736_v3 = vld [vmem:[%s6823_s23 + $0x43] sm:$0xff]  ;;  %v6774_v41 = vmov 0.0  }
 0x2c8   : > { %v1856_v38 = vsel %vm1823_vm7, %v1819_v42, %v12890_v31  ;;  %v12892_v57 = vld [vmem:[#allocation139_spill] sm:$0xff]  ;;  %v1894_v40 = vsel %vm12427_vm8, %v1857_v51, %v1560_v14  ;;  %v1785_v15 = vsel %vm1749_vm5, %v1748_v19, %v12894_v29  ;;  %v6733_v50 = vld [vmem:[%s6823_s23 + $0x2b] sm:$0xff]  ;;  %v6740_v61 = vld [vmem:[%s6823_s23 + $0x63] sm:$0xff]  ;;  %3590 = vst.msk [vmem:[#allocation2 + $0x18] sm:$0xff] %vm12430_vm2, %v6774_v41 }
 0x2c9   : > { %v1747_v32 = vsel %vm12429_vm4, %v1710_v10, %v12892_v57  ;;  %v1893_v20 = vsel %vm12427_vm8, %v1856_v38, %v1558_v13  ;;  %v12895_v45 = vld [vmem:[#allocation163_spill] sm:$0xff]  ;;  %v6737_v39 = vld [vmem:[%s6823_s23 + $0x4b] sm:$0xff]  ;;  %3591 = vst.msk [vmem:[#allocation2 + $0x20] sm:$0xff] %vm12430_vm2, %v6774_v41  ;;  %3587 = vst.msk [vmem:[#allocation2] sm:$0xff] %vm12430_vm2, %v6774_v41 }
 0x2ca   : > { %v1784_v52 = vsel %vm1749_vm5, %v1747_v32, %v12895_v45  ;;  %6538 = vmatprep.mubr.msk.f32.mxu0 %vm1902_vm9, %v1893_v20  ;;  %v12897_v35 = vld [vmem:[#allocation187_spill] sm:$0xff]  ;;  %3588 = vst.msk [vmem:[#allocation2 + $0x8] sm:$0xff] %vm12430_vm2, %v6774_v41  ;;  %3589 = vst.msk [vmem:[#allocation2 + $0x10] sm:$0xff] %vm12430_vm2, %v6774_v41  ;;  %v6741_v55 = vld [vmem:[%s6823_s23 + $0x6b] sm:$0xff] }
 0x2cb   : > { %v1822_v36 = vsel %vm12428_vm6, %v1785_v15, %v12897_v35  ;;  %v1821_v7 = vsel %vm12428_vm6, %v1784_v52, %v12898_v11  ;;  %6539 = vmatmul.mubr.msk.f32.gmra.mrb[32].mxu0 %vm1902_vm9, %v1894_v40  ;;  %v6731_v43 = vld [vmem:[%s6823_s23 + $0x1b] sm:$0xff]  ;;  %v6734_v49 = vld [vmem:[%s6823_s23 + $0x33] sm:$0xff]  ;;  %3592 = vst.msk [vmem:[#allocation2 + $0x28] sm:$0xff] %vm12430_vm2, %v6774_v41  ;;  %3593 = vst.msk [vmem:[#allocation2 + $0x30] sm:$0xff] %vm12430_vm2, %v6774_v41 }
 0x2cc   : > { %v1859_v0 = vsel %vm1823_vm7, %v1822_v36, %v8383_v16  ;;  %v1858_v1 = vsel %vm1823_vm7, %v1821_v7, %v8385_v8  ;;  %v6730_v16 = vld [vmem:[%s6823_s23 + $0x13] sm:$0xff]  ;;  %v9024_v8 = vpop.f32.mrb[12].mxu1  ;;  %v6735_v4 = vld [vmem:[%s6823_s23 + $0x3b] sm:$0xff]  ;;  %3594 = vst.msk [vmem:[#allocation2 + $0x38] sm:$0xff] %vm12430_vm2, %v6774_v41  ;;  %3595 = vst.msk [vmem:[#allocation2 + $0x40] sm:$0xff] %vm12430_vm2, %v6774_v41 }
 0x2cd   : > { %v1896_v6 = vsel %vm12427_vm8, %v1859_v0, %v1564_v28  ;;  %v1895_v27 = vsel %vm12427_vm8, %v1858_v1, %v1562_v63  ;;  %12901 = vst [vmem:[#allocation104_spill] sm:$0xff] %v9024_v8  ;;  %v9026_v9 = vpop.f32.mrb[13].mxu1  ;;  %v6738_v21 = vld [vmem:[%s6823_s23 + $0x53] sm:$0xff]  ;;  %v6739_v24 = vld [vmem:[%s6823_s23 + $0x5b] sm:$0xff]  ;;  %3596 = vst.msk [vmem:[#allocation2 + $0x48] sm:$0xff] %vm12430_vm2, %v6774_v41 }
 0x2ce   : > { %6541 = vmatprep.mubr.msk.f32.mxu0 %vm1902_vm9, %v1895_v27  ;;  %12902 = vst [vmem:[#allocation105_spill] sm:$0xff] %v9026_v9  ;;  %v9032_v23 = vpop.f32.mrb[14].mxu1  ;;  %3597 = vst.msk [vmem:[#allocation2 + $0x50] sm:$0xff] %vm12430_vm2, %v6774_v41  ;;  %v6742_v42 = vld [vmem:[%s6823_s23 + $0x73] sm:$0xff]  ;;  %v6743_v34 = vld [vmem:[%s6823_s23 + $0x7b] sm:$0xff] }
 0x2cf   : > { %6542 = vmatmul.mubr.msk.f32.gmra.mrb[34].mxu0 %vm1902_vm9, %v1896_v6  ;;  %12903 = vst [vmem:[#allocation34_spill] sm:$0xff] %v9032_v23  ;;  %v9034_v18 = vpop.f32.mrb[15].mxu1  ;;  %3598 = vst.msk [vmem:[#allocation2 + $0x58] sm:$0xff] %vm12430_vm2, %v6774_v41  ;;  %v6744_v22 = vld [vmem:[%s6823_s23 + $0x83] sm:$0xff]  ;;  %v6745_v47 = vld [vmem:[%s6823_s23 + $0x8b] sm:$0xff]  ;;  %s6778_s23 = smov 64  }
 0x2d0   : > { %6546 = vmatprep.mubr.msk.f32.mxu0 %vm1601_vm0, %v6730_v16  ;;  %12904 = vst [vmem:[#allocation35_spill] sm:$0xff] %v9034_v18  ;;  %v9040_v58 = vpop.f32.mrb[16].mxu1  ;;  %3599 = vst.msk [vmem:[#allocation2 + $0x60] sm:$0xff] %vm12430_vm2, %v6774_v41 }
 0x2d1   : > { %12905 = vst [vmem:[#allocation70_spill] sm:$0xff] %v9040_v58  ;;  %v9042_v60 = vpop.f32.mrb[17].mxu1  ;;  %3600 = vst.msk [vmem:[#allocation2 + $0x68] sm:$0xff] %vm12430_vm2, %v6774_v41 }
 0x2d2   : > { %12906 = vst [vmem:[#allocation71_spill] sm:$0xff] %v9042_v60  ;;  %v9048_v25 = vpop.f32.mrb[18].mxu1  ;;  %3601 = vst.msk [vmem:[#allocation2 + $0x70] sm:$0xff] %vm12430_vm2, %v6774_v41 }
 0x2d3   : > { %6547 = vmatmul.mubr.msk.f32.vlgmr.msra.gmra.mrb[36].mxu0 %vm1601_vm0, %v6731_v43  ;;  %12907 = vst [vmem:[#allocation106_spill] sm:$0xff] %v9048_v25  ;;  %v9050_v62 = vpop.f32.mrb[19].mxu1  ;;  %3602 = vst.msk [vmem:[#allocation2 + $0x78] sm:$0xff] %vm12430_vm2, %v6774_v41  ;;  %v9111_v10 = vpop.permute.xlu0 %2262 }
 0x2d4   : > { %6549 = vmatprep.mubr.msk.f32.mxu0 %vm1601_vm0, %v6732_v59  ;;  %12908 = vst [vmem:[#allocation107_spill] sm:$0xff] %v9050_v62  ;;  %3603 = vst.msk [vmem:[#allocation2 + $0x80] sm:$0xff] %vm12430_vm2, %v6774_v41  ;;  %v9113_v53 = vpop.permute.xlu1 %2267 }
 0x2d5   : > { %3604 = vst.msk [vmem:[#allocation2 + $0x88] sm:$0xff] %vm12430_vm2, %v6774_v41  ;;  %3605 = vst.msk [vmem:[#allocation2 + $0x90] sm:$0xff] %vm12430_vm2, %v6774_v41 }
 0x2d6   : > { %3606 = vst.msk [vmem:[#allocation2 + $0x98] sm:$0xff] %vm12430_vm2, %v6774_v41  ;;  %3607 = vst.msk [vmem:[#allocation2 + $0xa0] sm:$0xff] %vm12430_vm2, %v6774_v41 }
 0x2d7   : > { %6550 = vmatmul.mubr.msk.f32.gmra.mrb[38].mxu0 %vm1601_vm0, %v6733_v50  ;;  %3608 = vst.msk [vmem:[#allocation2 + $0xa8] sm:$0xff] %vm12430_vm2, %v6774_v41  ;;  %3609 = vst.msk [vmem:[#allocation2 + $0xb0] sm:$0xff] %vm12430_vm2, %v6774_v41  ;;  %v9115_v51 = vpop.permute.xlu0 %2277 }
 0x2d8   : > { %6552 = vmatprep.mubr.msk.f32.mxu0 %vm1601_vm0, %v6734_v49  ;;  %3610 = vst.msk [vmem:[#allocation2 + $0xb8] sm:$0xff] %vm12430_vm2, %v6774_v41  ;;  %3611 = vst.msk [vmem:[#allocation2 + $0xc0] sm:$0xff] %vm12430_vm2, %v6774_v41  ;;  %v9117_v31 = vpop.permute.xlu1 %2272 }
 0x2d9   : > { %3612 = vst.msk [vmem:[#allocation2 + $0xc8] sm:$0xff] %vm12430_vm2, %v6774_v41  ;;  %3613 = vst.msk [vmem:[#allocation2 + $0xd0] sm:$0xff] %vm12430_vm2, %v6774_v41 }
 0x2da   : > { %3614 = vst.msk [vmem:[#allocation2 + $0xd8] sm:$0xff] %vm12430_vm2, %v6774_v41  ;;  %3615 = vst.msk [vmem:[#allocation2 + $0xe0] sm:$0xff] %vm12430_vm2, %v6774_v41 }
 0x2db   : > { %6553 = vmatmul.mubr.msk.f32.gmra.mrb[40].mxu0 %vm1601_vm0, %v6735_v4  ;;  %3616 = vst.msk [vmem:[#allocation2 + $0xe8] sm:$0xff] %vm12430_vm2, %v6774_v41  ;;  %3617 = vst.msk [vmem:[#allocation2 + $0xf0] sm:$0xff] %vm12430_vm2, %v6774_v41  ;;  %v9119_v38 = vpop.permute.xlu0 %2287 }
 0x2dc   : > { %6555 = vmatprep.mubr.msk.f32.mxu0 %vm1601_vm0, %v6736_v3  ;;  %3618 = vst.msk [vmem:[#allocation2 + $0xf8] sm:$0xff] %vm12430_vm2, %v6774_v41  ;;  %3619 = vst.msk [vmem:[#allocation2 + $0x100] sm:$0xff] %vm12430_vm2, %v6774_v41  ;;  %v9121_v14 = vpop.permute.xlu1 %2282 }
 0x2dd   : > { %3620 = vst.msk [vmem:[#allocation2 + $0x108] sm:$0xff] %vm12430_vm2, %v6774_v41  ;;  %3621 = vst.msk [vmem:[#allocation2 + $0x110] sm:$0xff] %vm12430_vm2, %v6774_v41 }
 0x2de   : > { %3622 = vst.msk [vmem:[#allocation2 + $0x118] sm:$0xff] %vm12430_vm2, %v6774_v41  ;;  %3623 = vst.msk [vmem:[#allocation2 + $0x120] sm:$0xff] %vm12430_vm2, %v6774_v41 }
 0x2df   : > { %6556 = vmatmul.mubr.msk.f32.gmra.mrb[42].mxu0 %vm1601_vm0, %v6737_v39  ;;  %3624 = vst.msk [vmem:[#allocation2 + $0x128] sm:$0xff] %vm12430_vm2, %v6774_v41  ;;  %3625 = vst.msk [vmem:[#allocation2 + $0x130] sm:$0xff] %vm12430_vm2, %v6774_v41  ;;  %v9123_v13 = vpop.permute.xlu0 %2297 }
 0x2e0   : > { %6558 = vmatprep.mubr.msk.f32.mxu0 %vm1601_vm0, %v6738_v21  ;;  %3626 = vst.msk [vmem:[#allocation2 + $0x138] sm:$0xff] %vm12430_vm2, %v6774_v41  ;;  %3627 = vst.msk [vmem:[#allocation2 + $0x140] sm:$0xff] %vm12430_vm2, %v6774_v41  ;;  %v9125_v2 = vpop.permute.xlu1 %2292 }
 0x2e1   : > { %12909 = vst [vmem:[#allocation36_spill] sm:$0xff] %v9111_v10  ;;  %12910 = vst [vmem:[#allocation37_spill] sm:$0xff] %v9113_v53 }
 0x2e2   : > { %12911 = vst [vmem:[#allocation72_spill] sm:$0xff] %v9115_v51  ;;  %12912 = vst [vmem:[#allocation73_spill] sm:$0xff] %v9117_v31 }
 0x2e3   : > { %6559 = vmatmul.mubr.msk.f32.gmra.mrb[44].mxu0 %vm1601_vm0, %v6739_v24  ;;  %12913 = vst [vmem:[#allocation108_spill] sm:$0xff] %v9119_v38  ;;  %12914 = vst [vmem:[#allocation109_spill] sm:$0xff] %v9121_v14  ;;  %v9127_v19 = vpop.permute.xlu0 %2307 }
 0x2e4   : > { %6561 = vmatprep.mubr.msk.f32.mxu0 %vm1601_vm0, %v6740_v61  ;;  %12915 = vst [vmem:[#allocation38_spill] sm:$0xff] %v9123_v13  ;;  %12916 = vst [vmem:[#allocation39_spill] sm:$0xff] %v9125_v2  ;;  %v9129_v57 = vpop.permute.xlu1 %2302 }
 0x2e5   : > { %12917 = vst [vmem:[#allocation74_spill] sm:$0xff] %v9127_v19  ;;  %12918 = vst [vmem:[#allocation75_spill] sm:$0xff] %v9129_v57 }
 0x2e7   : > { %6562 = vmatmul.mubr.msk.f32.gmra.mrb[46].mxu0 %vm1601_vm0, %v6741_v55  ;;  %v9131_v32 = vpop.permute.xlu0 %2317 }
 0x2e8   : > { %6564 = vmatprep.mubr.msk.f32.mxu0 %vm1601_vm0, %v6742_v42  ;;  %12919 = vst [vmem:[#allocation110_spill] sm:$0xff] %v9131_v32  ;;  %v9133_v40 = vpop.permute.xlu1 %2312 }
 0x2e9   : > { %12920 = vst [vmem:[#allocation111_spill] sm:$0xff] %v9133_v40 }
 0x2eb   : > { %6565 = vmatmul.mubr.msk.f32.gmra.mrb[48].mxu0 %vm1601_vm0, %v6743_v34  ;;  %v9143_v52 = vpop.permute.xlu0 %2327 }
 0x2ec   : > { %6567 = vmatprep.mubr.msk.f32.mxu0 %vm1601_vm0, %v6744_v22  ;;  %12921 = vst [vmem:[#allocation40_spill] sm:$0xff] %v9143_v52  ;;  %v9149_v11 = vpop.permute.xlu1 %2322 }
 0x2ed   : > { %12922 = vst [vmem:[#allocation41_spill] sm:$0xff] %v9149_v11 }
 0x2ef   : > { %6568 = vmatmul.mubr.msk.f32.gmra.mrb[50].mxu0 %vm1601_vm0, %v6745_v47  ;;  %v9169_v39 = vpop.permute.xlu0 %2337 }
 0x2f0   : > { %12923 = vst [vmem:[#allocation76_spill] sm:$0xff] %v9169_v39  ;;  %v9176_v55 = vpop.permute.xlu1 %2332 }
 0x2f1   : > { %12924 = vst [vmem:[#allocation77_spill] sm:$0xff] %v9176_v55 }
 0x355   : > { %v9135_v20 = vpop.f32.mrb[0].mxu0 }
 0x356   : > { %v2441_v29 = vmul.f32 %v9135_v20, %v9113_v53  ;;  %v2554_v15 = vmul.f32 %v9135_v20, %v9135_v20  ;;  %v9141_v45 = vpop.f32.mrb[1].mxu0 }
 0x357   : > { %v2440_v35 = vmul.f32 %v9111_v10, %v9141_v45  ;;  %v2553_v36 = vmul.f32 %v9141_v45, %v9141_v45 }
 0x358   : > { %v2477_v7 = vsel %vm12430_vm2, %v2441_v29, 0.0  ;;  %v2590_v0 = vmul.f32 %v2554_v15, %v9113_v53 }
 0x359   : > { %v2476_v1 = vsel %vm12430_vm2, %v2440_v35, 0.0  ;;  %v2589_v28 = vmul.f32 %v2553_v36, %v9111_v10  ;;  %v9155_v63 = vpop.f32.mrb[2].mxu0 }
 0x35a   : > { %v2626_v6 = vsel %vm12430_vm2, %v2590_v0, 0.0  ;;  %v2478_v27 = vadd.f32 %v2477_v7, %v2476_v1  ;;  %v2556_v16 = vmul.f32 %v9155_v63, %v9155_v63  ;;  %v9160_v43 = vpop.f32.mrb[3].mxu0  ;;  %v2443_v50 = vmul.f32 %v9155_v63, %v9115_v51 }
 0x35b   : > { %v2625_v59 = vsel %vm12430_vm2, %v2589_v28, 0.0  ;;  %v2442_v49 = vmul.f32 %v9117_v31, %v9160_v43  ;;  %v2555_v4 = vmul.f32 %v9160_v43, %v9160_v43 }
 0x35c   : > { %v2627_v3 = vadd.f32 %v2626_v6, %v2625_v59  ;;  %v2592_v21 = vmul.f32 %v2556_v16, %v9115_v51  ;;  %v2481_v29 = vsel %vm12430_vm2, %v2443_v50, 0.0 }
 0x35d   : > { %v2479_v24 = vsel %vm12430_vm2, %v2442_v49, 0.0  ;;  %v2591_v61 = vmul.f32 %v2555_v4, %v9117_v31  ;;  %v9174_v41 = vpop.f32.mrb[4].mxu0 }
 0x35e   : > { %v2480_v42 = vadd.f32 %v2479_v24, %v2478_v27  ;;  %v2445_v34 = vmul.f32 %v9174_v41, %v9119_v38  ;;  %v2558_v22 = vmul.f32 %v9174_v41, %v9174_v41  ;;  %v9182_v47 = vpop.f32.mrb[5].mxu0  ;;  %v2630_v1 = vsel %vm12430_vm2, %v2592_v21, 0.0 }
 0x35f   : > { %v2628_v15 = vsel %vm12430_vm2, %v2591_v61, 0.0  ;;  %v2444_v35 = vmul.f32 %v9121_v14, %v9182_v47  ;;  %v2557_v36 = vmul.f32 %v9182_v47, %v9182_v47 }
 0x360   : > { %v2629_v7 = vadd.f32 %v2628_v15, %v2627_v3  ;;  %v2482_v0 = vadd.f32 %v2481_v29, %v2480_v42  ;;  %v2594_v28 = vmul.f32 %v2558_v22, %v9119_v38  ;;  %v2485_v59 = vsel %vm12430_vm2, %v2445_v34, 0.0  ;;  %v9201_v3 = vpop.permute.xlu0 %2347  ;;  %v9210_v22 = vpop.permute.xlu1 %2342 }
 0x361   : > { %v2483_v6 = vsel %vm12430_vm2, %v2444_v35, 0.0  ;;  %v2593_v27 = vmul.f32 %v2557_v36, %v9121_v14  ;;  %v9194_v16 = vpop.f32.mrb[6].mxu0  ;;  %12925 = vst [vmem:[#allocation112_spill] sm:$0xff] %v9201_v3  ;;  %12926 = vst [vmem:[#allocation113_spill] sm:$0xff] %v9210_v22 }
 0x362   : > { %v2484_v50 = vadd.f32 %v2483_v6, %v2482_v0  ;;  %v2631_v49 = vadd.f32 %v2630_v1, %v2629_v7  ;;  %v2447_v4 = vmul.f32 %v9194_v16, %v9123_v13  ;;  %v9199_v24 = vpop.f32.mrb[7].mxu0  ;;  %v2560_v61 = vmul.f32 %v9194_v16, %v9194_v16 }
 0x363   : > { %v2632_v21 = vsel %vm12430_vm2, %v2593_v27, 0.0  ;;  %v2446_v42 = vmul.f32 %v9125_v2, %v9199_v24  ;;  %v2559_v34 = vmul.f32 %v9199_v24, %v9199_v24  ;;  %v2634_v35 = vsel %vm12430_vm2, %v2594_v28, 0.0 }
 0x364   : > { %v2633_v29 = vadd.f32 %v2632_v21, %v2631_v49  ;;  %v2486_v15 = vadd.f32 %v2485_v59, %v2484_v50  ;;  %v2596_v36 = vmul.f32 %v2560_v61, %v9123_v13  ;;  %v2489_v28 = vsel %vm12430_vm2, %v2447_v4, 0.0 }
 0x365   : > { %v2487_v7 = vsel %vm12430_vm2, %v2446_v42, 0.0  ;;  %v2595_v0 = vmul.f32 %v2559_v34, %v9125_v2  ;;  %v9216_v1 = vpop.f32.mrb[8].mxu0  ;;  %v9230_v34 = vpop.permute.xlu0 %2357 }
 0x366   : > { %v2488_v6 = vadd.f32 %v2487_v7, %v2486_v15  ;;  %v2635_v27 = vadd.f32 %v2634_v35, %v2633_v29  ;;  %v2449_v25 = vmul.f32 %v9216_v1, %v9127_v19  ;;  %v2562_v62 = vmul.f32 %v9216_v1, %v9216_v1  ;;  %v9222_v49 = vpop.f32.mrb[9].mxu0  ;;  %12927 = vst [vmem:[#allocation42_spill] sm:$0xff] %v9230_v34 }
 0x367   : > { %v2636_v59 = vsel %vm12430_vm2, %v2595_v0, 0.0  ;;  %v2448_v50 = vmul.f32 %v9129_v57, %v9222_v49  ;;  %v2561_v21 = vmul.f32 %v9222_v49, %v9222_v49  ;;  %v2638_v29 = vsel %vm12430_vm2, %v2596_v36, 0.0  ;;  %v9238_v0 = vpop.permute.xlu1 %2352 }
 0x368   : > { %v2637_v61 = vadd.f32 %v2636_v59, %v2635_v27  ;;  %v2490_v42 = vadd.f32 %v2489_v28, %v2488_v6  ;;  %v2598_v15 = vmul.f32 %v2562_v62, %v9127_v19  ;;  %12928 = vst [vmem:[#allocation43_spill] sm:$0xff] %v9238_v0  ;;  %v2493_v58 = vsel %vm12430_vm2, %v2449_v25, 0.0 }
 0x369   : > { %v2491_v35 = vsel %vm12430_vm2, %v2448_v50, 0.0  ;;  %v2597_v4 = vmul.f32 %v2561_v21, %v9129_v57  ;;  %v9236_v7 = vpop.f32.mrb[10].mxu0 }
 0x36a   : > { %v2492_v60 = vadd.f32 %v2491_v35, %v2490_v42  ;;  %v2639_v23 = vadd.f32 %v2638_v29, %v2637_v61  ;;  %v2451_v6 = vmul.f32 %v9236_v7, %v9131_v32  ;;  %v9243_v27 = vpop.f32.mrb[11].mxu0  ;;  %v2564_v62 = vmul.f32 %v9236_v7, %v9236_v7 }
 0x36b   : > { %v2640_v36 = vsel %vm12430_vm2, %v2597_v4, 0.0  ;;  %v2450_v28 = vmul.f32 %v9133_v40, %v9243_v27  ;;  %v2563_v59 = vmul.f32 %v9243_v27, %v9243_v27  ;;  %v2642_v21 = vsel %vm12430_vm2, %v2598_v15, 0.0 }
 0x36c   : > { %v2641_v50 = vadd.f32 %v2640_v36, %v2639_v23  ;;  %v2494_v25 = vadd.f32 %v2493_v58, %v2492_v60  ;;  %v2600_v61 = vmul.f32 %v2564_v62, %v9131_v32  ;;  %v9264_v58 = vpop.permute.xlu0 %2367  ;;  %v2497_v60 = vsel %vm12430_vm2, %v2451_v6, 0.0 }
 0x36d   : > { %v2495_v42 = vsel %vm12430_vm2, %v2450_v28, 0.0  ;;  %v2599_v29 = vmul.f32 %v2563_v59, %v9133_v40  ;;  %v9256_v35 = vpop.f32.mrb[12].mxu0  ;;  %12929 = vst [vmem:[#allocation78_spill] sm:$0xff] %v9264_v58  ;;  %v9272_v28 = vpop.permute.xlu1 %2362 }
 0x36e   : > { %v2496_v4 = vadd.f32 %v2495_v42, %v2494_v25  ;;  %v2643_v18 = vadd.f32 %v2642_v21, %v2641_v50  ;;  %v2453_v8 = vmul.f32 %v9256_v35, %v9143_v52  ;;  %v2566_v9 = vmul.f32 %v9256_v35, %v9256_v35  ;;  %v9262_v23 = vpop.f32.mrb[13].mxu0  ;;  %12930 = vst [vmem:[#allocation79_spill] sm:$0xff] %v9272_v28 }
 0x36f   : > { %v2644_v15 = vsel %vm12430_vm2, %v2599_v29, 0.0  ;;  %v2452_v36 = vmul.f32 %v9149_v11, %v9262_v23  ;;  %v2565_v62 = vmul.f32 %v9262_v23, %v9262_v23  ;;  %v2646_v25 = vsel %vm12430_vm2, %v2600_v61, 0.0 }
 0x370   : > { %v2645_v59 = vadd.f32 %v2644_v15, %v2643_v18  ;;  %v2498_v50 = vadd.f32 %v2497_v60, %v2496_v4  ;;  %v2602_v21 = vmul.f32 %v2566_v9, %v9143_v52  ;;  %v2501_v29 = vsel %vm12430_vm2, %v2453_v8, 0.0  ;;  %v9292_v15 = vpop.permute.xlu0 %2377 }
 0x371   : > { %v2499_v42 = vsel %vm12430_vm2, %v2452_v36, 0.0  ;;  %v2601_v6 = vmul.f32 %v2565_v62, %v9149_v11  ;;  %v9278_v5 = vpop.f32.mrb[14].mxu0  ;;  %12931 = vst [vmem:[#allocation114_spill] sm:$0xff] %v9292_v15 }
 0x372   : > { %v2500_v44 = vadd.f32 %v2499_v42, %v2498_v50  ;;  %v2647_v30 = vadd.f32 %v2646_v25, %v2645_v59  ;;  %v2455_v56 = vmul.f32 %v9278_v5, %v9169_v39  ;;  %v9283_v54 = vpop.f32.mrb[15].mxu0  ;;  %v2568_v9 = vmul.f32 %v9278_v5, %v9278_v5  ;;  %v9300_v42 = vpop.permute.xlu1 %2372 }
 0x373   : > { %v2648_v18 = vsel %vm12430_vm2, %v2601_v6, 0.0  ;;  %v2454_v61 = vmul.f32 %v9176_v55, %v9283_v54  ;;  %v2567_v4 = vmul.f32 %v9283_v54, %v9283_v54  ;;  %v2650_v36 = vsel %vm12430_vm2, %v2602_v21, 0.0  ;;  %12932 = vst [vmem:[#allocation115_spill] sm:$0xff] %v9300_v42 }
 0x374   : > { %v2649_v60 = vadd.f32 %v2648_v18, %v2647_v30  ;;  %v2502_v8 = vadd.f32 %v2501_v29, %v2500_v44  ;;  %v2604_v62 = vmul.f32 %v2568_v9, %v9169_v39  ;;  %v2505_v21 = vsel %vm12430_vm2, %v2455_v56, 0.0 }
 0x375   : > { %v2503_v59 = vsel %vm12430_vm2, %v2454_v61, 0.0  ;;  %v2603_v50 = vmul.f32 %v2567_v4, %v9176_v55  ;;  %v9298_v25 = vpop.f32.mrb[16].mxu0 }
 0x376   : > { %v2504_v6 = vadd.f32 %v2503_v59, %v2502_v8  ;;  %v2651_v46 = vadd.f32 %v2650_v36, %v2649_v60  ;;  %v2457_v30 = vmul.f32 %v9298_v25, %v9201_v3  ;;  %v2570_v44 = vmul.f32 %v9298_v25, %v9298_v25  ;;  %v9306_v29 = vpop.f32.mrb[17].mxu0 }
 0x377   : > { %v2652_v18 = vsel %vm12430_vm2, %v2603_v50, 0.0  ;;  %v2456_v9 = vmul.f32 %v9210_v22, %v9306_v29  ;;  %v2569_v61 = vmul.f32 %v9306_v29, %v9306_v29  ;;  %v2654_v8 = vsel %vm12430_vm2, %v2604_v62, 0.0 }
 0x378   : > { %v2653_v4 = vadd.f32 %v2652_v18, %v2651_v46  ;;  %v2506_v60 = vadd.f32 %v2505_v21, %v2504_v6  ;;  %v2606_v36 = vmul.f32 %v2570_v44, %v9201_v3  ;;  %v2509_v56 = vsel %vm12430_vm2, %v2457_v30, 0.0  ;;  %v9325_v46 = vpop.permute.xlu0 %2387  ;;  %v9334_v21 = vpop.permute.xlu1 %2382 }
 0x379   : > { %v2507_v59 = vsel %vm12430_vm2, %v2456_v9, 0.0  ;;  %v2605_v12 = vmul.f32 %v2569_v61, %v9210_v22  ;;  %v9318_v17 = vpop.f32.mrb[18].mxu0  ;;  %12933 = vst [vmem:[#allocation44_spill] sm:$0xff] %v9325_v46  ;;  %12934 = vst [vmem:[#allocation45_spill] sm:$0xff] %v9334_v21 }
 0x37a   : > { %v2508_v50 = vadd.f32 %v2507_v59, %v2506_v60  ;;  %v2655_v48 = vadd.f32 %v2654_v8, %v2653_v4  ;;  %v2459_v37 = vmul.f32 %v9318_v17, %v9230_v34  ;;  %v9323_v33 = vpop.f32.mrb[19].mxu0  ;;  %v2572_v6 = vmul.f32 %v9318_v17, %v9318_v17 }
 0x37b   : > { %v2656_v62 = vsel %vm12430_vm2, %v2605_v12, 0.0  ;;  %v2458_v44 = vmul.f32 %v9238_v0, %v9323_v33  ;;  %v2571_v30 = vmul.f32 %v9323_v33, %v9323_v33  ;;  %v2658_v61 = vsel %vm12430_vm2, %v2606_v36, 0.0 }
 0x37c   : > { %v2657_v18 = vadd.f32 %v2656_v62, %v2655_v48  ;;  %v2510_v9 = vadd.f32 %v2509_v56, %v2508_v50  ;;  %v2608_v4 = vmul.f32 %v2572_v6, %v9230_v34  ;;  %v2513_v36 = vsel %vm12430_vm2, %v2459_v37, 0.0 }
 0x37d   : > { %v2511_v60 = vsel %vm12430_vm2, %v2458_v44, 0.0  ;;  %v2607_v12 = vmul.f32 %v2571_v30, %v9238_v0  ;;  %v9340_v8 = vpop.f32.mrb[20].mxu0  ;;  %v9354_v30 = vpop.permute.xlu0 %2397 }
 0x37e   : > { %v2512_v59 = vadd.f32 %v2511_v60, %v2510_v9  ;;  %v2659_v26 = vadd.f32 %v2658_v61, %v2657_v18  ;;  %v2461_v3 = vmul.f32 %v9340_v8, %v9264_v58  ;;  %v2574_v22 = vmul.f32 %v9340_v8, %v9340_v8  ;;  %v9346_v48 = vpop.f32.mrb[21].mxu0  ;;  %12935 = vst [vmem:[#allocation164_spill] sm:$0xff] %v9354_v30 }
 0x37f   : > { %v2660_v56 = vsel %vm12430_vm2, %v2607_v12, 0.0  ;;  %v2460_v50 = vmul.f32 %v9272_v28, %v9346_v48  ;;  %v2573_v62 = vmul.f32 %v9346_v48, %v9346_v48  ;;  %v2662_v18 = vsel %vm12430_vm2, %v2608_v4, 0.0  ;;  %v9362_v12 = vpop.permute.xlu1 %2392 }
 0x380   : > { %v2661_v6 = vadd.f32 %v2660_v56, %v2659_v26  ;;  %v2514_v44 = vadd.f32 %v2513_v36, %v2512_v59  ;;  %v2610_v9 = vmul.f32 %v2574_v22, %v9264_v58  ;;  %12936 = vst [vmem:[#allocation80_spill] sm:$0xff] %v9362_v12  ;;  %v2517_v34 = vsel %vm12430_vm2, %v2461_v3, 0.0 }
 0x381   : > { %v2515_v61 = vsel %vm12430_vm2, %v2460_v50, 0.0  ;;  %v2609_v37 = vmul.f32 %v2573_v62, %v9272_v28 }
 0x382   : > { %v9360_v60 = vpop.f32.mrb[22].mxu0  ;;  %v2516_v0 = vadd.f32 %v2515_v61, %v2514_v44  ;;  %v2663_v39 = vadd.f32 %v2662_v18, %v2661_v6  ;;  %v2666_v62 = vsel %vm12430_vm2, %v2610_v9, 0.0  ;;  %v9388_v9 = vpop.permute.xlu0 %2407 }
 0x383   : > { %v2463_v26 = vmul.f32 %v9360_v60, %v9292_v15  ;;  %v9367_v59 = vpop.f32.mrb[23].mxu0  ;;  %v2664_v4 = vsel %vm12430_vm2, %v2609_v37, 0.0  ;;  %v2576_v22 = vmul.f32 %v9360_v60, %v9360_v60  ;;  %12937 = vst [vmem:[#allocation81_spill] sm:$0xff] %v9388_v9 }
 0x384   : > { %v2462_v36 = vmul.f32 %v9300_v42, %v9367_v59  ;;  %v2575_v56 = vmul.f32 %v9367_v59, %v9367_v59  ;;  %v2665_v50 = vadd.f32 %v2664_v4, %v2663_v39  ;;  %v2518_v3 = vadd.f32 %v2517_v34, %v2516_v0  ;;  %v3703_v34 = vld [vmem:[#allocation2 + $0x1] sm:$0xff]  ;;  %v3704_v0 = vld [vmem:[#allocation2 + $0x9] sm:$0xff] }
 0x385   : > { %v2612_v6 = vmul.f32 %v2576_v22, %v9292_v15  ;;  %v2521_v4 = vsel %vm12430_vm2, %v2463_v26, 0.0  ;;  %3959 = vrot.lane.b32.xlu1 %v3703_v34, %s6766_s25  ;;  %3961 = vrot.lane.b32.xlu0 %v3704_v0, %s6766_s25 }
 0x386   : > { %v2519_v44 = vsel %vm12430_vm2, %v2462_v36, 0.0  ;;  %v2611_v18 = vmul.f32 %v2575_v56, %v9300_v42  ;;  %v2667_v58 = vadd.f32 %v2666_v62, %v2665_v50  ;;  %v9398_v50 = vpop.permute.xlu1 %2402 }
 0x387   : > { %v2520_v37 = vadd.f32 %v2519_v44, %v2518_v3  ;;  %12938 = vst [vmem:[#allocation189_spill] sm:$0xff] %v9398_v50  ;;  %v2670_v44 = vsel %vm12430_vm2, %v2612_v6, 0.0 }
 0x388   : > { %v9380_v61 = vpop.f32.mrb[24].mxu0  ;;  %v2668_v22 = vsel %vm12430_vm2, %v2611_v18, 0.0 }
 0x389   : > { %v2465_v28 = vmul.f32 %v9380_v61, %v9325_v46  ;;  %v2578_v55 = vmul.f32 %v9380_v61, %v9380_v61  ;;  %v9386_v39 = vpop.f32.mrb[25].mxu0  ;;  %v2669_v3 = vadd.f32 %v2668_v22, %v2667_v58  ;;  %v2522_v62 = vadd.f32 %v2521_v4, %v2520_v37  ;;  %v9418_v22 = vpop.permute.xlu0 %2417 }
 0x38a   : > { %v2464_v36 = vmul.f32 %v9334_v21, %v9386_v39  ;;  %v2577_v56 = vmul.f32 %v9386_v39, %v9386_v39  ;;  %12939 = vst [vmem:[#allocation190_spill] sm:$0xff] %v9418_v22 }
 0x38b   : > { %v2614_v26 = vmul.f32 %v2578_v55, %v9325_v46  ;;  %v2525_v11 = vsel %vm12430_vm2, %v2465_v28, 0.0  ;;  %v2671_v34 = vadd.f32 %v2670_v44, %v2669_v3  ;;  %v9426_v44 = vpop.permute.xlu1 %2412 }
 0x38c   : > { %v2523_v18 = vsel %vm12430_vm2, %v2464_v36, 0.0  ;;  %v2613_v15 = vmul.f32 %v2577_v56, %v9334_v21  ;;  %12940 = vst [vmem:[#allocation116_spill] sm:$0xff] %v9426_v44 }
 0x38d   : > { %v9404_v42 = vpop.f32.mrb[26].mxu0  ;;  %v2524_v52 = vadd.f32 %v2523_v18, %v2522_v62  ;;  %v2674_v36 = vsel %vm12430_vm2, %v2614_v26, 0.0 }
 0x38e   : > { %v2467_v0 = vmul.f32 %v9404_v42, %v9354_v30  ;;  %v9409_v32 = vpop.f32.mrb[27].mxu0  ;;  %v2672_v58 = vsel %vm12430_vm2, %v2613_v15, 0.0  ;;  %v2580_v55 = vmul.f32 %v9404_v42, %v9404_v42 }
 0x38f   : > { %v2466_v6 = vmul.f32 %v9362_v12, %v9409_v32  ;;  %v2579_v37 = vmul.f32 %v9409_v32, %v9409_v32  ;;  %v2673_v4 = vadd.f32 %v2672_v58, %v2671_v34  ;;  %v2526_v28 = vadd.f32 %v2525_v11, %v2524_v52 }
 0x390   : > { %v2616_v56 = vmul.f32 %v2580_v55, %v9354_v30  ;;  %v2529_v26 = vsel %vm12430_vm2, %v2467_v0, 0.0 }
 0x391   : > { %v2527_v3 = vsel %vm12430_vm2, %v2466_v6, 0.0  ;;  %v2615_v15 = vmul.f32 %v2579_v37, %v9362_v12  ;;  %v2675_v46 = vadd.f32 %v2674_v36, %v2673_v4 }
 0x392   : > { %v9424_v62 = vpop.f32.mrb[28].mxu0  ;;  %v2528_v18 = vadd.f32 %v2527_v3, %v2526_v28  ;;  %v2678_v28 = vsel %vm12430_vm2, %v2616_v56, 0.0 }
 0x393   : > { %v2469_v34 = vmul.f32 %v9424_v62, %v9388_v9  ;;  %v2582_v52 = vmul.f32 %v9424_v62, %v9424_v62  ;;  %v9432_v11 = vpop.f32.mrb[29].mxu0  ;;  %v2676_v58 = vsel %vm12430_vm2, %v2615_v15, 0.0 }
 0x394   : > { %v2468_v55 = vmul.f32 %v9398_v50, %v9432_v11  ;;  %v2581_v6 = vmul.f32 %v9432_v11, %v9432_v11  ;;  %v2677_v37 = vadd.f32 %v2676_v58, %v2675_v46  ;;  %v2530_v4 = vadd.f32 %v2529_v26, %v2528_v18  ;;  %v9451_v46 = vpop.permute.xlu0 %2427  ;;  %v9460_v26 = vpop.permute.xlu1 %2422 }
 0x395   : > { %v2618_v36 = vmul.f32 %v2582_v52, %v9388_v9  ;;  %v2533_v0 = vsel %vm12430_vm2, %v2469_v34, 0.0  ;;  %12941 = vst [vmem:[#allocation117_spill] sm:$0xff] %v9451_v46  ;;  %12942 = vst [vmem:[#allocation46_spill] sm:$0xff] %v9460_v26 }
 0x396   : > { %v2531_v3 = vsel %vm12430_vm2, %v2468_v55, 0.0  ;;  %v2617_v30 = vmul.f32 %v2581_v6, %v9398_v50  ;;  %v2679_v21 = vadd.f32 %v2678_v28, %v2677_v37 }
 0x397   : > { %v2532_v15 = vadd.f32 %v2531_v3, %v2530_v4  ;;  %v2682_v6 = vsel %vm12430_vm2, %v2618_v36, 0.0 }
 0x398   : > { %v9444_v12 = vpop.f32.mrb[30].mxu0  ;;  %v2680_v56 = vsel %vm12430_vm2, %v2617_v30, 0.0 }
 0x399   : > { %v2471_v40 = vmul.f32 %v9444_v12, %v9418_v22  ;;  %v9449_v57 = vpop.f32.mrb[31].mxu0  ;;  %v2584_v18 = vmul.f32 %v9444_v12, %v9444_v12  ;;  %v2681_v58 = vadd.f32 %v2680_v56, %v2679_v21  ;;  %v2534_v55 = vadd.f32 %v2533_v0, %v2532_v15 }
 0x39a   : > { %v2470_v52 = vmul.f32 %v9426_v44, %v9449_v57  ;;  %v2583_v34 = vmul.f32 %v9449_v57, %v9449_v57 }
 0x39b   : > { %v2620_v37 = vmul.f32 %v2584_v18, %v9418_v22  ;;  %v2683_v9 = vadd.f32 %v2682_v6, %v2681_v58  ;;  %v2537_v36 = vsel %vm12430_vm2, %v2471_v40, 0.0 }
 0x39c   : > { %v2535_v4 = vsel %vm12430_vm2, %v2470_v52, 0.0  ;;  %v2619_v30 = vmul.f32 %v2583_v34, %v9426_v44  ;;  %v9480_v34 = vpop.permute.xlu0 %2437 }
 0x39d   : > { %v2536_v3 = vadd.f32 %v2535_v4, %v2534_v55  ;;  %12944 = vst [vmem:[#allocation140_spill] sm:$0xff] %v9480_v34  ;;  %v2686_v58 = vsel %vm12430_vm2, %v2620_v37, 0.0 }
 0x39e   : > { %v9466_v28 = vpop.f32.mrb[32].mxu0  ;;  %v2684_v0 = vsel %vm12430_vm2, %v2619_v30, 0.0  ;;  %v9488_v30 = vpop.permute.xlu1 %2432 }
 0x39f   : > { %12943 = vst [vmem:[#allocation4_spill] sm:$0xff] %v9466_v28  ;;  %v2473_v50 = vmul.f32 %v9466_v28, %v9451_v46  ;;  %v2586_v19 = vmul.f32 %v9466_v28, %v9466_v28  ;;  %v9472_v21 = vpop.f32.mrb[33].mxu0  ;;  %v2685_v18 = vadd.f32 %v2684_v0, %v2683_v9  ;;  %v2538_v52 = vadd.f32 %v2537_v36, %v2536_v3 }
 0x3a0   : > { %v2472_v15 = vmul.f32 %v9460_v26, %v9472_v21  ;;  %v2585_v56 = vmul.f32 %v9472_v21, %v9472_v21  ;;  %12946 = vst [vmem:[#allocation47_spill] sm:$0xff] %v9488_v30 }
 0x3a1   : > { %v2622_v55 = vmul.f32 %v2586_v19, %v9451_v46  ;;  %v2541_v22 = vsel %vm12430_vm2, %v2473_v50, 0.0  ;;  %v2687_v28 = vadd.f32 %v2686_v58, %v2685_v18 }
 0x3a2   : > { %v2539_v6 = vsel %vm12430_vm2, %v2472_v15, 0.0  ;;  %v2621_v40 = vmul.f32 %v2585_v56, %v9460_v26  ;;  %v9486_v4 = vpop.f32.mrb[34].mxu0 }
 0x3a3   : > { %12945 = vst [vmem:[#allocation141_spill] sm:$0xff] %v9486_v4  ;;  %v2540_v44 = vadd.f32 %v2539_v6, %v2538_v52  ;;  %v2475_v9 = vmul.f32 %v9486_v4, %v9480_v34  ;;  %v9493_v3 = vpop.f32.mrb[35].mxu0  ;;  %v2588_v19 = vmul.f32 %v9486_v4, %v9486_v4  ;;  %v2690_v56 = vsel %vm12430_vm2, %v2622_v55, 0.0 }
 0x3a4   : > { %v2688_v37 = vsel %vm12430_vm2, %v2621_v40, 0.0  ;;  %v2474_v36 = vmul.f32 %v9488_v30, %v9493_v3  ;;  %v2587_v0 = vmul.f32 %v9493_v3, %v9493_v3 }
 0x3a5   : > { %v2689_v15 = vadd.f32 %v2688_v37, %v2687_v28  ;;  %v2542_v50 = vadd.f32 %v2541_v22, %v2540_v44  ;;  %v2624_v18 = vmul.f32 %v2588_v19, %v9480_v34  ;;  %v2545_v22 = vsel %vm12430_vm2, %v2475_v9, 0.0 }
 0x3a6   : > { %v2543_v52 = vsel %vm12430_vm2, %v2474_v36, 0.0  ;;  %v2623_v58 = vmul.f32 %v2587_v0, %v9488_v30  ;;  %v9506_v6 = vpop.f32.mrb[36].mxu0 }
 0x3a7   : > { %12947 = vst [vmem:[#allocation5_spill] sm:$0xff] %v9506_v6  ;;  %v2544_v40 = vadd.f32 %v2543_v52, %v2542_v50  ;;  %v2691_v46 = vadd.f32 %v2690_v56, %v2689_v15  ;;  %v3247_v26 = vmul.f32 %v9506_v6, %v9113_v53  ;;  %v3360_v4 = vmul.f32 %v9506_v6, %v9506_v6  ;;  %v9512_v28 = vpop.f32.mrb[37].mxu0 }
 0x3a8   : > { %12948 = vst [vmem:[#allocation165_spill] sm:$0xff] %v9512_v28  ;;  %v2692_v44 = vsel %vm12430_vm2, %v2623_v58, 0.0  ;;  %v3246_v55 = vmul.f32 %v9512_v28, %v9111_v10  ;;  %v3359_v37 = vmul.f32 %v9512_v28, %v9512_v28  ;;  %v2694_v50 = vsel %vm12430_vm2, %v2624_v18, 0.0 }
 0x3a9   : > { %v2546_v19 = vadd.f32 %v2545_v22, %v2544_v40  ;;  %v2693_v36 = vadd.f32 %v2692_v44, %v2691_v46  ;;  %v3283_v0 = vsel %vm12430_vm2, %v3247_v26, 0.0  ;;  %v3396_v15 = vmul.f32 %v3360_v4, %v9113_v53 }
 0x3aa   : > { %v3282_v56 = vsel %vm12430_vm2, %v3246_v55, 0.0  ;;  %v3395_v9 = vmul.f32 %v3359_v37, %v9111_v10  ;;  %v9525_v52 = vpop.f32.mrb[38].mxu0 }
 0x3ab   : > { %12949 = vst [vmem:[#allocation166_spill] sm:$0xff] %v9525_v52  ;;  %v2547_v58 = vrot.slane %v2546_v19, 4  ;;  %v2695_v6 = vadd.f32 %v2694_v50, %v2693_v36  ;;  %v3432_v34 = vsel %vm12430_vm2, %v3396_v15, 0.0  ;;  %v3284_v30 = vadd.f32 %v3283_v0, %v3282_v56  ;;  %v9528_v28 = vpop.f32.mrb[39].mxu0 }
 0x3ac   : > { %12950 = vst [vmem:[#allocation82_spill] sm:$0xff] %v9528_v28  ;;  %v3431_v46 = vsel %vm12430_vm2, %v3395_v9, 0.0  ;;  %v3249_v26 = vmul.f32 %v9525_v52, %v9115_v51  ;;  %v3362_v4 = vmul.f32 %v9525_v52, %v9525_v52  ;;  %v3248_v18 = vmul.f32 %v9528_v28, %v9117_v31 }
 0x3ad   : > { %v2548_v40 = vadd.f32 %v2547_v58, %v2546_v19  ;;  %v2696_v22 = vrot.slane %v2695_v6, 4  ;;  %v3433_v44 = vadd.f32 %v3432_v34, %v3431_v46  ;;  %v3361_v55 = vmul.f32 %v9528_v28, %v9528_v28 }
 0x3ae   : > { %v3398_v37 = vmul.f32 %v3362_v4, %v9115_v51  ;;  %v3285_v36 = vsel %vm12430_vm2, %v3248_v18, 0.0  ;;  %v9541_v0 = vpop.f32.mrb[40].mxu0  ;;  %v3287_v19 = vsel %vm12430_vm2, %v3249_v26, 0.0 }
 0x3af   : > { %12951 = vst [vmem:[#allocation83_spill] sm:$0xff] %v9541_v0  ;;  %v2549_v15 = vrot.slane %v2548_v40, 2  ;;  %v2697_v50 = vadd.f32 %v2696_v22, %v2695_v6  ;;  %v3286_v56 = vadd.f32 %v3285_v36, %v3284_v30  ;;  %v3397_v9 = vmul.f32 %v3361_v55, %v9117_v31  ;;  %v9544_v52 = vpop.f32.mrb[41].mxu0 }
 0x3b0   : > { %12952 = vst [vmem:[#allocation191_spill] sm:$0xff] %v9544_v52  ;;  %v3251_v34 = vmul.f32 %v9541_v0, %v9119_v38  ;;  %v3364_v58 = vmul.f32 %v9541_v0, %v9541_v0  ;;  %v3250_v46 = vmul.f32 %v9544_v52, %v9121_v14  ;;  %v3436_v22 = vsel %vm12430_vm2, %v3398_v37, 0.0 }
 0x3b1   : > { %v2550_v4 = vadd.f32 %v2549_v15, %v2548_v40  ;;  %v2698_v18 = vrot.slane %v2697_v50, 2  ;;  %v3434_v6 = vsel %vm12430_vm2, %v3397_v9, 0.0  ;;  %v3288_v30 = vadd.f32 %v3287_v19, %v3286_v56 }
 0x3b2   : > { %v3435_v55 = vadd.f32 %v3434_v6, %v3433_v44  ;;  %v3400_v36 = vmul.f32 %v3364_v58, %v9119_v38  ;;  %v3289_v26 = vsel %vm12430_vm2, %v3250_v46, 0.0  ;;  %v9557_v28 = vpop.f32.mrb[42].mxu0  ;;  %v3363_v53 = vmul.f32 %v9544_v52, %v9544_v52 }
 0x3b3   : > { %12953 = vst [vmem:[#allocation192_spill] sm:$0xff] %v9557_v28  ;;  %v2551_v51 = vrot.slane %v2550_v4, 1  ;;  %v2699_v31 = vadd.f32 %v2698_v18, %v2697_v50  ;;  %v3290_v0 = vadd.f32 %v3289_v26, %v3288_v30  ;;  %v9561_v40 = vpop.f32.mrb[43].mxu0  ;;  %v3291_v15 = vsel %vm12430_vm2, %v3251_v34, 0.0 }
 0x3b4   : > { %12954 = vst [vmem:[#allocation118_spill] sm:$0xff] %v9561_v40  ;;  %v3437_v56 = vadd.f32 %v3436_v22, %v3435_v55  ;;  %v3253_v44 = vmul.f32 %v9557_v28, %v9123_v13  ;;  %v3366_v37 = vmul.f32 %v9557_v28, %v9557_v28  ;;  %v3399_v58 = vmul.f32 %v3363_v53, %v9121_v14 }
 0x3b5   : > { %v2552_v9 = vadd.f32 %v2551_v51, %v2550_v4  ;;  %v2700_v19 = vrot.slane %v2699_v31, 1  ;;  %v3252_v50 = vmul.f32 %v9561_v40, %v9125_v2  ;;  %v3440_v46 = vsel %vm12430_vm2, %v3400_v36, 0.0 }
 0x3b6   : > { %v9573_v18 = vsel %vm12430_vm2, %v3253_v44, 0.0  ;;  %v3292_v34 = vadd.f32 %v3291_v15, %v3290_v0  ;;  %v3365_v6 = vmul.f32 %v9561_v40, %v9561_v40  ;;  %v9577_v30 = vpop.f32.mrb[44].mxu0  ;;  %v3438_v51 = vsel %vm12430_vm2, %v3399_v58, 0.0 }
 0x3b7   : > { %12955 = vst [vmem:[#allocation119_spill] sm:$0xff] %v9577_v30  ;;  %v2701_v22 = vadd.f32 %v2700_v19, %v2699_v31  ;;  %v9579_v55 = vmul.f32 0.00390625, %v2552_v9  ;;  %v3293_v53 = vsel %vm12430_vm2, %v3252_v50, 0.0  ;;  %v9583_v4 = vpop.f32.mrb[45].mxu0  ;;  %v3439_v26 = vadd.f32 %v3438_v51, %v3437_v56  ;;  %v12962_v56 = vld [vmem:[#allocation4_spill] sm:$0xff]  ;;  %v12963_v9 = vld [vmem:[#allocation141_spill] sm:$0xff] }
 0x3b8   : > { %12956 = vst [vmem:[#allocation48_spill] sm:$0xff] %v9583_v4  ;;  %v3402_v36 = vmul.f32 %v3366_v37, %v9123_v13  ;;  %v3294_v44 = vadd.f32 %v3293_v53, %v3292_v34  ;;  %v3401_v0 = vmul.f32 %v3365_v6, %v9125_v2  ;;  %v3367_v37 = vmul.f32 %v9583_v4, %v9583_v4 }
 0x3b9   : > { %v2703_v15 = vmul.f32 0.00390625, %v2701_v22  ;;  %v2704_v28 = vmul.f32 %v9579_v55, %v9579_v55  ;;  %v3441_v31 = vadd.f32 %v3440_v46, %v3439_v26  ;;  %v12967_v26 = vld [vmem:[#allocation111_spill] sm:$0xff] }
 0x3ba   : > { %v9601_v50 = vpop.f32.mrb[46].mxu0  ;;  %v3444_v2 = vsel %vm12430_vm2, %v3402_v36, 0.0 }
 0x3bb   : > { %12957 = vst [vmem:[#allocation142_spill] sm:$0xff] %v9601_v50  ;;  %v2705_v34 = vsub.f32 %v2703_v15, %v2704_v28  ;;  %v9609_v53 = vpop.f32.mrb[47].mxu0  ;;  %v3442_v28 = vsel %vm12430_vm2, %v3401_v0, 0.0 }
 0x3bc   : > { %12958 = vst [vmem:[#allocation143_spill] sm:$0xff] %v9609_v53  ;;  %v3256_v0 = vmul.f32 %v9609_v53, %v12967_v26 }
 0x3bd   : > { %v2706_v6 = vmax.f32 %v2705_v34, 0.0  ;;  %v12965_v34 = vld [vmem:[#allocation74_spill] sm:$0xff] }
 0x3be   : > { %v9633_v15 = vpop.f32.mrb[48].mxu0  ;;  %v3255_v52 = vmul.f32 %v9577_v30, %v12965_v34  ;;  %v3301_v10 = vsel %vm12430_vm2, %v3256_v0, 0.0 }
 0x3bf   : > { %12959 = vst [vmem:[#allocation49_spill] sm:$0xff] %v9633_v15  ;;  %v2743_v22 = vadd.f32 1e-05, %v2706_v6  ;;  %v9641_v19 = vpop.f32.mrb[49].mxu0  ;;  %v12966_v6 = vld [vmem:[#allocation75_spill] sm:$0xff] }
 0x3c0   : > { %12960 = vst [vmem:[#allocation167_spill] sm:$0xff] %v9641_v19  ;;  %v3254_v13 = vmul.f32 %v9583_v4, %v12966_v6  ;;  %v3299_v14 = vsel %vm12430_vm2, %v3255_v52, 0.0 }
 0x3c1   : > { %6724 = vrsqrt.f32 %v2743_v22  ;;  %v3296_v22 = vadd.f32 %v9573_v18, %v3294_v44 }
 0x3c2   : > { %v9665_v51 = vpop.f32.mrb[50].mxu0  ;;  %v3297_v46 = vsel %vm12430_vm2, %v3254_v13, 0.0  ;;  %v3368_v13 = vmul.f32 %v9577_v30, %v9577_v30 }
 0x3c3   : > { %12961 = vst [vmem:[#allocation168_spill] sm:$0xff] %v9665_v51  ;;  %v9672_v40 = vpop.f32.mrb[51].mxu0  ;;  %v3443_v51 = vadd.f32 %v3442_v28, %v3441_v31  ;;  %v3298_v58 = vadd.f32 %v3297_v46, %v3296_v22  ;;  %v12969_v22 = vsub.f32 %v9493_v3, %v9579_v55 }
 0x3c4   : > { %12964 = vst [vmem:[#allocation84_spill] sm:$0xff] %v9672_v40  ;;  %v3403_v40 = vmul.f32 %v3367_v37, %v12966_v6 }
 0x3c5   : > { %v3445_v38 = vadd.f32 %v3444_v2, %v3443_v51  ;;  %v3300_v44 = vadd.f32 %v3299_v14, %v3298_v58  ;;  %v12970_v2 = vsub.f32 %v9141_v45, %v9579_v55  ;;  %v12971_v14 = vsub.f32 %v9135_v20, %v9579_v55 }
 0x3c6   : > { %v3446_v18 = vsel %vm12430_vm2, %v3403_v40, 0.0  ;;  %v12972_v40 = vsub.f32 %v9160_v43, %v9579_v55  ;;  %v12974_v45 = vsub.f32 %v9182_v47, %v9579_v55  ;;  %v12975_v20 = vsub.f32 %v9174_v41, %v9579_v55 }
 0x3c7   : > { %v9689_v31 = vadd.f32 %v3446_v18, %v3445_v38  ;;  %v9693_v36 = vadd.f32 %v3301_v10, %v3300_v44  ;;  %v12973_v10 = vsub.f32 %v9155_v63, %v9579_v55  ;;  %v12976_v43 = vsub.f32 %v9199_v24, %v9579_v55 }
 0x3c8   : > { %v12977_v63 = vsub.f32 %v9194_v16, %v9579_v55  ;;  %v12978_v47 = vsub.f32 %v9222_v49, %v9579_v55  ;;  %v12979_v41 = vsub.f32 %v9216_v1, %v9579_v55  ;;  %v12980_v24 = vsub.f32 %v9243_v27, %v9579_v55 }
 0x3c9   : > { %12968 = vst [vmem:[#allocation85_spill] sm:$0xff] %v9693_v36  ;;  %v12981_v16 = vsub.f32 %v9236_v7, %v9579_v55  ;;  %v12982_v49 = vsub.f32 %v9262_v23, %v9579_v55  ;;  %v12983_v1 = vsub.f32 %v9256_v35, %v9579_v55  ;;  %v12984_v27 = vsub.f32 %v9283_v54, %v9579_v55 }
 0x3ca   : > { %v12985_v7 = vsub.f32 %v9278_v5, %v9579_v55  ;;  %v12988_v35 = vsub.f32 %v9298_v25, %v9579_v55  ;;  %v12989_v54 = vsub.f32 %v9323_v33, %v9579_v55  ;;  %v12990_v5 = vsub.f32 %v9318_v17, %v9579_v55 }
 0x3cb   : > { %v6725_v28 = vpop.eup %6724  ;;  %v12992_v25 = vsub.f32 %v9340_v8, %v9579_v55  ;;  %v12993_v33 = vsub.f32 %v9367_v59, %v9579_v55  ;;  %v12994_v17 = vsub.f32 %v9360_v60, %v9579_v55  ;;  %v12996_v8 = vsub.f32 %v9380_v61, %v9579_v55 }
 0x3cc   : > { %v2779_v37 = vmul.f32 %v6725_v28, %v12969_v22  ;;  %v9701_v52 = vmul.f32 %v6725_v28, %v12970_v2  ;;  %v9706_v38 = vmul.f32 %v6725_v28, %v12971_v14  ;;  %v9711_v58 = vmul.f32 %v6725_v28, %v12972_v40 }
 0x3cd   : > { %v9716_v3 = vmul.f32 %v6725_v28, %v12973_v10  ;;  %v9721_v51 = vmul.f32 %v6725_v28, %v12974_v45  ;;  %v9726_v46 = vmul.f32 %v6725_v28, %v12975_v20  ;;  %v9731_v0 = vmul.f32 %v6725_v28, %v12976_v43 }
 0x3ce   : > { %vm2815_vm10 = vcmp.ge.f32.partialorder %v2779_v37, 0.0  ;;  %v2851_v18 = vmul.f32 0.2, %v2779_v37  ;;  %v9736_v44 = vmul.f32 %v6725_v28, %v12977_v63  ;;  %v9741_v22 = vmul.f32 %v6725_v28, %v12978_v47  ;;  %v12986_v47 = vld [vmem:[#allocation47_spill] sm:$0xff] }
 0x3cf   : > { %v9746_v2 = vmul.f32 %v6725_v28, %v12979_v41  ;;  %v9751_v14 = vmul.f32 %v6725_v28, %v12980_v24  ;;  %v9756_v40 = vmul.f32 %v6725_v28, %v12981_v16  ;;  %v9761_v10 = vmul.f32 %v6725_v28, %v12982_v49 }
 0x3d0   : > { %v2887_v45 = vsel %vm2815_vm10, %v2779_v37, %v2851_v18  ;;  %v9766_v20 = vmul.f32 %v6725_v28, %v12983_v1  ;;  %v9771_v43 = vmul.f32 %v6725_v28, %v12984_v27  ;;  %v9776_v63 = vmul.f32 %v6725_v28, %v12985_v7 }
 0x3d1   : > { %v2923_v23 = vmul.f32 %v2887_v45, %v12986_v47  ;;  %v12987_v37 = vsub.f32 %v9306_v29, %v9579_v55  ;;  %v9787_v41 = vmul.f32 %v6725_v28, %v12988_v35  ;;  %v9792_v24 = vmul.f32 %v6725_v28, %v12989_v54 }
 0x3d2   : > { %v9797_v16 = vmul.f32 %v6725_v28, %v12990_v5  ;;  %v12991_v29 = vsub.f32 %v9346_v48, %v9579_v55  ;;  %v9807_v45 = vmul.f32 %v6725_v28, %v12992_v25  ;;  %v9812_v1 = vmul.f32 %v6725_v28, %v12993_v33 }
 0x3d3   : > { %v9782_v18 = vmul.f32 %v6725_v28, %v12987_v37  ;;  %3665 = vst.msk [vmem:[#allocation2 + $0x123] sm:$0xff] %vm12430_vm2, %v2923_v23  ;;  %v9818_v27 = vmul.f32 %v6725_v28, %v12994_v17  ;;  %v12995_v48 = vsub.f32 %v9386_v39, %v9579_v55  ;;  %v9828_v37 = vmul.f32 %v6725_v28, %v12996_v8 }
 0x3d4   : > { %v9802_v49 = vmul.f32 %v6725_v28, %v12991_v29  ;;  %v12997_v59 = vsub.f32 %v9409_v32, %v9579_v55  ;;  %v12998_v60 = vsub.f32 %v9404_v42, %v9579_v55  ;;  %v12999_v39 = vsub.f32 %v9432_v11, %v9579_v55 }
 0x3d5   : > { %v9823_v7 = vmul.f32 %v6725_v28, %v12995_v48  ;;  %v13000_v61 = vsub.f32 %v9424_v62, %v9579_v55  ;;  %v13001_v32 = vsub.f32 %v9449_v57, %v9579_v55  ;;  %v13002_v42 = vsub.f32 %v9444_v12, %v9579_v55  ;;  %v13006_v12 = vld [vmem:[#allocation110_spill] sm:$0xff] }
 0x3d6   : > { %v9833_v35 = vmul.f32 %v6725_v28, %v12997_v59  ;;  %v9838_v23 = vmul.f32 %v6725_v28, %v12998_v60  ;;  %v9843_v54 = vmul.f32 %v6725_v28, %v12999_v39  ;;  %v13003_v11 = vsub.f32 %v9472_v21, %v9579_v55 }
 0x3d7   : > { %v9848_v5 = vmul.f32 %v6725_v28, %v13000_v61  ;;  %v9853_v29 = vmul.f32 %v6725_v28, %v13001_v32  ;;  %v9858_v25 = vmul.f32 %v6725_v28, %v13002_v42  ;;  %v13004_v62 = vsub.f32 %v12962_v56, %v9579_v55  ;;  %v13013_v32 = vld [vmem:[#allocation41_spill] sm:$0xff] }
 0x3d8   : > { %v9863_v33 = vmul.f32 %v6725_v28, %v13003_v11  ;;  %v13005_v57 = vsub.f32 %v12963_v9, %v9579_v55  ;;  %v3404_v8 = vmul.f32 %v3368_v13, %v12965_v34  ;;  %v3257_v59 = vmul.f32 %v9601_v50, %v13006_v12 }
 0x3d9   : > { %v9868_v17 = vmul.f32 %v6725_v28, %v13004_v62  ;;  %v3370_v21 = vmul.f32 %v9601_v50, %v9601_v50  ;;  %v3369_v60 = vmul.f32 %v9609_v53, %v9609_v53  ;;  %v9898_v61 = vmul.f32 %v9633_v15, %v9633_v15 }
 0x3da   : > { %v9873_v48 = vmul.f32 %v6725_v28, %v13005_v57  ;;  %v3448_v56 = vsel %vm12430_vm2, %v3404_v8, 0.0  ;;  %v9884_v39 = vsel %vm12430_vm2, %v3257_v59, 0.0  ;;  %v13010_v28 = vld [vmem:[#allocation40_spill] sm:$0xff]  ;;  %v9902_v42 = vmul.f32 %v9641_v19, %v13013_v32 }
 0x3db   : > { %13007 = vst [vmem:[#allocation193_spill] sm:$0xff] %v9884_v39  ;;  %v9887_v55 = vmul.f32 %v3370_v21, %v13006_v12  ;;  %v9890_v9 = vmul.f32 %v3369_v60, %v12967_v26  ;;  %v9894_v13 = vmul.f32 %v9633_v15, %v13010_v28  ;;  %13012 = vst [vmem:[#allocation14_spill] sm:$0xff] %v9898_v61  ;;  %vm2781_vm11 = vcmp.ge.f32.partialorder %v9701_v52, 0.0 }
 0x3dc   : > { %13014 = vst [vmem:[#allocation15_spill] sm:$0xff] %v9902_v42  ;;  %vm2782_vm12 = vcmp.ge.f32.partialorder %v9706_v38, 0.0  ;;  %vm2783_vm13 = vcmp.ge.f32.partialorder %v9711_v58, 0.0  ;;  %v9909_v11 = vmul.f32 %v9641_v19, %v9641_v19  ;;  %vm2784_vm14 = vcmp.ge.f32.partialorder %v9716_v3, 0.0 }
 0x3dd   : > { %13008 = vst [vmem:[#allocation194_spill] sm:$0xff] %v9887_v55  ;;  %13009 = vst [vmem:[#allocation120_spill] sm:$0xff] %v9890_v9  ;;  %vm2785_vm15 = vcmp.ge.f32.partialorder %v9721_v51, 0.0  ;;  %vm2786_vm0 = vcmp.ge.f32.partialorder %v9726_v46, 0.0  ;;  %vm2787_vm1 = vcmp.ge.f32.partialorder %v9731_v0, 0.0  ;;  %vm2788_vm3 = vcmp.ge.f32.partialorder %v9736_v44, 0.0 }
 0x3de   : > { %13011 = vst [vmem:[#allocation121_spill] sm:$0xff] %v9894_v13  ;;  %13015 = vst [vmem:[#allocation144_spill] sm:$0xff] %v9909_v11  ;;  %vm2789_vm5 = vcmp.ge.f32.partialorder %v9741_v22, 0.0  ;;  %vm2790_vm7 = vcmp.ge.f32.partialorder %v9746_v2, 0.0  ;;  %v2817_v62 = vmul.f32 0.2, %v9701_v52  ;;  %v9926_v21 = vadd.f32 %v3448_v56, %v9689_v31 }
 0x3df   : > { %vm2792_vm10 = vcmp.ge.f32.partialorder %v9756_v40, 0.0  ;;  %v2818_v57 = vmul.f32 0.2, %v9706_v38  ;;  %v2819_v8 = vmul.f32 0.2, %v9711_v58  ;;  %vm2797_vm9 = vcmp.ge.f32.partialorder %v9782_v18, 0.0 }
 0x3e0   : > { %v2820_v59 = vmul.f32 0.2, %v9716_v3  ;;  %13016 = vst [vmem:[#allocation145_spill] sm:$0xff] %v9926_v21  ;;  %v2821_v60 = vmul.f32 0.2, %v9721_v51  ;;  %v9938_v50 = vsel %vm2781_vm11, %v9701_v52, %v2817_v62  ;;  %vm2801_vm2 = vcmp.ge.f32.partialorder %v9802_v49, 0.0 }
 0x3e1   : > { %v2822_v15 = vmul.f32 0.2, %v9726_v46  ;;  %v2823_v19 = vmul.f32 0.2, %v9731_v0  ;;  %v2824_v31 = vmul.f32 0.2, %v9736_v44  ;;  %v9950_v30 = vsel %vm2782_vm12, %v9706_v38, %v2818_v57 }
 0x3e2   : > { %v2825_v56 = vmul.f32 0.2, %v9741_v22  ;;  %v2826_v53 = vmul.f32 0.2, %v9746_v2  ;;  %13017 = vst [vmem:[#allocation50_spill] sm:$0xff] %v9950_v30  ;;  %vm2805_vm4 = vcmp.ge.f32.partialorder %v9823_v7, 0.0  ;;  %v9962_v47 = vsel %vm2783_vm13, %v9711_v58, %v2819_v8 }
 0x3e3   : > { %v2827_v52 = vmul.f32 0.2, %v9751_v14  ;;  %v2828_v62 = vmul.f32 0.2, %v9756_v40  ;;  %v2829_v4 = vmul.f32 0.2, %v9761_v10  ;;  %v2856_v11 = vsel %vm2784_vm14, %v9716_v3, %v2820_v59 }
 0x3e4   : > { %13018 = vst [vmem:[#allocation51_spill] sm:$0xff] %v9962_v47  ;;  %vm2809_vm6 = vcmp.ge.f32.partialorder %v9843_v54, 0.0  ;;  %v2830_v38 = vmul.f32 0.2, %v9766_v20  ;;  %v2831_v57 = vmul.f32 0.2, %v9771_v43  ;;  %v2857_v61 = vsel %vm2785_vm15, %v9721_v51, %v2821_v60 }
 0x3e5   : > { %v2832_v13 = vmul.f32 0.2, %v9776_v63  ;;  %vm2811_vm12 = vcmp.ge.f32.partialorder %v9853_v29, 0.0  ;;  %vm2812_vm11 = vcmp.ge.f32.partialorder %v9858_v25, 0.0  ;;  %vm2813_vm8 = vcmp.ge.f32.partialorder %v9863_v33, 0.0 }
 0x3e6   : > { %v2833_v58 = vmul.f32 0.2, %v9782_v18  ;;  %v2834_v8 = vmul.f32 0.2, %v9787_v41  ;;  %v2835_v42 = vmul.f32 0.2, %v9792_v24  ;;  %v2858_v39 = vsel %vm2786_vm0, %v9726_v46, %v2822_v15 }
 0x3e7   : > { %vm2814_vm14 = vcmp.ge.f32.partialorder %v9868_v17, 0.0  ;;  %vm2816_vm13 = vcmp.ge.f32.partialorder %v9873_v48, 0.0  ;;  %v2836_v3 = vmul.f32 0.2, %v9797_v16  ;;  %v2837_v59 = vmul.f32 0.2, %v9802_v49 }
 0x3e8   : > { %v2838_v21 = vmul.f32 0.2, %v9807_v45  ;;  %v2839_v36 = vmul.f32 0.2, %v9812_v1  ;;  %v2840_v9 = vmul.f32 0.2, %v9818_v27  ;;  %v2859_v60 = vsel %vm2787_vm1, %v9731_v0, %v2823_v19 }
 0x3e9   : > { %v2841_v51 = vmul.f32 0.2, %v9823_v7  ;;  %v2842_v55 = vmul.f32 0.2, %v9828_v37  ;;  %v2843_v28 = vmul.f32 0.2, %v9833_v35  ;;  %v2860_v15 = vsel %vm2788_vm3, %v9736_v44, %v2824_v31 }
 0x3ea   : > { %v2844_v32 = vmul.f32 0.2, %v9838_v23  ;;  %v2845_v46 = vmul.f32 0.2, %v9843_v54  ;;  %v2846_v12 = vmul.f32 0.2, %v9848_v5  ;;  %v2861_v19 = vsel %vm2789_vm5, %v9741_v22, %v2825_v56 }
 0x3eb   : > { %v2847_v26 = vmul.f32 0.2, %v9853_v29  ;;  %v2848_v0 = vmul.f32 0.2, %v9858_v25  ;;  %v2849_v34 = vmul.f32 0.2, %v9863_v33  ;;  %v2862_v44 = vsel %vm2790_vm7, %v9746_v2, %v2826_v53 }
 0x3ec   : > { %v2850_v6 = vmul.f32 0.2, %v9868_v17  ;;  %v2852_v31 = vmul.f32 0.2, %v9873_v48  ;;  %vm13019_vm15 = vcmp.ge.f32.partialorder %v9751_v14, 0.0  ;;  %v2864_v22 = vsel %vm2792_vm10, %v9756_v40, %v2828_v62  ;;  %v13045_v62 = vld [vmem:[#allocation74_spill] sm:$0xff] }
 0x3ed   : > { %v2863_v47 = vsel %vm13019_vm15, %v9751_v14, %v2827_v52  ;;  %vm13020_vm0 = vcmp.ge.f32.partialorder %v9761_v10, 0.0  ;;  %vm13021_vm1 = vcmp.ge.f32.partialorder %v9766_v20, 0.0  ;;  %vm13022_vm3 = vcmp.ge.f32.partialorder %v9771_v43, 0.0 }
 0x3ee   : > { %v2865_v56 = vsel %vm13020_vm0, %v9761_v10, %v2829_v4  ;;  %v2866_v30 = vsel %vm13021_vm1, %v9766_v20, %v2830_v38  ;;  %v2867_v53 = vsel %vm13022_vm3, %v9771_v43, %v2831_v57  ;;  %vm13023_vm5 = vcmp.ge.f32.partialorder %v9776_v63, 0.0  ;;  %v13048_v38 = vld [vmem:[#allocation111_spill] sm:$0xff] }
 0x3ef   : > { %v2868_v2 = vsel %vm13023_vm5, %v9776_v63, %v2832_v13  ;;  %v2869_v14 = vsel %vm2797_vm9, %v9782_v18, %v2833_v58  ;;  %vm13024_vm7 = vcmp.ge.f32.partialorder %v9787_v41, 0.0  ;;  %vm13025_vm10 = vcmp.ge.f32.partialorder %v9792_v24, 0.0  ;;  %v13041_v13 = vld [vmem:[#allocation108_spill] sm:$0xff]  ;;  %v13049_v58 = vld [vmem:[#allocation110_spill] sm:$0xff] }
 0x3f0   : > { %v2870_v4 = vsel %vm13024_vm7, %v9787_v41, %v2834_v8  ;;  %v2871_v40 = vsel %vm13025_vm10, %v9792_v24, %v2835_v42  ;;  %vm13026_vm15 = vcmp.ge.f32.partialorder %v9797_v16, 0.0  ;;  %v2873_v20 = vsel %vm2801_vm2, %v9802_v49, %v2837_v59  ;;  %v13043_v42 = vld [vmem:[#allocation38_spill] sm:$0xff]  ;;  %v13050_v8 = vld [vmem:[#allocation41_spill] sm:$0xff] }
 0x3f1   : > { %v2872_v10 = vsel %vm13026_vm15, %v9797_v16, %v2836_v3  ;;  %vm13027_vm0 = vcmp.ge.f32.partialorder %v9807_v45, 0.0  ;;  %vm13028_vm9 = vcmp.ge.f32.partialorder %v9812_v1, 0.0  ;;  %vm13029_vm1 = vcmp.ge.f32.partialorder %v9818_v27, 0.0  ;;  %v13051_v3 = vld [vmem:[#allocation40_spill] sm:$0xff]  ;;  %v13056_v59 = vld [vmem:[#allocation77_spill] sm:$0xff] }
 0x3f2   : > { %v2874_v43 = vsel %vm13027_vm0, %v9807_v45, %v2838_v21  ;;  %v2875_v63 = vsel %vm13028_vm9, %v9812_v1, %v2839_v36  ;;  %v2876_v18 = vsel %vm13029_vm1, %v9818_v27, %v2840_v9  ;;  %v2877_v41 = vsel %vm2805_vm4, %v9823_v7, %v2841_v51  ;;  %v13039_v9 = vld [vmem:[#allocation72_spill] sm:$0xff] }
 0x3f3   : > { %vm13030_vm3 = vcmp.ge.f32.partialorder %v9828_v37, 0.0  ;;  %vm13031_vm2 = vcmp.ge.f32.partialorder %v9833_v35, 0.0  ;;  %vm13032_vm5 = vcmp.ge.f32.partialorder %v9838_v23, 0.0  ;;  %v2881_v49 = vsel %vm2809_vm6, %v9843_v54, %v2845_v46  ;;  %v13058_v46 = vld [vmem:[#allocation113_spill] sm:$0xff] }
 0x3f4   : > { %v2878_v24 = vsel %vm13030_vm3, %v9828_v37, %v2842_v55  ;;  %v2879_v16 = vsel %vm13031_vm2, %v9833_v35, %v2843_v28  ;;  %v2880_v36 = vsel %vm13032_vm5, %v9838_v23, %v2844_v32  ;;  %vm13033_vm7 = vcmp.ge.f32.partialorder %v9848_v5, 0.0  ;;  %v13034_v23 = vld [vmem:[#allocation36_spill] sm:$0xff] }
 0x3f5   : > { %v2882_v45 = vsel %vm13033_vm7, %v9848_v5, %v2846_v12  ;;  %v2883_v1 = vsel %vm2811_vm12, %v9853_v29, %v2847_v26  ;;  %v2884_v27 = vsel %vm2812_vm11, %v9858_v25, %v2848_v0  ;;  %v2885_v7 = vsel %vm2813_vm8, %v9863_v33, %v2849_v34  ;;  %v13035_v26 = vld [vmem:[#allocation37_spill] sm:$0xff]  ;;  %v13036_v5 = vld [vmem:[#allocation50_spill] sm:$0xff]  ;;  %v13038_v25 = vld [vmem:[#allocation51_spill] sm:$0xff] }
 0x3f6   : > { %v2886_v37 = vsel %vm2814_vm14, %v9868_v17, %v2850_v6  ;;  %v2888_v35 = vsel %vm2816_vm13, %v9873_v48, %v2852_v31  ;;  %v2889_v54 = vmul.f32 %v9938_v50, %v13034_v23  ;;  %v2890_v29 = vmul.f32 %v13036_v5, %v13035_v26  ;;  %v13037_v12 = vld [vmem:[#allocation73_spill] sm:$0xff]  ;;  %v13042_v6 = vld [vmem:[#allocation39_spill] sm:$0xff]  ;;  %v13065_v31 = vld [vmem:[#allocation42_spill] sm:$0xff] }
 0x3f7   : > { %v2891_v55 = vmul.f32 %v13038_v25, %v13037_v12  ;;  %v2892_v28 = vmul.f32 %v2856_v11, %v13039_v9  ;;  %v13040_v34 = vld [vmem:[#allocation109_spill] sm:$0xff]  ;;  %v2894_v32 = vmul.f32 %v2858_v39, %v13041_v13  ;;  %v2895_v17 = vmul.f32 %v2859_v60, %v13042_v6  ;;  %v13044_v48 = vld [vmem:[#allocation75_spill] sm:$0xff]  ;;  %v13057_v60 = vld [vmem:[#allocation76_spill] sm:$0xff] }
 0x3f8   : > { %v2893_v33 = vmul.f32 %v2857_v61, %v13040_v34  ;;  %v2896_v21 = vmul.f32 %v2860_v15, %v13043_v42  ;;  %v2897_v52 = vmul.f32 %v2861_v19, %v13044_v48  ;;  %v2898_v50 = vmul.f32 %v2862_v44, %v13045_v62  ;;  %v13059_v19 = vld [vmem:[#allocation112_spill] sm:$0xff]  ;;  %v13073_v5 = vld [vmem:[#allocation114_spill] sm:$0xff]  ;;  %v13074_v25 = vld [vmem:[#allocation45_spill] sm:$0xff] }
 0x3f9   : > { %vm13046_vm4 = vcmask 64512   ;;  %v2899_v57 = vmul.f32 %v2863_v47, %v13048_v38  ;;  %v2900_v11 = vmul.f32 %v2864_v22, %v13049_v58  ;;  %v2901_v61 = vmul.f32 %v2865_v56, %v13050_v8  ;;  %v13066_v56 = vld [vmem:[#allocation79_spill] sm:$0xff] }
 0x3fa   : > { %3631 = vst.msk [vmem:[#allocation2 + $0x13] sm:$0xff] %vm13046_vm4, %v2889_v54  ;;  %vm13047_vm6 = vmmov %vm13046_vm4  ;;  %v2902_v39 = vmul.f32 %v2866_v30, %v13051_v3  ;;  %v2903_v51 = vmul.f32 %v2867_v53, %v13056_v59  ;;  %v2904_v15 = vmul.f32 %v2868_v2, %v13057_v60  ;;  %v2905_v47 = vmul.f32 %v2869_v14, %v13058_v46  ;;  %v13064_v30 = vld [vmem:[#allocation43_spill] sm:$0xff]  ;;  %v13067_v54 = vld [vmem:[#allocation78_spill] sm:$0xff] }
 0x3fb   : > { %3632 = vst.msk [vmem:[#allocation2 + $0x1b] sm:$0xff] %vm13047_vm6, %v2890_v29  ;;  %vm13052_vm8 = vmmov %vm13046_vm4  ;;  %v2906_v0 = vmul.f32 %v2870_v4, %v13059_v19  ;;  %v2907_v44 = vmul.f32 %v2871_v40, %v13064_v30  ;;  %v2908_v22 = vmul.f32 %v2872_v10, %v13065_v31  ;;  %v2909_v53 = vmul.f32 %v2873_v20, %v13066_v56  ;;  %v13072_v14 = vld [vmem:[#allocation115_spill] sm:$0xff]  ;;  %v13080_v20 = vld [vmem:[#allocation80_spill] sm:$0xff] }
 0x3fc   : > { %3633 = vst.msk [vmem:[#allocation2 + $0x23] sm:$0xff] %vm13052_vm8, %v2891_v55  ;;  %vm13053_vm11 = vmmov %vm13046_vm4  ;;  %v2910_v2 = vmul.f32 %v2874_v43, %v13067_v54  ;;  %v2911_v4 = vmul.f32 %v2875_v63, %v13072_v14  ;;  %v2912_v29 = vmul.f32 %v2876_v18, %v13073_v5  ;;  %v2913_v40 = vmul.f32 %v2877_v41, %v13074_v25  ;;  %v13075_v55 = vld [vmem:[#allocation44_spill] sm:$0xff] }
 0x3fd   : > { %3634 = vst.msk [vmem:[#allocation2 + $0x2b] sm:$0xff] %vm13053_vm11, %v2892_v28  ;;  %vm13054_vm12 = vmmov %vm13046_vm4  ;;  %v2914_v10 = vmul.f32 %v2878_v24, %v13075_v55  ;;  %v2915_v43 = vmul.f32 %v2879_v16, %v13080_v20  ;;  %v13081_v28 = vld [vmem:[#allocation164_spill] sm:$0xff] }
 0x3fe   : > { %3635 = vst.msk [vmem:[#allocation2 + $0x33] sm:$0xff] %vm13054_vm12, %v2893_v33  ;;  %vm13055_vm13 = vmmov %vm13046_vm4  ;;  %v2916_v33 = vmul.f32 %v2880_v36, %v13081_v28  ;;  %v13088_v41 = vld [vmem:[#allocation116_spill] sm:$0xff] }
 0x3ff   : > { %3636 = vst.msk [vmem:[#allocation2 + $0x3b] sm:$0xff] %vm13055_vm13, %v2894_v32  ;;  %vm13060_vm14 = vmmov %vm13046_vm4  ;;  %v13082_v32 = vld [vmem:[#allocation189_spill] sm:$0xff]  ;;  %v2919_v24 = vmul.f32 %v2883_v1, %v13088_v41  ;;  %v13100_v1 = vld [vmem:[#allocation194_spill] sm:$0xff] }
 0x400   : > { %3637 = vst.msk [vmem:[#allocation2 + $0x43] sm:$0xff] %vm13060_vm14, %v2895_v17  ;;  %vm13061_vm10 = vmmov %vm13046_vm4  ;;  %v2917_v63 = vmul.f32 %v2881_v49, %v13082_v32  ;;  %v13083_v17 = vld [vmem:[#allocation81_spill] sm:$0xff]  ;;  %v13095_v49 = vld [vmem:[#allocation140_spill] sm:$0xff] }
 0x401   : > { %3638 = vst.msk [vmem:[#allocation2 + $0x4b] sm:$0xff] %vm13061_vm10, %v2896_v21  ;;  %vm13062_vm15 = vmmov %vm13046_vm4  ;;  %v2918_v18 = vmul.f32 %v2882_v45, %v13083_v17  ;;  %v13089_v21 = vld [vmem:[#allocation190_spill] sm:$0xff]  ;;  %v2924_v45 = vmul.f32 %v2888_v35, %v13095_v49  ;;  %v13110_v35 = vld [vmem:[#allocation145_spill] sm:$0xff] }
 0x402   : > { %3639 = vst.msk [vmem:[#allocation2 + $0x53] sm:$0xff] %vm13062_vm15, %v2897_v52  ;;  %vm13063_vm0 = vmmov %vm13046_vm4  ;;  %v2920_v52 = vmul.f32 %v2884_v27, %v13089_v21 }
 0x403   : > { %3640 = vst.msk [vmem:[#allocation2 + $0x5b] sm:$0xff] %vm13063_vm0, %v2898_v50  ;;  %vm13068_vm9 = vmmov %vm13063_vm0  ;;  %v13090_v50 = vld [vmem:[#allocation46_spill] sm:$0xff] }
 0x404   : > { %3641 = vst.msk [vmem:[#allocation2 + $0x63] sm:$0xff] %vm13068_vm9, %v2899_v57  ;;  %vm13069_vm1 = vmmov %vm13063_vm0  ;;  %v2921_v16 = vmul.f32 %v2885_v7, %v13090_v50  ;;  %v13091_v57 = vld [vmem:[#allocation117_spill] sm:$0xff]  ;;  %v13102_v7 = vld [vmem:[#allocation120_spill] sm:$0xff] }
 0x405   : > { %3642 = vst.msk [vmem:[#allocation2 + $0x6b] sm:$0xff] %vm13069_vm1, %v2900_v11  ;;  %vm13070_vm3 = vmmov %vm13063_vm0  ;;  %v2922_v36 = vmul.f32 %v2886_v37, %v13091_v57  ;;  %v13104_v11 = vld [vmem:[#allocation85_spill] sm:$0xff] }
 0x406   : > { %3643 = vst.msk [vmem:[#allocation2 + $0x73] sm:$0xff] %vm13070_vm3, %v2901_v61  ;;  %vm13071_vm2 = vmmov %vm13063_vm0  ;;  %v13105_v61 = vld [vmem:[#allocation193_spill] sm:$0xff]  ;;  %v3817_v58 = vld [vmem:[#allocation2 + $0x34] sm:$0xff] }
 0x407   : > { %3644 = vst.msk [vmem:[#allocation2 + $0x7b] sm:$0xff] %vm13071_vm2, %v2902_v39  ;;  %vm13076_vm5 = vmmov %vm13063_vm0  ;;  %v3304_v39 = vadd.f32 %v13105_v61, %v13104_v11  ;;  %v3708_v61 = vld [vmem:[#allocation2 + $0x29] sm:$0xff]  ;;  %v3818_v38 = vld [vmem:[#allocation2 + $0x3c] sm:$0xff] }
 0x408   : > { %3645 = vst.msk [vmem:[#allocation2 + $0x83] sm:$0xff] %vm13076_vm5, %v2903_v51  ;;  %vm13077_vm7 = vmmov %vm13063_vm0  ;;  %v3706_v51 = vld [vmem:[#allocation2 + $0x19] sm:$0xff]  ;;  %v3819_v34 = vld [vmem:[#allocation2 + $0x44] sm:$0xff] }
 0x409   : > { %3646 = vst.msk [vmem:[#allocation2 + $0x8b] sm:$0xff] %vm13077_vm7, %v2904_v15  ;;  %vm13078_vm4 = vmmov %vm13063_vm0  ;;  %v3705_v15 = vld [vmem:[#allocation2 + $0x11] sm:$0xff]  ;;  %3965 = vrot.lane.b32.xlu0 %v3706_v51, %s6766_s25  ;;  %v3854_v62 = vld [vmem:[#allocation2 + $0x3d] sm:$0xff] }
 0x40a   : > { %3647 = vst.msk [vmem:[#allocation2 + $0x93] sm:$0xff] %vm13078_vm4, %v2905_v47  ;;  %vm13079_vm6 = vmmov %vm13063_vm0  ;;  %3963 = vrot.lane.b32.xlu1 %v3705_v15, %s6766_s25  ;;  %v13123_v51 = vld [vmem:[#allocation6_spill] sm:$0xff]  ;;  %v3782_v42 = vld [vmem:[#allocation2 + $0x3b] sm:$0xff] }
 0x40b   : > { %3648 = vst.msk [vmem:[#allocation2 + $0x9b] sm:$0xff] %vm13079_vm6, %v2906_v0  ;;  %vm13084_vm8 = vmmov %vm13063_vm0  ;;  %v13111_v0 = vld [vmem:[#allocation14_spill] sm:$0xff]  ;;  %v3376_v15 = vmul.f32 %v13123_v51, %v13123_v51  ;;  %v3783_v13 = vld [vmem:[#allocation2 + $0x43] sm:$0xff] }
 0x40c   : > { %3649 = vst.msk [vmem:[#allocation2 + $0xa3] sm:$0xff] %vm13084_vm8, %v2907_v44  ;;  %vm13085_vm11 = vmmov %vm13063_vm0  ;;  %v3408_v44 = vmul.f32 %v13111_v0, %v13051_v3  ;;  %v3889_v48 = vld [vmem:[#allocation2 + $0x36] sm:$0xff]  ;;  %v3856_v12 = vld [vmem:[#allocation2 + $0x4d] sm:$0xff] }
 0x40d   : > { %3650 = vst.msk [vmem:[#allocation2 + $0xab] sm:$0xff] %vm13085_vm11, %v2908_v22  ;;  %vm13086_vm12 = vmmov %vm13063_vm0  ;;  %v13112_v22 = vld [vmem:[#allocation15_spill] sm:$0xff]  ;;  %3969 = vrot.lane.b32.xlu0 %v3708_v61, %s6766_s25  ;;  %v3859_v23 = vld [vmem:[#allocation2 + $0x65] sm:$0xff] }
 0x40e   : > { %3651 = vst.msk [vmem:[#allocation2 + $0xb3] sm:$0xff] %vm13086_vm12, %v2909_v53  ;;  %vm13087_vm13 = vmmov %vm13063_vm0  ;;  %v3895_v26 = vld [vmem:[#allocation2 + $0x66] sm:$0xff] }
 0x40f   : > { %3652 = vst.msk [vmem:[#allocation2 + $0xbb] sm:$0xff] %vm13087_vm13, %v2910_v2  ;;  %vm13092_vm14 = vmmov %vm13063_vm0  ;;  %v13114_v2 = vld [vmem:[#allocation144_spill] sm:$0xff] }
 0x410   : > { %3653 = vst.msk [vmem:[#allocation2 + $0xc3] sm:$0xff] %vm13092_vm14, %v2911_v4  ;;  %vm13093_vm10 = vmmov %vm13063_vm0  ;;  %v3407_v4 = vmul.f32 %v13114_v2, %v13050_v8  ;;  %v3263_v2 = vmul.f32 %v13123_v51, %v13059_v19 }
 0x411   : > { %3654 = vst.msk [vmem:[#allocation2 + $0xcb] sm:$0xff] %vm13093_vm10, %v2912_v29  ;;  %vm13094_vm15 = vmmov %vm13063_vm0 }
 0x412   : > { %3655 = vst.msk [vmem:[#allocation2 + $0xd3] sm:$0xff] %vm13094_vm15, %v2913_v40  ;;  %vm13096_vm9 = vmmov %vm13063_vm0  ;;  %v13116_v40 = vld [vmem:[#allocation168_spill] sm:$0xff] }
 0x413   : > { %3656 = vst.msk [vmem:[#allocation2 + $0xdb] sm:$0xff] %vm13063_vm0, %v2914_v10  ;;  %vm13097_vm1 = vmmov %vm13063_vm0  ;;  %v3374_v10 = vmul.f32 %v13116_v40, %v13116_v40 }
 0x414   : > { %3657 = vst.msk [vmem:[#allocation2 + $0xe3] sm:$0xff] %vm13096_vm9, %v2915_v43  ;;  %vm13098_vm3 = vmmov %vm13063_vm0  ;;  %v13117_v43 = vld [vmem:[#allocation84_spill] sm:$0xff] }
 0x415   : > { %3658 = vst.msk [vmem:[#allocation2 + $0xeb] sm:$0xff] %vm13097_vm1, %v2916_v33  ;;  %vm13099_vm2 = vmmov %vm13063_vm0  ;;  %v3260_v33 = vmul.f32 %v13117_v43, %v13056_v59  ;;  %v3410_v0 = vmul.f32 %v3374_v10, %v13057_v60 }
 0x416   : > { %3659 = vst.msk [vmem:[#allocation2 + $0xf3] sm:$0xff] %vm13098_vm3, %v2917_v63  ;;  %vm13101_vm5 = vmmov %vm13063_vm0  ;;  %v3373_v63 = vmul.f32 %v13117_v43, %v13117_v43 }
 0x417   : > { %3660 = vst.msk [vmem:[#allocation2 + $0xfb] sm:$0xff] %vm13099_vm2, %v2918_v18  ;;  %v3452_v27 = vsel %vm13101_vm5, %v13100_v1, 0.0  ;;  %vm13103_vm7 = vmmov %vm13063_vm0  ;;  %v13118_v18 = vld [vmem:[#allocation121_spill] sm:$0xff] }
 0x418   : > { %v3450_v37 = vsel %vm13103_vm7, %v13102_v7, 0.0  ;;  %vm13106_vm4 = vmmov %vm13063_vm0  ;;  %v3409_v11 = vmul.f32 %v3373_v63, %v13056_v59  ;;  %v13126_v63 = vld [vmem:[#allocation9_spill] sm:$0xff] }
 0x419   : > { %3661 = vst.msk [vmem:[#allocation2 + $0x103] sm:$0xff] %vm13106_vm4, %v2919_v24  ;;  %vm13107_vm6 = vmmov %vm13063_vm0  ;;  %v3451_v47 = vadd.f32 %v3450_v37, %v13110_v35  ;;  %v3264_v10 = vmul.f32 %v13126_v63, %v13064_v30 }
 0x41a   : > { %3662 = vst.msk [vmem:[#allocation2 + $0x10b] sm:$0xff] %vm13107_vm6, %v2920_v52  ;;  %vm13108_vm8 = vmmov %vm13063_vm0 }
 0x41b   : > { %3663 = vst.msk [vmem:[#allocation2 + $0x113] sm:$0xff] %vm13108_vm8, %v2921_v16  ;;  %vm13109_vm11 = vmmov %vm13063_vm0  ;;  %v3453_v52 = vadd.f32 %v3452_v27, %v3451_v47  ;;  %v3456_v47 = vsel %vm13063_vm0, %v3408_v44, 0.0 }
 0x41c   : > { %3664 = vst.msk [vmem:[#allocation2 + $0x11b] sm:$0xff] %vm13109_vm11, %v2922_v36  ;;  %vm13113_vm12 = vmmov %vm13063_vm0  ;;  %v3261_v36 = vmul.f32 %v13116_v40, %v13057_v60 }
 0x41d   : > { %v3305_v53 = vsel %vm13113_vm12, %v13112_v22, 0.0  ;;  %vm13115_vm13 = vmmov %vm13063_vm0 }
 0x41e   : > { %3666 = vst.msk [vmem:[#allocation2 + $0x12b] sm:$0xff] %vm13115_vm13, %v2924_v45  ;;  %v3306_v29 = vadd.f32 %v3305_v53, %v3304_v39  ;;  %vm13119_vm14 = vmmov %vm13063_vm0  ;;  %v13121_v45 = vld [vmem:[#allocation7_spill] sm:$0xff]  ;;  %v3707_v39 = vld [vmem:[#allocation2 + $0x21] sm:$0xff] }
 0x41f   : > { %v3307_v24 = vsel %vm13119_vm14, %v13118_v18, 0.0  ;;  %vm13120_vm10 = vmmov %vm13063_vm0  ;;  %v3375_v1 = vmul.f32 %v13121_v45, %v13121_v45  ;;  %v3262_v27 = vmul.f32 %v13121_v45, %v13058_v46  ;;  %3967 = vrot.lane.b32.xlu1 %v3707_v39, %s6766_s25  ;;  %v3377_v18 = vmul.f32 %v13126_v63, %v13126_v63 }
 0x420   : > { %v3454_v16 = vsel %vm13120_vm10, %v3407_v4, 0.0  ;;  %v3308_v7 = vadd.f32 %v3307_v24, %v3306_v29  ;;  %vm13122_vm15 = vmmov %vm13063_vm0 }
 0x421   : > { %v3309_v37 = vsel %vm13122_vm15, %v3260_v33, 0.0  ;;  %v3455_v35 = vadd.f32 %v3454_v16, %v3453_v52  ;;  %vm13124_vm9 = vmmov %vm13063_vm0  ;;  %v3411_v33 = vmul.f32 %v3375_v1, %v13058_v46  ;;  %v3710_v52 = vld [vmem:[#allocation2 + $0x39] sm:$0xff]  ;;  %v3709_v16 = vld [vmem:[#allocation2 + $0x31] sm:$0xff] }
 0x422   : > { %v3310_v22 = vadd.f32 %v3309_v37, %v3308_v7  ;;  %v3458_v53 = vsel %vm13124_vm9, %v3409_v11, 0.0  ;;  %vm13125_vm1 = vmmov %vm13063_vm0  ;;  %3973 = vrot.lane.b32.xlu0 %v3710_v52, %s6766_s25  ;;  %v13128_v37 = vld [vmem:[#allocation8_spill] sm:$0xff] }
 0x423   : > { %v3311_v4 = vsel %vm13125_vm1, %v3261_v36, 0.0  ;;  %v3457_v29 = vadd.f32 %v3456_v47, %v3455_v35  ;;  %vm13127_vm3 = vmmov %vm13063_vm0  ;;  %3971 = vrot.lane.b32.xlu1 %v3709_v16, %s6766_s25  ;;  %v3412_v36 = vmul.f32 %v3376_v15, %v13059_v19  ;;  %v3378_v1 = vmul.f32 %v13128_v37, %v13128_v37  ;;  %v3711_v52 = vld [vmem:[#allocation2 + $0x41] sm:$0xff] }
 0x424   : > { %v3312_v24 = vadd.f32 %v3311_v4, %v3310_v22  ;;  %v3313_v44 = vsel %vm13127_vm3, %v3262_v27, 0.0  ;;  %vm13129_vm2 = vmmov %vm13063_vm0  ;;  %v3265_v27 = vmul.f32 %v13128_v37, %v13065_v31  ;;  %v3413_v22 = vmul.f32 %v3377_v18, %v13064_v30 }
 0x425   : > { %v3459_v7 = vadd.f32 %v3458_v53, %v3457_v29  ;;  %v3460_v11 = vsel %vm13129_vm2, %v3410_v0, 0.0  ;;  %vm13130_vm5 = vmmov %vm13063_vm0  ;;  %v13132_v53 = vld [vmem:[#allocation11_spill] sm:$0xff]  ;;  %v3712_v29 = vld [vmem:[#allocation2 + $0x49] sm:$0xff]  ;;  %v3414_v18 = vmul.f32 %v3378_v1, %v13065_v31 }
 0x426   : > { %v3314_v61 = vadd.f32 %v3313_v44, %v3312_v24  ;;  %v3315_v39 = vsel %vm13130_vm5, %v3263_v2, 0.0  ;;  %vm13131_vm7 = vmmov %vm13063_vm0  ;;  %v3379_v4 = vmul.f32 %v13132_v53, %v13132_v53  ;;  %v3266_v0 = vmul.f32 %v13132_v53, %v13066_v56  ;;  %3977 = vrot.lane.b32.xlu0 %v3712_v29, %s6766_s25  ;;  %v13135_v24 = vld [vmem:[#allocation10_spill] sm:$0xff]  ;;  %v13174_v31 = vld [vmem:[#allocation47_spill] sm:$0xff] }
 0x427   : > { %v3461_v35 = vadd.f32 %v3460_v11, %v3459_v7  ;;  %v3462_v47 = vsel %vm13131_vm7, %v3411_v33, 0.0  ;;  %vm13133_vm4 = vmmov %vm13063_vm0  ;;  %3975 = vrot.lane.b32.xlu1 %v3711_v52, %s6766_s25  ;;  %v3380_v44 = vmul.f32 %v13135_v24, %v13135_v24  ;;  %v3714_v52 = vld [vmem:[#allocation2 + $0x59] sm:$0xff]  ;;  %v3713_v1 = vld [vmem:[#allocation2 + $0x51] sm:$0xff] }
 0x428   : > { %v3316_v15 = vadd.f32 %v3315_v39, %v3314_v61  ;;  %v3317_v16 = vsel %vm13133_vm4, %v3264_v10, 0.0  ;;  %vm13134_vm6 = vmmov %vm13063_vm0  ;;  %v3267_v10 = vmul.f32 %v13135_v24, %v13067_v54 }
 0x429   : > { %v3463_v2 = vadd.f32 %v3462_v47, %v3461_v35  ;;  %v3464_v33 = vsel %vm13134_vm6, %v3412_v36, 0.0  ;;  %vm13136_vm8 = vmmov %vm13063_vm0  ;;  %v3415_v35 = vmul.f32 %v3379_v4, %v13066_v56  ;;  %v13138_v47 = vld [vmem:[#allocation33_spill] sm:$0xff]  ;;  %v3416_v4 = vmul.f32 %v3380_v44, %v13067_v54 }
 0x42a   : > { %v3318_v7 = vadd.f32 %v3317_v16, %v3316_v15  ;;  %v3319_v11 = vsel %vm13136_vm8, %v3265_v27, 0.0  ;;  %vm13137_vm11 = vmmov %vm13063_vm0  ;;  %v3381_v29 = vmul.f32 %v13138_v47, %v13138_v47  ;;  %v3268_v15 = vmul.f32 %v13138_v47, %v13072_v14  ;;  %3981 = vrot.lane.b32.xlu0 %v3714_v52, %s6766_s25  ;;  %v13141_v16 = vld [vmem:[#allocation32_spill] sm:$0xff]  ;;  %v3716_v56 = vld [vmem:[#allocation2 + $0x69] sm:$0xff] }
 0x42b   : > { %v3465_v61 = vadd.f32 %v3464_v33, %v3463_v2  ;;  %v3466_v39 = vsel %vm13137_vm11, %v3413_v22, 0.0  ;;  %vm13139_vm12 = vmmov %vm13063_vm0  ;;  %3979 = vrot.lane.b32.xlu1 %v3713_v1, %s6766_s25  ;;  %v3382_v2 = vmul.f32 %v13141_v16, %v13141_v16  ;;  %v13144_v52 = vld [vmem:[#allocation68_spill] sm:$0xff] }
 0x42c   : > { %v3320_v36 = vadd.f32 %v3319_v11, %v3318_v7  ;;  %v3321_v30 = vsel %vm13139_vm12, %v3266_v0, 0.0  ;;  %vm13140_vm13 = vmmov %vm13063_vm0  ;;  %v3269_v0 = vmul.f32 %v13141_v16, %v13073_v5  ;;  %v3383_v1 = vmul.f32 %v13144_v52, %v13144_v52  ;;  %v3715_v44 = vld [vmem:[#allocation2 + $0x61] sm:$0xff] }
 0x42d   : > { %v3467_v27 = vadd.f32 %v3466_v39, %v3465_v61  ;;  %v3468_v22 = vsel %vm13140_vm13, %v3414_v18, 0.0  ;;  %vm13142_vm14 = vmmov %vm13063_vm0  ;;  %v3417_v39 = vmul.f32 %v3381_v29, %v13072_v14  ;;  %v3418_v29 = vmul.f32 %v3382_v2, %v13073_v5  ;;  %v3718_v14 = vld [vmem:[#allocation2 + $0x79] sm:$0xff]  ;;  %v3717_v2 = vld [vmem:[#allocation2 + $0x71] sm:$0xff] }
 0x42e   : > { %v3322_v33 = vadd.f32 %v3321_v30, %v3320_v36  ;;  %v3323_v7 = vsel %vm13142_vm14, %v3267_v10, 0.0  ;;  %vm13143_vm10 = vmmov %vm13063_vm0  ;;  %v3270_v30 = vmul.f32 %v13144_v52, %v13074_v25  ;;  %3985 = vrot.lane.b32.xlu0 %v3716_v56, %s6766_s25  ;;  %v13146_v36 = vld [vmem:[#allocation12_spill] sm:$0xff]  ;;  %v3419_v56 = vmul.f32 %v3383_v1, %v13074_v25  ;;  %v3720_v25 = vld [vmem:[#allocation2 + $0x89] sm:$0xff] }
 0x42f   : > { %v3469_v11 = vadd.f32 %v3468_v22, %v3467_v27  ;;  %v3470_v61 = vsel %vm13143_vm10, %v3415_v35, 0.0  ;;  %vm13145_vm15 = vmmov %vm13063_vm0  ;;  %3983 = vrot.lane.b32.xlu1 %v3715_v44, %s6766_s25  ;;  %v3472_v35 = vsel %vm13063_vm0, %v3416_v4, 0.0  ;;  %v3384_v27 = vmul.f32 %v13146_v36, %v13146_v36 }
 0x430   : > { %v3324_v18 = vadd.f32 %v3323_v7, %v3322_v33  ;;  %v3325_v54 = vsel %vm13145_vm15, %v3268_v15, 0.0  ;;  %vm13147_vm9 = vmmov %vm13063_vm0  ;;  %v3271_v15 = vmul.f32 %v13146_v36, %v13075_v55 }
 0x431   : > { %v3471_v10 = vadd.f32 %v3470_v61, %v3469_v11  ;;  %v3327_v33 = vsel %vm13147_vm9, %v3269_v0, 0.0  ;;  %vm13148_vm1 = vmmov %vm13063_vm0  ;;  %v13149_v61 = vld [vmem:[#allocation13_spill] sm:$0xff]  ;;  %v3420_v1 = vmul.f32 %v3384_v27, %v13075_v55 }
 0x432   : > { %v3326_v22 = vadd.f32 %v3325_v54, %v3324_v18  ;;  %v3474_v11 = vsel %vm13148_vm1, %v3417_v39, 0.0  ;;  %v3385_v44 = vmul.f32 %v13149_v61, %v13149_v61  ;;  %vm13150_vm3 = vmmov %vm13063_vm0  ;;  %v3272_v54 = vmul.f32 %v13149_v61, %v13080_v20  ;;  %3989 = vrot.lane.b32.xlu0 %v3718_v14, %s6766_s25  ;;  %v13152_v18 = vld [vmem:[#allocation69_spill] sm:$0xff] }
 0x433   : > { %v3473_v7 = vadd.f32 %v3472_v35, %v3471_v10  ;;  %v3329_v5 = vsel %vm13150_vm3, %v3270_v30, 0.0  ;;  %3987 = vrot.lane.b32.xlu1 %v3717_v2, %s6766_s25  ;;  %vm13151_vm2 = vmmov %vm13063_vm0  ;;  %v3386_v10 = vmul.f32 %v13152_v18, %v13152_v18  ;;  %v3273_v30 = vmul.f32 %v13152_v18, %v13081_v28  ;;  %v3719_v27 = vld [vmem:[#allocation2 + $0x81] sm:$0xff] }
 0x434   : > { %v3328_v4 = vadd.f32 %v3327_v33, %v3326_v22  ;;  %v3476_v39 = vsel %vm13151_vm2, %v3418_v29, 0.0  ;;  %vm13153_vm5 = vmmov %vm13063_vm0  ;;  %v3421_v14 = vmul.f32 %v3385_v44, %v13080_v20  ;;  %v3722_v20 = vld [vmem:[#allocation2 + $0x99] sm:$0xff] }
 0x435   : > { %v3475_v0 = vadd.f32 %v3474_v11, %v3473_v7  ;;  %v3331_v22 = vsel %vm13153_vm5, %v3271_v15, 0.0  ;;  %vm13154_vm7 = vmmov %vm13063_vm0  ;;  %v13155_v11 = vld [vmem:[#allocation105_spill] sm:$0xff]  ;;  %v3422_v44 = vmul.f32 %v3386_v10, %v13081_v28  ;;  %v3721_v10 = vld [vmem:[#allocation2 + $0x91] sm:$0xff] }
 0x436   : > { %v3330_v35 = vadd.f32 %v3329_v5, %v3328_v4  ;;  %v3478_v7 = vsel %vm13154_vm7, %v3419_v56, 0.0  ;;  %v3387_v2 = vmul.f32 %v13155_v11, %v13155_v11  ;;  %vm13156_vm4 = vmmov %vm13063_vm0  ;;  %v3274_v5 = vmul.f32 %v13155_v11, %v13082_v32  ;;  %3993 = vrot.lane.b32.xlu0 %v3720_v25, %s6766_s25  ;;  %v13158_v4 = vld [vmem:[#allocation104_spill] sm:$0xff] }
 0x437   : > { %v3477_v33 = vadd.f32 %v3476_v39, %v3475_v0  ;;  %v3333_v55 = vsel %vm13156_vm4, %v3272_v54, 0.0  ;;  %3991 = vrot.lane.b32.xlu1 %v3719_v27, %s6766_s25  ;;  %vm13157_vm6 = vmmov %vm13063_vm0  ;;  %v3388_v0 = vmul.f32 %v13158_v4, %v13158_v4  ;;  %v3275_v54 = vmul.f32 %v13158_v4, %v13083_v17 }
 0x438   : > { %v3332_v29 = vadd.f32 %v3331_v22, %v3330_v35  ;;  %v3480_v56 = vsel %vm13157_vm6, %v3420_v1, 0.0  ;;  %vm13159_vm8 = vmmov %vm13063_vm0  ;;  %v3423_v25 = vmul.f32 %v3387_v2, %v13082_v32  ;;  %v3724_v32 = vld [vmem:[#allocation2 + $0xa9] sm:$0xff] }
 0x439   : > { %v3479_v15 = vadd.f32 %v3478_v7, %v3477_v33  ;;  %v3335_v35 = vsel %vm13159_vm8, %v3273_v30, 0.0  ;;  %vm13160_vm11 = vmmov %vm13063_vm0  ;;  %v13161_v7 = vld [vmem:[#allocation35_spill] sm:$0xff]  ;;  %v3424_v2 = vmul.f32 %v3388_v0, %v13083_v17  ;;  %v3723_v0 = vld [vmem:[#allocation2 + $0xa1] sm:$0xff] }
 0x43a   : > { %v3334_v39 = vadd.f32 %v3333_v55, %v3332_v29  ;;  %v3482_v33 = vsel %vm13160_vm11, %v3421_v14, 0.0  ;;  %v3389_v27 = vmul.f32 %v13161_v7, %v13161_v7  ;;  %vm13162_vm12 = vmmov %vm13063_vm0  ;;  %v3276_v55 = vmul.f32 %v13161_v7, %v13088_v41  ;;  %3997 = vrot.lane.b32.xlu0 %v3722_v20, %s6766_s25  ;;  %v13164_v29 = vld [vmem:[#allocation34_spill] sm:$0xff] }
 0x43b   : > { %v3481_v22 = vadd.f32 %v3480_v56, %v3479_v15  ;;  %v3337_v28 = vsel %vm13162_vm12, %v3274_v5, 0.0  ;;  %3995 = vrot.lane.b32.xlu1 %v3721_v10, %s6766_s25  ;;  %vm13163_vm13 = vmmov %vm13063_vm0  ;;  %v3390_v15 = vmul.f32 %v13164_v29, %v13164_v29  ;;  %v3277_v5 = vmul.f32 %v13164_v29, %v13089_v21 }
 0x43c   : > { %v3336_v1 = vadd.f32 %v3335_v35, %v3334_v39  ;;  %v3484_v14 = vsel %vm13163_vm13, %v3422_v44, 0.0  ;;  %vm13165_vm14 = vmmov %vm13063_vm0  ;;  %v3425_v20 = vmul.f32 %v3389_v27, %v13088_v41  ;;  %v3726_v41 = vld [vmem:[#allocation2 + $0xb9] sm:$0xff] }
 0x43d   : > { %v3483_v30 = vadd.f32 %v3482_v33, %v3481_v22  ;;  %v3339_v39 = vsel %vm13165_vm14, %v3275_v54, 0.0  ;;  %vm13166_vm10 = vmmov %vm13063_vm0  ;;  %v13167_v33 = vld [vmem:[#allocation71_spill] sm:$0xff]  ;;  %v3426_v27 = vmul.f32 %v3390_v15, %v13089_v21  ;;  %vm13283_vm14 = vcmask 130048  }
 0x43e   : > { %v3338_v56 = vadd.f32 %v3337_v28, %v3336_v1  ;;  %v3486_v22 = vsel %vm13166_vm10, %v3423_v25, 0.0  ;;  %v3391_v10 = vmul.f32 %v13167_v33, %v13167_v33  ;;  %vm13168_vm15 = vmmov %vm13063_vm0  ;;  %v3278_v28 = vmul.f32 %v13167_v33, %v13090_v50  ;;  %4001 = vrot.lane.b32.xlu0 %v3724_v32, %s6766_s25  ;;  %v13169_v1 = vld [vmem:[#allocation70_spill] sm:$0xff] }
 0x43f   : > { %v3485_v35 = vadd.f32 %v3484_v14, %v3483_v30  ;;  %v3341_v17 = vsel %vm13168_vm15, %v3276_v55, 0.0  ;;  %3999 = vrot.lane.b32.xlu1 %v3723_v0, %s6766_s25  ;;  %v3488_v25 = vsel %vm13063_vm0, %v3424_v2, 0.0  ;;  %v3392_v30 = vmul.f32 %v13169_v1, %v13169_v1  ;;  %vm13170_vm9 = vmmov %vm13063_vm0  ;;  %v3725_v15 = vld [vmem:[#allocation2 + $0xb1] sm:$0xff] }
 0x440   : > { %v3340_v44 = vadd.f32 %v3339_v39, %v3338_v56  ;;  %v3343_v56 = vsel %vm13170_vm9, %v3277_v5, 0.0  ;;  %v3279_v55 = vmul.f32 %v13169_v1, %v13091_v57  ;;  %vm13171_vm1 = vmmov %vm13063_vm0  ;;  %v3427_v32 = vmul.f32 %v3391_v10, %v13090_v50  ;;  %v3727_v50 = vld [vmem:[#allocation2 + $0xc1] sm:$0xff] }
 0x441   : > { %v3487_v54 = vadd.f32 %v3486_v22, %v3485_v35  ;;  %v3490_v35 = vsel %vm13171_vm1, %v3425_v20, 0.0  ;;  %v13172_v22 = vld [vmem:[#allocation107_spill] sm:$0xff]  ;;  %vm13173_vm3 = vmmov %vm13063_vm0  ;;  %vm5151_vm10 = vcmask 326656   ;;  %vm13284_vm15 = vcmask 195584  }
 0x442   : > { %v3342_v14 = vadd.f32 %v3341_v17, %v3340_v44  ;;  %v3393_v0 = vmul.f32 %v13172_v22, %v13172_v22  ;;  %v3345_v21 = vsel %vm13173_vm3, %v3278_v28, 0.0  ;;  %v3280_v17 = vmul.f32 %v13172_v22, %v13174_v31  ;;  %4005 = vrot.lane.b32.xlu0 %v3726_v41, %s6766_s25  ;;  %vm13175_vm2 = vmmov %vm13063_vm0  ;;  %v13176_v44 = vld [vmem:[#allocation106_spill] sm:$0xff] }
 0x443   : > { %v3489_v39 = vadd.f32 %v3488_v25, %v3487_v54  ;;  %4003 = vrot.lane.b32.xlu1 %v3725_v15, %s6766_s25  ;;  %v3492_v20 = vsel %vm13175_vm2, %v3426_v27, 0.0  ;;  %v3394_v10 = vmul.f32 %v13176_v44, %v13176_v44  ;;  %v3428_v54 = vmul.f32 %v3392_v30, %v13091_v57  ;;  %vm13177_vm5 = vmmov %vm13063_vm0  ;;  %v3728_v15 = vld [vmem:[#allocation2 + $0xc9] sm:$0xff] }
 0x444   : > { %v3344_v2 = vadd.f32 %v3343_v56, %v3342_v14  ;;  %v3347_v14 = vsel %vm13177_vm5, %v3279_v55, 0.0  ;;  %v3281_v28 = vmul.f32 %v13176_v44, %v13095_v49  ;;  %vm13178_vm7 = vmmov %vm13063_vm0  ;;  %v3429_v41 = vmul.f32 %v3393_v0, %v13174_v31 }
 0x445   : > { %v3491_v5 = vadd.f32 %v3490_v35, %v3489_v39  ;;  %v3494_v39 = vsel %vm13178_vm7, %v3427_v32, 0.0  ;;  %vm13179_vm4 = vmmov %vm13063_vm0  ;;  %v3430_v30 = vmul.f32 %v3394_v10, %v13095_v49  ;;  %v3732_v10 = vld [vmem:[#allocation2 + $0xe9] sm:$0xff]  ;;  %vm13285_vm9 = vcmask 261120  }
 0x446   : > { %v3346_v25 = vadd.f32 %v3345_v21, %v3344_v2  ;;  %v3349_v27 = vsel %vm13179_vm4, %v3280_v17, 0.0  ;;  %4009 = vrot.lane.b32.xlu0 %v3728_v15, %s6766_s25  ;;  %vm13180_vm6 = vmmov %vm13063_vm0  ;;  %v3734_v15 = vld [vmem:[#allocation2 + $0xf9] sm:$0xff]  ;;  %v13195_v49 = vld [vmem:[#allocation142_spill] sm:$0xff]  ;;  %vm5225_vm1 = vcmask 457728   ;;  %vm5262_vm3 = vcmask 523264  }
 0x447   : > { %v3493_v56 = vadd.f32 %v3492_v20, %v3491_v5  ;;  %4007 = vrot.lane.b32.xlu1 %v3727_v50, %s6766_s25  ;;  %v3496_v21 = vsel %vm13180_vm6, %v3428_v54, 0.0  ;;  %vm13181_vm8 = vmmov %vm13063_vm0  ;;  %v3730_v20 = vld [vmem:[#allocation2 + $0xd9] sm:$0xff]  ;;  %vm5308_vm2 = vcmask 588800  }
 0x448   : > { %v3348_v35 = vadd.f32 %v3347_v14, %v3346_v25  ;;  %v3351_v2 = vsel %vm13181_vm8, %v3281_v28, 0.0  ;;  %vm13182_vm11 = vmmov %vm13063_vm0  ;;  %v3729_v25 = vld [vmem:[#allocation2 + $0xd1] sm:$0xff] }
 0x449   : > { %v3495_v46 = vadd.f32 %v3494_v39, %v3493_v56  ;;  %v3498_v0 = vsel %vm13182_vm11, %v3429_v41, 0.0  ;;  %vm13183_vm12 = vmmov %vm13063_vm0  ;;  %v3731_v39 = vld [vmem:[#allocation2 + $0xe1] sm:$0xff] }
 0x44a   : > { %v3350_v55 = vadd.f32 %v3349_v27, %v3348_v35  ;;  %4013 = vrot.lane.b32.xlu0 %v3730_v20, %s6766_s25  ;;  %v3500_v50 = vsel %vm13183_vm12, %v3430_v30, 0.0  ;;  %v3733_v27 = vld [vmem:[#allocation2 + $0xf1] sm:$0xff]  ;;  %vm13282_vm13 = vmmov %vm13063_vm0  ;;  %vm5188_vm0 = vcmask 392192  }
 0x44b   : > { %v3497_v32 = vadd.f32 %v3496_v21, %v3495_v46  ;;  %4011 = vrot.lane.b32.xlu1 %v3729_v25, %s6766_s25  ;;  %vm13286_vm5 = vmmov %vm13179_vm4 }
 0x44c   : > { %v3352_v5 = vadd.f32 %v3351_v2, %v3350_v55  ;;  %vm13287_vm7 = vmmov %vm13283_vm14 }
 0x44d   : > { %v3499_v14 = vadd.f32 %v3498_v0, %v3497_v32  ;;  %v3736_v32 = vld [vmem:[#allocation2 + $0x109] sm:$0xff]  ;;  %v3735_v0 = vld [vmem:[#allocation2 + $0x101] sm:$0xff]  ;;  %vm13288_vm4 = vmmov %vm13284_vm15 }
 0x44e   : > { %v3353_v17 = vrot.slane %v3352_v5, 4  ;;  %4017 = vrot.lane.b32.xlu0 %v3732_v10, %s6766_s25  ;;  %vm13289_vm6 = vmmov %vm13285_vm9 }
 0x44f   : > { %v3501_v54 = vadd.f32 %v3500_v50, %v3499_v14  ;;  %4015 = vrot.lane.b32.xlu1 %v3731_v39, %s6766_s25  ;;  %v13185_v39 = vld [vmem:[#allocation5_spill] sm:$0xff]  ;;  %vm13290_vm8 = vmmov %vm13286_vm5 }
 0x450   : > { %v3354_v56 = vadd.f32 %v3353_v17, %v3352_v5  ;;  %v3738_v17 = vld [vmem:[#allocation2 + $0x119] sm:$0xff]  ;;  %vm13291_vm11 = vmmov %vm13287_vm7 }
 0x451   : > { %v3502_v35 = vrot.slane %v3501_v54, 4  ;;  %vm13292_vm12 = vmmov %vm13288_vm4 }
 0x452   : > { %v3355_v46 = vrot.slane %v3354_v56, 2  ;;  %4021 = vrot.lane.b32.xlu0 %v3734_v15, %s6766_s25  ;;  %v13187_v15 = vld [vmem:[#allocation166_spill] sm:$0xff] }
 0x453   : > { %v3503_v28 = vadd.f32 %v3502_v35, %v3501_v54  ;;  %4019 = vrot.lane.b32.xlu1 %v3733_v27, %s6766_s25  ;;  %v3737_v54 = vld [vmem:[#allocation2 + $0x111] sm:$0xff] }
 0x454   : > { %v3356_v41 = vadd.f32 %v3355_v46, %v3354_v56  ;;  %v13184_v56 = vld [vmem:[#allocation165_spill] sm:$0xff] }
 0x455   : > { %v3504_v21 = vrot.slane %v3503_v28, 2 }
 0x456   : > { %v3357_v30 = vrot.slane %v3356_v41, 1  ;;  %4025 = vrot.lane.b32.xlu0 %v3736_v32, %s6766_s25 }
 0x457   : > { %v3505_v55 = vadd.f32 %v3504_v21, %v3503_v28  ;;  %4023 = vrot.lane.b32.xlu1 %v3735_v0, %s6766_s25  ;;  %v13186_v28 = vld [vmem:[#allocation82_spill] sm:$0xff] }
 0x458   : > { %v3358_v2 = vadd.f32 %v3357_v30, %v3356_v41  ;;  %v3740_v30 = vld [vmem:[#allocation2 + $0xa] sm:$0xff] }
 0x459   : > { %v3506_v5 = vrot.slane %v3505_v55, 1  ;;  %v13190_v0 = vld [vmem:[#allocation118_spill] sm:$0xff] }
 0x45a   : > { %v10368_v20 = vmul.f32 0.00390625, %v3358_v2  ;;  %4029 = vrot.lane.b32.xlu0 %v3738_v17, %s6766_s25  ;;  %v13189_v2 = vld [vmem:[#allocation83_spill] sm:$0xff] }
 0x45b   : > { %v3507_v25 = vadd.f32 %v3506_v5, %v3505_v55  ;;  %4027 = vrot.lane.b32.xlu1 %v3737_v54, %s6766_s25  ;;  %v3739_v55 = vld [vmem:[#allocation2 + $0x2] sm:$0xff] }
 0x45c   : > { %v3510_v14 = vmul.f32 %v10368_v20, %v10368_v20  ;;  %v3527_v50 = vsub.f32 %v13117_v43, %v10368_v20  ;;  %v3513_v10 = vsub.f32 %v13184_v56, %v10368_v20  ;;  %v3514_v35 = vsub.f32 %v13185_v39, %v10368_v20  ;;  %v13188_v43 = vld [vmem:[#allocation191_spill] sm:$0xff]  ;;  %v13192_v54 = vld [vmem:[#allocation48_spill] sm:$0xff] }
 0x45d   : > { %v3509_v46 = vmul.f32 0.00390625, %v3507_v25  ;;  %v3515_v41 = vsub.f32 %v13186_v28, %v10368_v20  ;;  %v3516_v27 = vsub.f32 %v13187_v15, %v10368_v20  ;;  %v3517_v21 = vsub.f32 %v13188_v43, %v10368_v20  ;;  %v13191_v25 = vld [vmem:[#allocation192_spill] sm:$0xff]  ;;  %v13193_v28 = vld [vmem:[#allocation119_spill] sm:$0xff] }
 0x45e   : > { %v3518_v32 = vsub.f32 %v13189_v2, %v10368_v20  ;;  %v3519_v5 = vsub.f32 %v13190_v0, %v10368_v20  ;;  %v3520_v17 = vsub.f32 %v13191_v25, %v10368_v20  ;;  %v3521_v56 = vsub.f32 %v13192_v54, %v10368_v20  ;;  %v13194_v43 = vld [vmem:[#allocation143_spill] sm:$0xff]  ;;  %v13197_v0 = vld [vmem:[#allocation49_spill] sm:$0xff]  ;;  %4105 = vrot.lane.b32.xlu0 %v3740_v30, %s6768_s27 }
 0x45f   : > { %v3511_v39 = vsub.f32 %v3509_v46, %v3510_v14  ;;  %v3522_v15 = vsub.f32 %v13193_v28, %v10368_v20  ;;  %v3523_v31 = vsub.f32 %v13194_v43, %v10368_v20  ;;  %v3524_v57 = vsub.f32 %v13195_v49, %v10368_v20  ;;  %v13196_v2 = vld [vmem:[#allocation167_spill] sm:$0xff]  ;;  %4103 = vrot.lane.b32.xlu1 %v3739_v55, %s6768_s27 }
 0x460   : > { %v3525_v19 = vsub.f32 %v13196_v2, %v10368_v20  ;;  %v3526_v59 = vsub.f32 %v13197_v0, %v10368_v20  ;;  %v3528_v25 = vsub.f32 %v13116_v40, %v10368_v20  ;;  %v3529_v14 = vsub.f32 %v13121_v45, %v10368_v20  ;;  %v10432_v43 = vld [vmem:[#allocation2 + $0x12] sm:$0xff]  ;;  %v10458_v2 = vld [vmem:[#allocation2 + $0x22] sm:$0xff] }
 0x461   : > { %v3512_v46 = vmax.f32 %v3511_v39, 0.0  ;;  %v3530_v49 = vsub.f32 %v13123_v51, %v10368_v20  ;;  %v3531_v54 = vsub.f32 %v13126_v63, %v10368_v20  ;;  %v3532_v28 = vsub.f32 %v13128_v37, %v10368_v20 }
 0x462   : > { %v3533_v40 = vsub.f32 %v13132_v53, %v10368_v20  ;;  %v3534_v45 = vsub.f32 %v13135_v24, %v10368_v20  ;;  %v3535_v30 = vsub.f32 %v13138_v47, %v10368_v20  ;;  %v3536_v55 = vsub.f32 %v13141_v16, %v10368_v20  ;;  %v10430_v53 = vld [vmem:[#allocation2 + $0x1a] sm:$0xff] }
 0x463   : > { %v3549_v39 = vadd.f32 1e-05, %v3512_v46  ;;  %v3537_v51 = vsub.f32 %v13144_v52, %v10368_v20  ;;  %v3538_v63 = vsub.f32 %v13146_v36, %v10368_v20  ;;  %v3539_v37 = vsub.f32 %v13149_v61, %v10368_v20  ;;  %4109 = vrot.lane.b32.xlu0 %v10430_v53, %s6768_s27  ;;  %4107 = vrot.lane.b32.xlu1 %v10432_v43, %s6768_s27 }
 0x464   : > { %v3540_v24 = vsub.f32 %v13152_v18, %v10368_v20  ;;  %v3541_v47 = vsub.f32 %v13155_v11, %v10368_v20  ;;  %v3542_v16 = vsub.f32 %v13158_v4, %v10368_v20  ;;  %v3543_v52 = vsub.f32 %v13161_v7, %v10368_v20  ;;  %v10456_v7 = vld [vmem:[#allocation2 + $0x2a] sm:$0xff] }
 0x465   : > { %6726 = vrsqrt.f32 %v3549_v39  ;;  %v3544_v36 = vsub.f32 %v13164_v29, %v10368_v20  ;;  %v3545_v61 = vsub.f32 %v13167_v33, %v10368_v20  ;;  %v3546_v18 = vsub.f32 %v13169_v1, %v10368_v20  ;;  %v10464_v29 = vld [vmem:[#allocation2 + $0x3a] sm:$0xff]  ;;  %v10466_v33 = vld [vmem:[#allocation2 + $0x32] sm:$0xff] }
 0x466   : > { %v3547_v11 = vsub.f32 %v13172_v22, %v10368_v20  ;;  %v3548_v4 = vsub.f32 %v13176_v44, %v10368_v20  ;;  %v10474_v44 = vld [vmem:[#allocation2 + $0x4a] sm:$0xff]  ;;  %v10476_v20 = vld [vmem:[#allocation2 + $0x42] sm:$0xff] }
 0x467   : > { %4113 = vrot.lane.b32.xlu0 %v10456_v7, %s6768_s27  ;;  %4111 = vrot.lane.b32.xlu1 %v10458_v2, %s6768_s27 }
 0x46b   : > { %4117 = vrot.lane.b32.xlu0 %v10464_v29, %s6768_s27  ;;  %4115 = vrot.lane.b32.xlu1 %v10466_v33, %s6768_s27 }
 0x46f   : > { %v6727_v1 = vpop.eup %6726  ;;  %4121 = vrot.lane.b32.xlu0 %v10474_v44, %s6768_s27  ;;  %4119 = vrot.lane.b32.xlu1 %v10476_v20, %s6768_s27 }
 0x470   : > { %v10472_v22 = vmul.f32 %v6727_v1, %v3527_v50  ;;  %v10478_v0 = vmul.f32 %v6727_v1, %v3513_v10  ;;  %v10480_v46 = vmul.f32 %v6727_v1, %v3514_v35  ;;  %v10482_v39 = vmul.f32 %v6727_v1, %v3515_v41 }
 0x471   : > { %v10488_v60 = vmul.f32 %v6727_v1, %v3516_v27  ;;  %v10490_v50 = vmul.f32 %v6727_v1, %v3517_v21  ;;  %v10494_v8 = vmul.f32 %v6727_v1, %v3519_v5  ;;  %v10496_v10 = vmul.f32 %v6727_v1, %v3520_v17  ;;  %v10510_v21 = vld [vmem:[#allocation2 + $0x5a] sm:$0xff] }
 0x472   : > { %13198 = vst [vmem:[#allocation169_spill] sm:$0xff] %v10472_v22  ;;  %13199 = vst [vmem:[#allocation170_spill] sm:$0xff] %v10478_v0  ;;  %v10492_v22 = vmul.f32 %v6727_v1, %v3518_v32  ;;  %v10498_v35 = vmul.f32 %v6727_v1, %v3521_v56  ;;  %v10500_v41 = vmul.f32 %v6727_v1, %v3522_v15  ;;  %v10512_v32 = vld [vmem:[#allocation2 + $0x52] sm:$0xff] }
 0x473   : > { %13200 = vst [vmem:[#allocation86_spill] sm:$0xff] %v10480_v46  ;;  %13201 = vst [vmem:[#allocation87_spill] sm:$0xff] %v10482_v39  ;;  %v10502_v39 = vmul.f32 %v6727_v1, %v3523_v31  ;;  %v10504_v46 = vmul.f32 %v6727_v1, %v3524_v57  ;;  %v10506_v0 = vmul.f32 %v6727_v1, %v3525_v19  ;;  %4125 = vrot.lane.b32.xlu0 %v10510_v21, %s6768_s27 }
 0x474   : > { %13202 = vst [vmem:[#allocation195_spill] sm:$0xff] %v10488_v60  ;;  %13203 = vst [vmem:[#allocation196_spill] sm:$0xff] %v10490_v50  ;;  %v10508_v27 = vmul.f32 %v6727_v1, %v3526_v59  ;;  %v10514_v5 = vmul.f32 %v6727_v1, %v3528_v25  ;;  %v10516_v17 = vmul.f32 %v6727_v1, %v3529_v14  ;;  %4123 = vrot.lane.b32.xlu1 %v10512_v32, %s6768_s27  ;;  %v3816_v50 = vld [vmem:[#allocation2 + $0x2c] sm:$0xff]  ;;  %v3815_v60 = vld [vmem:[#allocation2 + $0x24] sm:$0xff] }
 0x475   : > { %13204 = vst [vmem:[#allocation122_spill] sm:$0xff] %v10492_v22  ;;  %13205 = vst [vmem:[#allocation123_spill] sm:$0xff] %v10494_v8  ;;  %v10518_v56 = vmul.f32 %v6727_v1, %v3530_v49  ;;  %v10520_v15 = vmul.f32 %v6727_v1, %v3531_v54  ;;  %v10526_v59 = vmul.f32 %v6727_v1, %v3532_v28  ;;  %v3814_v8 = vld [vmem:[#allocation2 + $0x1c] sm:$0xff]  ;;  %v3813_v22 = vld [vmem:[#allocation2 + $0x14] sm:$0xff] }
 0x476   : > { %13206 = vst [vmem:[#allocation16_spill] sm:$0xff] %v10496_v10  ;;  %13207 = vst [vmem:[#allocation17_spill] sm:$0xff] %v10498_v35  ;;  %v10528_v19 = vmul.f32 %v6727_v1, %v3533_v40  ;;  %v10530_v31 = vmul.f32 %v6727_v1, %v3534_v45  ;;  %v10532_v57 = vmul.f32 %v6727_v1, %v3535_v30  ;;  %v10548_v40 = vld [vmem:[#allocation2 + $0x6a] sm:$0xff]  ;;  %v10550_v45 = vld [vmem:[#allocation2 + $0x62] sm:$0xff] }
 0x477   : > { %13208 = vst [vmem:[#allocation146_spill] sm:$0xff] %v10500_v41  ;;  %13209 = vst [vmem:[#allocation147_spill] sm:$0xff] %v10502_v39  ;;  %v10534_v25 = vmul.f32 %v6727_v1, %v3536_v55  ;;  %v10536_v14 = vmul.f32 %v6727_v1, %v3537_v51  ;;  %v10538_v49 = vmul.f32 %v6727_v1, %v3538_v63  ;;  %4129 = vrot.lane.b32.xlu0 %v10548_v40, %s6768_s27  ;;  %v3778_v35 = vld [vmem:[#allocation2 + $0x1b] sm:$0xff]  ;;  %v3777_v10 = vld [vmem:[#allocation2 + $0x13] sm:$0xff] }
 0x478   : > { %13210 = vst [vmem:[#allocation52_spill] sm:$0xff] %v10504_v46  ;;  %13211 = vst [vmem:[#allocation53_spill] sm:$0xff] %v10506_v0  ;;  %v10540_v54 = vmul.f32 %v6727_v1, %v3539_v37  ;;  %v10546_v28 = vmul.f32 %v6727_v1, %v3542_v16  ;;  %v10552_v30 = vmul.f32 %v6727_v1, %v3543_v52  ;;  %4127 = vrot.lane.b32.xlu1 %v10550_v45, %s6768_s27  ;;  %v10570_v16 = vld [vmem:[#allocation2 + $0x72] sm:$0xff]  ;;  %v10576_v52 = vld [vmem:[#allocation2 + $0x8a] sm:$0xff] }
 0x479   : > { %13212 = vst [vmem:[#allocation171_spill] sm:$0xff] %v10508_v27  ;;  %13213 = vst [vmem:[#allocation172_spill] sm:$0xff] %v10514_v5  ;;  %v10554_v55 = vmul.f32 %v6727_v1, %v3544_v36  ;;  %v10556_v51 = vmul.f32 %v6727_v1, %v3545_v61  ;;  %v10558_v63 = vmul.f32 %v6727_v1, %v3546_v18  ;;  %v10578_v36 = vld [vmem:[#allocation2 + $0x82] sm:$0xff]  ;;  %v10584_v61 = vld [vmem:[#allocation2 + $0x9a] sm:$0xff] }
 0x47a   : > { %13214 = vst [vmem:[#allocation88_spill] sm:$0xff] %v10516_v17  ;;  %13215 = vst [vmem:[#allocation89_spill] sm:$0xff] %v10518_v56  ;;  %v10544_v56 = vmul.f32 %v6727_v1, %v3541_v47  ;;  %v10564_v37 = vmul.f32 %v6727_v1, %v3547_v11  ;;  %v10568_v47 = vld [vmem:[#allocation2 + $0x7a] sm:$0xff]  ;;  %v10586_v18 = vld [vmem:[#allocation2 + $0x92] sm:$0xff] }
 0x47b   : > { %13216 = vst [vmem:[#allocation197_spill] sm:$0xff] %v10520_v15  ;;  %13217 = vst [vmem:[#allocation198_spill] sm:$0xff] %v10526_v59  ;;  %v10542_v15 = vmul.f32 %v6727_v1, %v3540_v24  ;;  %v10566_v24 = vmul.f32 %v6727_v1, %v3548_v4  ;;  %4133 = vrot.lane.b32.xlu0 %v10568_v47, %s6768_s27  ;;  %v10592_v11 = vld [vmem:[#allocation2 + $0xaa] sm:$0xff]  ;;  %v10594_v4 = vld [vmem:[#allocation2 + $0xa2] sm:$0xff]  ;;  %v10600_v1 = vpop.permute.xlu1 %3959 }
 0x47c   : > { %13218 = vst [vmem:[#allocation124_spill] sm:$0xff] %v10528_v19  ;;  %13219 = vst [vmem:[#allocation125_spill] sm:$0xff] %v10530_v31  ;;  %4131 = vrot.lane.b32.xlu1 %v10570_v16, %s6768_s27  ;;  %v3767_v31 = vld [vmem:[#allocation2 + $0xe2] sm:$0xff]  ;;  %v3770_v59 = vld [vmem:[#allocation2 + $0xfa] sm:$0xff] }
 0x47d   : > { %13220 = vst [vmem:[#allocation18_spill] sm:$0xff] %v10532_v57  ;;  %13221 = vst [vmem:[#allocation19_spill] sm:$0xff] %v10534_v25  ;;  %v3768_v57 = vld [vmem:[#allocation2 + $0xea] sm:$0xff]  ;;  %v3769_v17 = vld [vmem:[#allocation2 + $0xf2] sm:$0xff] }
 0x47e   : > { %13222 = vst [vmem:[#allocation148_spill] sm:$0xff] %v10536_v14  ;;  %13223 = vst [vmem:[#allocation149_spill] sm:$0xff] %v10538_v49  ;;  %v3765_v49 = vld [vmem:[#allocation2 + $0xd2] sm:$0xff]  ;;  %v3772_v5 = vld [vmem:[#allocation2 + $0x10a] sm:$0xff] }
 0x47f   : > { %13224 = vst [vmem:[#allocation54_spill] sm:$0xff] %v10540_v54  ;;  %13225 = vst [vmem:[#allocation55_spill] sm:$0xff] %v10542_v15  ;;  %4137 = vrot.lane.b32.xlu0 %v10576_v52, %s6768_s27  ;;  %v3766_v54 = vld [vmem:[#allocation2 + $0xda] sm:$0xff]  ;;  %v3771_v27 = vld [vmem:[#allocation2 + $0x102] sm:$0xff] }
 0x480   : > { %13226 = vst [vmem:[#allocation173_spill] sm:$0xff] %v10544_v56  ;;  %13227 = vst [vmem:[#allocation174_spill] sm:$0xff] %v10546_v28  ;;  %4135 = vrot.lane.b32.xlu1 %v10578_v36, %s6768_s27  ;;  %v10616_v28 = vld [vmem:[#allocation2 + $0xc2] sm:$0xff]  ;;  %v3774_v0 = vld [vmem:[#allocation2 + $0x11a] sm:$0xff] }
 0x481   : > { %13228 = vst [vmem:[#allocation90_spill] sm:$0xff] %v10552_v30  ;;  %13229 = vst [vmem:[#allocation91_spill] sm:$0xff] %v10554_v55  ;;  %v10614_v55 = vpop.permute.xlu1 %3963  ;;  %v3764_v30 = vld [vmem:[#allocation2 + $0xca] sm:$0xff]  ;;  %v3773_v46 = vld [vmem:[#allocation2 + $0x112] sm:$0xff] }
 0x482   : > { %13230 = vst [vmem:[#allocation199_spill] sm:$0xff] %v10556_v51  ;;  %13231 = vst [vmem:[#allocation200_spill] sm:$0xff] %v10558_v63  ;;  %v10606_v63 = vld [vmem:[#allocation2 + $0xb2] sm:$0xff] }
 0x483   : > { %13232 = vst [vmem:[#allocation126_spill] sm:$0xff] %v10564_v37  ;;  %13233 = vst [vmem:[#allocation127_spill] sm:$0xff] %v10566_v24  ;;  %4141 = vrot.lane.b32.xlu0 %v10584_v61, %s6768_s27  ;;  %v10602_v24 = vpop.permute.xlu0 %3961  ;;  %v10604_v37 = vld [vmem:[#allocation2 + $0xba] sm:$0xff] }
 0x484   : > { %4139 = vrot.lane.b32.xlu1 %v10586_v18, %s6768_s27 }
 0x487   : > { %4145 = vrot.lane.b32.xlu0 %v10592_v11, %s6768_s27  ;;  %v10612_v51 = vpop.permute.xlu0 %3965 }
 0x488   : > { %4143 = vrot.lane.b32.xlu1 %v10594_v4, %s6768_s27 }
 0x48b   : > { %4149 = vrot.lane.b32.xlu0 %v10604_v37, %s6768_s27  ;;  %v10621_v56 = vpop.permute.xlu0 %3969 }
 0x48c   : > { %4147 = vrot.lane.b32.xlu1 %v10606_v63, %s6768_s27 }
 0x48f   : > { %4153 = vrot.lane.b32.xlu0 %v3764_v30, %s6768_s27 }
 0x490   : > { %4151 = vrot.lane.b32.xlu1 %v10616_v28, %s6768_s27 }
 0x491   : > { %v10623_v15 = vpop.permute.xlu1 %3967 }
 0x493   : > { %4157 = vrot.lane.b32.xlu0 %v3766_v54, %s6768_s27 }
 0x494   : > { %4155 = vrot.lane.b32.xlu1 %v3765_v49, %s6768_s27  ;;  %v10627_v14 = vpop.permute.xlu0 %3973 }
 0x495   : > { %v10629_v25 = vpop.permute.xlu1 %3971 }
 0x497   : > { %4161 = vrot.lane.b32.xlu0 %v3768_v57, %s6768_s27 }
 0x498   : > { %4159 = vrot.lane.b32.xlu1 %v3767_v31, %s6768_s27  ;;  %v10633_v30 = vpop.permute.xlu0 %3977 }
 0x499   : > { %v10635_v19 = vpop.permute.xlu1 %3975 }
 0x49b   : > { %4165 = vrot.lane.b32.xlu0 %v3770_v59, %s6768_s27 }
 0x49c   : > { %4163 = vrot.lane.b32.xlu1 %v3769_v17, %s6768_s27  ;;  %v10639_v49 = vpop.permute.xlu0 %3981 }
 0x49d   : > { %v10641_v54 = vpop.permute.xlu1 %3979 }
 0x49f   : > { %4169 = vrot.lane.b32.xlu0 %v3772_v5, %s6768_s27 }
 0x4a0   : > { %4167 = vrot.lane.b32.xlu1 %v3771_v27, %s6768_s27  ;;  %v10645_v31 = vpop.permute.xlu0 %3985 }
 0x4a1   : > { %v10647_v57 = vpop.permute.xlu1 %3983 }
 0x4a3   : > { %4173 = vrot.lane.b32.xlu0 %v3774_v0, %s6768_s27 }
 0x4a4   : > { %4171 = vrot.lane.b32.xlu1 %v3773_v46, %s6768_s27  ;;  %v10651_v17 = vpop.permute.xlu0 %3989 }
 0x4a5   : > { %13234 = vst [vmem:[#allocation20_spill] sm:$0xff] %v10651_v17  ;;  %v10653_v59 = vpop.permute.xlu1 %3987  ;;  %v3828_v17 = vld [vmem:[#allocation2 + $0x8c] sm:$0xff] }
 0x4a7   : > { %4215 = vrot.lane.b32.xlu0 %v10430_v53, %s6770_s29 }
 0x4a8   : > { %4213 = vrot.lane.b32.xlu1 %v10432_v43, %s6770_s29  ;;  %v10659_v27 = vpop.permute.xlu0 %3993 }
 0x4a9   : > { %13235 = vst [vmem:[#allocation21_spill] sm:$0xff] %v10659_v27  ;;  %v10661_v5 = vpop.permute.xlu1 %3991  ;;  %v3862_v27 = vld [vmem:[#allocation2 + $0x7d] sm:$0xff] }
 0x4aa   : > { %13236 = vst [vmem:[#allocation150_spill] sm:$0xff] %v10661_v5  ;;  %v3790_v5 = vld [vmem:[#allocation2 + $0x7b] sm:$0xff] }
 0x4ab   : > { %4219 = vrot.lane.b32.xlu0 %v10456_v7, %s6770_s29 }
 0x4ac   : > { %4217 = vrot.lane.b32.xlu1 %v10458_v2, %s6770_s29  ;;  %v10667_v0 = vpop.permute.xlu0 %3997 }
 0x4ad   : > { %13237 = vst [vmem:[#allocation151_spill] sm:$0xff] %v10667_v0  ;;  %v10669_v46 = vpop.permute.xlu1 %3995  ;;  %v3826_v0 = vld [vmem:[#allocation2 + $0x7c] sm:$0xff] }
 0x4ae   : > { %13238 = vst [vmem:[#allocation56_spill] sm:$0xff] %v10669_v46  ;;  %v3789_v46 = vld [vmem:[#allocation2 + $0x73] sm:$0xff] }
 0x4af   : > { %4223 = vrot.lane.b32.xlu0 %v10464_v29, %s6770_s29 }
 0x4b0   : > { %4221 = vrot.lane.b32.xlu1 %v10466_v33, %s6770_s29  ;;  %v10675_v53 = vpop.permute.xlu0 %4001 }
 0x4b1   : > { %13239 = vst [vmem:[#allocation57_spill] sm:$0xff] %v10675_v53  ;;  %v10677_v43 = vpop.permute.xlu1 %3999 }
 0x4b2   : > { %13240 = vst [vmem:[#allocation175_spill] sm:$0xff] %v10677_v43  ;;  %v3788_v43 = vld [vmem:[#allocation2 + $0x6b] sm:$0xff] }
 0x4b3   : > { %4227 = vrot.lane.b32.xlu0 %v10474_v44, %s6770_s29 }
 0x4b4   : > { %4225 = vrot.lane.b32.xlu1 %v10476_v20, %s6770_s29  ;;  %v10683_v7 = vpop.permute.xlu0 %4005 }
 0x4b5   : > { %13241 = vst [vmem:[#allocation176_spill] sm:$0xff] %v10683_v7  ;;  %v10685_v2 = vpop.permute.xlu1 %4003  ;;  %v3824_v7 = vld [vmem:[#allocation2 + $0x6c] sm:$0xff] }
 0x4b6   : > { %13242 = vst [vmem:[#allocation92_spill] sm:$0xff] %v10685_v2  ;;  %v3787_v2 = vld [vmem:[#allocation2 + $0x63] sm:$0xff] }
 0x4b7   : > { %4231 = vrot.lane.b32.xlu0 %v10510_v21, %s6770_s29 }
 0x4b8   : > { %4229 = vrot.lane.b32.xlu1 %v10512_v32, %s6770_s29  ;;  %v10691_v29 = vpop.permute.xlu0 %4009 }
 0x4b9   : > { %13243 = vst [vmem:[#allocation93_spill] sm:$0xff] %v10691_v29  ;;  %v10693_v33 = vpop.permute.xlu1 %4007  ;;  %v3855_v29 = vld [vmem:[#allocation2 + $0x45] sm:$0xff] }
 0x4ba   : > { %13244 = vst [vmem:[#allocation201_spill] sm:$0xff] %v10693_v33  ;;  %v3891_v33 = vld [vmem:[#allocation2 + $0x46] sm:$0xff] }
 0x4bb   : > { %4235 = vrot.lane.b32.xlu0 %v10548_v40, %s6770_s29 }
 0x4bc   : > { %4233 = vrot.lane.b32.xlu1 %v10550_v45, %s6770_s29  ;;  %v10699_v44 = vpop.permute.xlu0 %4013 }
 0x4bd   : > { %13245 = vst [vmem:[#allocation202_spill] sm:$0xff] %v10699_v44  ;;  %v10701_v20 = vpop.permute.xlu1 %4011  ;;  %v3890_v44 = vld [vmem:[#allocation2 + $0x3e] sm:$0xff] }
 0x4be   : > { %13246 = vst [vmem:[#allocation128_spill] sm:$0xff] %v10701_v20  ;;  %v3820_v20 = vld [vmem:[#allocation2 + $0x4c] sm:$0xff] }
 0x4bf   : > { %4239 = vrot.lane.b32.xlu0 %v10568_v47, %s6770_s29  ;;  %v5299_v47 = vld [vmem:[%s12318_s3] sm:$0xff] }
 0x4c0   : > { %4237 = vrot.lane.b32.xlu1 %v10570_v16, %s6770_s29  ;;  %v10707_v21 = vpop.permute.xlu0 %4017  ;;  %v5300_v16 = vld [vmem:[%s12318_s3 + $0x8] sm:$0xff] }
 0x4c1   : > { %13247 = vst [vmem:[#allocation129_spill] sm:$0xff] %v10707_v21  ;;  %v10709_v32 = vpop.permute.xlu1 %4015  ;;  %v3853_v21 = vld [vmem:[#allocation2 + $0x35] sm:$0xff] }
 0x4c2   : > { %13248 = vst [vmem:[#allocation22_spill] sm:$0xff] %v10709_v32 }
 0x4c3   : > { %4243 = vrot.lane.b32.xlu0 %v10576_v52, %s6770_s29  ;;  %v6680_v52 = vpack.c.bf16 %v5300_v16, %v5299_v47 }
 0x4c4   : > { %4241 = vrot.lane.b32.xlu1 %v10578_v36, %s6770_s29  ;;  %v10715_v40 = vpop.permute.xlu0 %4021 }
 0x4c5   : > { %13249 = vst [vmem:[#allocation23_spill] sm:$0xff] %v10715_v40  ;;  %v10717_v45 = vpop.permute.xlu1 %4019  ;;  %6681 = vmatprep.subr.bf16.mxu1 %v6680_v52 }
 0x4c6   : > { %13250 = vst [vmem:[#allocation152_spill] sm:$0xff] %v10717_v45  ;;  %6683 = vmatpush3.bf16.msra.mxu1 %v6680_v52  ;;  %v3781_v45 = vld [vmem:[#allocation2 + $0x33] sm:$0xff] }
 0x4c7   : > { %4247 = vrot.lane.b32.xlu0 %v10584_v61, %s6770_s29  ;;  %v5301_v61 = vld [vmem:[%s12318_s3 + $0x10] sm:$0xff] }
 0x4c8   : > { %4245 = vrot.lane.b32.xlu1 %v10586_v18, %s6770_s29  ;;  %v10729_v36 = vpop.permute.xlu0 %4025  ;;  %v5302_v18 = vld [vmem:[%s12318_s3 + $0x18] sm:$0xff] }
 0x4c9   : > { %13251 = vst [vmem:[#allocation153_spill] sm:$0xff] %v10729_v36  ;;  %v10731_v39 = vpop.permute.xlu1 %4023  ;;  %v6684_v47 = vpack.c.bf16 %v5302_v18, %v5301_v61  ;;  %v3887_v36 = vld [vmem:[#allocation2 + $0x26] sm:$0xff] }
 0x4ca   : > { %13252 = vst [vmem:[#allocation58_spill] sm:$0xff] %v10731_v39  ;;  %v3852_v39 = vld [vmem:[#allocation2 + $0x2d] sm:$0xff] }
 0x4cb   : > { %4251 = vrot.lane.b32.xlu0 %v10592_v11, %s6770_s29  ;;  %6685 = vmatprep.subr.bf16.mxu1 %v6684_v47  ;;  %v5303_v11 = vld [vmem:[%s12318_s3 + $0x20] sm:$0xff] }
 0x4cc   : > { %4249 = vrot.lane.b32.xlu1 %v10594_v4, %s6770_s29  ;;  %v10743_v16 = vpop.permute.xlu0 %4029  ;;  %v5304_v4 = vld [vmem:[%s12318_s3 + $0x28] sm:$0xff]  ;;  %6687 = vmatpush3.bf16.msra.mxu1 %v6684_v47 }
 0x4cd   : > { %13253 = vst [vmem:[#allocation59_spill] sm:$0xff] %v10743_v16  ;;  %v10745_v41 = vpop.permute.xlu1 %4027  ;;  %v6688_v52 = vpack.c.bf16 %v5304_v4, %v5303_v11  ;;  %v3851_v16 = vld [vmem:[#allocation2 + $0x25] sm:$0xff] }
 0x4ce   : > { %13254 = vst [vmem:[#allocation177_spill] sm:$0xff] %v10745_v41  ;;  %v3779_v41 = vld [vmem:[#allocation2 + $0x23] sm:$0xff] }
 0x4cf   : > { %4359 = vrot.lane.b32.xlu0 %v3778_v35, %s6772_s20  ;;  %6689 = vmatprep.subr.bf16.mxu1 %v6688_v52  ;;  %v5306_v35 = vld [vmem:[%s12318_s3 + $0x38] sm:$0xff] }
 0x4d0   : > { %4357 = vrot.lane.b32.xlu1 %v3777_v10, %s6772_s20  ;;  %v10755_v61 = vpop.permute.xlu0 %4105  ;;  %6691 = vmatpush3.bf16.msra.mxu1 %v6688_v52  ;;  %v5305_v10 = vld [vmem:[%s12318_s3 + $0x30] sm:$0xff] }
 0x4d1   : > { %v10757_v18 = vpop.permute.xlu1 %4103  ;;  %v6692_v4 = vpack.c.bf16 %v5306_v35, %v5305_v10 }
 0x4d3   : > { %4503 = vrot.lane.b32.xlu0 %v3814_v8, %s6775_s9  ;;  %v5307_v8 = vld [vmem:[%s12318_s3 + $0x40] sm:$0xff]  ;;  %6693 = vmatprep.subr.bf16.mxu1 %v6692_v4 }
 0x4d4   : > { %4501 = vrot.lane.b32.xlu1 %v3813_v22, %s6775_s9  ;;  %6695 = vmatpush3.bf16.msra.mxu1 %v6692_v4 }
 0x4d5   : > { %v10767_v47 = vpop.permute.xlu0 %4109  ;;  %v10769_v11 = vpop.permute.xlu1 %4107  ;;  %6616 = vmatprep.subr.mxu1 %v5307_v8 }
 0x4d7   : > { %4613 = vrot.lane.b32.xlu0 %v3816_v50, %s6776_s14 }
 0x4d8   : > { %4611 = vrot.lane.b32.xlu1 %v3815_v60, %s6776_s14  ;;  %6617 = vmatpush3.msra.mxu1 %v5307_v8  ;;  %v3888_v8 = vld [vmem:[#allocation2 + $0x2e] sm:$0xff] }
 0x4d9   : > { %v10776_v22 = vpop.permute.xlu0 %4113  ;;  %v10778_v52 = vpop.permute.xlu1 %4111 }
 0x4db   : > { %4361 = vrot.lane.b32.xlu0 %v3779_v41, %s6772_s20  ;;  %v3780_v41 = vld [vmem:[#allocation2 + $0x2b] sm:$0xff] }
 0x4dc   : > { %4755 = vrot.lane.b32.xlu1 %v3851_v16, %s6777_s17 }
 0x4dd   : > { %v10782_v10 = vpop.permute.xlu0 %4117  ;;  %v10784_v35 = vpop.permute.xlu1 %4115 }
 0x4df   : > { %4899 = vrot.lane.b32.xlu0 %v3887_v36, %s6778_s23 }
 0x4e0   : > { %4757 = vrot.lane.b32.xlu1 %v3852_v39, %s6777_s17 }
 0x4e1   : > { %v10788_v4 = vpop.permute.xlu0 %4121  ;;  %v10790_v3 = vpop.permute.xlu1 %4119 }
 0x4e3   : > { %4505 = vrot.lane.b32.xlu0 %v3815_v60, %s6775_s9 }
 0x4e4   : > { %4363 = vrot.lane.b32.xlu1 %v3780_v41, %s6772_s20 }
 0x4e5   : > { %v10794_v16 = vpop.permute.xlu0 %4125 }
 0x4e6   : > { %v10796_v40 = vpop.permute.xlu1 %4123 }
 0x4e7   : > { %4507 = vrot.lane.b32.xlu0 %v3816_v50, %s6775_s9 }
 0x4e8   : > { %4901 = vrot.lane.b32.xlu1 %v3888_v8, %s6778_s23 }
 0x4e9   : > { %v10800_v36 = vpop.permute.xlu0 %4129 }
 0x4ea   : > { %v10802_v39 = vpop.permute.xlu1 %4127 }
 0x4eb   : > { %4617 = vrot.lane.b32.xlu0 %v3818_v38, %s6776_s14 }
 0x4ec   : > { %4615 = vrot.lane.b32.xlu1 %v3817_v58, %s6776_s14 }
 0x4ed   : > { %v10806_v60 = vpop.permute.xlu0 %4133 }
 0x4ee   : > { %13255 = vst [vmem:[#allocation178_spill] sm:$0xff] %v10806_v60  ;;  %v10808_v41 = vpop.permute.xlu1 %4131 }
 0x4ef   : > { %4365 = vrot.lane.b32.xlu0 %v3781_v45, %s6772_s20 }
 0x4f0   : > { %4759 = vrot.lane.b32.xlu1 %v3853_v21, %s6777_s17 }
 0x4f1   : > { %v10812_v50 = vpop.permute.xlu0 %4137 }
 0x4f2   : > { %13256 = vst [vmem:[#allocation94_spill] sm:$0xff] %v10812_v50  ;;  %v10814_v8 = vpop.permute.xlu1 %4135  ;;  %v3861_v50 = vld [vmem:[#allocation2 + $0x75] sm:$0xff] }
 0x4f3   : > { %13257 = vst [vmem:[#allocation95_spill] sm:$0xff] %v10814_v8  ;;  %4903 = vrot.lane.b32.xlu0 %v3889_v48, %s6778_s23 }
 0x4f4   : > { %4761 = vrot.lane.b32.xlu1 %v3854_v62, %s6777_s17 }
 0x4f5   : > { %v10818_v32 = vpop.permute.xlu0 %4141 }
 0x4f6   : > { %13258 = vst [vmem:[#allocation203_spill] sm:$0xff] %v10818_v32  ;;  %v10820_v6 = vpop.permute.xlu1 %4139  ;;  %v3896_v32 = vld [vmem:[#allocation2 + $0x6e] sm:$0xff] }
 0x4f7   : > { %13259 = vst [vmem:[#allocation204_spill] sm:$0xff] %v10820_v6  ;;  %4509 = vrot.lane.b32.xlu0 %v3817_v58, %s6775_s9  ;;  %v3825_v6 = vld [vmem:[#allocation2 + $0x74] sm:$0xff] }
 0x4f8   : > { %4367 = vrot.lane.b32.xlu1 %v3782_v42, %s6772_s20 }
 0x4f9   : > { %v10824_v21 = vpop.permute.xlu0 %4145 }
 0x4fa   : > { %13260 = vst [vmem:[#allocation130_spill] sm:$0xff] %v10824_v21  ;;  %v10826_v45 = vpop.permute.xlu1 %4143  ;;  %v3860_v21 = vld [vmem:[#allocation2 + $0x6d] sm:$0xff] }
 0x4fb   : > { %13261 = vst [vmem:[#allocation131_spill] sm:$0xff] %v10826_v45  ;;  %4511 = vrot.lane.b32.xlu0 %v3818_v38, %s6775_s9 }
 0x4fc   : > { %4905 = vrot.lane.b32.xlu1 %v3890_v44, %s6778_s23 }
 0x4fd   : > { %v10830_v48 = vpop.permute.xlu0 %4149 }
 0x4fe   : > { %13262 = vst [vmem:[#allocation24_spill] sm:$0xff] %v10830_v48  ;;  %v10832_v62 = vpop.permute.xlu1 %4147  ;;  %v3894_v48 = vld [vmem:[#allocation2 + $0x5e] sm:$0xff] }
 0x4ff   : > { %13263 = vst [vmem:[#allocation25_spill] sm:$0xff] %v10832_v62  ;;  %4621 = vrot.lane.b32.xlu0 %v3820_v20, %s6776_s14  ;;  %v3823_v62 = vld [vmem:[#allocation2 + $0x64] sm:$0xff] }
 0x500   : > { %4619 = vrot.lane.b32.xlu1 %v3819_v34, %s6776_s14 }
 0x501   : > { %v10836_v42 = vpop.permute.xlu0 %4153 }
 0x502   : > { %13264 = vst [vmem:[#allocation154_spill] sm:$0xff] %v10836_v42  ;;  %v10838_v58 = vpop.permute.xlu1 %4151 }
 0x503   : > { %13265 = vst [vmem:[#allocation155_spill] sm:$0xff] %v10838_v58  ;;  %4369 = vrot.lane.b32.xlu0 %v3783_v13, %s6772_s20  ;;  %v3784_v58 = vld [vmem:[#allocation2 + $0x4b] sm:$0xff] }
 0x504   : > { %4763 = vrot.lane.b32.xlu1 %v3855_v29, %s6777_s17 }
 0x505   : > { %v10842_v38 = vpop.permute.xlu0 %4157 }
 0x506   : > { %13266 = vst [vmem:[#allocation60_spill] sm:$0xff] %v10842_v38  ;;  %v10844_v44 = vpop.permute.xlu1 %4155  ;;  %v3892_v38 = vld [vmem:[#allocation2 + $0x4e] sm:$0xff] }
 0x507   : > { %13267 = vst [vmem:[#allocation61_spill] sm:$0xff] %v10844_v44  ;;  %4907 = vrot.lane.b32.xlu0 %v3891_v33, %s6778_s23 }
 0x508   : > { %4765 = vrot.lane.b32.xlu1 %v3856_v12, %s6777_s17 }
 0x509   : > { %v10848_v9 = vpop.permute.xlu0 %4161 }
 0x50a   : > { %13268 = vst [vmem:[#allocation179_spill] sm:$0xff] %v10848_v9  ;;  %v10850_v42 = vpop.permute.xlu1 %4159  ;;  %v3822_v9 = vld [vmem:[#allocation2 + $0x5c] sm:$0xff] }
 0x50b   : > { %13269 = vst [vmem:[#allocation180_spill] sm:$0xff] %v10850_v42  ;;  %4513 = vrot.lane.b32.xlu0 %v3819_v34, %s6775_s9  ;;  %v3821_v42 = vld [vmem:[#allocation2 + $0x54] sm:$0xff] }
 0x50c   : > { %4371 = vrot.lane.b32.xlu1 %v3784_v58, %s6772_s20 }
 0x50d   : > { %v10854_v13 = vpop.permute.xlu0 %4165 }
 0x50e   : > { %13270 = vst [vmem:[#allocation96_spill] sm:$0xff] %v10854_v13  ;;  %v10856_v29 = vpop.permute.xlu1 %4163  ;;  %v3785_v13 = vld [vmem:[#allocation2 + $0x53] sm:$0xff] }
 0x50f   : > { %13271 = vst [vmem:[#allocation97_spill] sm:$0xff] %v10856_v29  ;;  %4515 = vrot.lane.b32.xlu0 %v3820_v20, %s6775_s9  ;;  %v3857_v29 = vld [vmem:[#allocation2 + $0x55] sm:$0xff] }
 0x510   : > { %4909 = vrot.lane.b32.xlu1 %v3892_v38, %s6778_s23 }
 0x511   : > { %v10860_v33 = vpop.permute.xlu0 %4169 }
 0x512   : > { %13272 = vst [vmem:[#allocation205_spill] sm:$0xff] %v10860_v33  ;;  %v10862_v12 = vpop.permute.xlu1 %4167  ;;  %v3893_v33 = vld [vmem:[#allocation2 + $0x56] sm:$0xff] }
 0x513   : > { %13273 = vst [vmem:[#allocation206_spill] sm:$0xff] %v10862_v12  ;;  %4625 = vrot.lane.b32.xlu0 %v3822_v9, %s6776_s14  ;;  %v3858_v12 = vld [vmem:[#allocation2 + $0x5d] sm:$0xff] }
 0x514   : > { %4623 = vrot.lane.b32.xlu1 %v3821_v42, %s6776_s14 }
 0x515   : > { %v10866_v34 = vpop.permute.xlu0 %4173 }
 0x516   : > { %13274 = vst [vmem:[#allocation132_spill] sm:$0xff] %v10866_v34  ;;  %v10868_v58 = vpop.permute.xlu1 %4171 }
 0x517   : > { %13275 = vst [vmem:[#allocation133_spill] sm:$0xff] %v10868_v58  ;;  %4373 = vrot.lane.b32.xlu0 %v3785_v13, %s6772_s20  ;;  %v3786_v58 = vld [vmem:[#allocation2 + $0x5b] sm:$0xff] }
 0x518   : > { %4767 = vrot.lane.b32.xlu1 %v3857_v29, %s6777_s17 }
 0x519   : > { %v10872_v20 = vpop.permute.xlu0 %4215 }
 0x51a   : > { %v10874_v38 = vpop.permute.xlu1 %4213 }
 0x51b   : > { %4911 = vrot.lane.b32.xlu0 %v3893_v33, %s6778_s23 }
 0x51c   : > { %4769 = vrot.lane.b32.xlu1 %v3858_v12, %s6777_s17 }
 0x51d   : > { %v10878_v44 = vpop.permute.xlu0 %4219 }
 0x51e   : > { %v10880_v34 = vpop.permute.xlu1 %4217 }
 0x51f   : > { %4517 = vrot.lane.b32.xlu0 %v3821_v42, %s6775_s9 }
 0x520   : > { %4375 = vrot.lane.b32.xlu1 %v3786_v58, %s6772_s20 }
 0x521   : > { %v10884_v13 = vpop.permute.xlu0 %4223 }
 0x522   : > { %v10886_v29 = vpop.permute.xlu1 %4221 }
 0x523   : > { %4519 = vrot.lane.b32.xlu0 %v3822_v9, %s6775_s9 }
 0x524   : > { %4913 = vrot.lane.b32.xlu1 %v3894_v48, %s6778_s23 }
 0x525   : > { %v10890_v33 = vpop.permute.xlu0 %4227 }
 0x526   : > { %v10892_v12 = vpop.permute.xlu1 %4225 }
 0x527   : > { %4629 = vrot.lane.b32.xlu0 %v3824_v7, %s6776_s14 }
 0x528   : > { %4627 = vrot.lane.b32.xlu1 %v3823_v62, %s6776_s14 }
 0x529   : > { %v10896_v42 = vpop.permute.xlu0 %4231 }
 0x52a   : > { %v10898_v58 = vpop.permute.xlu1 %4229 }
 0x52b   : > { %4377 = vrot.lane.b32.xlu0 %v3787_v2, %s6772_s20 }
 0x52c   : > { %4771 = vrot.lane.b32.xlu1 %v3859_v23, %s6777_s17 }
 0x52d   : > { %v10902_v9 = vpop.permute.xlu0 %4235 }
 0x52e   : > { %v10904_v48 = vpop.permute.xlu1 %4233 }
 0x52f   : > { %4915 = vrot.lane.b32.xlu0 %v3895_v26, %s6778_s23 }
 0x530   : > { %4773 = vrot.lane.b32.xlu1 %v3860_v21, %s6777_s17 }
 0x531   : > { %v10908_v53 = vpop.permute.xlu0 %4239 }
 0x532   : > { %v10910_v45 = vpop.permute.xlu1 %4237 }
 0x533   : > { %4521 = vrot.lane.b32.xlu0 %v3823_v62, %s6775_s9 }
 0x534   : > { %4379 = vrot.lane.b32.xlu1 %v3788_v43, %s6772_s20 }
 0x535   : > { %v10914_v23 = vpop.permute.xlu0 %4243 }
 0x536   : > { %13276 = vst [vmem:[#allocation26_spill] sm:$0xff] %v10914_v23  ;;  %v10916_v2 = vpop.permute.xlu1 %4241  ;;  %v3898_v23 = vld [vmem:[#allocation2 + $0x7e] sm:$0xff] }
 0x537   : > { %13277 = vst [vmem:[#allocation27_spill] sm:$0xff] %v10916_v2  ;;  %4523 = vrot.lane.b32.xlu0 %v3824_v7, %s6775_s9  ;;  %v3827_v2 = vld [vmem:[#allocation2 + $0x84] sm:$0xff] }
 0x538   : > { %4917 = vrot.lane.b32.xlu1 %v3896_v32, %s6778_s23 }
 0x539   : > { %v10920_v26 = vpop.permute.xlu0 %4247 }
 0x53a   : > { %13278 = vst [vmem:[#allocation156_spill] sm:$0xff] %v10920_v26  ;;  %v10922_v21 = vpop.permute.xlu1 %4245  ;;  %v3897_v26 = vld [vmem:[#allocation2 + $0x76] sm:$0xff] }
 0x53b   : > { %13279 = vst [vmem:[#allocation157_spill] sm:$0xff] %v10922_v21  ;;  %4633 = vrot.lane.b32.xlu0 %v3826_v0, %s6776_s14 }
 0x53c   : > { %4631 = vrot.lane.b32.xlu1 %v3825_v6, %s6776_s14 }
 0x53d   : > { %v10926_v43 = vpop.permute.xlu0 %4251 }
 0x53e   : > { %13280 = vst [vmem:[#allocation62_spill] sm:$0xff] %v10926_v43  ;;  %v10928_v62 = vpop.permute.xlu1 %4249  ;;  %v3667_v43 = vld [vmem:[#allocation2] sm:$0xff] }
 0x53f   : > { %13281 = vst [vmem:[#allocation63_spill] sm:$0xff] %v10928_v62  ;;  %4381 = vrot.lane.b32.xlu0 %v3789_v46, %s6772_s20 }
 0x540   : > { %4775 = vrot.lane.b32.xlu1 %v3861_v50, %s6777_s17  ;;  %v5007_v50 = vsel %vm13282_vm13, %v3667_v43, %v10600_v1  ;;  %vm13293_vm13 = vmmov %vm13289_vm6 }
 0x541   : > { %v4360_v7 = vpop.permute.xlu0 %4359 }
 0x542   : > { %v4358_v32 = vpop.permute.xlu1 %4357 }
 0x543   : > { %4919 = vrot.lane.b32.xlu0 %v3897_v26, %s6778_s23 }
 0x544   : > { %4777 = vrot.lane.b32.xlu1 %v3862_v27, %s6777_s17  ;;  %v5043_v27 = vsel %vm13283_vm14, %v5007_v50, %v10757_v18  ;;  %v3791_v50 = vld [vmem:[#allocation2 + $0x83] sm:$0xff]  ;;  %vm13294_vm14 = vmmov %vm13286_vm5 }
 0x545   : > { %v4504_v21 = vpop.permute.xlu0 %4503 }
 0x546   : > { %v4502_v8 = vpop.permute.xlu1 %4501 }
 0x547   : > { %4525 = vrot.lane.b32.xlu0 %v3825_v6, %s6775_s9  ;;  %v5079_v6 = vsel %vm13284_vm15, %v5043_v27, %v10874_v38  ;;  %v3863_v27 = vld [vmem:[#allocation2 + $0x85] sm:$0xff]  ;;  %vm13295_vm15 = vmmov %vm13287_vm7 }
 0x548   : > { %4383 = vrot.lane.b32.xlu1 %v3790_v5, %s6772_s20  ;;  %v5115_v60 = vsel %vm13285_vm9, %v5079_v6, %v4358_v32  ;;  %vm13296_vm9 = vmmov %vm13288_vm4 }
 0x549   : > { %v4614_v62 = vpop.permute.xlu0 %4613  ;;  %v5152_v1 = vsel %vm5151_vm10, %v5115_v60, %v4502_v8 }
 0x54a   : > { %v4612_v46 = vpop.permute.xlu1 %4611 }
 0x54b   : > { %4527 = vrot.lane.b32.xlu0 %v3826_v0, %s6775_s9  ;;  %v3668_v0 = vld [vmem:[#allocation2 + $0x8] sm:$0xff]  ;;  %v5189_v18 = vsel %vm5188_vm0, %v5152_v1, %v4612_v46 }
 0x54c   : > { %4921 = vrot.lane.b32.xlu1 %v3898_v23, %s6778_s23  ;;  %v5008_v60 = vsel %vm13286_vm5, %v3668_v0, %v10602_v24  ;;  %vm13297_vm5 = vmmov %vm13289_vm6 }
 0x54d   : > { %v4362_v5 = vpop.permute.xlu0 %4361  ;;  %v5044_v8 = vsel %vm13287_vm7, %v5008_v60, %v10755_v61  ;;  %v3900_v60 = vld [vmem:[#allocation2 + $0x8e] sm:$0xff]  ;;  %vm13298_vm7 = vmmov %vm13290_vm8 }
 0x54e   : > { %v4756_v26 = vpop.permute.xlu1 %4755  ;;  %v5080_v46 = vsel %vm13288_vm4, %v5044_v8, %v10872_v20  ;;  %vm13299_vm4 = vmmov %vm13291_vm11 }
 0x54f   : > { %4637 = vrot.lane.b32.xlu0 %v3828_v17, %s6776_s14  ;;  %v5226_v38 = vsel %vm5225_vm1, %v5189_v18, %v4756_v26  ;;  %v5116_v1 = vsel %vm13289_vm6, %v5080_v46, %v4360_v7  ;;  %v3899_v18 = vld [vmem:[#allocation2 + $0x86] sm:$0xff]  ;;  %vm13300_vm6 = vmmov %vm13296_vm9 }
 0x550   : > { %4635 = vrot.lane.b32.xlu1 %v3827_v2, %s6776_s14  ;;  %v5153_v24 = vsel %vm5151_vm10, %v5116_v1, %v4504_v21 }
 0x551   : > { %v4900_v23 = vpop.permute.xlu0 %4899  ;;  %v5190_v0 = vsel %vm5188_vm0, %v5153_v24, %v4614_v62 }
 0x552   : > { %v4758_v43 = vpop.permute.xlu1 %4757  ;;  %v5263_v32 = vsel %vm5262_vm3, %v5226_v38, %v4900_v23  ;;  %v3864_v38 = vld [vmem:[#allocation2 + $0x8d] sm:$0xff] }
 0x553   : > { %4385 = vrot.lane.b32.xlu0 %v3791_v50, %s6772_s20  ;;  %6618 = vmatprep.mubr.msk.f32.mxu1 %vm5308_vm2, %v5263_v32  ;;  %v5227_v61 = vsel %vm5225_vm1, %v5190_v0, %v4758_v43  ;;  %v3792_v50 = vld [vmem:[#allocation2 + $0x8b] sm:$0xff] }
 0x554   : > { %4779 = vrot.lane.b32.xlu1 %v3863_v27, %s6777_s17  ;;  %v3669_v27 = vld [vmem:[#allocation2 + $0x10] sm:$0xff] }
 0x555   : > { %v4506_v6 = vpop.permute.xlu0 %4505  ;;  %v5009_v62 = vsel %vm13290_vm8, %v3669_v27, %v10614_v55  ;;  %vm13301_vm8 = vmmov %vm13297_vm5 }
 0x556   : > { %v4364_v26 = vpop.permute.xlu1 %4363  ;;  %v5045_v43 = vsel %vm13291_vm11, %v5009_v62, %v10769_v11  ;;  %v3901_v62 = vld [vmem:[#allocation2 + $0x96] sm:$0xff]  ;;  %vm13302_vm11 = vmmov %vm13298_vm7 }
 0x557   : > { %4923 = vrot.lane.b32.xlu0 %v3899_v18, %s6778_s23  ;;  %v3830_v18 = vld [vmem:[#allocation2 + $0x9c] sm:$0xff] }
 0x558   : > { %4781 = vrot.lane.b32.xlu1 %v3864_v38, %s6777_s17  ;;  %v3829_v38 = vld [vmem:[#allocation2 + $0x94] sm:$0xff] }
 0x559   : > { %v4508_v23 = vpop.permute.xlu0 %4507 }
 0x55a   : > { %v4902_v32 = vpop.permute.xlu1 %4901 }
 0x55b   : > { %v5264_v20 = vsel %vm5262_vm3, %v5227_v61, %v4902_v32  ;;  %4529 = vrot.lane.b32.xlu0 %v3827_v2, %s6775_s9  ;;  %v5081_v2 = vsel %vm13292_vm12, %v5045_v43, %v10880_v34  ;;  %v3670_v61 = vld [vmem:[#allocation2 + $0x18] sm:$0xff]  ;;  %vm13303_vm12 = vmmov %vm13299_vm4 }
 0x55c   : > { %4387 = vrot.lane.b32.xlu1 %v3792_v50, %s6772_s20  ;;  %6619 = vmatmul.mubr.msk.f32.vlgmr.msra.gmra.mrb[20].mxu1 %vm5308_vm2, %v5264_v20  ;;  %v5117_v1 = vsel %vm13293_vm13, %v5081_v2, %v4362_v5  ;;  %v3793_v32 = vld [vmem:[#allocation2 + $0x93] sm:$0xff]  ;;  %v5010_v5 = vsel %vm13294_vm14, %v3670_v61, %v10612_v51  ;;  %v3866_v43 = vld [vmem:[#allocation2 + $0x9d] sm:$0xff]  ;;  %vm13304_vm13 = vmmov %vm13300_vm6 }
 0x55d   : > { %v4618_v21 = vpop.permute.xlu0 %4617  ;;  %v5154_v24 = vsel %vm5151_vm10, %v5117_v1, %v4506_v6  ;;  %v3865_v20 = vld [vmem:[#allocation2 + $0x95] sm:$0xff]  ;;  %v5046_v6 = vsel %vm13295_vm15, %v5010_v5, %v10767_v47  ;;  %vm13305_vm14 = vmmov %vm13297_vm5 }
 0x55e   : > { %v4616_v7 = vpop.permute.xlu1 %4615  ;;  %v5082_v50 = vsel %vm13296_vm9, %v5046_v6, %v10878_v44  ;;  %vm13306_vm15 = vmmov %vm13298_vm7 }
 0x55f   : > { %4531 = vrot.lane.b32.xlu0 %v3828_v17, %s6775_s9  ;;  %v5191_v55 = vsel %vm5188_vm0, %v5154_v24, %v4616_v7  ;;  %v3794_v24 = vld [vmem:[#allocation2 + $0x9b] sm:$0xff]  ;;  %vm13307_vm9 = vmmov %vm13299_vm4 }
 0x560   : > { %4925 = vrot.lane.b32.xlu1 %v3900_v60, %s6778_s23  ;;  %v5118_v60 = vsel %vm13297_vm5, %v5082_v50, %v4364_v26  ;;  %v3672_v50 = vld [vmem:[#allocation2 + $0x28] sm:$0xff]  ;;  %vm13308_vm5 = vmmov %vm13300_vm6 }
 0x561   : > { %v4366_v8 = vpop.permute.xlu0 %4365  ;;  %v5155_v51 = vsel %vm5151_vm10, %v5118_v60, %v4508_v23  ;;  %v3795_v60 = vld [vmem:[#allocation2 + $0xa3] sm:$0xff] }
 0x562   : > { %v4760_v46 = vpop.permute.xlu1 %4759  ;;  %v5192_v2 = vsel %vm5188_vm0, %v5155_v51, %v4618_v21 }
 0x563   : > { %4641 = vrot.lane.b32.xlu0 %v3830_v18, %s6776_s14  ;;  %v5228_v17 = vsel %vm5225_vm1, %v5191_v55, %v4760_v46  ;;  %v3671_v55 = vld [vmem:[#allocation2 + $0x20] sm:$0xff] }
 0x564   : > { %4639 = vrot.lane.b32.xlu1 %v3829_v38, %s6776_s14  ;;  %v5011_v21 = vsel %vm13298_vm7, %v3671_v55, %v10623_v15  ;;  %vm13309_vm7 = vmmov %vm13301_vm8 }
 0x565   : > { %v4904_v11 = vpop.permute.xlu0 %4903 }
 0x566   : > { %v4762_v0 = vpop.permute.xlu1 %4761  ;;  %v5265_v34 = vsel %vm5262_vm3, %v5228_v17, %v4904_v11  ;;  %v3902_v17 = vld [vmem:[#allocation2 + $0x9e] sm:$0xff]  ;;  %v5047_v11 = vsel %vm13299_vm4, %v5011_v21, %v10778_v52  ;;  %v3673_v21 = vld [vmem:[#allocation2 + $0x30] sm:$0xff]  ;;  %vm13310_vm4 = vmmov %vm13302_vm11 }
 0x567   : > { %4389 = vrot.lane.b32.xlu0 %v3793_v32, %s6772_s20  ;;  %6621 = vmatprep.mubr.msk.f32.mxu1 %vm5308_vm2, %v5265_v34  ;;  %v5229_v47 = vsel %vm5225_vm1, %v5192_v2, %v4762_v0  ;;  %v3832_v32 = vld [vmem:[#allocation2 + $0xac] sm:$0xff] }
 0x568   : > { %4783 = vrot.lane.b32.xlu1 %v3865_v20, %s6777_s17  ;;  %v3831_v20 = vld [vmem:[#allocation2 + $0xa4] sm:$0xff] }
 0x569   : > { %v4510_v7 = vpop.permute.xlu0 %4509 }
 0x56a   : > { %v4368_v27 = vpop.permute.xlu1 %4367 }
 0x56b   : > { %4927 = vrot.lane.b32.xlu0 %v3901_v62, %s6778_s23  ;;  %v3867_v62 = vld [vmem:[#allocation2 + $0xa5] sm:$0xff] }
 0x56c   : > { %4785 = vrot.lane.b32.xlu1 %v3866_v43, %s6777_s17 }
 0x56d   : > { %v4512_v46 = vpop.permute.xlu0 %4511 }
 0x56e   : > { %v4906_v1 = vpop.permute.xlu1 %4905 }
 0x56f   : > { %v5266_v44 = vsel %vm5262_vm3, %v5229_v47, %v4906_v1  ;;  %4533 = vrot.lane.b32.xlu0 %v3829_v38, %s6775_s9  ;;  %v5083_v38 = vsel %vm13300_vm6, %v5047_v11, %v10886_v29  ;;  %v3903_v1 = vld [vmem:[#allocation2 + $0xa6] sm:$0xff]  ;;  %v3904_v11 = vld [vmem:[#allocation2 + $0xae] sm:$0xff]  ;;  %vm13311_vm6 = vmmov %vm13307_vm9 }
 0x570   : > { %4391 = vrot.lane.b32.xlu1 %v3794_v24, %s6772_s20  ;;  %6622 = vmatmul.mubr.msk.f32.gmra.mrb[22].mxu1 %vm5308_vm2, %v5266_v44  ;;  %v5119_v34 = vsel %vm13301_vm8, %v5083_v38, %v4366_v8  ;;  %v5012_v8 = vsel %vm13302_vm11, %v3672_v50, %v10621_v56  ;;  %v3868_v44 = vld [vmem:[#allocation2 + $0xad] sm:$0xff]  ;;  %v3869_v50 = vld [vmem:[#allocation2 + $0xb5] sm:$0xff]  ;;  %vm13312_vm8 = vmmov %vm13308_vm5 }
 0x571   : > { %v4622_v26 = vpop.permute.xlu0 %4621  ;;  %v5156_v5 = vsel %vm5151_vm10, %v5119_v34, %v4510_v7  ;;  %v5048_v7 = vsel %vm13303_vm12, %v5012_v8, %v10776_v22  ;;  %vm13313_vm11 = vmmov %vm13309_vm7 }
 0x572   : > { %v4620_v23 = vpop.permute.xlu1 %4619  ;;  %v5084_v43 = vsel %vm13304_vm13, %v5048_v7, %v10884_v13  ;;  %vm13314_vm12 = vmmov %vm13310_vm4 }
 0x573   : > { %4535 = vrot.lane.b32.xlu0 %v3830_v18, %s6775_s9  ;;  %v5193_v15 = vsel %vm5188_vm0, %v5156_v5, %v4620_v23  ;;  %v5120_v47 = vsel %vm13305_vm14, %v5084_v43, %v4368_v27  ;;  %v3797_v43 = vld [vmem:[#allocation2 + $0xb3] sm:$0xff]  ;;  %vm13315_vm13 = vmmov %vm13311_vm6 }
 0x574   : > { %4929 = vrot.lane.b32.xlu1 %v3902_v17, %s6778_s23  ;;  %v5157_v56 = vsel %vm5151_vm10, %v5120_v47, %v4512_v46  ;;  %v3796_v17 = vld [vmem:[#allocation2 + $0xab] sm:$0xff]  ;;  %vm13316_vm14 = vmmov %vm13308_vm5 }
 0x575   : > { %v4370_v0 = vpop.permute.xlu0 %4369  ;;  %v5194_v24 = vsel %vm5188_vm0, %v5157_v56, %v4622_v26  ;;  %v5013_v26 = vsel %vm13306_vm15, %v3673_v21, %v10629_v25  ;;  %v3870_v56 = vld [vmem:[#allocation2 + $0xbd] sm:$0xff]  ;;  %vm13317_vm15 = vmmov %vm13309_vm7 }
 0x576   : > { %v4764_v61 = vpop.permute.xlu1 %4763  ;;  %v5049_v38 = vsel %vm13307_vm9, %v5013_v26, %v10784_v35  ;;  %v3906_v21 = vld [vmem:[#allocation2 + $0xbe] sm:$0xff]  ;;  %vm13318_vm9 = vmmov %vm13310_vm4 }
 0x577   : > { %4645 = vrot.lane.b32.xlu0 %v3832_v32, %s6776_s14  ;;  %v5230_v18 = vsel %vm5225_vm1, %v5193_v15, %v4764_v61  ;;  %v5085_v61 = vsel %vm13308_vm5, %v5049_v38, %v10892_v12  ;;  %v3833_v15 = vld [vmem:[#allocation2 + $0xb4] sm:$0xff]  ;;  %vm13319_vm5 = vmmov %vm13311_vm6 }
 0x578   : > { %4643 = vrot.lane.b32.xlu1 %v3831_v20, %s6776_s14  ;;  %v5121_v5 = vsel %vm13309_vm7, %v5085_v61, %v4370_v0  ;;  %v3676_v61 = vld [vmem:[#allocation2 + $0x48] sm:$0xff]  ;;  %vm13320_vm7 = vmmov %vm13312_vm8 }
 0x579   : > { %v4908_v52 = vpop.permute.xlu0 %4907 }
 0x57a   : > { %v4766_v6 = vpop.permute.xlu1 %4765  ;;  %v5267_v29 = vsel %vm5262_vm3, %v5230_v18, %v4908_v52 }
 0x57b   : > { %4393 = vrot.lane.b32.xlu0 %v3795_v60, %s6772_s20  ;;  %6624 = vmatprep.mubr.msk.f32.mxu1 %vm5308_vm2, %v5267_v29  ;;  %v5231_v22 = vsel %vm5225_vm1, %v5194_v24, %v4766_v6  ;;  %v3674_v6 = vld [vmem:[#allocation2 + $0x38] sm:$0xff] }
 0x57c   : > { %4787 = vrot.lane.b32.xlu1 %v3867_v62, %s6777_s17  ;;  %v3834_v29 = vld [vmem:[#allocation2 + $0xbc] sm:$0xff]  ;;  %v5014_v0 = vsel %vm13310_vm4, %v3674_v6, %v10627_v14  ;;  %vm13321_vm4 = vmmov %vm13313_vm11 }
 0x57d   : > { %v4514_v51 = vpop.permute.xlu0 %4513 }
 0x57e   : > { %v4372_v2 = vpop.permute.xlu1 %4371  ;;  %v5158_v18 = vsel %vm5151_vm10, %v5121_v5, %v4514_v51 }
 0x57f   : > { %4931 = vrot.lane.b32.xlu0 %v3903_v1, %s6778_s23 }
 0x580   : > { %4789 = vrot.lane.b32.xlu1 %v3868_v44, %s6777_s17  ;;  %v3905_v44 = vld [vmem:[#allocation2 + $0xb6] sm:$0xff] }
 0x581   : > { %v4516_v23 = vpop.permute.xlu0 %4515 }
 0x582   : > { %v4910_v55 = vpop.permute.xlu1 %4909 }
 0x583   : > { %v5268_v13 = vsel %vm5262_vm3, %v5231_v22, %v4910_v55  ;;  %4537 = vrot.lane.b32.xlu0 %v3831_v20, %s6775_s9  ;;  %v3675_v22 = vld [vmem:[#allocation2 + $0x40] sm:$0xff] }
 0x584   : > { %4395 = vrot.lane.b32.xlu1 %v3796_v17, %s6772_s20  ;;  %6625 = vmatmul.mubr.msk.f32.gmra.mrb[24].mxu1 %vm5308_vm2, %v5268_v13 }
 0x585   : > { %v4626_v27 = vpop.permute.xlu0 %4625 }
 0x586   : > { %v4624_v46 = vpop.permute.xlu1 %4623 }
 0x587   : > { %4539 = vrot.lane.b32.xlu0 %v3832_v32, %s6775_s9  ;;  %v5195_v25 = vsel %vm5188_vm0, %v5158_v18, %v4624_v46 }
 0x588   : > { %4933 = vrot.lane.b32.xlu1 %v3904_v11, %s6778_s23 }
 0x589   : > { %v4374_v34 = vpop.permute.xlu0 %4373 }
 0x58a   : > { %v4768_v20 = vpop.permute.xlu1 %4767 }
 0x58b   : > { %4253 = vrot.lane.b32.xlu0 %v10606_v63, %s6770_s29  ;;  %v5232_v32 = vsel %vm5225_vm1, %v5195_v25, %v4768_v20  ;;  %v5050_v63 = vsel %vm13311_vm6, %v5014_v0, %v10782_v10  ;;  %v3835_v20 = vld [vmem:[#allocation2 + $0xc4] sm:$0xff]  ;;  %vm13322_vm6 = vmmov %vm13318_vm9 }
 0x58c   : > { %4647 = vrot.lane.b32.xlu1 %v3833_v15, %s6776_s14  ;;  %v5086_v60 = vsel %vm13312_vm8, %v5050_v63, %v10890_v33  ;;  %vm13323_vm8 = vmmov %vm13319_vm5 }
 0x58d   : > { %v4912_v35 = vpop.permute.xlu0 %4911  ;;  %v5122_v7 = vsel %vm13313_vm11, %v5086_v60, %v4372_v2  ;;  %v3677_v60 = vld [vmem:[#allocation2 + $0x50] sm:$0xff]  ;;  %vm13324_vm11 = vmmov %vm13320_vm7 }
 0x58e   : > { %v4770_v52 = vpop.permute.xlu1 %4769  ;;  %v5269_v12 = vsel %vm5262_vm3, %v5232_v32, %v4912_v35  ;;  %v5159_v51 = vsel %vm5151_vm10, %v5122_v7, %v4516_v23  ;;  %v5015_v23 = vsel %vm13314_vm12, %v3675_v22, %v10635_v19  ;;  %v3871_v35 = vld [vmem:[#allocation2 + $0xc5] sm:$0xff]  ;;  %v5017_v7 = vsel %vm13322_vm6, %v3677_v60, %v10641_v54  ;;  %vm13325_vm12 = vmmov %vm13321_vm4 }
 0x58f   : > { %4791 = vrot.lane.b32.xlu0 %v3869_v50, %s6777_s17  ;;  %6627 = vmatprep.mubr.msk.f32.mxu1 %vm5308_vm2, %v5269_v12  ;;  %v5196_v14 = vsel %vm5188_vm0, %v5159_v51, %v4626_v27  ;;  %v5051_v55 = vsel %vm13315_vm13, %v5015_v23, %v10790_v3  ;;  %v3799_v50 = vld [vmem:[#allocation2 + $0xc3] sm:$0xff]  ;;  %vm13326_vm13 = vmmov %vm13322_vm6 }
 0x590   : > { %4649 = vrot.lane.b32.xlu1 %v3834_v29, %s6776_s14  ;;  %v5233_v10 = vsel %vm5225_vm1, %v5196_v14, %v4770_v52  ;;  %v5087_v13 = vsel %vm13316_vm14, %v5051_v55, %v10898_v58  ;;  %v3836_v52 = vld [vmem:[#allocation2 + $0xcc] sm:$0xff]  ;;  %vm13327_vm14 = vmmov %vm13319_vm5 }
 0x591   : > { %v4518_v62 = vpop.permute.xlu0 %4517  ;;  %v5123_v46 = vsel %vm13317_vm15, %v5087_v13, %v4374_v34  ;;  %v5016_v34 = vsel %vm13318_vm9, %v3676_v61, %v10633_v30  ;;  %vm13328_vm15 = vmmov %vm13320_vm7 }
 0x592   : > { %v4376_v8 = vpop.permute.xlu1 %4375  ;;  %v5160_v11 = vsel %vm5151_vm10, %v5123_v46, %v4518_v62  ;;  %v5052_v5 = vsel %vm13319_vm5, %v5016_v34, %v10788_v4  ;;  %v3907_v62 = vld [vmem:[#allocation2 + $0xc6] sm:$0xff]  ;;  %vm13329_vm9 = vmmov %vm13321_vm4 }
 0x593   : > { %4397 = vrot.lane.b32.xlu0 %v3797_v43, %s6772_s20  ;;  %v5053_v43 = vsel %vm13323_vm8, %v5017_v7, %v10796_v40  ;;  %vm13330_vm5 = vmmov %vm13322_vm6 }
 0x594   : > { %4255 = vrot.lane.b32.xlu1 %v10604_v37, %s6770_s29  ;;  %v3798_v37 = vld [vmem:[#allocation2 + $0xbb] sm:$0xff]  ;;  %v5089_v51 = vsel %vm13324_vm11, %v5053_v43, %v10904_v48  ;;  %vm13333_vm6 = vmmov %vm13329_vm9 }
 0x595   : > { %v4520_v47 = vpop.permute.xlu0 %4519 }
 0x596   : > { %v4914_v1 = vpop.permute.xlu1 %4913 }
 0x597   : > { %v5270_v33 = vsel %vm5262_vm3, %v5233_v10, %v4914_v1  ;;  %4935 = vrot.lane.b32.xlu0 %v3905_v44, %s6778_s23  ;;  %v3800_v1 = vld [vmem:[#allocation2 + $0xcb] sm:$0xff] }
 0x598   : > { %4793 = vrot.lane.b32.xlu1 %v3870_v56, %s6777_s17  ;;  %6628 = vmatmul.mubr.msk.f32.gmra.mrb[26].mxu1 %vm5308_vm2, %v5270_v33 }
 0x599   : > { %v4630_v2 = vpop.permute.xlu0 %4629 }
 0x59a   : > { %v4628_v24 = vpop.permute.xlu1 %4627 }
 0x59b   : > { %4541 = vrot.lane.b32.xlu0 %v3833_v15, %s6775_s9  ;;  %v5197_v19 = vsel %vm5188_vm0, %v5160_v11, %v4628_v24  ;;  %v5088_v15 = vsel %vm13320_vm7, %v5052_v5, %v10896_v42  ;;  %v3908_v24 = vld [vmem:[#allocation2 + $0xce] sm:$0xff]  ;;  %v6748_v5 = vld [vmem:[#allocation2 + $0xda] sm:$0xff]  ;;  %vm13331_vm7 = vmmov %vm13323_vm8 }
 0x59c   : > { %4399 = vrot.lane.b32.xlu1 %v3798_v37, %s6772_s20  ;;  %v5124_v32 = vsel %vm13321_vm4, %v5088_v15, %v4376_v8  ;;  %v3872_v8 = vld [vmem:[#allocation2 + $0xcd] sm:$0xff]  ;;  %vm13332_vm4 = vmmov %vm13324_vm11 }
 0x59d   : > { %v4378_v17 = vpop.permute.xlu0 %4377  ;;  %v5161_v30 = vsel %vm5151_vm10, %v5124_v32, %v4520_v47  ;;  %vm13334_vm8 = vmmov %vm13330_vm5 }
 0x59e   : > { %v4772_v27 = vpop.permute.xlu1 %4771  ;;  %v5125_v47 = vsel %vm13325_vm12, %v5089_v51, %v4378_v17  ;;  %vm13335_vm11 = vmmov %vm13331_vm7 }
 0x59f   : > { %4543 = vrot.lane.b32.xlu0 %v3834_v29, %s6775_s9  ;;  %v5234_v26 = vsel %vm5225_vm1, %v5197_v19, %v4772_v27  ;;  %v6746_v29 = vld [vmem:[#allocation2 + $0xca] sm:$0xff]  ;;  %v3837_v27 = vld [vmem:[#allocation2 + $0xd4] sm:$0xff]  ;;  %vm13336_vm12 = vmmov %vm13332_vm4 }
 0x5a0   : > { %4937 = vrot.lane.b32.xlu1 %v3906_v21, %s6778_s23 }
 0x5a1   : > { %v4916_v38 = vpop.permute.xlu0 %4915 }
 0x5a2   : > { %v4774_v3 = vpop.permute.xlu1 %4773  ;;  %v5271_v58 = vsel %vm5262_vm3, %v5234_v26, %v4916_v38  ;;  %v3873_v26 = vld [vmem:[#allocation2 + $0xd5] sm:$0xff] }
 0x5a3   : > { %4257 = vrot.lane.b32.xlu0 %v10616_v28, %s6770_s29  ;;  %6630 = vmatprep.mubr.msk.f32.mxu1 %vm5308_vm2, %v5271_v58  ;;  %v5198_v28 = vsel %vm5188_vm0, %v5161_v30, %v4630_v2  ;;  %v3678_v2 = vld [vmem:[#allocation2 + $0x58] sm:$0xff]  ;;  %v3679_v58 = vld [vmem:[#allocation2 + $0x60] sm:$0xff] }
 0x5a4   : > { %4651 = vrot.lane.b32.xlu1 %v3835_v20, %s6776_s14  ;;  %v5235_v4 = vsel %vm5225_vm1, %v5198_v28, %v4774_v3  ;;  %v5018_v22 = vsel %vm13326_vm13, %v3678_v2, %v10639_v49  ;;  %v6747_v49 = vld [vmem:[#allocation2 + $0xd2] sm:$0xff]  ;;  %v3838_v38 = vld [vmem:[#allocation2 + $0xdc] sm:$0xff]  ;;  %v5019_v34 = vsel %vm13330_vm5, %v3679_v58, %v10647_v57  ;;  %vm13337_vm13 = vmmov %vm13333_vm6 }
 0x5a5   : > { %v4522_v18 = vpop.permute.xlu0 %4521  ;;  %v5054_v37 = vsel %vm13327_vm14, %v5018_v22, %v10794_v16  ;;  %v5055_v15 = vsel %vm13331_vm7, %v5019_v34, %v10802_v39  ;;  %v3874_v30 = vld [vmem:[#allocation2 + $0xdd] sm:$0xff]  ;;  %vm13338_vm14 = vmmov %vm13330_vm5  ;;  %v3804_v34 = vld [vmem:[#allocation2 + $0xeb] sm:$0xff] }
 0x5a6   : > { %v4380_v25 = vpop.permute.xlu1 %4379  ;;  %v5162_v33 = vsel %vm5151_vm10, %v5125_v47, %v4522_v18  ;;  %v5090_v23 = vsel %vm13328_vm15, %v5054_v37, %v10902_v9  ;;  %v5091_v18 = vsel %vm13332_vm4, %v5055_v15, %v10910_v45  ;;  %vm13339_vm15 = vmmov %vm13331_vm7  ;;  %v13340_v2 = vld [vmem:[#allocation27_spill] sm:$0xff] }
 0x5a7   : > { %4795 = vrot.lane.b32.xlu0 %v3871_v35, %s6777_s17  ;;  %v5126_v17 = vsel %vm13329_vm9, %v5090_v23, %v4380_v25  ;;  %vm13341_vm9 = vmmov %vm13332_vm4  ;;  %v3803_v23 = vld [vmem:[#allocation2 + $0xe3] sm:$0xff] }
 0x5a8   : > { %4653 = vrot.lane.b32.xlu1 %v3836_v52, %s6776_s14  ;;  %vm13342_vm5 = vmmov %vm13333_vm6 }
 0x5a9   : > { %v4524_v6 = vpop.permute.xlu0 %4523  ;;  %vm13344_vm7 = vmmov %vm13334_vm8 }
 0x5aa   : > { %v4918_v12 = vpop.permute.xlu1 %4917  ;;  %v5163_v46 = vsel %vm5151_vm10, %v5126_v17, %v4524_v6  ;;  %vm13346_vm4 = vmmov %vm13335_vm11 }
 0x5ab   : > { %v5272_v42 = vsel %vm5262_vm3, %v5235_v4, %v4918_v12  ;;  %4401 = vrot.lane.b32.xlu0 %v3799_v50, %s6772_s20  ;;  %v3680_v12 = vld [vmem:[#allocation2 + $0x68] sm:$0xff] }
 0x5ac   : > { %4259 = vrot.lane.b32.xlu1 %v6746_v29, %s6770_s29  ;;  %6631 = vmatmul.mubr.msk.f32.gmra.mrb[28].mxu1 %vm5308_vm2, %v5272_v42  ;;  %v3802_v42 = vld [vmem:[#allocation2 + $0xdb] sm:$0xff]  ;;  %v5020_v50 = vsel %vm13334_vm8, %v3680_v12, %v10645_v31  ;;  %vm13349_vm8 = vmmov %vm13342_vm5  ;;  %v6751_v12 = vld [vmem:[#allocation2 + $0xf2] sm:$0xff] }
 0x5ad   : > { %v4634_v0 = vpop.permute.xlu0 %4633  ;;  %v5056_v29 = vsel %vm13335_vm11, %v5020_v50, %v10800_v36  ;;  %vm13351_vm11 = vmmov %vm13344_vm7  ;;  %v13354_v50 = vld [vmem:[#allocation157_spill] sm:$0xff] }
 0x5ae   : > { %v4632_v63 = vpop.permute.xlu1 %4631  ;;  %v5200_v21 = vsel %vm5188_vm0, %v5163_v46, %v4634_v0  ;;  %v5092_v0 = vsel %vm13336_vm12, %v5056_v29, %v10908_v53  ;;  %v3839_v53 = vld [vmem:[#allocation2 + $0xe4] sm:$0xff]  ;;  %v3682_v46 = vld [vmem:[#allocation2 + $0x78] sm:$0xff]  ;;  %vm13353_vm12 = vmmov %vm13346_vm4 }
 0x5af   : > { %4939 = vrot.lane.b32.xlu0 %v3907_v62, %s6778_s23  ;;  %v5199_v54 = vsel %vm5188_vm0, %v5162_v33, %v4632_v63  ;;  %v3681_v33 = vld [vmem:[#allocation2 + $0x70] sm:$0xff] }
 0x5b0   : > { %4797 = vrot.lane.b32.xlu1 %v3872_v8, %s6777_s17  ;;  %v3910_v8 = vld [vmem:[#allocation2 + $0xde] sm:$0xff] }
 0x5b1   : > { %v4382_v14 = vpop.permute.xlu0 %4381 }
 0x5b2   : > { %v4776_v10 = vpop.permute.xlu1 %4775  ;;  %v5127_v35 = vsel %vm13333_vm6, %v5091_v18, %v4382_v14  ;;  %vm13348_vm6 = vmmov %vm13341_vm9 }
 0x5b3   : > { %4545 = vrot.lane.b32.xlu0 %v3835_v20, %s6775_s9  ;;  %v5236_v44 = vsel %vm5225_vm1, %v5199_v54, %v4776_v10  ;;  %v3801_v20 = vld [vmem:[#allocation2 + $0xd3] sm:$0xff]  ;;  %v6749_v10 = vld [vmem:[#allocation2 + $0xe2] sm:$0xff] }
 0x5b4   : > { %4403 = vrot.lane.b32.xlu1 %v3800_v1, %s6772_s20  ;;  %v3875_v54 = vld [vmem:[#allocation2 + $0xe5] sm:$0xff] }
 0x5b5   : > { %v4920_v56 = vpop.permute.xlu0 %4919 }
 0x5b6   : > { %v4778_v40 = vpop.permute.xlu1 %4777  ;;  %v5273_v48 = vsel %vm5262_vm3, %v5236_v44, %v4920_v56  ;;  %v3840_v44 = vld [vmem:[#allocation2 + $0xec] sm:$0xff]  ;;  %v5021_v56 = vsel %vm13338_vm14, %v3681_v33, %v10653_v59  ;;  %vm13356_vm14 = vmmov %vm13342_vm5  ;;  %v6752_v33 = vld [vmem:[#allocation2 + $0xfa] sm:$0xff] }
 0x5b7   : > { %4547 = vrot.lane.b32.xlu0 %v3836_v52, %s6775_s9  ;;  %6633 = vmatprep.mubr.msk.f32.mxu1 %vm5308_vm2, %v5273_v48  ;;  %v5237_v16 = vsel %vm5225_vm1, %v5200_v21, %v4778_v40  ;;  %v3909_v52 = vld [vmem:[#allocation2 + $0xd6] sm:$0xff]  ;;  %v5057_v40 = vsel %vm13339_vm15, %v5021_v56, %v10808_v41  ;;  %v6750_v59 = vld [vmem:[#allocation2 + $0xea] sm:$0xff]  ;;  %vm13358_vm15 = vmmov %vm13344_vm7 }
 0x5b8   : > { %4941 = vrot.lane.b32.xlu1 %v3908_v24, %s6778_s23  ;;  %v5093_v48 = vsel %vm13341_vm9, %v5057_v40, %v13340_v2  ;;  %v3911_v21 = vld [vmem:[#allocation2 + $0xe6] sm:$0xff]  ;;  %vm13360_vm9 = vmmov %vm13346_vm4 }
 0x5b9   : > { %v4526_v55 = vpop.permute.xlu0 %4525  ;;  %v13361_v56 = vld [vmem:[#allocation156_spill] sm:$0xff] }
 0x5ba   : > { %v4384_v13 = vpop.permute.xlu1 %4383  ;;  %v5164_v28 = vsel %vm5151_vm10, %v5127_v35, %v4526_v55 }
 0x5bb   : > { %4261 = vrot.lane.b32.xlu0 %v6747_v49, %s6770_s29  ;;  %v5128_v62 = vsel %vm13337_vm13, %v5092_v0, %v4384_v13  ;;  %vm13355_vm13 = vmmov %vm13348_vm6 }
 0x5bc   : > { %4655 = vrot.lane.b32.xlu1 %v3837_v27, %s6776_s14 }
 0x5bd   : > { %v4528_v11 = vpop.permute.xlu0 %4527 }
 0x5be   : > { %v4922_v19 = vpop.permute.xlu1 %4921  ;;  %v5165_v7 = vsel %vm5151_vm10, %v5128_v62, %v4528_v11  ;;  %v13343_v11 = vld [vmem:[#allocation20_spill] sm:$0xff]  ;;  %v3877_v62 = vld [vmem:[#allocation2 + $0xf5] sm:$0xff] }
 0x5bf   : > { %v5274_v9 = vsel %vm5262_vm3, %v5237_v16, %v4922_v19  ;;  %4799 = vrot.lane.b32.xlu0 %v3873_v26, %s6777_s17  ;;  %v3876_v16 = vld [vmem:[#allocation2 + $0xed] sm:$0xff]  ;;  %v5022_v19 = vsel %vm13344_vm7, %v3682_v46, %v13343_v11  ;;  %vm13363_vm7 = vmmov %vm13349_vm8 }
 0x5c0   : > { %4657 = vrot.lane.b32.xlu1 %v3838_v38, %s6776_s14  ;;  %6634 = vmatmul.mubr.msk.f32.gmra.mrb[30].mxu1 %vm5308_vm2, %v5274_v9  ;;  %v13345_v9 = vld [vmem:[#allocation178_spill] sm:$0xff] }
 0x5c1   : > { %v4638_v3 = vpop.permute.xlu0 %4637  ;;  %v5058_v26 = vsel %vm13346_vm4, %v5022_v19, %v13345_v9  ;;  %v3685_v19 = vld [vmem:[#allocation2 + $0x90] sm:$0xff]  ;;  %v3843_v9 = vld [vmem:[#allocation2 + $0x104] sm:$0xff]  ;;  %vm13365_vm4 = vmmov %vm13351_vm11 }
 0x5c2   : > { %v4636_v61 = vpop.permute.xlu1 %4635  ;;  %v5202_v31 = vsel %vm5188_vm0, %v5165_v7, %v4638_v3 }
 0x5c3   : > { %4405 = vrot.lane.b32.xlu0 %v3801_v20, %s6772_s20  ;;  %v5201_v57 = vsel %vm5188_vm0, %v5164_v28, %v4636_v61 }
 0x5c4   : > { %4263 = vrot.lane.b32.xlu1 %v6748_v5, %s6770_s29 }
 0x5c5   : > { %v4386_v25 = vpop.permute.xlu0 %4385 }
 0x5c6   : > { %v4780_v32 = vpop.permute.xlu1 %4779  ;;  %v5129_v37 = vsel %vm13342_vm5, %v5093_v48, %v4386_v25  ;;  %vm13362_vm5 = vmmov %vm13348_vm6 }
 0x5c7   : > { %4943 = vrot.lane.b32.xlu0 %v3909_v52, %s6778_s23  ;;  %v5238_v4 = vsel %vm5225_vm1, %v5201_v57, %v4780_v32  ;;  %v3912_v52 = vld [vmem:[#allocation2 + $0xee] sm:$0xff]  ;;  %v3683_v57 = vld [vmem:[#allocation2 + $0x80] sm:$0xff] }
 0x5c8   : > { %4801 = vrot.lane.b32.xlu1 %v3874_v30, %s6777_s17 }
 0x5c9   : > { %v4924_v39 = vpop.permute.xlu0 %4923 }
 0x5ca   : > { %v4782_v6 = vpop.permute.xlu1 %4781  ;;  %v5275_v45 = vsel %vm5262_vm3, %v5238_v4, %v4924_v39  ;;  %v3841_v4 = vld [vmem:[#allocation2 + $0xf4] sm:$0xff] }
 0x5cb   : > { %4549 = vrot.lane.b32.xlu0 %v3837_v27, %s6775_s9  ;;  %6636 = vmatprep.mubr.msk.f32.mxu1 %vm5308_vm2, %v5275_v45  ;;  %v5239_v36 = vsel %vm5225_vm1, %v5202_v31, %v4782_v6  ;;  %v13350_v39 = vld [vmem:[#allocation150_spill] sm:$0xff]  ;;  %v13352_v45 = vld [vmem:[#allocation95_spill] sm:$0xff] }
 0x5cc   : > { %4407 = vrot.lane.b32.xlu1 %v3802_v42, %s6772_s20  ;;  %v5023_v6 = vsel %vm13351_vm11, %v3683_v57, %v13350_v39  ;;  %vm13370_vm11 = vmmov %vm13363_vm7 }
 0x5cd   : > { %v4530_v63 = vpop.permute.xlu0 %4529  ;;  %v5059_v42 = vsel %vm13353_vm12, %v5023_v6, %v13352_v45  ;;  %v3807_v6 = vld [vmem:[#allocation2 + $0x103] sm:$0xff]  ;;  %vm13372_vm12 = vmmov %vm13365_vm4 }
 0x5ce   : > { %v4388_v60 = vpop.permute.xlu1 %4387  ;;  %v5166_v55 = vsel %vm5151_vm10, %v5129_v37, %v4530_v63  ;;  %v5095_v29 = vsel %vm13355_vm13, %v5059_v42, %v13354_v50  ;;  %v3878_v37 = vld [vmem:[#allocation2 + $0xfd] sm:$0xff]  ;;  %v6754_v42 = vld [vmem:[#allocation2 + $0x10a] sm:$0xff] }
 0x5cf   : > { %4551 = vrot.lane.b32.xlu0 %v3838_v38, %s6775_s9  ;;  %v13347_v38 = vld [vmem:[#allocation26_spill] sm:$0xff]  ;;  %v13373_v50 = vld [vmem:[#allocation203_spill] sm:$0xff] }
 0x5d0   : > { %4945 = vrot.lane.b32.xlu1 %v3910_v8, %s6778_s23  ;;  %v5094_v3 = vsel %vm13348_vm6, %v5058_v26, %v13347_v38  ;;  %v3842_v8 = vld [vmem:[#allocation2 + $0xfc] sm:$0xff]  ;;  %vm13367_vm6 = vmmov %vm13360_vm9 }
 0x5d1   : > { %v4532_v43 = vpop.permute.xlu0 %4531  ;;  %v5130_v20 = vsel %vm13349_vm8, %v5094_v3, %v4388_v60  ;;  %v13364_v26 = vld [vmem:[#allocation56_spill] sm:$0xff]  ;;  %vm13369_vm8 = vmmov %vm13362_vm5 }
 0x5d2   : > { %v4926_v51 = vpop.permute.xlu1 %4925  ;;  %v5167_v5 = vsel %vm5151_vm10, %v5130_v20, %v4532_v43  ;;  %v5025_v38 = vsel %vm13365_vm4, %v3685_v19, %v13364_v26  ;;  %v6753_v3 = vld [vmem:[#allocation2 + $0x102] sm:$0xff]  ;;  %v13368_v20 = vld [vmem:[#allocation63_spill] sm:$0xff]  ;;  %vm13374_vm13 = vmmov %vm13367_vm6 }
 0x5d3   : > { %v5276_v14 = vsel %vm5262_vm3, %v5239_v36, %v4926_v51  ;;  %4265 = vrot.lane.b32.xlu0 %v6749_v10, %s6770_s29  ;;  %v3805_v10 = vld [vmem:[#allocation2 + $0xf3] sm:$0xff]  ;;  %v3688_v19 = vld [vmem:[#allocation2 + $0xa8] sm:$0xff] }
 0x5d4   : > { %4659 = vrot.lane.b32.xlu1 %v3839_v53, %s6776_s14  ;;  %6637 = vmatmul.mubr.msk.f32.gmra.mrb[32].mxu1 %vm5308_vm2, %v5276_v14  ;;  %v3684_v14 = vld [vmem:[#allocation2 + $0x88] sm:$0xff]  ;;  %v3809_v26 = vld [vmem:[#allocation2 + $0x113] sm:$0xff] }
 0x5d5   : > { %v4642_v47 = vpop.permute.xlu0 %4641 }
 0x5d6   : > { %v4640_v1 = vpop.permute.xlu1 %4639  ;;  %v5204_v15 = vsel %vm5188_vm0, %v5167_v5, %v4642_v47  ;;  %v13357_v47 = vld [vmem:[#allocation21_spill] sm:$0xff] }
 0x5d7   : > { %4803 = vrot.lane.b32.xlu0 %v3875_v54, %s6777_s17  ;;  %v5203_v13 = vsel %vm5188_vm0, %v5166_v55, %v4640_v1  ;;  %v5024_v1 = vsel %vm13358_vm15, %v3684_v14, %v13357_v47  ;;  %v13359_v54 = vld [vmem:[#allocation94_spill] sm:$0xff]  ;;  %vm13377_vm15 = vmmov %vm13363_vm7 }
 0x5d8   : > { %4661 = vrot.lane.b32.xlu1 %v3840_v44, %s6776_s14  ;;  %v3808_v47 = vld [vmem:[#allocation2 + $0x10b] sm:$0xff] }
 0x5d9   : > { %v4390_v24 = vpop.permute.xlu0 %4389 }
 0x5da   : > { %v4784_v22 = vpop.permute.xlu1 %4783  ;;  %v5131_v60 = vsel %vm13356_vm14, %v5095_v29, %v4390_v24  ;;  %vm13376_vm14 = vmmov %vm13362_vm5 }
 0x5db   : > { %4409 = vrot.lane.b32.xlu0 %v3803_v23, %s6772_s20  ;;  %v5240_v17 = vsel %vm5225_vm1, %v5203_v13, %v4784_v22  ;;  %v3913_v22 = vld [vmem:[#allocation2 + $0xf6] sm:$0xff] }
 0x5dc   : > { %4267 = vrot.lane.b32.xlu1 %v6750_v59, %s6770_s29 }
 0x5dd   : > { %v4928_v41 = vpop.permute.xlu0 %4927 }
 0x5de   : > { %v4786_v27 = vpop.permute.xlu1 %4785  ;;  %v5277_v49 = vsel %vm5262_vm3, %v5240_v17, %v4928_v41 }
 0x5df   : > { %4947 = vrot.lane.b32.xlu0 %v3911_v21, %s6778_s23  ;;  %6639 = vmatprep.mubr.msk.f32.mxu1 %vm5308_vm2, %v5277_v49  ;;  %v5241_v18 = vsel %vm5225_vm1, %v5204_v15, %v4786_v27  ;;  %v3806_v27 = vld [vmem:[#allocation2 + $0xfb] sm:$0xff] }
 0x5e0   : > { %4805 = vrot.lane.b32.xlu1 %v3876_v16, %s6777_s17  ;;  %v3914_v21 = vld [vmem:[#allocation2 + $0xfe] sm:$0xff] }
 0x5e1   : > { %v4534_v61 = vpop.permute.xlu0 %4533 }
 0x5e2   : > { %v4392_v58 = vpop.permute.xlu1 %4391  ;;  %v5168_v7 = vsel %vm5151_vm10, %v5131_v60, %v4534_v61  ;;  %v13366_v61 = vld [vmem:[#allocation204_spill] sm:$0xff] }
 0x5e3   : > { %4553 = vrot.lane.b32.xlu0 %v3839_v53, %s6775_s9 }
 0x5e4   : > { %4411 = vrot.lane.b32.xlu1 %v3804_v34, %s6772_s20 }
 0x5e5   : > { %v4536_v25 = vpop.permute.xlu0 %4535 }
 0x5e6   : > { %v4930_v32 = vpop.permute.xlu1 %4929 }
 0x5e7   : > { %v5278_v35 = vsel %vm5262_vm3, %v5241_v18, %v4930_v32  ;;  %4555 = vrot.lane.b32.xlu0 %v3840_v44, %s6775_s9  ;;  %v5060_v44 = vsel %vm13360_vm9, %v5024_v1, %v13359_v54  ;;  %v3844_v32 = vld [vmem:[#allocation2 + $0x10c] sm:$0xff]  ;;  %vm13379_vm9 = vmmov %vm13365_vm4 }
 0x5e8   : > { %4949 = vrot.lane.b32.xlu1 %v3912_v52, %s6778_s23  ;;  %6640 = vmatmul.mubr.msk.f32.gmra.mrb[34].mxu1 %vm5308_vm2, %v5278_v35  ;;  %v5096_v40 = vsel %vm13362_vm5, %v5060_v44, %v13361_v56  ;;  %v3916_v54 = vld [vmem:[#allocation2 + $0x10e] sm:$0xff]  ;;  %vm13381_vm5 = vmmov %vm13367_vm6 }
 0x5e9   : > { %v4646_v30 = vpop.permute.xlu0 %4645  ;;  %v5132_v24 = vsel %vm13363_vm7, %v5096_v40, %v4392_v58  ;;  %v5061_v58 = vsel %vm13367_vm6, %v5025_v38, %v13366_v61  ;;  %v3687_v40 = vld [vmem:[#allocation2 + $0xa0] sm:$0xff]  ;;  %vm13382_vm7 = vmmov %vm13369_vm8  ;;  %v13384_v38 = vld [vmem:[#allocation57_spill] sm:$0xff] }
 0x5ea   : > { %v4644_v28 = vpop.permute.xlu1 %4643  ;;  %v5169_v23 = vsel %vm5151_vm10, %v5132_v24, %v4536_v25  ;;  %v5097_v34 = vsel %vm13369_vm8, %v5061_v58, %v13368_v20  ;;  %v3879_v25 = vld [vmem:[#allocation2 + $0x105] sm:$0xff]  ;;  %vm13383_vm4 = vmmov %vm13370_vm11  ;;  %v6756_v61 = vld [vmem:[#allocation2 + $0x11a] sm:$0xff] }
 0x5eb   : > { %4269 = vrot.lane.b32.xlu0 %v6751_v12, %s6770_s29  ;;  %v5205_v31 = vsel %vm5188_vm0, %v5168_v7, %v4644_v28  ;;  %v5206_v55 = vsel %vm5188_vm0, %v5169_v23, %v4646_v30  ;;  %v13371_v12 = vld [vmem:[#allocation151_spill] sm:$0xff]  ;;  %v3915_v7 = vld [vmem:[#allocation2 + $0x106] sm:$0xff]  ;;  %vm13385_vm6 = vmmov %vm13379_vm9 }
 0x5ec   : > { %4663 = vrot.lane.b32.xlu1 %v3841_v4, %s6776_s14  ;;  %v13386_v58 = vld [vmem:[#allocation130_spill] sm:$0xff]  ;;  %vm13387_vm8 = vmmov %vm13381_vm5 }
 0x5ed   : > { %v4394_v0 = vpop.permute.xlu0 %4393 }
 0x5ee   : > { %v4788_v63 = vpop.permute.xlu1 %4787  ;;  %v5133_v18 = vsel %vm13370_vm11, %v5097_v34, %v4394_v0  ;;  %v13375_v0 = vld [vmem:[#allocation62_spill] sm:$0xff]  ;;  %vm13388_vm11 = vmmov %vm13382_vm7 }
 0x5ef   : > { %4807 = vrot.lane.b32.xlu0 %v3877_v62, %s6777_s17  ;;  %v5242_v36 = vsel %vm5225_vm1, %v5205_v31, %v4788_v63  ;;  %v3880_v31 = vld [vmem:[#allocation2 + $0x10d] sm:$0xff] }
 0x5f0   : > { %4665 = vrot.lane.b32.xlu1 %v3842_v8, %s6776_s14 }
 0x5f1   : > { %v4932_v43 = vpop.permute.xlu0 %4931 }
 0x5f2   : > { %v4790_v51 = vpop.permute.xlu1 %4789  ;;  %v5279_v53 = vsel %vm5262_vm3, %v5242_v36, %v4932_v43 }
 0x5f3   : > { %4413 = vrot.lane.b32.xlu0 %v3805_v10, %s6772_s20  ;;  %6642 = vmatprep.mubr.msk.f32.mxu1 %vm5308_vm2, %v5279_v53  ;;  %v5243_v59 = vsel %vm5225_vm1, %v5206_v55, %v4790_v51 }
 0x5f4   : > { %4271 = vrot.lane.b32.xlu1 %v6752_v33, %s6770_s29 }
 0x5f5   : > { %v4538_v2 = vpop.permute.xlu0 %4537 }
 0x5f6   : > { %v4396_v48 = vpop.permute.xlu1 %4395  ;;  %v5170_v35 = vsel %vm5151_vm10, %v5133_v18, %v4538_v2  ;;  %v3845_v2 = vld [vmem:[#allocation2 + $0x114] sm:$0xff] }
 0x5f7   : > { %4951 = vrot.lane.b32.xlu0 %v3913_v22, %s6778_s23  ;;  %v6755_v22 = vld [vmem:[#allocation2 + $0x112] sm:$0xff] }
 0x5f8   : > { %4809 = vrot.lane.b32.xlu1 %v3878_v37, %s6777_s17  ;;  %v13380_v37 = vld [vmem:[#allocation131_spill] sm:$0xff] }
 0x5f9   : > { %v4540_v13 = vpop.permute.xlu0 %4539 }
 0x5fa   : > { %v4934_v17 = vpop.permute.xlu1 %4933 }
 0x5fb   : > { %v5280_v41 = vsel %vm5262_vm3, %v5243_v59, %v4934_v17  ;;  %4557 = vrot.lane.b32.xlu0 %v3841_v4, %s6775_s9  ;;  %v3686_v4 = vld [vmem:[#allocation2 + $0x98] sm:$0xff] }
 0x5fc   : > { %4415 = vrot.lane.b32.xlu1 %v3806_v27, %s6772_s20  ;;  %6643 = vmatmul.mubr.msk.f32.gmra.mrb[36].mxu1 %vm5308_vm2, %v5280_v41  ;;  %v5026_v45 = vsel %vm13372_vm12, %v3686_v4, %v13371_v12  ;;  %v3881_v41 = vld [vmem:[#allocation2 + $0x115] sm:$0xff]  ;;  %vm13389_vm12 = vmmov %vm13383_vm4 }
 0x5fd   : > { %v11245_v46 = vpop.permute.xlu0 %4253  ;;  %v5062_v29 = vsel %vm13374_vm13, %v5026_v45, %v13373_v50  ;;  %v3846_v27 = vld [vmem:[#allocation2 + $0x11c] sm:$0xff]  ;;  %v13390_v50 = vld [vmem:[#allocation37_spill] sm:$0xff]  ;;  %vm13392_vm13 = vmmov %vm13385_vm6 }
 0x5fe   : > { %v4648_v49 = vpop.permute.xlu1 %4647  ;;  %v5098_v63 = vsel %vm13376_vm14, %v5062_v29, %v13375_v0  ;;  %v3918_v45 = vld [vmem:[#allocation2 + $0x11e] sm:$0xff]  ;;  %vm13394_vm14 = vmmov %vm13385_vm6 }
 0x5ff   : > { %4559 = vrot.lane.b32.xlu0 %v3842_v8, %s6775_s9  ;;  %v5207_v52 = vsel %vm5188_vm0, %v5170_v35, %v4648_v49  ;;  %v5134_v8 = vsel %vm13377_vm15, %v5098_v63, %v4396_v48  ;;  %v13378_v48 = vld [vmem:[#allocation175_spill] sm:$0xff]  ;;  %vm13395_vm15 = vmmov %vm13385_vm6 }
 0x600   : > { %4953 = vrot.lane.b32.xlu1 %v3914_v21, %s6778_s23  ;;  %v5171_v36 = vsel %vm5151_vm10, %v5134_v8, %v4540_v13  ;;  %v5027_v24 = vsel %vm13379_vm9, %v3687_v40, %v13378_v48  ;;  %v3882_v35 = vld [vmem:[#allocation2 + $0x11d] sm:$0xff]  ;;  %vm13397_vm9 = vmmov %vm13381_vm5 }
 0x601   : > { %v4792_v16 = vpop.permute.xlu0 %4791  ;;  %v5063_v23 = vsel %vm13381_vm5, %v5027_v24, %v13380_v37  ;;  %vm13398_vm5 = vmmov %vm13385_vm6 }
 0x602   : > { %v4650_v11 = vpop.permute.xlu1 %4649  ;;  %v5244_v30 = vsel %vm5225_vm1, %v5207_v52, %v4792_v16  ;;  %v5099_v55 = vsel %vm13382_vm7, %v5063_v23, %v11245_v46 }
 0x603   : > { %4273 = vrot.lane.b32.xlu0 %v6753_v3, %s6770_s29  ;;  %v5208_v43 = vsel %vm5188_vm0, %v5171_v36, %v4650_v11  ;;  %v5028_v3 = vsel %vm13385_vm6, %v3688_v19, %v13384_v38  ;;  %v3689_v36 = vld [vmem:[#allocation2 + $0xb0] sm:$0xff]  ;;  %vm13400_vm6 = vmmov %vm13389_vm12  ;;  %v3811_v19 = vld [vmem:[#allocation2 + $0x123] sm:$0xff] }
 0x604   : > { %4667 = vrot.lane.b32.xlu1 %v3843_v9, %s6776_s14  ;;  %v5064_v20 = vsel %vm13387_vm8, %v5028_v3, %v13386_v58  ;;  %v13403_v38 = vld [vmem:[#allocation24_spill] sm:$0xff] }
 0x605   : > { %v4398_v5 = vpop.permute.xlu0 %4397 }
 0x606   : > { %v11257_v15 = vpop.permute.xlu1 %4255  ;;  %v5135_v17 = vsel %vm13383_vm4, %v5099_v55, %v4398_v5  ;;  %vm13399_vm4 = vmmov %vm13398_vm5 }
 0x607   : > { %4811 = vrot.lane.b32.xlu0 %v3879_v25, %s6777_s17  ;;  %v5100_v34 = vsel %vm13388_vm11, %v5064_v20, %v11257_v15  ;;  %vm13402_vm8 = vmmov %vm13399_vm4 }
 0x608   : > { %4669 = vrot.lane.b32.xlu1 %v3844_v32, %s6776_s14  ;;  %vm13404_vm11 = vmmov %vm13397_vm9 }
 0x609   : > { %v4936_v28 = vpop.permute.xlu0 %4935 }
 0x60a   : > { %v4794_v57 = vpop.permute.xlu1 %4793  ;;  %v5281_v39 = vsel %vm5262_vm3, %v5244_v30, %v4936_v28 }
 0x60b   : > { %4417 = vrot.lane.b32.xlu0 %v3807_v6, %s6772_s20  ;;  %6645 = vmatprep.mubr.msk.f32.mxu1 %vm5308_vm2, %v5281_v39  ;;  %v5245_v51 = vsel %vm5225_vm1, %v5208_v43, %v4794_v57  ;;  %v3810_v39 = vld [vmem:[#allocation2 + $0x11b] sm:$0xff] }
 0x60c   : > { %4275 = vrot.lane.b32.xlu1 %v6754_v42, %s6770_s29 }
 0x60d   : > { %v4542_v60 = vpop.permute.xlu0 %4541 }
 0x60e   : > { %v4400_v62 = vpop.permute.xlu1 %4399  ;;  %v5172_v49 = vsel %vm5151_vm10, %v5135_v17, %v4542_v60  ;;  %v13391_v60 = vld [vmem:[#allocation36_spill] sm:$0xff] }
 0x60f   : > { %4955 = vrot.lane.b32.xlu0 %v3915_v7, %s6778_s23  ;;  %v5136_v25 = vsel %vm13389_vm12, %v5100_v34, %v4400_v62  ;;  %v3883_v17 = vld [vmem:[#allocation2 + $0x125] sm:$0xff]  ;;  %vm13405_vm12 = vmmov %vm13382_vm7 }
 0x610   : > { %4813 = vrot.lane.b32.xlu1 %v3880_v31, %s6777_s17 }
 0x611   : > { %v4544_v14 = vpop.permute.xlu0 %4543 }
 0x612   : > { %v4938_v53 = vpop.permute.xlu1 %4937  ;;  %v5173_v52 = vsel %vm5151_vm10, %v5136_v25, %v4544_v14  ;;  %v3775_v14 = vld [vmem:[#allocation2 + $0x122] sm:$0xff]  ;;  %v3884_v25 = vld [vmem:[#allocation2 + $0x12d] sm:$0xff] }
 0x613   : > { %v5282_v10 = vsel %vm5262_vm3, %v5245_v51, %v4938_v53  ;;  %4561 = vrot.lane.b32.xlu0 %v3843_v9, %s6775_s9  ;;  %v3847_v53 = vld [vmem:[#allocation2 + $0x124] sm:$0xff] }
 0x614   : > { %4419 = vrot.lane.b32.xlu1 %v3808_v47, %s6772_s20  ;;  %6646 = vmatmul.mubr.msk.f32.gmra.mrb[38].mxu1 %vm5308_vm2, %v5282_v10  ;;  %v13393_v10 = vld [vmem:[#allocation92_spill] sm:$0xff] }
 0x615   : > { %v11285_v1 = vpop.permute.xlu0 %4257  ;;  %v5029_v47 = vsel %vm13394_vm14, %v3689_v36, %v13393_v10  ;;  %vm13409_vm14 = vmmov %vm13399_vm4 }
 0x616   : > { %v4652_v33 = vpop.permute.xlu1 %4651 }
 0x617   : > { %4563 = vrot.lane.b32.xlu0 %v3844_v32, %s6775_s9  ;;  %v5209_v21 = vsel %vm5188_vm0, %v5172_v49, %v4652_v33  ;;  %v3917_v32 = vld [vmem:[#allocation2 + $0x116] sm:$0xff] }
 0x618   : > { %4957 = vrot.lane.b32.xlu1 %v3916_v54, %s6778_s23 }
 0x619   : > { %v4796_v44 = vpop.permute.xlu0 %4795 }
 0x61a   : > { %v4654_v56 = vpop.permute.xlu1 %4653  ;;  %v5246_v16 = vsel %vm5225_vm1, %v5209_v21, %v4796_v44  ;;  %v13396_v44 = vld [vmem:[#allocation25_spill] sm:$0xff] }
 0x61b   : > { %4277 = vrot.lane.b32.xlu0 %v6755_v22, %s6770_s29  ;;  %v5210_v30 = vsel %vm5188_vm0, %v5173_v52, %v4654_v56  ;;  %v5065_v56 = vsel %vm13397_vm9, %v5029_v47, %v13396_v44  ;;  %vm13411_vm9 = vmmov %vm13399_vm4 }
 0x61c   : > { %4671 = vrot.lane.b32.xlu1 %v3845_v2, %s6776_s14  ;;  %v5101_v48 = vsel %vm13382_vm7, %v5065_v56, %v11285_v1  ;;  %v13412_v56 = vld [vmem:[#allocation201_spill] sm:$0xff]  ;;  %vm13414_vm7 = vmmov %vm13399_vm4 }
 0x61d   : > { %v11297_v59 = vpop.permute.xlu0 %4401 }
 0x61e   : > { %v11299_v13 = vpop.permute.xlu1 %4259  ;;  %v5137_v23 = vsel %vm13400_vm6, %v5101_v48, %v11297_v59  ;;  %v3776_v59 = vld [vmem:[#allocation2 + $0x12a] sm:$0xff] }
 0x61f   : > { %4815 = vrot.lane.b32.xlu0 %v3881_v41, %s6777_s17  ;;  %v3848_v41 = vld [vmem:[#allocation2 + $0x12c] sm:$0xff] }
 0x620   : > { %4673 = vrot.lane.b32.xlu1 %v3846_v27, %s6776_s14 }
 0x621   : > { %v4940_v11 = vpop.permute.xlu0 %4939 }
 0x622   : > { %v4798_v46 = vpop.permute.xlu1 %4797  ;;  %v5283_v9 = vsel %vm5262_vm3, %v5246_v16, %v4940_v11  ;;  %v3690_v11 = vld [vmem:[#allocation2 + $0xb8] sm:$0xff] }
 0x623   : > { %4421 = vrot.lane.b32.xlu0 %v3809_v26, %s6772_s20  ;;  %6648 = vmatprep.mubr.msk.f32.mxu1 %vm5308_vm2, %v5283_v9  ;;  %v5247_v28 = vsel %vm5225_vm1, %v5210_v30, %v4798_v46  ;;  %v13401_v9 = vld [vmem:[#allocation176_spill] sm:$0xff] }
 0x624   : > { %4279 = vrot.lane.b32.xlu1 %v6756_v61, %s6770_s29  ;;  %v5030_v26 = vsel %vm13402_vm8, %v3690_v11, %v13401_v9  ;;  %v3922_v11 = vld [vmem:[#allocation2 + $0x13e] sm:$0xff]  ;;  %v3692_v9 = vld [vmem:[#allocation2 + $0xc8] sm:$0xff] }
 0x625   : > { %v4546_v5 = vpop.permute.xlu0 %4545  ;;  %v5066_v3 = vsel %vm13404_vm11, %v5030_v26, %v13403_v38  ;;  %v13419_v38 = vld [vmem:[#allocation93_spill] sm:$0xff] }
 0x626   : > { %v11317_v18 = vpop.permute.xlu1 %4403  ;;  %v5102_v61 = vsel %vm13405_vm12, %v5066_v3, %v11299_v13  ;;  %v13421_v3 = vld [vmem:[#allocation154_spill] sm:$0xff] }
 0x627   : > { %4959 = vrot.lane.b32.xlu0 %v3917_v32, %s6778_s23 }
 0x628   : > { %4817 = vrot.lane.b32.xlu1 %v3882_v35, %s6777_s17 }
 0x629   : > { %v11325_v57 = vpop.permute.xlu0 %4547 }
 0x62a   : > { %v4942_v15 = vpop.permute.xlu1 %4941 }
 0x62b   : > { %v5284_v4 = vsel %vm5262_vm3, %v5247_v28, %v4942_v15  ;;  %4565 = vrot.lane.b32.xlu0 %v3845_v2, %s6775_s9  ;;  %v3812_v15 = vld [vmem:[#allocation2 + $0x12b] sm:$0xff] }
 0x62c   : > { %4423 = vrot.lane.b32.xlu1 %v3810_v39, %s6772_s20  ;;  %6649 = vmatmul.mubr.msk.f32.gmra.mrb[40].mxu1 %vm5308_vm2, %v5284_v4  ;;  %v13407_v39 = vld [vmem:[#allocation72_spill] sm:$0xff] }
 0x62d   : > { %v11331_v6 = vpop.permute.xlu0 %4261 }
 0x62e   : > { %v4656_v12 = vpop.permute.xlu1 %4655 }
 0x62f   : > { %v11333_v42 = vpop.f32.mrb[20].mxu1  ;;  %4567 = vrot.lane.b32.xlu0 %v3846_v27, %s6775_s9  ;;  %v5174_v27 = vsel %vm5151_vm10, %v5137_v23, %v4546_v5  ;;  %v3919_v5 = vld [vmem:[#allocation2 + $0x126] sm:$0xff]  ;;  %v3886_v23 = vld [vmem:[#allocation2 + $0x13d] sm:$0xff] }
 0x630   : > { %4961 = vrot.lane.b32.xlu1 %v3918_v45, %s6778_s23  ;;  %v5663_v29 = vmul.f32 %v11333_v42, %v13390_v50  ;;  %v5776_v0 = vmul.f32 %v11333_v42, %v11333_v42  ;;  %v11341_v63 = vpop.f32.mrb[21].mxu1  ;;  %v5211_v1 = vsel %vm5188_vm0, %v5174_v27, %v4656_v12  ;;  %v13408_v45 = vld [vmem:[#allocation73_spill] sm:$0xff] }
 0x631   : > { %v5662_v62 = vmul.f32 %v11341_v63, %v13391_v60  ;;  %v5775_v8 = vmul.f32 %v11341_v63, %v11341_v63  ;;  %v4800_v7 = vpop.permute.xlu0 %4799 }
 0x632   : > { %v4658_v31 = vpop.permute.xlu1 %4657  ;;  %v5699_v43 = vsel %vm13392_vm13, %v5663_v29, 0.0  ;;  %v5812_v51 = vmul.f32 %v5776_v0, %v13390_v50  ;;  %v5248_v49 = vsel %vm5225_vm1, %v5211_v1, %v4800_v7  ;;  %vm13406_vm13 = vmmov %vm13400_vm6 }
 0x633   : > { %v5698_v33 = vsel %vm13395_vm15, %v5662_v62, 0.0  ;;  %v5811_v54 = vmul.f32 %v5775_v8, %v13391_v60  ;;  %4281 = vrot.lane.b32.xlu0 %v3775_v14, %s6770_s29  ;;  %v5138_v34 = vsel %vm13406_vm13, %v5102_v61, %v11317_v18  ;;  %v3920_v62 = vld [vmem:[#allocation2 + $0x12e] sm:$0xff]  ;;  %vm13410_vm15 = vmmov %vm13399_vm4 }
 0x634   : > { %4675 = vrot.lane.b32.xlu1 %v3847_v53, %s6776_s14  ;;  %v5848_v40 = vsel %vm13398_vm5, %v5812_v51, 0.0  ;;  %v5700_v2 = vadd.f32 %v5699_v43, %v5698_v33  ;;  %v5175_v32 = vsel %vm5151_vm10, %v5138_v34, %v11325_v57  ;;  %v3850_v43 = vld [vmem:[#allocation2 + $0x13c] sm:$0xff]  ;;  %v3849_v51 = vld [vmem:[#allocation2 + $0x134] sm:$0xff]  ;;  %vm13413_vm5 = vmmov %vm13399_vm4 }
 0x635   : > { %v5847_v24 = vsel %vm13399_vm4, %v5811_v54, 0.0  ;;  %v11361_v22 = vpop.permute.xlu0 %4405  ;;  %v5212_v35 = vsel %vm5188_vm0, %v5175_v32, %v4658_v31  ;;  %v3691_v33 = vld [vmem:[#allocation2 + $0xc0] sm:$0xff]  ;;  %vm13416_vm4 = vmmov %vm13404_vm11 }
 0x636   : > { %v11363_v37 = vpop.permute.xlu1 %4263  ;;  %v5849_v55 = vadd.f32 %v5848_v40, %v5847_v24  ;;  %v5031_v40 = vsel %vm13413_vm5, %v3691_v33, %v13412_v56  ;;  %vm13417_vm6 = vmmov %vm13405_vm12  ;;  %v13430_v56 = vld [vmem:[#allocation128_spill] sm:$0xff] }
 0x637   : > { %4819 = vrot.lane.b32.xlu0 %v3883_v17, %s6777_s17  ;;  %v3885_v17 = vld [vmem:[#allocation2 + $0x135] sm:$0xff]  ;;  %vm13418_vm8 = vmmov %vm13406_vm13 }
 0x638   : > { %4677 = vrot.lane.b32.xlu1 %v3848_v41, %s6776_s14  ;;  %vm13420_vm11 = vmmov %vm13413_vm5 }
 0x639   : > { %v4944_v21 = vpop.permute.xlu0 %4943  ;;  %vm13422_vm12 = vmmov %vm13416_vm4 }
 0x63a   : > { %v4802_v16 = vpop.permute.xlu1 %4801  ;;  %v5285_v46 = vsel %vm5262_vm3, %v5248_v49, %v4944_v21  ;;  %vm13423_vm13 = vmmov %vm13417_vm6 }
 0x63b   : > { %4425 = vrot.lane.b32.xlu0 %v3811_v19, %s6772_s20  ;;  %6651 = vmatprep.mubr.msk.f32.mxu1 %vm5308_vm2, %v5285_v46  ;;  %v5249_v52 = vsel %vm5225_vm1, %v5212_v35, %v4802_v16  ;;  %v3921_v46 = vld [vmem:[#allocation2 + $0x136] sm:$0xff] }
 0x63c   : > { %4283 = vrot.lane.b32.xlu1 %v3776_v59, %s6770_s29  ;;  %s6699_s29 = smul.u32 288, %s13661_s19 }
 0x63d   : > { %v4550_v58 = vpop.permute.xlu0 %4549 }
 0x63e   : > { %v11382_v20 = vpop.permute.xlu1 %4407  ;;  %s12067_s25 = scalar_lea.vmem %s12320_s5, %s6699_s29 }
 0x63f   : > { %4963 = vrot.lane.b32.xlu0 %v3919_v5, %s6778_s23 }
 0x640   : > { %4821 = vrot.lane.b32.xlu1 %v3884_v25, %s6777_s17 }
 0x641   : > { %v11392_v13 = vpop.permute.xlu0 %4551 }
 0x642   : > { %v4946_v30 = vpop.permute.xlu1 %4945 }
 0x643   : > { %v5286_v28 = vsel %vm5262_vm3, %v5249_v52, %v4946_v30  ;;  %v11395_v18 = vpop.f32.mrb[22].mxu1  ;;  %4569 = vrot.lane.b32.xlu0 %v3847_v53, %s6775_s9 }
 0x644   : > { %4427 = vrot.lane.b32.xlu1 %v3812_v15, %s6772_s20  ;;  %v5778_v57 = vmul.f32 %v11395_v18, %v11395_v18  ;;  %v11401_v4 = vpop.f32.mrb[23].mxu1  ;;  %6652 = vmatmul.mubr.msk.f32.gmra.mrb[42].mxu1 %vm5308_vm2, %v5286_v28  ;;  %v5665_v12 = vmul.f32 %v11395_v18, %v13407_v39 }
 0x645   : > { %v5664_v50 = vmul.f32 %v11401_v4, %v13408_v45  ;;  %v5777_v29 = vmul.f32 %v11401_v4, %v11401_v4  ;;  %v11410_v0 = vpop.permute.xlu0 %4265 }
 0x646   : > { %v4660_v60 = vpop.permute.xlu1 %4659  ;;  %v5814_v8 = vmul.f32 %v5778_v57, %v13407_v39  ;;  %v5703_v14 = vsel %vm13410_vm15, %v5665_v12, 0.0  ;;  %v13426_v39 = vld [vmem:[#allocation109_spill] sm:$0xff]  ;;  %vm13427_vm15 = vmmov %vm13413_vm5 }
 0x647   : > { %v5701_v7 = vsel %vm13409_vm14, %v5664_v50, 0.0  ;;  %v5813_v31 = vmul.f32 %v5777_v29, %v13408_v45  ;;  %4571 = vrot.lane.b32.xlu0 %v3848_v41, %s6775_s9  ;;  %vm13424_vm14 = vmmov %vm13418_vm8 }
 0x648   : > { %4965 = vrot.lane.b32.xlu1 %v3920_v62, %s6778_s23  ;;  %v5702_v36 = vadd.f32 %v5701_v7, %v5700_v2  ;;  %v5852_v48 = vsel %vm13414_vm7, %v5814_v8, 0.0  ;;  %v13415_v2 = vld [vmem:[#allocation155_spill] sm:$0xff]  ;;  %vm13429_vm7 = vmmov %vm13413_vm5 }
 0x649   : > { %v5850_v53 = vsel %vm13411_vm9, %v5813_v31, 0.0  ;;  %v4804_v10 = vpop.permute.xlu0 %4803  ;;  %v5067_v24 = vsel %vm13416_vm4, %v5031_v40, %v13415_v2  ;;  %vm13428_vm9 = vmmov %vm13413_vm5 }
 0x64a   : > { %v4662_v47 = vpop.permute.xlu1 %4661  ;;  %v5851_v54 = vadd.f32 %v5850_v53, %v5849_v55  ;;  %v5704_v44 = vadd.f32 %v5703_v14, %v5702_v36  ;;  %v5103_v27 = vsel %vm13417_vm6, %v5067_v24, %v11331_v6  ;;  %vm13431_vm4 = vmmov %vm13413_vm5 }
 0x64b   : > { %4681 = vrot.lane.b32.xlu0 %v3850_v43, %s6776_s14  ;;  %v5139_v49 = vsel %vm13418_vm8, %v5103_v27, %v11361_v22  ;;  %v5032_v22 = vsel %vm13420_vm11, %v3692_v9, %v13419_v38  ;;  %vm13433_vm6 = vmmov %vm13422_vm12 }
 0x64c   : > { %4679 = vrot.lane.b32.xlu1 %v3849_v51, %s6776_s14  ;;  %v5853_v41 = vadd.f32 %v5852_v48, %v5851_v54  ;;  %v5176_v21 = vsel %vm5151_vm10, %v5139_v49, %v4550_v58  ;;  %v5068_v61 = vsel %vm13422_vm12, %v5032_v22, %v13421_v3  ;;  %v3693_v54 = vld [vmem:[#allocation2 + $0xd0] sm:$0xff]  ;;  %v13432_v48 = vld [vmem:[#allocation61_spill] sm:$0xff]  ;;  %vm13434_vm8 = vmmov %vm13423_vm13 }
 0x64d   : > { %v4410_v55 = vpop.permute.xlu0 %4409  ;;  %v5213_v16 = vsel %vm5188_vm0, %v5176_v21, %v4660_v60  ;;  %v5104_v58 = vsel %vm13423_vm13, %v5068_v61, %v11363_v37  ;;  %v13425_v37 = vld [vmem:[#allocation108_spill] sm:$0xff]  ;;  %v5033_v40 = vsel %vm13431_vm4, %v3693_v54, %v13430_v56  ;;  %vm13435_vm11 = vmmov %vm13424_vm14  ;;  %v13441_v22 = vld [vmem:[#allocation38_spill] sm:$0xff] }
 0x64e   : > { %v11428_v1 = vpop.permute.xlu1 %4267  ;;  %v5250_v19 = vsel %vm5225_vm1, %v5213_v16, %v4804_v10  ;;  %v5140_v25 = vsel %vm13424_vm14, %v5104_v58, %v11382_v20  ;;  %vm13437_vm12 = vmmov %vm13431_vm4  ;;  %v13442_v61 = vld [vmem:[#allocation39_spill] sm:$0xff] }
 0x64f   : > { %4825 = vrot.lane.b32.xlu0 %v3886_v23, %s6777_s17  ;;  %v5177_v32 = vsel %vm5151_vm10, %v5140_v25, %v11392_v13  ;;  %vm13439_vm13 = vmmov %vm13433_vm6 }
 0x650   : > { %4823 = vrot.lane.b32.xlu1 %v3885_v17, %s6777_s17  ;;  %v5214_v52 = vsel %vm5188_vm0, %v5177_v32, %v4662_v47  ;;  %vm13440_vm14 = vmmov %vm13434_vm8 }
 0x651   : > { %v4948_v59 = vpop.permute.xlu0 %4947 }
 0x652   : > { %v4806_v6 = vpop.permute.xlu1 %4805  ;;  %v5287_v26 = vsel %vm5262_vm3, %v5250_v19, %v4948_v59  ;;  %v13436_v19 = vld [vmem:[#allocation202_spill] sm:$0xff] }
 0x653   : > { %4969 = vrot.lane.b32.xlu0 %v3922_v11, %s6778_s23  ;;  %6654 = vmatprep.mubr.msk.f32.mxu1 %vm5308_vm2, %v5287_v26  ;;  %v5251_v15 = vsel %vm5225_vm1, %v5214_v52, %v4806_v6  ;;  %v3694_v11 = vld [vmem:[#allocation2 + $0xd8] sm:$0xff]  ;;  %v13438_v6 = vld [vmem:[#allocation60_spill] sm:$0xff] }
 0x654   : > { %4967 = vrot.lane.b32.xlu1 %v3921_v46, %s6778_s23  ;;  %v5034_v59 = vsel %vm13437_vm12, %v3694_v11, %v13436_v19 }
 0x655   : > { %v4554_v34 = vpop.permute.xlu0 %4553 }
 0x656   : > { %v4412_v5 = vpop.permute.xlu1 %4411 }
 0x657   : > { %v11451_v35 = vpop.f32.mrb[24].mxu1 }
 0x658   : > { %v5780_v30 = vmul.f32 %v11451_v35, %v11451_v35  ;;  %v11456_v28 = vpop.f32.mrb[25].mxu1  ;;  %v5667_v57 = vmul.f32 %v11451_v35, %v13425_v37 }
 0x659   : > { %v5666_v20 = vmul.f32 %v11456_v28, %v13426_v39  ;;  %v5779_v13 = vmul.f32 %v11456_v28, %v11456_v28  ;;  %v4556_v12 = vpop.permute.xlu0 %4555 }
 0x65a   : > { %v4950_v45 = vpop.permute.xlu1 %4949  ;;  %v5816_v29 = vmul.f32 %v5780_v30, %v13425_v37  ;;  %v5707_v7 = vsel %vm13428_vm9, %v5667_v57, 0.0  ;;  %vm13444_vm9 = vmmov %vm13431_vm4 }
 0x65b   : > { %v5288_v50 = vsel %vm5262_vm3, %v5251_v15, %v4950_v45  ;;  %v5705_v60 = vsel %vm13427_vm15, %v5666_v20, 0.0  ;;  %v5815_v62 = vmul.f32 %v5779_v13, %v13426_v39  ;;  %vm13443_vm15 = vmmov %vm13435_vm11 }
 0x65c   : > { %6655 = vmatmul.mubr.msk.f32.gmra.mrb[44].mxu1 %vm5308_vm2, %v5288_v50  ;;  %v5706_v8 = vadd.f32 %v5705_v60, %v5704_v44  ;;  %v5856_v53 = vsel %vm13429_vm7, %v5816_v29, 0.0  ;;  %v5069_v44 = vsel %vm13433_vm6, %v5033_v40, %v13432_v48  ;;  %vm13446_vm7 = vmmov %vm13431_vm4 }
 0x65d   : > { %v5854_v31 = vsel %vm13413_vm5, %v5815_v62, 0.0  ;;  %v4270_v36 = vpop.permute.xlu0 %4269  ;;  %v5105_v2 = vsel %vm13434_vm8, %v5069_v44, %v11410_v0  ;;  %vm13445_vm5 = vmmov %vm13431_vm4 }
 0x65e   : > { %v4664_v43 = vpop.permute.xlu1 %4663  ;;  %v5855_v51 = vadd.f32 %v5854_v31, %v5853_v41  ;;  %v5708_v14 = vadd.f32 %v5707_v7, %v5706_v8  ;;  %v5141_v17 = vsel %vm13435_vm11, %v5105_v2, %v4410_v55  ;;  %v5070_v55 = vsel %vm13439_vm13, %v5034_v59, %v13438_v6  ;;  %vm13448_vm6 = vmmov %vm13431_vm4  ;;  %v3696_v59 = vld [vmem:[#allocation2 + $0xe8] sm:$0xff] }
 0x65f   : > { %v5178_v41 = vsel %vm5151_vm10, %v5141_v17, %v4554_v34  ;;  %v5106_v38 = vsel %vm13440_vm14, %v5070_v55, %v11428_v1  ;;  %vm13450_vm8 = vmmov %vm13439_vm13  ;;  %v13455_v55 = vld [vmem:[#allocation129_spill] sm:$0xff] }
 0x660   : > { %v5857_v10 = vadd.f32 %v5856_v53, %v5855_v51  ;;  %v5215_v27 = vsel %vm5188_vm0, %v5178_v41, %v4664_v43  ;;  %v5142_v52 = vsel %vm13443_vm15, %v5106_v38, %v4412_v5  ;;  %v13447_v53 = vld [vmem:[#allocation22_spill] sm:$0xff]  ;;  %vm13451_vm11 = vmmov %vm13440_vm14 }
 0x661   : > { %v4808_v47 = vpop.permute.xlu0 %4807  ;;  %v5179_v30 = vsel %vm5151_vm10, %v5142_v52, %v4556_v12  ;;  %vm13452_vm12 = vmmov %vm13443_vm15 }
 0x662   : > { %v4666_v33 = vpop.permute.xlu1 %4665  ;;  %v5252_v49 = vsel %vm5225_vm1, %v5215_v27, %v4808_v47  ;;  %vm13456_vm13 = vmmov %vm13431_vm4 }
 0x663   : > { %v5216_v57 = vsel %vm5188_vm0, %v5179_v30, %v4666_v33  ;;  %v13449_v33 = vld [vmem:[#allocation180_spill] sm:$0xff]  ;;  %vm13457_vm14 = vmmov %vm13431_vm4 }
 0x664   : > { %vm13459_vm15 = vmmov %vm13450_vm8 }
 0x665   : > { %v4414_v24 = vpop.permute.xlu0 %4413 }
 0x666   : > { %v11479_v23 = vpop.permute.xlu1 %4271 }
 0x669   : > { %v4952_v21 = vpop.permute.xlu0 %4951 }
 0x66a   : > { %v4810_v16 = vpop.permute.xlu1 %4809  ;;  %v5289_v46 = vsel %vm5262_vm3, %v5252_v49, %v4952_v21  ;;  %v13453_v21 = vld [vmem:[#allocation74_spill] sm:$0xff] }
 0x66b   : > { %v11488_v0 = vpop.f32.mrb[26].mxu1  ;;  %6657 = vmatprep.mubr.msk.f32.mxu1 %vm5308_vm2, %v5289_v46  ;;  %v5253_v20 = vsel %vm5225_vm1, %v5216_v57, %v4810_v16  ;;  %v13454_v16 = vld [vmem:[#allocation75_spill] sm:$0xff] }
 0x66c   : > { %v5782_v9 = vmul.f32 %v11488_v0, %v11488_v0  ;;  %v11495_v26 = vpop.f32.mrb[27].mxu1  ;;  %v5669_v3 = vmul.f32 %v11488_v0, %v13441_v22 }
 0x66d   : > { %v5668_v58 = vmul.f32 %v11495_v26, %v13442_v61  ;;  %v5781_v34 = vmul.f32 %v11495_v26, %v11495_v26  ;;  %v4558_v25 = vpop.permute.xlu0 %4557 }
 0x66e   : > { %v4416_v32 = vpop.permute.xlu1 %4415  ;;  %v5818_v15 = vmul.f32 %v5782_v9, %v13441_v22  ;;  %v5711_v13 = vsel %vm13445_vm5, %v5669_v3, 0.0  ;;  %v5036_v9 = vsel %vm13456_vm13, %v3696_v59, %v13455_v55  ;;  %vm13461_vm5 = vmmov %vm13431_vm4 }
 0x66f   : > { %v5709_v37 = vsel %vm13444_vm9, %v5668_v58, 0.0  ;;  %v5817_v1 = vmul.f32 %v5781_v34, %v13442_v61  ;;  %v13458_v61 = vld [vmem:[#allocation179_spill] sm:$0xff]  ;;  %vm13460_vm9 = vmmov %vm13451_vm11 }
 0x670   : > { %v5710_v39 = vadd.f32 %v5709_v37, %v5708_v14  ;;  %v5860_v62 = vsel %vm13431_vm4, %v5818_v15, 0.0  ;;  %v3695_v14 = vld [vmem:[#allocation2 + $0xe0] sm:$0xff]  ;;  %v5072_v58 = vsel %vm13459_vm15, %v5036_v9, %v13458_v61 }
 0x671   : > { %v5858_v45 = vsel %vm13446_vm7, %v5817_v1, 0.0  ;;  %v4560_v50 = vpop.permute.xlu0 %4559  ;;  %v5035_v47 = vsel %vm13448_vm6, %v3695_v14, %v13447_v53  ;;  %vm13462_vm7 = vmmov %vm13431_vm4 }
 0x672   : > { %v4954_v29 = vpop.permute.xlu1 %4953  ;;  %v5859_v5 = vadd.f32 %v5858_v45, %v5857_v10  ;;  %v5712_v60 = vadd.f32 %v5711_v13, %v5710_v39  ;;  %v5071_v54 = vsel %vm13450_vm8, %v5035_v47, %v13449_v33  ;;  %vm13463_vm4 = vmmov %vm13452_vm12 }
 0x673   : > { %v5290_v12 = vsel %vm5262_vm3, %v5253_v20, %v4954_v29  ;;  %v5107_v10 = vsel %vm13451_vm11, %v5071_v54, %v4270_v36  ;;  %vm13464_vm6 = vmmov %vm13461_vm5 }
 0x674   : > { %6658 = vmatmul.mubr.msk.f32.gmra.mrb[46].mxu1 %vm5308_vm2, %v5290_v12  ;;  %v5861_v8 = vadd.f32 %v5860_v62, %v5859_v5  ;;  %v5143_v48 = vsel %vm13452_vm12, %v5107_v10, %v4414_v24  ;;  %vm13466_vm8 = vmmov %vm13461_vm5 }
 0x675   : > { %v4274_v7 = vpop.permute.xlu0 %4273  ;;  %v5180_v44 = vsel %vm5151_vm10, %v5143_v48, %v4558_v25  ;;  %v5108_v25 = vsel %vm13460_vm9, %v5072_v58, %v11479_v23  ;;  %vm13468_vm11 = vmmov %vm13459_vm15  ;;  %v13470_v48 = vld [vmem:[#allocation110_spill] sm:$0xff] }
 0x676   : > { %v4668_v31 = vpop.permute.xlu1 %4667  ;;  %v5144_v1 = vsel %vm13463_vm4, %v5108_v25, %v4416_v32  ;;  %vm13469_vm12 = vmmov %vm13460_vm9 }
 0x677   : > { %v5217_v17 = vsel %vm5188_vm0, %v5180_v44, %v4668_v31  ;;  %v5181_v20 = vsel %vm5151_vm10, %v5144_v1, %v4560_v50  ;;  %v13465_v50 = vld [vmem:[#allocation152_spill] sm:$0xff]  ;;  %vm13472_vm13 = vmmov %vm13463_vm4 }
 0x678   : > { %vm13474_vm15 = vmmov %vm13461_vm5 }
 0x679   : > { %v4812_v43 = vpop.permute.xlu0 %4811  ;;  %vm13475_vm9 = vmmov %vm13461_vm5 }
 0x67a   : > { %v4670_v51 = vpop.permute.xlu1 %4669  ;;  %v5254_v49 = vsel %vm5225_vm1, %v5217_v17, %v4812_v43  ;;  %v3697_v43 = vld [vmem:[#allocation2 + $0xf0] sm:$0xff]  ;;  %v13471_v17 = vld [vmem:[#allocation111_spill] sm:$0xff]  ;;  %vm13479_vm4 = vmmov %vm13468_vm11 }
 0x67b   : > { %v5218_v45 = vsel %vm5188_vm0, %v5181_v20, %v4670_v51  ;;  %v5037_v14 = vsel %vm13466_vm8, %v3697_v43, %v13465_v50  ;;  %v13467_v51 = vld [vmem:[#allocation97_spill] sm:$0xff]  ;;  %vm13481_vm8 = vmmov %vm13472_vm13 }
 0x67c   : > { %v5073_v47 = vsel %vm13468_vm11, %v5037_v14, %v13467_v51  ;;  %v13483_v14 = vld [vmem:[#allocation41_spill] sm:$0xff]  ;;  %vm13485_vm11 = vmmov %vm13461_vm5 }
 0x67d   : > { %v4418_v56 = vpop.permute.xlu0 %4417  ;;  %v5109_v10 = vsel %vm13469_vm12, %v5073_v47, %v4274_v7 }
 0x67e   : > { %v11522_v40 = vpop.permute.xlu1 %4275 }
 0x67f   : > { %v11526_v2 = vpop.f32.mrb[28].mxu1 }
 0x680   : > { %v5784_v41 = vmul.f32 %v11526_v2, %v11526_v2  ;;  %v11531_v27 = vpop.f32.mrb[29].mxu1  ;;  %v5671_v36 = vmul.f32 %v11526_v2, %v13453_v21 }
 0x681   : > { %v5670_v11 = vmul.f32 %v11531_v27, %v13454_v16  ;;  %v5783_v24 = vmul.f32 %v11531_v27, %v11531_v27  ;;  %v4956_v46 = vpop.permute.xlu0 %4955 }
 0x682   : > { %v4814_v19 = vpop.permute.xlu1 %4813  ;;  %v5291_v6 = vsel %vm5262_vm3, %v5254_v49, %v4956_v46  ;;  %v5820_v38 = vmul.f32 %v5784_v41, %v13453_v21  ;;  %v5715_v52 = vsel %vm13461_vm5, %v5671_v36, 0.0 }
 0x683   : > { %v5713_v22 = vsel %vm13457_vm14, %v5670_v11, 0.0  ;;  %v5819_v3 = vmul.f32 %v5783_v24, %v13454_v16  ;;  %6660 = vmatprep.mubr.msk.f32.mxu1 %vm5308_vm2, %v5291_v6  ;;  %v5255_v5 = vsel %vm5225_vm1, %v5218_v45, %v4814_v19  ;;  %v5145_v16 = vsel %vm13472_vm13, %v5109_v10, %v4418_v56  ;;  %vm13473_vm14 = vmmov %vm13461_vm5  ;;  %v3698_v56 = vld [vmem:[#allocation2 + $0xf8] sm:$0xff] }
 0x684   : > { %v5714_v34 = vadd.f32 %v5713_v22, %v5712_v60  ;;  %v5864_v13 = vsel %vm13464_vm6, %v5820_v38, 0.0  ;;  %vm13480_vm6 = vmmov %vm13469_vm12 }
 0x685   : > { %v5862_v30 = vsel %vm13462_vm7, %v5819_v3, 0.0  ;;  %v4562_v15 = vpop.permute.xlu0 %4561  ;;  %vm13477_vm7 = vmmov %vm13461_vm5 }
 0x686   : > { %v4420_v37 = vpop.permute.xlu1 %4419  ;;  %v5863_v57 = vadd.f32 %v5862_v30, %v5861_v8  ;;  %v5716_v39 = vadd.f32 %v5715_v52, %v5714_v34  ;;  %v5182_v11 = vsel %vm5151_vm10, %v5145_v16, %v4562_v15  ;;  %v13476_v34 = vld [vmem:[#allocation23_spill] sm:$0xff]  ;;  %v13478_v30 = vld [vmem:[#allocation96_spill] sm:$0xff]  ;;  %vm13486_vm12 = vmmov %vm13461_vm5 }
 0x687   : > { %v5038_v25 = vsel %vm13461_vm5, %v3698_v56, %v13476_v34  ;;  %vm13488_vm13 = vmmov %vm13479_vm4 }
 0x688   : > { %v5865_v29 = vadd.f32 %v5864_v13, %v5863_v57  ;;  %v5074_v15 = vsel %vm13479_vm4, %v5038_v25, %v13478_v30  ;;  %vm13494_vm4 = vmmov %vm13477_vm7 }
 0x689   : > { %v4564_v23 = vpop.permute.xlu0 %4563  ;;  %v5110_v57 = vsel %vm13480_vm6, %v5074_v15, %v11522_v40  ;;  %v13493_v15 = vld [vmem:[#allocation153_spill] sm:$0xff] }
 0x68a   : > { %v4958_v12 = vpop.permute.xlu1 %4957  ;;  %v5146_v13 = vsel %vm13481_vm8, %v5110_v57, %v4420_v37 }
 0x68b   : > { %v5292_v60 = vsel %vm5262_vm3, %v5255_v5, %v4958_v12  ;;  %v5183_v45 = vsel %vm5151_vm10, %v5146_v13, %v4564_v23  ;;  %v13482_v23 = vld [vmem:[#allocation40_spill] sm:$0xff] }
 0x68c   : > { %6661 = vmatmul.mubr.msk.f32.gmra.mrb[48].mxu1 %vm5308_vm2, %v5292_v60 }
 0x68d   : > { %v11560_v62 = vpop.permute.xlu0 %4277 }
 0x68e   : > { %v4672_v32 = vpop.permute.xlu1 %4671 }
 0x68f   : > { %v5219_v19 = vsel %vm5188_vm0, %v5182_v11, %v4672_v32  ;;  %v13487_v11 = vld [vmem:[#allocation206_spill] sm:$0xff] }
 0x691   : > { %v4816_v8 = vpop.permute.xlu0 %4815 }
 0x692   : > { %v4674_v31 = vpop.permute.xlu1 %4673  ;;  %v5256_v6 = vsel %vm5225_vm1, %v5219_v19, %v4816_v8 }
 0x693   : > { %v11564_v53 = vpop.f32.mrb[30].mxu1 }
 0x694   : > { %v5786_v33 = vmul.f32 %v11564_v53, %v11564_v53  ;;  %v11570_v54 = vpop.f32.mrb[31].mxu1  ;;  %v5673_v44 = vmul.f32 %v11564_v53, %v13470_v48 }
 0x695   : > { %v5672_v41 = vmul.f32 %v11570_v54, %v13471_v17  ;;  %v5785_v49 = vmul.f32 %v11570_v54, %v11570_v54  ;;  %v4422_v21 = vpop.permute.xlu0 %4421 }
 0x696   : > { %v11579_v36 = vpop.permute.xlu1 %4279  ;;  %v5822_v24 = vmul.f32 %v5786_v33, %v13470_v48  ;;  %v5719_v55 = vsel %vm13474_vm15, %v5673_v44, 0.0  ;;  %v3699_v48 = vld [vmem:[#allocation2 + $0x100] sm:$0xff]  ;;  %v13484_v44 = vld [vmem:[#allocation58_spill] sm:$0xff]  ;;  %vm13490_vm15 = vmmov %vm13461_vm5 }
 0x697   : > { %v5717_v7 = vsel %vm13473_vm14, %v5672_v41, 0.0  ;;  %v5821_v46 = vmul.f32 %v5785_v49, %v13471_v17  ;;  %v5039_v17 = vsel %vm13485_vm11, %v3699_v48, %v13484_v44  ;;  %vm13489_vm14 = vmmov %vm13480_vm6 }
 0x698   : > { %v5718_v59 = vadd.f32 %v5717_v7, %v5716_v39  ;;  %v5868_v52 = vsel %vm13477_vm7, %v5822_v24, 0.0  ;;  %v5075_v24 = vsel %vm13488_vm13, %v5039_v17, %v13487_v11  ;;  %vm13496_vm6 = vmmov %vm13488_vm13  ;;  %v13501_v17 = vld [vmem:[#allocation59_spill] sm:$0xff] }
 0x699   : > { %v5866_v9 = vsel %vm13475_vm9, %v5821_v46, 0.0  ;;  %v4960_v38 = vpop.permute.xlu0 %4959  ;;  %v5111_v46 = vsel %vm13489_vm14, %v5075_v24, %v11560_v62  ;;  %vm13491_vm9 = vmmov %vm13461_vm5 }
 0x69a   : > { %v4818_v22 = vpop.permute.xlu1 %4817  ;;  %v5867_v3 = vadd.f32 %v5866_v9, %v5865_v29  ;;  %v5293_v61 = vsel %vm5262_vm3, %v5256_v6, %v4960_v38  ;;  %v5720_v58 = vadd.f32 %v5719_v55, %v5718_v59  ;;  %v5220_v29 = vsel %vm5188_vm0, %v5183_v45, %v4674_v31  ;;  %vm13492_vm5 = vmmov %vm13481_vm8 }
 0x69b   : > { %6663 = vmatprep.mubr.msk.f32.mxu1 %vm5308_vm2, %v5293_v61  ;;  %v5257_v5 = vsel %vm5225_vm1, %v5220_v29, %v4818_v22  ;;  %v5147_v9 = vsel %vm13492_vm5, %v5111_v46, %v4422_v21  ;;  %v13495_v21 = vld [vmem:[#allocation205_spill] sm:$0xff]  ;;  %vm13497_vm8 = vmmov %vm13489_vm14 }
 0x69c   : > { %v5869_v1 = vadd.f32 %v5868_v52, %v5867_v3  ;;  %v3700_v52 = vld [vmem:[#allocation2 + $0x108] sm:$0xff]  ;;  %vm13498_vm11 = vmmov %vm13492_vm5 }
 0x69d   : > { %v4566_v39 = vpop.permute.xlu0 %4565  ;;  %v5040_v57 = vsel %vm13494_vm4, %v3700_v52, %v13493_v15  ;;  %vm13504_vm13 = vmmov %vm13494_vm4 }
 0x69e   : > { %v4424_v20 = vpop.permute.xlu1 %4423  ;;  %v5184_v56 = vsel %vm5151_vm10, %v5147_v9, %v4566_v39  ;;  %vm13505_vm14 = vmmov %vm13494_vm4  ;;  %v13508_v9 = vld [vmem:[#allocation133_spill] sm:$0xff] }
 0x69f   : > { %vm13510_vm5 = vmmov %vm13497_vm8 }
 0x6a1   : > { %v4568_v12 = vpop.permute.xlu0 %4567 }
 0x6a2   : > { %v4962_v60 = vpop.permute.xlu1 %4961 }
 0x6a3   : > { %v5294_v32 = vsel %vm5262_vm3, %v5257_v5, %v4962_v60 }
 0x6a4   : > { %6664 = vmatmul.mubr.msk.f32.gmra.mrb[50].mxu1 %vm5308_vm2, %v5294_v32 }
 0x6a5   : > { %v11605_v8 = vpop.permute.xlu0 %4281 }
 0x6a6   : > { %v4676_v43 = vpop.permute.xlu1 %4675 }
 0x6a7   : > { %v11607_v40 = vpop.f32.mrb[32].mxu1  ;;  %v5221_v61 = vsel %vm5188_vm0, %v5184_v56, %v4676_v43 }
 0x6a8   : > { %v5788_v37 = vmul.f32 %v11607_v40, %v11607_v40  ;;  %v11611_v50 = vpop.f32.mrb[33].mxu1  ;;  %v5675_v31 = vmul.f32 %v11607_v40, %v13482_v23 }
 0x6a9   : > { %v5674_v51 = vmul.f32 %v11611_v50, %v13483_v14  ;;  %v5787_v47 = vmul.f32 %v11611_v50, %v11611_v50  ;;  %v4820_v33 = vpop.permute.xlu0 %4819 }
 0x6aa   : > { %v4678_v10 = vpop.permute.xlu1 %4677  ;;  %v5824_v41 = vmul.f32 %v5788_v37, %v13482_v23  ;;  %v5723_v19 = vsel %vm13490_vm15, %v5675_v31, 0.0  ;;  %v5258_v34 = vsel %vm5225_vm1, %v5221_v61, %v4820_v33  ;;  %vm13507_vm15 = vmmov %vm13496_vm6 }
 0x6ab   : > { %v5721_v49 = vsel %vm13486_vm12, %v5674_v51, 0.0  ;;  %v5823_v16 = vmul.f32 %v5787_v47, %v13483_v14  ;;  %v13499_v51 = vld [vmem:[#allocation76_spill] sm:$0xff]  ;;  %v13500_v47 = vld [vmem:[#allocation77_spill] sm:$0xff]  ;;  %vm13502_vm12 = vmmov %vm13494_vm4 }
 0x6ac   : > { %v5722_v7 = vadd.f32 %v5721_v49, %v5720_v58  ;;  %v5872_v3 = vsel %vm13477_vm7, %v5824_v41, 0.0  ;;  %v3701_v49 = vld [vmem:[#allocation2 + $0x110] sm:$0xff]  ;;  %vm13511_vm7 = vmmov %vm13510_vm5 }
 0x6ad   : > { %v5870_v59 = vsel %vm13491_vm9, %v5823_v16, 0.0  ;;  %v4426_v6 = vpop.permute.xlu0 %4425  ;;  %v13503_v16 = vld [vmem:[#allocation177_spill] sm:$0xff]  ;;  %vm13509_vm9 = vmmov %vm13496_vm6 }
 0x6ae   : > { %v4284_v55 = vpop.permute.xlu1 %4283  ;;  %v5871_v38 = vadd.f32 %v5870_v59, %v5869_v1  ;;  %v5724_v22 = vadd.f32 %v5723_v19, %v5722_v7  ;;  %v5076_v1 = vsel %vm13496_vm6, %v5040_v57, %v13495_v21  ;;  %v5041_v11 = vsel %vm13504_vm13, %v3701_v49, %v13503_v16  ;;  %v13506_v19 = vld [vmem:[#allocation132_spill] sm:$0xff]  ;;  %vm13512_vm6 = vmmov %vm13494_vm4 }
 0x6af   : > { %v5112_v39 = vsel %vm13497_vm8, %v5076_v1, %v11579_v36  ;;  %vm13513_vm8 = vmmov %vm13498_vm11 }
 0x6b0   : > { %v5873_v58 = vadd.f32 %v5872_v3, %v5871_v38  ;;  %v5148_v29 = vsel %vm13498_vm11, %v5112_v39, %v4424_v20  ;;  %v3702_v20 = vld [vmem:[#allocation2 + $0x118] sm:$0xff]  ;;  %v5077_v38 = vsel %vm13509_vm9, %v5041_v11, %v13508_v9  ;;  %vm13514_vm11 = vmmov %vm13513_vm8 }
 0x6b1   : > { %v4964_v62 = vpop.permute.xlu0 %4963  ;;  %v5185_v5 = vsel %vm5151_vm10, %v5148_v29, %v4568_v12  ;;  %v5042_v41 = vsel %vm13502_vm12, %v3702_v20, %v13501_v17  ;;  %v5113_v3 = vsel %vm13510_vm5, %v5077_v38, %v11605_v8  ;;  %vm13515_vm12 = vmmov %vm13494_vm4  ;;  %v13517_v20 = vld [vmem:[#allocation113_spill] sm:$0xff]  ;;  %v13523_v9 = vld [vmem:[#allocation43_spill] sm:$0xff] }
 0x6b2   : > { %v4822_v25 = vpop.permute.xlu1 %4821  ;;  %v5295_v30 = vsel %vm5262_vm3, %v5258_v34, %v4964_v62  ;;  %v5222_v60 = vsel %vm5188_vm0, %v5185_v5, %v4678_v10  ;;  %v5078_v59 = vsel %vm13507_vm15, %v5042_v41, %v13506_v19  ;;  %v13522_v19 = vld [vmem:[#allocation42_spill] sm:$0xff] }
 0x6b3   : > { %6666 = vmatprep.mubr.msk.f32.mxu1 %vm5308_vm2, %v5295_v30  ;;  %v5259_v32 = vsel %vm5225_vm1, %v5222_v60, %v4822_v25  ;;  %v5114_v61 = vsel %vm13511_vm7, %v5078_v59, %v4284_v55  ;;  %v5149_v30 = vsel %vm13513_vm8, %v5113_v3, %v4426_v6 }
 0x6b5   : > { %v4570_v13 = vpop.permute.xlu0 %4569 }
 0x6b6   : > { %v4428_v45 = vpop.permute.xlu1 %4427  ;;  %v5186_v1 = vsel %vm5151_vm10, %v5149_v30, %v4570_v13 }
 0x6b7   : > { %v5150_v15 = vsel %vm13514_vm11, %v5114_v61, %v4428_v45 }
 0x6b9   : > { %v4572_v43 = vpop.permute.xlu0 %4571 }
 0x6ba   : > { %v4966_v37 = vpop.permute.xlu1 %4965 }
 0x6bb   : > { %v5296_v23 = vsel %vm5262_vm3, %v5259_v32, %v4966_v37  ;;  %v11648_v31 = vpop.f32.mrb[34].mxu1 }
 0x6bc   : > { %6667 = vmatmul.mubr.msk.f32.gmra.mrb[52].mxu1 %vm5308_vm2, %v5296_v23  ;;  %v5790_v36 = vmul.f32 %v11648_v31, %v11648_v31  ;;  %v11653_v14 = vpop.f32.mrb[35].mxu1  ;;  %v5677_v12 = vmul.f32 %v11648_v31, %v13499_v51  ;;  %v13516_v23 = vld [vmem:[#allocation112_spill] sm:$0xff] }
 0x6bd   : > { %v5676_v33 = vmul.f32 %v11653_v14, %v13500_v47  ;;  %v5789_v10 = vmul.f32 %v11653_v14, %v11653_v14  ;;  %v4682_v48 = vpop.permute.xlu0 %4681 }
 0x6be   : > { %v4680_v44 = vpop.permute.xlu1 %4679  ;;  %v5826_v24 = vmul.f32 %v5790_v36, %v13499_v51  ;;  %v5727_v34 = vsel %vm13494_vm4, %v5677_v12, 0.0 }
 0x6bf   : > { %v5725_v7 = vsel %vm13505_vm14, %v5676_v33, 0.0  ;;  %v5825_v46 = vmul.f32 %v5789_v10, %v13500_v47  ;;  %v5223_v39 = vsel %vm5188_vm0, %v5186_v1, %v4680_v44 }
 0x6c0   : > { %v5726_v56 = vadd.f32 %v5725_v7, %v5724_v22  ;;  %v5187_v22 = vsel %vm5151_vm10, %v5150_v15, %v4572_v43  ;;  %v5876_v8 = vsel %vm13515_vm12, %v5826_v24, 0.0  ;;  %vm13518_vm10 = vmmov %vm13494_vm4 }
 0x6c1   : > { %v5874_v62 = vsel %vm13512_vm6, %v5825_v46, 0.0  ;;  %v4826_v25 = vpop.permute.xlu0 %4825  ;;  %v5224_v55 = vsel %vm5188_vm0, %v5187_v22, %v4682_v48  ;;  %vm13519_vm0 = vmmov %vm13494_vm4 }
 0x6c2   : > { %v4824_v52 = vpop.permute.xlu1 %4823  ;;  %v5875_v57 = vadd.f32 %v5874_v62, %v5873_v58  ;;  %v5728_v21 = vadd.f32 %v5727_v34, %v5726_v56  ;;  %v5261_v5 = vsel %vm5225_vm1, %v5224_v55, %v4826_v25  ;;  %vm13525_vm13 = vmmov %vm13519_vm0  ;;  %v13528_v55 = vld [vmem:[#allocation78_spill] sm:$0xff] }
 0x6c3   : > { %v5260_v60 = vsel %vm5225_vm1, %v5223_v39, %v4824_v52  ;;  %vm13520_vm1 = vmmov %vm13519_vm0 }
 0x6c4   : > { %v5877_v29 = vadd.f32 %v5876_v8, %v5875_v57  ;;  %vm13526_vm14 = vmmov %vm13519_vm0 }
 0x6c5   : > { %v4970_v6 = vpop.permute.xlu0 %4969  ;;  %vm13527_vm15 = vmmov %vm13519_vm0 }
 0x6c6   : > { %v4968_v32 = vpop.permute.xlu1 %4967  ;;  %v5298_v58 = vsel %vm5262_vm3, %v5261_v5, %v4970_v6  ;;  %vm13530_vm9 = vmmov %vm13519_vm0 }
 0x6c7   : > { %v5297_v45 = vsel %vm5262_vm3, %v5260_v60, %v4968_v32  ;;  %vm13521_vm3 = vmmov %vm13519_vm0 }
 0x6c8   : > { %6669 = vmatprep.mubr.msk.f32.mxu1 %vm5308_vm2, %v5297_v45  ;;  %vm13531_vm5 = vmmov %vm13519_vm0 }
 0x6c9   : > { %6670 = vmatmul.mubr.msk.f32.gmra.mrb[54].mxu1 %vm5308_vm2, %v5298_v58  ;;  %vm13524_vm2 = vmmov %vm13519_vm0 }
 0x6ca   : > { %vm13532_vm7 = vmmov %vm13519_vm0 }
 0x6cb   : > { %vm13533_vm4 = vmmov %vm13519_vm0 }
 0x6cc   : > { %vm13536_vm6 = vmmov %vm13519_vm0 }
 0x6cd   : > { %vm13537_vm8 = vmmov %vm13519_vm0 }
 0x6ce   : > { %vm13538_vm11 = vmmov %vm13519_vm0 }
 0x6cf   : > { %v11690_v13 = vpop.f32.mrb[36].mxu1  ;;  %vm13539_vm12 = vmmov %vm13519_vm0 }
 0x6d0   : > { %v5792_v43 = vmul.f32 %v11690_v13, %v11690_v13  ;;  %v11694_v37 = vpop.f32.mrb[37].mxu1  ;;  %v5679_v36 = vmul.f32 %v11690_v13, %v13516_v23 }
 0x6d1   : > { %v5678_v51 = vmul.f32 %v11694_v37, %v13517_v20  ;;  %v5791_v12 = vmul.f32 %v11694_v37, %v11694_v37 }
 0x6d2   : > { %v5828_v47 = vmul.f32 %v5792_v43, %v13516_v23  ;;  %v5731_v44 = vsel %vm13519_vm0, %v5679_v36, 0.0 }
 0x6d3   : > { %v5729_v33 = vsel %vm13518_vm10, %v5678_v51, 0.0  ;;  %v5827_v10 = vmul.f32 %v5791_v12, %v13517_v20  ;;  %vm13542_vm10 = vmmov %vm13519_vm0 }
 0x6d4   : > { %v5730_v48 = vadd.f32 %v5729_v33, %v5728_v21  ;;  %v5880_v16 = vsel %vm13521_vm3, %v5828_v47, 0.0  ;;  %vm13544_vm3 = vmmov %vm13519_vm0 }
 0x6d5   : > { %v5878_v17 = vsel %vm13520_vm1, %v5827_v10, 0.0  ;;  %vm13543_vm1 = vmmov %vm13519_vm0 }
 0x6d6   : > { %v5879_v41 = vadd.f32 %v5878_v17, %v5877_v29  ;;  %v5732_v49 = vadd.f32 %v5731_v44, %v5730_v48  ;;  %v13529_v29 = vld [vmem:[#allocation79_spill] sm:$0xff]  ;;  %v13534_v48 = vld [vmem:[#allocation114_spill] sm:$0xff] }
 0x6d7   : > { %v13535_v17 = vld [vmem:[#allocation115_spill] sm:$0xff] }
 0x6d8   : > { %v5881_v11 = vadd.f32 %v5880_v16, %v5879_v41 }
 0x6e7   : > { %v11708_v24 = vpop.f32.mrb[38].mxu1 }
 0x6e8   : > { %v5794_v7 = vmul.f32 %v11708_v24, %v11708_v24  ;;  %v11712_v46 = vpop.f32.mrb[39].mxu1  ;;  %v5681_v59 = vmul.f32 %v11708_v24, %v13522_v19 }
 0x6e9   : > { %v5680_v38 = vmul.f32 %v11712_v46, %v13523_v9  ;;  %v5793_v56 = vmul.f32 %v11712_v46, %v11712_v46 }
 0x6ea   : > { %v5830_v3 = vmul.f32 %v5794_v7, %v13522_v19  ;;  %v5735_v25 = vsel %vm13525_vm13, %v5681_v59, 0.0  ;;  %vm13548_vm13 = vmmov %vm13519_vm0 }
 0x6eb   : > { %v5733_v61 = vsel %vm13524_vm2, %v5680_v38, 0.0  ;;  %v5829_v34 = vmul.f32 %v5793_v56, %v13523_v9  ;;  %vm13547_vm2 = vmmov %vm13519_vm0 }
 0x6ec   : > { %v5734_v62 = vadd.f32 %v5733_v61, %v5732_v49  ;;  %v5884_v57 = vsel %vm13527_vm15, %v5830_v3, 0.0  ;;  %vm13550_vm15 = vmmov %vm13519_vm0 }
 0x6ed   : > { %v5882_v52 = vsel %vm13526_vm14, %v5829_v34, 0.0  ;;  %vm13549_vm14 = vmmov %vm13519_vm0 }
 0x6ee   : > { %v5883_v30 = vadd.f32 %v5882_v52, %v5881_v11  ;;  %v5736_v15 = vadd.f32 %v5735_v25, %v5734_v62  ;;  %v13540_v52 = vld [vmem:[#allocation44_spill] sm:$0xff] }
 0x6f0   : > { %v5885_v21 = vadd.f32 %v5884_v57, %v5883_v30 }
 0x6ff   : > { %v11726_v1 = vpop.f32.mrb[40].mxu1 }
 0x700   : > { %v5796_v22 = vmul.f32 %v11726_v1, %v11726_v1  ;;  %v11730_v8 = vpop.f32.mrb[41].mxu1  ;;  %v5683_v39 = vmul.f32 %v11726_v1, %v13528_v55 }
 0x701   : > { %v5682_v5 = vmul.f32 %v11730_v8, %v13529_v29  ;;  %v5795_v60 = vmul.f32 %v11730_v8, %v11730_v8 }
 0x702   : > { %v5832_v6 = vmul.f32 %v5796_v22, %v13528_v55  ;;  %v5739_v43 = vsel %vm13531_vm5, %v5683_v39, 0.0  ;;  %vm13554_vm5 = vmmov %vm13519_vm0 }
 0x703   : > { %v5737_v32 = vsel %vm13530_vm9, %v5682_v5, 0.0  ;;  %v5831_v58 = vmul.f32 %v5795_v60, %v13529_v29  ;;  %vm13553_vm9 = vmmov %vm13519_vm0 }
 0x704   : > { %v5738_v45 = vadd.f32 %v5737_v32, %v5736_v15  ;;  %v5888_v51 = vsel %vm13533_vm4, %v5832_v6, 0.0  ;;  %v13541_v15 = vld [vmem:[#allocation45_spill] sm:$0xff]  ;;  %vm13556_vm4 = vmmov %vm13519_vm0 }
 0x705   : > { %v5886_v23 = vsel %vm13532_vm7, %v5831_v58, 0.0  ;;  %vm13555_vm7 = vmmov %vm13519_vm0 }
 0x706   : > { %v5887_v36 = vadd.f32 %v5886_v23, %v5885_v21  ;;  %v5740_v20 = vadd.f32 %v5739_v43, %v5738_v45 }
 0x708   : > { %v5889_v12 = vadd.f32 %v5888_v51, %v5887_v36 }
 0x717   : > { %v11744_v47 = vpop.f32.mrb[42].mxu1 }
 0x718   : > { %v5798_v33 = vmul.f32 %v11744_v47, %v11744_v47  ;;  %v11748_v10 = vpop.f32.mrb[43].mxu1  ;;  %v5685_v44 = vmul.f32 %v11744_v47, %v13534_v48 }
 0x719   : > { %v5684_v41 = vmul.f32 %v11748_v10, %v13535_v17  ;;  %v5797_v49 = vmul.f32 %v11748_v10, %v11748_v10 }
 0x71a   : > { %v5834_v16 = vmul.f32 %v5798_v33, %v13534_v48  ;;  %v5743_v59 = vsel %vm13537_vm8, %v5685_v44, 0.0  ;;  %vm13560_vm8 = vmmov %vm13519_vm0 }
 0x71b   : > { %v5741_v11 = vsel %vm13536_vm6, %v5684_v41, 0.0  ;;  %v5833_v7 = vmul.f32 %v5797_v49, %v13535_v17  ;;  %vm13559_vm6 = vmmov %vm13519_vm0 }
 0x71c   : > { %v5742_v19 = vadd.f32 %v5741_v11, %v5740_v20  ;;  %v5892_v3 = vsel %vm13539_vm12, %v5834_v16, 0.0  ;;  %v13545_v20 = vld [vmem:[#allocation164_spill] sm:$0xff]  ;;  %vm13562_vm12 = vmmov %vm13519_vm0 }
 0x71d   : > { %v5890_v9 = vsel %vm13538_vm11, %v5833_v7, 0.0  ;;  %vm13561_vm11 = vmmov %vm13519_vm0 }
 0x71e   : > { %v5891_v38 = vadd.f32 %v5890_v9, %v5889_v12  ;;  %v5744_v56 = vadd.f32 %v5743_v59, %v5742_v19  ;;  %v13546_v12 = vld [vmem:[#allocation80_spill] sm:$0xff] }
 0x720   : > { %v5893_v61 = vadd.f32 %v5892_v3, %v5891_v38 }
 0x72f   : > { %v11762_v34 = vpop.f32.mrb[44].mxu1 }
 0x730   : > { %v5800_v62 = vmul.f32 %v11762_v34, %v11762_v34  ;;  %v11766_v25 = vpop.f32.mrb[45].mxu1  ;;  %v5687_v30 = vmul.f32 %v11762_v34, %v13540_v52 }
 0x731   : > { %v5686_v57 = vmul.f32 %v11766_v25, %v13541_v15  ;;  %v5799_v21 = vmul.f32 %v11766_v25, %v11766_v25 }
 0x732   : > { %v5836_v22 = vmul.f32 %v5800_v62, %v13540_v52  ;;  %v5747_v5 = vsel %vm13519_vm0, %v5687_v30, 0.0  ;;  %v13552_v52 = vld [vmem:[#allocation189_spill] sm:$0xff] }
 0x733   : > { %v5745_v55 = vsel %vm13542_vm10, %v5686_v57, 0.0  ;;  %v5835_v39 = vmul.f32 %v5799_v21, %v13541_v15  ;;  %vm13565_vm10 = vmmov %vm13519_vm0 }
 0x734   : > { %v5746_v29 = vadd.f32 %v5745_v55, %v5744_v56  ;;  %v5896_v58 = vsel %vm13544_vm3, %v5836_v22, 0.0  ;;  %vm13567_vm3 = vmmov %vm13519_vm0 }
 0x735   : > { %v5894_v60 = vsel %vm13543_vm1, %v5835_v39, 0.0  ;;  %vm13566_vm1 = vmmov %vm13519_vm0 }
 0x736   : > { %v5895_v6 = vadd.f32 %v5894_v60, %v5893_v61  ;;  %v5748_v32 = vadd.f32 %v5747_v5, %v5746_v29  ;;  %v13551_v61 = vld [vmem:[#allocation81_spill] sm:$0xff] }
 0x738   : > { %v5897_v45 = vadd.f32 %v5896_v58, %v5895_v6 }
 0x747   : > { %v11780_v43 = vpop.f32.mrb[46].mxu1 }
 0x748   : > { %v5802_v23 = vmul.f32 %v11780_v43, %v11780_v43  ;;  %v11784_v36 = vpop.f32.mrb[47].mxu1  ;;  %v5689_v51 = vmul.f32 %v11780_v43, %v13545_v20 }
 0x749   : > { %v5688_v33 = vmul.f32 %v11784_v36, %v13546_v12  ;;  %v5801_v48 = vmul.f32 %v11784_v36, %v11784_v36 }
 0x74a   : > { %v5838_v44 = vmul.f32 %v5802_v23, %v13545_v20  ;;  %v5751_v16 = vsel %vm13548_vm13, %v5689_v51, 0.0  ;;  %v13557_v20 = vld [vmem:[#allocation190_spill] sm:$0xff]  ;;  %vm13571_vm13 = vmmov %vm13519_vm0 }
 0x74b   : > { %v5749_v17 = vsel %vm13547_vm2, %v5688_v33, 0.0  ;;  %v5837_v41 = vmul.f32 %v5801_v48, %v13546_v12  ;;  %v13558_v12 = vld [vmem:[#allocation116_spill] sm:$0xff]  ;;  %vm13570_vm2 = vmmov %vm13519_vm0 }
 0x74c   : > { %v5750_v49 = vadd.f32 %v5749_v17, %v5748_v32  ;;  %v5900_v59 = vsel %vm13550_vm15, %v5838_v44, 0.0  ;;  %vm13573_vm15 = vmmov %vm13519_vm0 }
 0x74d   : > { %v5898_v11 = vsel %vm13549_vm14, %v5837_v41, 0.0  ;;  %vm13572_vm14 = vmmov %vm13519_vm0 }
 0x74e   : > { %v5899_v7 = vadd.f32 %v5898_v11, %v5897_v45  ;;  %v5752_v19 = vadd.f32 %v5751_v16, %v5750_v49 }
 0x750   : > { %v5901_v9 = vadd.f32 %v5900_v59, %v5899_v7 }
 0x75f   : > { %v11798_v38 = vpop.f32.mrb[48].mxu1 }
 0x760   : > { %v5804_v56 = vmul.f32 %v11798_v38, %v11798_v38  ;;  %v11802_v3 = vpop.f32.mrb[49].mxu1  ;;  %v5691_v62 = vmul.f32 %v11798_v38, %v13551_v61 }
 0x761   : > { %v5690_v30 = vmul.f32 %v11802_v3, %v13552_v52  ;;  %v5803_v15 = vmul.f32 %v11802_v3, %v11802_v3 }
 0x762   : > { %v5840_v57 = vmul.f32 %v5804_v56, %v13551_v61  ;;  %v5755_v39 = vsel %vm13554_vm5, %v5691_v62, 0.0 }
 0x763   : > { %v5753_v21 = vsel %vm13553_vm9, %v5690_v30, 0.0  ;;  %v5839_v22 = vmul.f32 %v5803_v15, %v13552_v52  ;;  %v13563_v52 = vld [vmem:[#allocation117_spill] sm:$0xff]  ;;  %v13564_v15 = vld [vmem:[#allocation46_spill] sm:$0xff] }
 0x764   : > { %v5754_v55 = vadd.f32 %v5753_v21, %v5752_v19  ;;  %v5904_v6 = vsel %vm13556_vm4, %v5840_v57, 0.0 }
 0x765   : > { %v5902_v29 = vsel %vm13555_vm7, %v5839_v22, 0.0 }
 0x766   : > { %v5903_v5 = vadd.f32 %v5902_v29, %v5901_v9  ;;  %v5756_v60 = vadd.f32 %v5755_v39, %v5754_v55 }
 0x768   : > { %v5905_v32 = vadd.f32 %v5904_v6, %v5903_v5 }
 0x777   : > { %v11816_v58 = vpop.f32.mrb[50].mxu1 }
 0x778   : > { %v5806_v45 = vmul.f32 %v11816_v58, %v11816_v58  ;;  %v11820_v23 = vpop.f32.mrb[51].mxu1  ;;  %v5693_v51 = vmul.f32 %v11816_v58, %v13557_v20 }
 0x779   : > { %v5692_v33 = vmul.f32 %v11820_v23, %v13558_v12  ;;  %v5805_v48 = vmul.f32 %v11820_v23, %v11820_v23 }
 0x77a   : > { %v5842_v44 = vmul.f32 %v5806_v45, %v13557_v20  ;;  %v5759_v16 = vsel %vm13560_vm8, %v5693_v51, 0.0 }
 0x77b   : > { %v5757_v17 = vsel %vm13559_vm6, %v5692_v33, 0.0  ;;  %v5841_v41 = vmul.f32 %v5805_v48, %v13558_v12  ;;  %v13568_v48 = vld [vmem:[#allocation140_spill] sm:$0xff] }
 0x77c   : > { %v5758_v49 = vadd.f32 %v5757_v17, %v5756_v60  ;;  %v5908_v59 = vsel %vm13562_vm12, %v5842_v44, 0.0  ;;  %v13569_v17 = vld [vmem:[#allocation47_spill] sm:$0xff] }
 0x77d   : > { %v5906_v11 = vsel %vm13561_vm11, %v5841_v41, 0.0 }
 0x77e   : > { %v5907_v7 = vadd.f32 %v5906_v11, %v5905_v32  ;;  %v5760_v19 = vadd.f32 %v5759_v16, %v5758_v49 }
 0x780   : > { %v5909_v9 = vadd.f32 %v5908_v59, %v5907_v7 }
 0x78f   : > { %v11834_v56 = vpop.f32.mrb[52].mxu1 }
 0x790   : > { %v5808_v61 = vmul.f32 %v11834_v56, %v11834_v56  ;;  %v11838_v62 = vpop.f32.mrb[53].mxu1  ;;  %v5695_v30 = vmul.f32 %v11834_v56, %v13563_v52 }
 0x791   : > { %v5694_v57 = vmul.f32 %v11838_v62, %v13564_v15  ;;  %v5807_v21 = vmul.f32 %v11838_v62, %v11838_v62 }
 0x792   : > { %v5844_v22 = vmul.f32 %v5808_v61, %v13563_v52  ;;  %v5763_v5 = vsel %vm13519_vm0, %v5695_v30, 0.0 }
 0x793   : > { %v5761_v55 = vsel %vm13565_vm10, %v5694_v57, 0.0  ;;  %v5843_v39 = vmul.f32 %v5807_v21, %v13564_v15 }
 0x794   : > { %v5762_v29 = vadd.f32 %v5761_v55, %v5760_v19  ;;  %v5912_v45 = vsel %vm13567_vm3, %v5844_v22, 0.0 }
 0x795   : > { %v5910_v60 = vsel %vm13566_vm1, %v5843_v39, 0.0 }
 0x796   : > { %v5911_v6 = vadd.f32 %v5910_v60, %v5909_v9  ;;  %v5764_v32 = vadd.f32 %v5763_v5, %v5762_v29 }
 0x798   : > { %v5913_v20 = vadd.f32 %v5912_v45, %v5911_v6 }
 0x79c   : > { %v11852_v51 = vpop.f32.mrb[54].mxu1 }
 0x79d   : > { %v5810_v12 = vmul.f32 %v11852_v51, %v11852_v51  ;;  %v11856_v33 = vpop.f32.mrb[55].mxu1  ;;  %v5697_v44 = vmul.f32 %v11852_v51, %v13568_v48 }
 0x79e   : > { %v5696_v41 = vmul.f32 %v11856_v33, %v13569_v17  ;;  %v5809_v49 = vmul.f32 %v11856_v33, %v11856_v33 }
 0x79f   : > { %v5846_v16 = vmul.f32 %v5810_v12, %v13568_v48  ;;  %v5767_v59 = vsel %vm13571_vm13, %v5697_v44, 0.0 }
 0x7a0   : > { %v5765_v11 = vsel %vm13570_vm2, %v5696_v41, 0.0  ;;  %v5845_v7 = vmul.f32 %v5809_v49, %v13569_v17 }
 0x7a1   : > { %v5766_v19 = vadd.f32 %v5765_v11, %v5764_v32  ;;  %v5916_v30 = vsel %vm13573_vm15, %v5846_v16, 0.0 }
 0x7a2   : > { %v5914_v9 = vsel %vm13572_vm14, %v5845_v7, 0.0 }
 0x7a3   : > { %v5768_v61 = vadd.f32 %v5767_v59, %v5766_v19  ;;  %v5915_v52 = vadd.f32 %v5914_v9, %v5913_v20 }
 0x7a5   : > { %v5769_v15 = vrot.slane %v5768_v61, 4  ;;  %v5917_v57 = vadd.f32 %v5916_v30, %v5915_v52 }
 0x7a7   : > { %v5770_v21 = vadd.f32 %v5769_v15, %v5768_v61  ;;  %v5918_v22 = vrot.slane %v5917_v57, 4 }
 0x7a9   : > { %v5771_v55 = vrot.slane %v5770_v21, 2  ;;  %v5919_v39 = vadd.f32 %v5918_v22, %v5917_v57 }
 0x7ab   : > { %v5772_v29 = vadd.f32 %v5771_v55, %v5770_v21  ;;  %v5920_v5 = vrot.slane %v5919_v39, 2 }
 0x7ad   : > { %v5773_v60 = vrot.slane %v5772_v29, 1  ;;  %v5921_v6 = vadd.f32 %v5920_v5, %v5919_v39 }
 0x7af   : > { %v5774_v45 = vadd.f32 %v5773_v60, %v5772_v29  ;;  %v5922_v32 = vrot.slane %v5921_v6, 1 }
 0x7b1   : > { %v5923_v12 = vadd.f32 %v5922_v32, %v5921_v6  ;;  %v11870_v48 = vmul.f32 0.00390625, %v5774_v45 }
 0x7b3   : > { %v5925_v44 = vmul.f32 0.00390625, %v5923_v12  ;;  %v5926_v20 = vmul.f32 %v11870_v48, %v11870_v48  ;;  %v5929_v17 = vsub.f32 %v11341_v63, %v11870_v48  ;;  %v5930_v41 = vsub.f32 %v11333_v42, %v11870_v48 }
 0x7b4   : > { %v5931_v49 = vsub.f32 %v11401_v4, %v11870_v48  ;;  %v5932_v16 = vsub.f32 %v11395_v18, %v11870_v48  ;;  %v5933_v11 = vsub.f32 %v11456_v28, %v11870_v48  ;;  %v5934_v7 = vsub.f32 %v11451_v35, %v11870_v48 }
 0x7b5   : > { %v5927_v19 = vsub.f32 %v5925_v44, %v5926_v20  ;;  %v5935_v59 = vsub.f32 %v11495_v26, %v11870_v48  ;;  %v5936_v63 = vsub.f32 %v11488_v0, %v11870_v48  ;;  %v5937_v42 = vsub.f32 %v11531_v27, %v11870_v48 }
 0x7b6   : > { %v5938_v4 = vsub.f32 %v11526_v2, %v11870_v48  ;;  %v5939_v18 = vsub.f32 %v11570_v54, %v11870_v48  ;;  %v5940_v28 = vsub.f32 %v11564_v53, %v11870_v48  ;;  %v5941_v35 = vsub.f32 %v11611_v50, %v11870_v48 }
 0x7b7   : > { %v5928_v9 = vmax.f32 %v5927_v19, 0.0  ;;  %v5942_v26 = vsub.f32 %v11607_v40, %v11870_v48  ;;  %v5943_v0 = vsub.f32 %v11653_v14, %v11870_v48  ;;  %v5944_v27 = vsub.f32 %v11648_v31, %v11870_v48 }
 0x7b8   : > { %v5945_v2 = vsub.f32 %v11694_v37, %v11870_v48  ;;  %v5946_v54 = vsub.f32 %v11690_v13, %v11870_v48  ;;  %v5947_v53 = vsub.f32 %v11712_v46, %v11870_v48  ;;  %v5948_v50 = vsub.f32 %v11708_v24, %v11870_v48 }
 0x7b9   : > { %v5949_v40 = vsub.f32 %v11730_v8, %v11870_v48  ;;  %v5950_v14 = vsub.f32 %v11726_v1, %v11870_v48  ;;  %v5951_v31 = vsub.f32 %v11748_v10, %v11870_v48  ;;  %v5952_v37 = vsub.f32 %v11744_v47, %v11870_v48 }
 0x7ba   : > { %v5953_v13 = vsub.f32 %v11766_v25, %v11870_v48  ;;  %v5954_v46 = vsub.f32 %v11762_v34, %v11870_v48  ;;  %v5955_v24 = vsub.f32 %v11784_v36, %v11870_v48  ;;  %v5956_v8 = vsub.f32 %v11780_v43, %v11870_v48 }
 0x7bb   : > { %v5957_v1 = vsub.f32 %v11802_v3, %v11870_v48  ;;  %v5958_v10 = vsub.f32 %v11798_v38, %v11870_v48  ;;  %v5959_v47 = vsub.f32 %v11820_v23, %v11870_v48  ;;  %v5960_v25 = vsub.f32 %v11816_v58, %v11870_v48 }
 0x7bc   : > { %v5961_v34 = vsub.f32 %v11838_v62, %v11870_v48  ;;  %v5962_v36 = vsub.f32 %v11834_v56, %v11870_v48  ;;  %v5963_v43 = vsub.f32 %v11856_v33, %v11870_v48  ;;  %v5964_v3 = vsub.f32 %v11852_v51, %v11870_v48 }
 0x7bd   : > { %v5965_v61 = vadd.f32 1e-05, %v5928_v9  ;;  %v13575_v9 = vld [vmem:[#allocation86_spill] sm:$0xff] }
 0x7bf   : > { %6728 = vrsqrt.f32 %v5965_v61  ;;  %v13587_v61 = vld [vmem:[#allocation171_spill] sm:$0xff] }
 0x7c9   : > { %v6729_v38 = vpop.eup %6728 }
 0x7ca   : > { %v5967_v52 = vmul.f32 %v6729_v38, %v5929_v17  ;;  %v5968_v23 = vmul.f32 %v6729_v38, %v5930_v41  ;;  %v5969_v30 = vmul.f32 %v6729_v38, %v5931_v49  ;;  %v5970_v15 = vmul.f32 %v6729_v38, %v5932_v16 }
 0x7cb   : > { %v5971_v58 = vmul.f32 %v6729_v38, %v5933_v11  ;;  %v5972_v57 = vmul.f32 %v6729_v38, %v5934_v7  ;;  %v5973_v21 = vmul.f32 %v6729_v38, %v5935_v59  ;;  %v5974_v62 = vmul.f32 %v6729_v38, %v5936_v63 }
 0x7cc   : > { %v5975_v22 = vmul.f32 %v6729_v38, %v5937_v42  ;;  %v5976_v55 = vmul.f32 %v6729_v38, %v5938_v4  ;;  %v5977_v56 = vmul.f32 %v6729_v38, %v5939_v18  ;;  %v5978_v39 = vmul.f32 %v6729_v38, %v5940_v28  ;;  %v13574_v28 = vld [vmem:[#allocation170_spill] sm:$0xff] }
 0x7cd   : > { %v5979_v29 = vmul.f32 %v6729_v38, %v5941_v35  ;;  %v5980_v33 = vmul.f32 %v6729_v38, %v5942_v26  ;;  %v5981_v5 = vmul.f32 %v6729_v38, %v5943_v0  ;;  %v5982_v60 = vmul.f32 %v6729_v38, %v5944_v27  ;;  %v13576_v0 = vld [vmem:[#allocation87_spill] sm:$0xff] }
 0x7ce   : > { %v5983_v51 = vmul.f32 %v6729_v38, %v5945_v2  ;;  %v5984_v6 = vmul.f32 %v6729_v38, %v5946_v54  ;;  %v5985_v45 = vmul.f32 %v6729_v38, %v5947_v53  ;;  %v5986_v32 = vmul.f32 %v6729_v38, %v5948_v50  ;;  %v13577_v2 = vld [vmem:[#allocation195_spill] sm:$0xff]  ;;  %v13578_v53 = vld [vmem:[#allocation196_spill] sm:$0xff] }
 0x7cf   : > { %v5987_v12 = vmul.f32 %v6729_v38, %v5949_v40  ;;  %v5988_v48 = vmul.f32 %v6729_v38, %v5950_v14  ;;  %v5989_v44 = vmul.f32 %v6729_v38, %v5951_v31  ;;  %v5990_v20 = vmul.f32 %v6729_v38, %v5952_v37  ;;  %v13579_v40 = vld [vmem:[#allocation122_spill] sm:$0xff]  ;;  %v13580_v31 = vld [vmem:[#allocation123_spill] sm:$0xff] }
 0x7d0   : > { %v5991_v17 = vmul.f32 %v6729_v38, %v5953_v13  ;;  %v5992_v41 = vmul.f32 %v6729_v38, %v5954_v46  ;;  %v5993_v49 = vmul.f32 %v6729_v38, %v5955_v24  ;;  %v5994_v16 = vmul.f32 %v6729_v38, %v5956_v8  ;;  %v13581_v13 = vld [vmem:[#allocation16_spill] sm:$0xff]  ;;  %v13582_v24 = vld [vmem:[#allocation17_spill] sm:$0xff] }
 0x7d1   : > { %v5995_v11 = vmul.f32 %v6729_v38, %v5957_v1  ;;  %v5996_v7 = vmul.f32 %v6729_v38, %v5958_v10  ;;  %v5997_v19 = vmul.f32 %v6729_v38, %v5959_v47  ;;  %v5998_v59 = vmul.f32 %v6729_v38, %v5960_v25  ;;  %v13583_v1 = vld [vmem:[#allocation146_spill] sm:$0xff]  ;;  %v13584_v47 = vld [vmem:[#allocation147_spill] sm:$0xff] }
 0x7d2   : > { %v5999_v63 = vmul.f32 %v6729_v38, %v5961_v34  ;;  %v6000_v42 = vmul.f32 %v6729_v38, %v5962_v36  ;;  %v6001_v4 = vmul.f32 %v6729_v38, %v5963_v43  ;;  %v6002_v18 = vmul.f32 %v6729_v38, %v5964_v3  ;;  %v13585_v34 = vld [vmem:[#allocation52_spill] sm:$0xff]  ;;  %v13586_v43 = vld [vmem:[#allocation53_spill] sm:$0xff] }
 0x7d3   : > { %v11947_v35 = vadd.f32 %v5967_v52, %v13574_v28  ;;  %v11950_v26 = vadd.f32 %v5968_v23, %v13575_v9  ;;  %v11953_v27 = vadd.f32 %v5969_v30, %v13576_v0  ;;  %v11956_v54 = vadd.f32 %v5970_v15, %v13577_v2  ;;  %v13588_v52 = vld [vmem:[#allocation169_spill] sm:$0xff]  ;;  %v13589_v30 = vld [vmem:[#allocation172_spill] sm:$0xff] }
 0x7d4   : > { %v11959_v50 = vadd.f32 %v5971_v58, %v13578_v53  ;;  %v11962_v14 = vadd.f32 %v5972_v57, %v13579_v40  ;;  %v11965_v37 = vadd.f32 %v5973_v21, %v13580_v31  ;;  %v11968_v46 = vadd.f32 %v5974_v62, %v13581_v13  ;;  %v13590_v58 = vld [vmem:[#allocation88_spill] sm:$0xff]  ;;  %v13591_v21 = vld [vmem:[#allocation89_spill] sm:$0xff] }
 0x7d5   : > { %v11971_v8 = vadd.f32 %v5975_v22, %v13582_v24  ;;  %v11974_v10 = vadd.f32 %v5976_v55, %v13583_v1  ;;  %v11977_v25 = vadd.f32 %v5977_v56, %v13584_v47  ;;  %v11980_v36 = vadd.f32 %v5978_v39, %v13585_v34  ;;  %v13592_v22 = vld [vmem:[#allocation197_spill] sm:$0xff]  ;;  %v13593_v56 = vld [vmem:[#allocation198_spill] sm:$0xff] }
 0x7d6   : > { %v11983_v3 = vadd.f32 %v5979_v29, %v13586_v43  ;;  %v11986_v38 = vadd.f32 %v5980_v33, %v13587_v61  ;;  %v11989_v23 = vadd.f32 %v5981_v5, %v13588_v52  ;;  %v11992_v15 = vadd.f32 %v5982_v60, %v13589_v30  ;;  %v13594_v29 = vld [vmem:[#allocation124_spill] sm:$0xff]  ;;  %v13595_v5 = vld [vmem:[#allocation125_spill] sm:$0xff]  ;;  %v13596_v60 = vld [vmem:[#allocation18_spill] sm:$0xff] }
 0x7d7   : > { %v11995_v57 = vadd.f32 %v5983_v51, %v13590_v58  ;;  %v11998_v62 = vadd.f32 %v5984_v6, %v13591_v21  ;;  %v12001_v55 = vadd.f32 %v5985_v45, %v13592_v22  ;;  %v12004_v39 = vadd.f32 %v5986_v32, %v13593_v56  ;;  %v13597_v51 = vld [vmem:[#allocation19_spill] sm:$0xff]  ;;  %v13598_v6 = vld [vmem:[#allocation148_spill] sm:$0xff]  ;;  %v13599_v45 = vld [vmem:[#allocation149_spill] sm:$0xff] }
 0x7d8   : > { %v12007_v33 = vadd.f32 %v5987_v12, %v13594_v29  ;;  %v12010_v28 = vadd.f32 %v5988_v48, %v13595_v5  ;;  %v12013_v9 = vadd.f32 %v5989_v44, %v13596_v60  ;;  %v12016_v0 = vadd.f32 %v5990_v20, %v13597_v51  ;;  %v13600_v32 = vld [vmem:[#allocation54_spill] sm:$0xff]  ;;  %v13601_v12 = vld [vmem:[#allocation55_spill] sm:$0xff]  ;;  %v13602_v48 = vld [vmem:[#allocation173_spill] sm:$0xff] }
 0x7d9   : > { %v12019_v2 = vadd.f32 %v5991_v17, %v13598_v6  ;;  %v12022_v53 = vadd.f32 %v5992_v41, %v13599_v45  ;;  %v12025_v40 = vadd.f32 %v5993_v49, %v13600_v32  ;;  %v12028_v31 = vadd.f32 %v5994_v16, %v13601_v12  ;;  %v13603_v44 = vld [vmem:[#allocation174_spill] sm:$0xff]  ;;  %v13605_v17 = vld [vmem:[#allocation91_spill] sm:$0xff]  ;;  %v13607_v49 = vld [vmem:[#allocation200_spill] sm:$0xff] }
 0x7da   : > { %v12031_v13 = vadd.f32 %v5995_v11, %v13602_v48  ;;  %v12034_v24 = vadd.f32 %v5996_v7, %v13603_v44  ;;  %v13604_v20 = vld [vmem:[#allocation90_spill] sm:$0xff]  ;;  %v12040_v47 = vadd.f32 %v5998_v59, %v13605_v17  ;;  %v13606_v41 = vld [vmem:[#allocation199_spill] sm:$0xff]  ;;  %v12046_v43 = vadd.f32 %v6000_v42, %v13607_v49 }
 0x7db   : > { %v12037_v1 = vadd.f32 %v5997_v19, %v13604_v20  ;;  %v12043_v34 = vadd.f32 %v5999_v63, %v13606_v41  ;;  %v13608_v16 = vld [vmem:[#allocation126_spill] sm:$0xff]  ;;  %v13609_v11 = vld [vmem:[#allocation127_spill] sm:$0xff]  ;;  %vm6039_vm9 = vcmp.ge.f32.partialorder %v11947_v35, 0.0  ;;  %vm6040_vm5 = vcmp.ge.f32.partialorder %v11950_v26, 0.0 }
 0x7dc   : > { %v12049_v61 = vadd.f32 %v6001_v4, %v13608_v16  ;;  %v12052_v52 = vadd.f32 %v6002_v18, %v13609_v11  ;;  %vm6041_vm7 = vcmp.ge.f32.partialorder %v11953_v27, 0.0  ;;  %vm6042_vm4 = vcmp.ge.f32.partialorder %v11956_v54, 0.0 }
 0x7dd   : > { %vm6043_vm6 = vcmp.ge.f32.partialorder %v11959_v50, 0.0  ;;  %vm6044_vm8 = vcmp.ge.f32.partialorder %v11962_v14, 0.0  ;;  %vm6045_vm11 = vcmp.ge.f32.partialorder %v11965_v37, 0.0  ;;  %vm6046_vm12 = vcmp.ge.f32.partialorder %v11968_v46, 0.0 }
 0x7de   : > { %vm6047_vm10 = vcmp.ge.f32.partialorder %v11971_v8, 0.0  ;;  %v6075_v7 = vmul.f32 0.2, %v11947_v35  ;;  %v6076_v19 = vmul.f32 0.2, %v11950_v26  ;;  %vm6050_vm3 = vcmp.ge.f32.partialorder %v11980_v36, 0.0 }
 0x7df   : > { %v6077_v59 = vmul.f32 0.2, %v11953_v27  ;;  %vm6051_vm2 = vcmp.ge.f32.partialorder %v11983_v3, 0.0  ;;  %v6078_v63 = vmul.f32 0.2, %v11956_v54  ;;  %vm6056_vm1 = vcmp.ge.f32.partialorder %v11998_v62, 0.0 }
 0x7e0   : > { %v6079_v42 = vmul.f32 0.2, %v11959_v50  ;;  %v6080_v4 = vmul.f32 0.2, %v11962_v14  ;;  %v6081_v18 = vmul.f32 0.2, %v11965_v37  ;;  %v6111_v21 = vsel %vm6039_vm9, %v11947_v35, %v6075_v7  ;;  %vm13610_vm9 = vmmov %vm13519_vm0 }
 0x7e1   : > { %v6082_v30 = vmul.f32 0.2, %v11968_v46  ;;  %v6083_v58 = vmul.f32 0.2, %v11971_v8  ;;  %v6084_v22 = vmul.f32 0.2, %v11974_v10  ;;  %v6112_v5 = vsel %vm6040_vm5, %v11950_v26, %v6076_v19  ;;  %vm13611_vm5 = vmmov %vm13519_vm0 }
 0x7e2   : > { %v6085_v56 = vmul.f32 0.2, %v11977_v25  ;;  %v6086_v29 = vmul.f32 0.2, %v11980_v36  ;;  %6147 = vst.msk [vmem:[%s12067_s25] sm:$0xff] %vm13610_vm9, %v6111_v21  ;;  %vm6061_vm13 = vcmp.ge.f32.partialorder %v12013_v9, 0.0  ;;  %v6113_v26 = vsel %vm6041_vm7, %v11953_v27, %v6077_v59  ;;  %vm13612_vm7 = vmmov %vm13519_vm0 }
 0x7e3   : > { %v6087_v35 = vmul.f32 0.2, %v11983_v3  ;;  %v6088_v60 = vmul.f32 0.2, %v11986_v38  ;;  %v6089_v51 = vmul.f32 0.2, %v11989_v23  ;;  %v6114_v27 = vsel %vm6042_vm4, %v11956_v54, %v6078_v63  ;;  %vm13613_vm4 = vmmov %vm13519_vm0 }
 0x7e4   : > { %6148 = vst.msk [vmem:[%s12067_s25 + $0x8] sm:$0xff] %vm13611_vm5, %v6112_v5  ;;  %vm6065_vm9 = vcmp.ge.f32.partialorder %v12025_v40, 0.0  ;;  %v6090_v6 = vmul.f32 0.2, %v11992_v15  ;;  %v6091_v45 = vmul.f32 0.2, %v11995_v57  ;;  %v6115_v54 = vsel %vm6043_vm6, %v11959_v50, %v6079_v42  ;;  %vm13614_vm6 = vmmov %vm13519_vm0 }
 0x7e5   : > { %v6092_v32 = vmul.f32 0.2, %v11998_v62  ;;  %6149 = vst.msk [vmem:[%s12067_s25 + $0x10] sm:$0xff] %vm13612_vm7, %v6113_v26  ;;  %vm6069_vm5 = vcmp.ge.f32.partialorder %v12037_v1, 0.0  ;;  %vm6070_vm14 = vcmp.ge.f32.partialorder %v12040_v47, 0.0  ;;  %vm6073_vm7 = vcmp.ge.f32.partialorder %v12049_v61, 0.0 }
 0x7e6   : > { %v6093_v12 = vmul.f32 0.2, %v12001_v55  ;;  %v6094_v48 = vmul.f32 0.2, %v12004_v39  ;;  %v6095_v44 = vmul.f32 0.2, %v12007_v33  ;;  %v6116_v49 = vsel %vm6044_vm8, %v11962_v14, %v6080_v4  ;;  %vm13615_vm8 = vmmov %vm13519_vm0 }
 0x7e7   : > { %6150 = vst.msk [vmem:[%s12067_s25 + $0x18] sm:$0xff] %vm13613_vm4, %v6114_v27  ;;  %vm6074_vm15 = vcmp.ge.f32.partialorder %v12052_v52, 0.0  ;;  %v6096_v20 = vmul.f32 0.2, %v12010_v28  ;;  %v6097_v17 = vmul.f32 0.2, %v12013_v9  ;;  %v6117_v7 = vsel %vm6045_vm11, %v11965_v37, %v6081_v18  ;;  %vm13616_vm11 = vmmov %vm13519_vm0 }
 0x7e8   : > { %v6098_v41 = vmul.f32 0.2, %v12016_v0  ;;  %6151 = vst.msk [vmem:[%s12067_s25 + $0x20] sm:$0xff] %vm13519_vm0, %v6115_v54  ;;  %v6099_v50 = vmul.f32 0.2, %v12019_v2  ;;  %v6118_v63 = vsel %vm6046_vm12, %v11968_v46, %v6082_v30  ;;  %v6119_v18 = vsel %vm6047_vm10, %v11971_v8, %v6083_v58 }
 0x7e9   : > { %v6100_v16 = vmul.f32 0.2, %v12022_v53  ;;  %v6101_v11 = vmul.f32 0.2, %v12025_v40  ;;  %6152 = vst.msk [vmem:[%s12067_s25 + $0x28] sm:$0xff] %vm13614_vm6, %v6116_v49  ;;  %vm13617_vm12 = vcmp.ge.f32.partialorder %v11974_v10, 0.0  ;;  %v6122_v58 = vsel %vm6050_vm3, %v11980_v36, %v6086_v29  ;;  %vm13620_vm6 = vmmov %vm13519_vm0 }
 0x7ea   : > { %v6102_v19 = vmul.f32 0.2, %v12028_v31  ;;  %v6103_v14 = vmul.f32 0.2, %v12031_v13  ;;  %v6104_v59 = vmul.f32 0.2, %v12034_v24  ;;  %v6120_v5 = vsel %vm13617_vm12, %v11974_v10, %v6084_v22  ;;  %vm13625_vm12 = vmmov %vm13519_vm0 }
 0x7eb   : > { %6153 = vst.msk [vmem:[%s12067_s25 + $0x30] sm:$0xff] %vm13615_vm8, %v6117_v7  ;;  %v6105_v42 = vmul.f32 0.2, %v12037_v1  ;;  %v6106_v37 = vmul.f32 0.2, %v12040_v47  ;;  %vm13618_vm10 = vcmp.ge.f32.partialorder %v11977_v25, 0.0  ;;  %v6123_v26 = vsel %vm6051_vm2, %v11983_v3, %v6087_v35 }
 0x7ec   : > { %v6107_v4 = vmul.f32 0.2, %v12043_v34  ;;  %6154 = vst.msk [vmem:[%s12067_s25 + $0x38] sm:$0xff] %vm13616_vm11, %v6118_v63  ;;  %v6108_v21 = vmul.f32 0.2, %v12046_v43  ;;  %v6121_v8 = vsel %vm13618_vm10, %v11977_v25, %v6085_v56  ;;  %vm13619_vm4 = vcmp.ge.f32.partialorder %v11986_v38, 0.0  ;;  %vm13624_vm11 = vmmov %vm13519_vm0 }
 0x7ed   : > { %v6109_v46 = vmul.f32 0.2, %v12049_v61  ;;  %v6110_v30 = vmul.f32 0.2, %v12052_v52  ;;  %6155 = vst.msk [vmem:[%s12067_s25 + $0x40] sm:$0xff] %vm13519_vm0, %v6119_v18  ;;  %v6124_v10 = vsel %vm13619_vm4, %v11986_v38, %v6088_v60  ;;  %vm13621_vm8 = vcmp.ge.f32.partialorder %v11989_v23, 0.0  ;;  %vm13626_vm10 = vmmov %vm13519_vm0 }
 0x7ee   : > { %6156 = vst.msk [vmem:[%s12067_s25 + $0x48] sm:$0xff] %vm13620_vm6, %v6120_v5  ;;  %v6125_v25 = vsel %vm13621_vm8, %v11989_v23, %v6089_v51  ;;  %vm13622_vm3 = vcmp.ge.f32.partialorder %v11992_v15, 0.0  ;;  %vm13623_vm2 = vcmp.ge.f32.partialorder %v11995_v57, 0.0  ;;  %v6128_v38 = vsel %vm6056_vm1, %v11998_v62, %v6092_v32 }
 0x7ef   : > { %v6126_v36 = vsel %vm13622_vm3, %v11992_v15, %v6090_v6  ;;  %v6127_v3 = vsel %vm13623_vm2, %v11995_v57, %v6091_v45  ;;  %6157 = vst.msk [vmem:[%s12067_s25 + $0x50] sm:$0xff] %vm13624_vm11, %v6121_v8  ;;  %vm13627_vm4 = vcmp.ge.f32.partialorder %v12001_v55, 0.0  ;;  %vm13628_vm6 = vcmp.ge.f32.partialorder %v12004_v39, 0.0  ;;  %vm13631_vm3 = vmmov %vm13519_vm0 }
 0x7f0   : > { %6158 = vst.msk [vmem:[%s12067_s25 + $0x58] sm:$0xff] %vm13625_vm12, %v6122_v58  ;;  %v6129_v23 = vsel %vm13627_vm4, %v12001_v55, %v6093_v12  ;;  %v6130_v15 = vsel %vm13628_vm6, %v12004_v39, %v6094_v48  ;;  %vm13629_vm1 = vcmp.ge.f32.partialorder %v12007_v33, 0.0  ;;  %vm13630_vm8 = vcmp.ge.f32.partialorder %v12010_v28, 0.0  ;;  %vm13632_vm2 = vmmov %vm13519_vm0 }
 0x7f1   : > { %6159 = vst.msk [vmem:[%s12067_s25 + $0x60] sm:$0xff] %vm13519_vm0, %v6123_v26  ;;  %v6131_v57 = vsel %vm13629_vm1, %v12007_v33, %v6095_v44  ;;  %v6132_v62 = vsel %vm13630_vm8, %v12010_v28, %v6096_v20  ;;  %vm13633_vm11 = vmmov %vm13519_vm0  ;;  %v6133_v55 = vsel %vm6061_vm13, %v12013_v9, %v6097_v17  ;;  %vm13637_vm4 = vcmp.ge.f32.partialorder %v12022_v53, 0.0 }
 0x7f2   : > { %6160 = vst.msk [vmem:[%s12067_s25 + $0x68] sm:$0xff] %vm13626_vm10, %v6124_v10  ;;  %vm13634_vm12 = vmmov %vm13519_vm0  ;;  %vm13635_vm0 = vcmp.ge.f32.partialorder %v12016_v0, 0.0  ;;  %vm13636_vm10 = vcmp.ge.f32.partialorder %v12019_v2, 0.0  ;;  %v6136_v28 = vsel %vm13637_vm4, %v12022_v53, %v6100_v16  ;;  %v6137_v9 = vsel %vm6065_vm9, %v12025_v40, %v6101_v11 }
 0x7f3   : > { %6161 = vst.msk [vmem:[%s12067_s25 + $0x70] sm:$0xff] %vm13631_vm3, %v6125_v25  ;;  %v6134_v39 = vsel %vm13635_vm0, %v12016_v0, %v6098_v41  ;;  %v6135_v33 = vsel %vm13636_vm10, %v12019_v2, %v6099_v50  ;;  %vm13638_vm6 = vmmov %vm13632_vm2  ;;  %vm13642_vm3 = vcmp.ge.f32.partialorder %v12028_v31, 0.0  ;;  %v6141_v40 = vsel %vm6069_vm5, %v12037_v1, %v6105_v42 }
 0x7f4   : > { %6162 = vst.msk [vmem:[%s12067_s25 + $0x78] sm:$0xff] %vm13632_vm2, %v6126_v36  ;;  %vm13639_vm1 = vmmov %vm13632_vm2  ;;  %v6138_v0 = vsel %vm13642_vm3, %v12028_v31, %v6102_v19  ;;  %vm13643_vm2 = vcmp.ge.f32.partialorder %v12031_v13, 0.0  ;;  %v6142_v31 = vsel %vm6070_vm14, %v12040_v47, %v6106_v37  ;;  %vm13649_vm4 = vcmp.ge.f32.partialorder %v12043_v34, 0.0 }
 0x7f5   : > { %6163 = vst.msk [vmem:[%s12067_s25 + $0x80] sm:$0xff] %vm13633_vm11, %v6127_v3  ;;  %vm13640_vm8 = vmmov %vm13639_vm1  ;;  %v6139_v2 = vsel %vm13643_vm2, %v12031_v13, %v6103_v14  ;;  %vm13644_vm11 = vcmp.ge.f32.partialorder %v12034_v24, 0.0  ;;  %v6143_v13 = vsel %vm13649_vm4, %v12043_v34, %v6107_v4  ;;  %v6145_v1 = vsel %vm6073_vm7, %v12049_v61, %v6109_v46 }
 0x7f6   : > { %6164 = vst.msk [vmem:[%s12067_s25 + $0x88] sm:$0xff] %vm13634_vm12, %v6128_v38  ;;  %vm13641_vm13 = vmmov %vm13639_vm1  ;;  %v6140_v53 = vsel %vm13644_vm11, %v12034_v24, %v6104_v59  ;;  %v6146_v47 = vsel %vm6074_vm15, %v12052_v52, %v6110_v30 }
 0x7f7   : > { %6165 = vst.msk [vmem:[%s12067_s25 + $0x90] sm:$0xff] %vm13638_vm6, %v6129_v23  ;;  %vm13645_vm12 = vmmov %vm13639_vm1  ;;  %vm13650_vm6 = vcmp.ge.f32.partialorder %v12046_v43, 0.0 }
 0x7f8   : > { %6166 = vst.msk [vmem:[%s12067_s25 + $0x98] sm:$0xff] %vm13639_vm1, %v6130_v15  ;;  %vm13646_vm0 = vmmov %vm13639_vm1  ;;  %v6144_v24 = vsel %vm13650_vm6, %v12046_v43, %v6108_v21 }
 0x7f9   : > { %6167 = vst.msk [vmem:[%s12067_s25 + $0xa0] sm:$0xff] %vm13640_vm8, %v6131_v57  ;;  %vm13647_vm9 = vmmov %vm13646_vm0 }
 0x7fa   : > { %6168 = vst.msk [vmem:[%s12067_s25 + $0xa8] sm:$0xff] %vm13641_vm13, %v6132_v62  ;;  %vm13648_vm10 = vmmov %vm13646_vm0 }
 0x7fb   : > { %6169 = vst.msk [vmem:[%s12067_s25 + $0xb0] sm:$0xff] %vm13645_vm12, %v6133_v55  ;;  %vm13651_vm1 = vmmov %vm13646_vm0 }
 0x7fc   : > { %6170 = vst.msk [vmem:[%s12067_s25 + $0xb8] sm:$0xff] %vm13646_vm0, %v6134_v39  ;;  %vm13652_vm8 = vmmov %vm13646_vm0 }
 0x7fd   : > { %6171 = vst.msk [vmem:[%s12067_s25 + $0xc0] sm:$0xff] %vm13647_vm9, %v6135_v33  ;;  %vm13653_vm13 = vmmov %vm13646_vm0 }
 0x7fe   : > { %6172 = vst.msk [vmem:[%s12067_s25 + $0xc8] sm:$0xff] %vm13648_vm10, %v6136_v28  ;;  %vm13654_vm3 = vmmov %vm13646_vm0 }
 0x7ff   : > { %6173 = vst.msk [vmem:[%s12067_s25 + $0xd0] sm:$0xff] %vm13651_vm1, %v6137_v9  ;;  %vm13655_vm14 = vmmov %vm13646_vm0 }
 0x800   : > { %6174 = vst.msk [vmem:[%s12067_s25 + $0xd8] sm:$0xff] %vm13652_vm8, %v6138_v0  ;;  %vm13656_vm5 = vmmov %vm13646_vm0 }
 0x801   : > { %6175 = vst.msk [vmem:[%s12067_s25 + $0xe0] sm:$0xff] %vm13653_vm13, %v6139_v2  ;;  %vm13657_vm2 = vmmov %vm13646_vm0 }
 0x802   : > { %6176 = vst.msk [vmem:[%s12067_s25 + $0xe8] sm:$0xff] %vm13654_vm3, %v6140_v53  ;;  %vm13658_vm11 = vmmov %vm13646_vm0 }
 0x803   : > { %6177 = vst.msk [vmem:[%s12067_s25 + $0xf0] sm:$0xff] %vm13655_vm14, %v6141_v40  ;;  %vm13659_vm12 = vmmov %vm13646_vm0 }
 0x804   : > { %6178 = vst.msk [vmem:[%s12067_s25 + $0xf8] sm:$0xff] %vm13656_vm5, %v6142_v31 }
 0x805   : > { %6179 = vst.msk [vmem:[%s12067_s25 + $0x100] sm:$0xff] %vm13657_vm2, %v6143_v13 }
 0x806   : > { %6180 = vst.msk [vmem:[%s12067_s25 + $0x108] sm:$0xff] %vm13658_vm11, %v6144_v24 }
 0x807   : > { %6181 = vst.msk [vmem:[%s12067_s25 + $0x110] sm:$0xff] %vm13659_vm12, %v6145_v1 }
 0x808   : > { %6182 = vst.msk [vmem:[%s12067_s25 + $0x118] sm:$0xff] %vm13646_vm0, %v6146_v47 }
 0x809 PF: > { %s15_s18 = sadd.s32 1, %s6763_s18  }
 0x80a   : > { %p12_p4 = scmp.ge.s32.totalorder %s15_s18, 4  }
 0x80c   :  { %14 = sbr.rel (!%p12_p4) target bundleno = 1 (0x1), region = 70 }

</bundles_post_ra>
